<compile_context>
chip_gen: v6e
topology: v6e:2x2x1
jax: 0.10.0
libtpu: 0.0.40
codegen_flags: <defaults>
</compile_context>

<pallas_src>
import functools
import math

import jax
import jax.numpy as jnp
from jax.experimental import pallas as pl
from jax.experimental.pallas import tpu as pltpu


# -----------------------------------------------------------------------------
# Fused ResBlock kernel (one batch sample per grid step)
# -----------------------------------------------------------------------------
def resblock_kernel(x_ref, embo_ref,
                    dn1_ref, up1_ref, g1_ref, bt1_ref, w1_ref, b1_ref,
                    dn2_ref, up2_ref, g2_ref, bt2_ref, w2_ref, b2_ref,
                    wsk_ref, bsk_ref, ml_ref, mr_ref,
                    o_ref,
                    hpad1, hpad2,
                    *, H, W, C, Cout, eps):
    HW = H * W
    P = HW + 2 * W + 2

    def silu(v):
        # exp and reciprocal both run on the EUP slot; no VPU divide.
        return v * pl.reciprocal(1.0 + jnp.exp(-v), approx=True)

    def group_norm(v, dn_ref, up_ref, g_ref, b_ref):
        # v: (HW, c) f32.  Group stats via two small matmuls:
        #   (1,c) @ (c,G) sums channels into groups, then (1,G) @ (G,c) broadcasts
        #   the (pre-scaled by 1/(group_size*HW)) group mean back per-channel.
        # NOTE: variance = E[x^2] - mu^2 in f32 (single pass); fine for typical
        #       diffusion-model activation magnitudes.
        s1 = jnp.sum(v, axis=0, keepdims=True)                       # (1, c)
        s2 = jnp.sum(v * v, axis=0, keepdims=True)                   # (1, c)
        mu = jnp.dot(jnp.dot(s1, dn_ref[...], preferred_element_type=jnp.float32),
                     up_ref[...], preferred_element_type=jnp.float32)
        ex2 = jnp.dot(jnp.dot(s2, dn_ref[...], preferred_element_type=jnp.float32),
                      up_ref[...], preferred_element_type=jnp.float32)
        var = ex2 - mu * mu
        vn = (v - mu) * jax.lax.rsqrt(var + eps)
        return vn * g_ref[...] + b_ref[...]

    def conv3x3(v, cin, hpad_ref, w_ref, b_ref):
        # 3x3 conv, padding=1, stride=1.  v: (HW, cin) f32 -> (HW, cout) f32.
        # hpad_ref: (P, cin) f32 zero-padded flat image (row stride W).
        # Zero only the W+1 pad rows top/bottom; interior overwritten each call.
        cout = b_ref.shape[-1]
        zpad = jnp.zeros((W + 1, cin), jnp.float32)
        hpad_ref[0:W + 1, :] = zpad
        hpad_ref[W + 1 + HW:P, :] = zpad
        hpad_ref[W + 1:W + 1 + HW, :] = v

        ml = ml_ref[...]                                             # (HW, 1)
        mr = mr_ref[...]                                             # (HW, 1)
        acc = jnp.zeros((HW, cout), jnp.float32)
        for dy in range(3):
            for dx in range(3):
                t = 3 * dy + dx
                s = dy * W + dx                                      # static slice start
                slab = hpad_ref[s:s + HW, :]                         # (HW, cin) f32
                if dx == 0:
                    slab = slab * ml                                 # kill left W-wraparound
                elif dx == 2:
                    slab = slab * mr                                 # kill right W-wraparound
                acc = acc + jnp.dot(slab.astype(jnp.bfloat16), w_ref[t],
                                    preferred_element_type=jnp.float32)
        return acc + b_ref[...]

    x = x_ref[0]                                                     # (HW, C) f32

    # in_layers: GroupNorm32 -> SiLU -> Conv3x3 (C -> Cout)
    h = silu(group_norm(x, dn1_ref, up1_ref, g1_ref, bt1_ref))
    h = conv3x3(h, C, hpad1, w1_ref, b1_ref)                         # (HW, Cout)

    # emb_layers result (precomputed in the wrapper), broadcast over spatial rows
    h = h + embo_ref[0]                                              # (1, Cout) broadcast

    # out_layers: GroupNorm32 -> SiLU -> Dropout(identity) -> Conv3x3 (Cout -> Cout)
    h = silu(group_norm(h, dn2_ref, up2_ref, g2_ref, bt2_ref))
    h = conv3x3(h, Cout, hpad2, w2_ref, b2_ref)

    # skip_connection: 1x1 conv (C -> Cout), then residual add
    skip = jnp.dot(x.astype(jnp.bfloat16), wsk_ref[...],
                   preferred_element_type=jnp.float32) + bsk_ref[...]
    o_ref[0] = (skip + h).astype(o_ref.dtype)


# -----------------------------------------------------------------------------
# Wrapper
# -----------------------------------------------------------------------------
def _group_matrices(c, hw, groups=32):
    """Down (c,G) channel->group indicator and up (G,c) pre-scaled broadcast matrix."""
    gs = c // groups
    g = jnp.arange(c) // gs
    gid = jnp.arange(groups)
    dn = (g[:, None] == gid[None, :]).astype(jnp.float32)                      # (c, G)
    up = (gid[:, None] == g[None, :]).astype(jnp.float32) / float(gs * hw)     # (G, c)
    return dn, up


def _conv3x3_weight(w):
    """PyTorch (cout, cin, 3, 3) -> (9, cin, cout) bf16, tap-major."""
    cout, cin = w.shape[0], w.shape[1]
    return jnp.transpose(w, (2, 3, 1, 0)).reshape(9, cin, cout).astype(jnp.bfloat16)


def resblock_forward(params, x_nchw, emb):
    N, C, H, W = x_nchw.shape
    Cout = params["w2"].shape[0]
    assert C % 32 == 0 and Cout % 32 == 0, "GroupNorm32 needs channels % 32 == 0"
    HW = H * W
    P = HW + 2 * W + 2

    # Boundary glue only: NCHW -> (N, HW, C) channel-minor rows.
    x3 = jnp.transpose(x_nchw, (0, 2, 3, 1)).reshape(N, HW, C).astype(jnp.float32)

    # emb_layers (SiLU -> Linear) hoisted out of the kernel (tiny GEMM, XLA handles it).
    e = emb.astype(jnp.float32)
    emb_out = (e * jax.nn.sigmoid(e)) @ jnp.transpose(params["w_emb"]) \
        + params["b_emb"].reshape(1, Cout)
    emb_out = emb_out.reshape(N, 1, Cout)

    col = jnp.arange(HW) % W
    mask_l = (col != 0).astype(jnp.float32).reshape(HW, 1)
    mask_r = (col != W - 1).astype(jnp.float32).reshape(HW, 1)

    dn1, up1 = _group_matrices(C, HW)
    dn2, up2 = _group_matrices(Cout, HW)

    args = (
        x3, emb_out,
        dn1, up1,
        params["gn1_g"].reshape(1, C).astype(jnp.float32),
        params["gn1_b"].reshape(1, C).astype(jnp.float32),
        _conv3x3_weight(params["w1"]),
        params["b1"].reshape(1, Cout).astype(jnp.float32),
        dn2, up2,
        params["gn2_g"].reshape(1, Cout).astype(jnp.float32),
        params["gn2_b"].reshape(1, Cout).astype(jnp.float32),
        _conv3x3_weight(params["w2"]),
        params["b2"].reshape(1, Cout).astype(jnp.float32),
        jnp.transpose(params["w_skip"].reshape(Cout, C)).astype(jnp.bfloat16),
        params["b_skip"].reshape(1, Cout).astype(jnp.float32),
        mask_l, mask_r,
    )

    kernel = functools.partial(resblock_kernel, H=H, W=W, C=C, Cout=Cout, eps=1e-5)

    def _const_spec(arr):
        zeros = (0,) * arr.ndim
        return pl.BlockSpec(arr.shape, lambda n, _z=zeros: _z)

    in_specs = [
        pl.BlockSpec((1, HW, C), lambda n: (n, 0, 0)),      # x, per-sample block
        pl.BlockSpec((1, 1, Cout), lambda n: (n, 0, 0)),    # emb_out, per-sample block
    ] + [_const_spec(a) for a in args[2:]]                  # weights / constants

    out = pl.pallas_call(
        kernel,
        out_shape=jax.ShapeDtypeStruct((N, HW, Cout), jnp.float32),
        grid_spec=pltpu.PrefetchScalarGridSpec(
            num_scalar_prefetch=0,
            grid=(N,),
            in_specs=in_specs,
            out_specs=pl.BlockSpec((1, HW, Cout), lambda n: (n, 0, 0)),
            scratch_shapes=[
                pltpu.VMEM((P, C), jnp.float32),            # padded input, conv1
                pltpu.VMEM((P, Cout), jnp.float32),         # padded input, conv2
            ],
        ),
        compiler_params=pltpu.CompilerParams(
            dimension_semantics=("parallel",)),
    )(*args)

    return jnp.transpose(out.reshape(N, H, W, Cout), (0, 3, 1, 2))   # -> NCHW


# -----------------------------------------------------------------------------
# Deterministic synthetic parameters
# -----------------------------------------------------------------------------
def init_params(key, channels=64, emb_channels=64, out_channels=128):
    ks = iter(jax.random.split(key, 16))

    def nrm(shape, std):
        return jax.random.normal(next(ks), shape, jnp.float32) * std

    s1 = 1.0 / math.sqrt(channels * 9)
    se = 1.0 / math.sqrt(emb_channels)
    s2 = 1.0 / math.sqrt(out_channels * 9)
    ss = 1.0 / math.sqrt(channels)
    return {
        "gn1_g": 1.0 + 0.1 * nrm((channels,), 1.0),
        "gn1_b": 0.1 * nrm((channels,), 1.0),
        "w1": nrm((out_channels, channels, 3, 3), s1),
        "b1": nrm((out_channels,), s1),
        "w_emb": nrm((out_channels, emb_channels), se),
        "b_emb": nrm((out_channels,), se),
        "gn2_g": 1.0 + 0.1 * nrm((out_channels,), 1.0),
        "gn2_b": 0.1 * nrm((out_channels,), 1.0),
        # NOTE: zero_module() zero-inits this conv in PyTorch (init-time detail only);
        # random init here so the fused kernel path is actually exercised.
        "w2": nrm((out_channels, out_channels, 3, 3), s2),
        "b2": nrm((out_channels,), s2),
        "w_skip": nrm((out_channels, channels, 1, 1), ss),
        "b_skip": nrm((out_channels,), ss),
    }


# -----------------------------------------------------------------------------
if __name__ == "__main__":
    key = jax.random.PRNGKey(0)
    kp, kx, ke = jax.random.split(key, 3)

    channels, emb_channels, out_channels = 64, 64, 128
    params = init_params(kp, channels, emb_channels, out_channels)
    x = jax.random.normal(kx, (2, channels, 16, 16), jnp.float32)    # NCHW
    emb = jax.random.normal(ke, (2, emb_channels), jnp.float32)

    fwd = jax.jit(resblock_forward)
    out = jax.block_until_ready(fwd(params, x, emb))

    assert out.shape == (2, out_channels, 16, 16), out.shape
    assert out.dtype == jnp.float32
    assert bool(jnp.all(jnp.isfinite(out)))
    print("KERNEL_OK")
</pallas_src>

<mosaic_0001>
module attributes {stable_mosaic.version = 11 : i64} {
  func.func @resblock_kernel(%arg0: i32, %arg1: memref<1x256x64xf32, #tpu.memory_space<vmem>>, %arg2: memref<1x1x128xf32, #tpu.memory_space<vmem>>, %arg3: memref<64x32xf32, #tpu.memory_space<vmem>>, %arg4: memref<32x64xf32, #tpu.memory_space<vmem>>, %arg5: memref<1x64xf32, #tpu.memory_space<vmem>>, %arg6: memref<1x64xf32, #tpu.memory_space<vmem>>, %arg7: memref<9x64x128xbf16, #tpu.memory_space<vmem>>, %arg8: memref<1x128xf32, #tpu.memory_space<vmem>>, %arg9: memref<128x32xf32, #tpu.memory_space<vmem>>, %arg10: memref<32x128xf32, #tpu.memory_space<vmem>>, %arg11: memref<1x128xf32, #tpu.memory_space<vmem>>, %arg12: memref<1x128xf32, #tpu.memory_space<vmem>>, %arg13: memref<9x128x128xbf16, #tpu.memory_space<vmem>>, %arg14: memref<1x128xf32, #tpu.memory_space<vmem>>, %arg15: memref<64x128xbf16, #tpu.memory_space<vmem>>, %arg16: memref<1x128xf32, #tpu.memory_space<vmem>>, %arg17: memref<256x1xf32, #tpu.memory_space<vmem>>, %arg18: memref<256x1xf32, #tpu.memory_space<vmem>>, %arg19: memref<1x256x128xf32, #tpu.memory_space<vmem>>, %arg20: memref<290x64xf32, #tpu.memory_space<vmem>>, %arg21: memref<290x128xf32, #tpu.memory_space<vmem>>) attributes {dimension_semantics = [#tpu.dimension_semantics<parallel>], iteration_bounds = array<i64: 2>, scalar_prefetch = 0 : i64, scratch_operands = 2 : i64, tpu.core_type = #tpu.core_type<tc>, window_params = [{transform_indices = @transform_0, window_bounds = array<i64: 1, 256, 64>}, {transform_indices = @transform_1, window_bounds = array<i64: 1, 1, 128>}, {pipeline_mode = #tpu.pipeline_mode<synchronous>, transform_indices = @transform_2, window_bounds = array<i64: 64, 32>}, {pipeline_mode = #tpu.pipeline_mode<synchronous>, transform_indices = @transform_3, window_bounds = array<i64: 32, 64>}, {pipeline_mode = #tpu.pipeline_mode<synchronous>, transform_indices = @transform_4, window_bounds = array<i64: 1, 64>}, {pipeline_mode = #tpu.pipeline_mode<synchronous>, transform_indices = @transform_5, window_bounds = array<i64: 1, 64>}, {pipeline_mode = #tpu.pipeline_mode<synchronous>, transform_indices = @transform_6, window_bounds = array<i64: 9, 64, 128>}, {pipeline_mode = #tpu.pipeline_mode<synchronous>, transform_indices = @transform_7, window_bounds = array<i64: 1, 128>}, {pipeline_mode = #tpu.pipeline_mode<synchronous>, transform_indices = @transform_8, window_bounds = array<i64: 128, 32>}, {pipeline_mode = #tpu.pipeline_mode<synchronous>, transform_indices = @transform_9, window_bounds = array<i64: 32, 128>}, {pipeline_mode = #tpu.pipeline_mode<synchronous>, transform_indices = @transform_10, window_bounds = array<i64: 1, 128>}, {pipeline_mode = #tpu.pipeline_mode<synchronous>, transform_indices = @transform_11, window_bounds = array<i64: 1, 128>}, {pipeline_mode = #tpu.pipeline_mode<synchronous>, transform_indices = @transform_12, window_bounds = array<i64: 9, 128, 128>}, {pipeline_mode = #tpu.pipeline_mode<synchronous>, transform_indices = @transform_13, window_bounds = array<i64: 1, 128>}, {pipeline_mode = #tpu.pipeline_mode<synchronous>, transform_indices = @transform_14, window_bounds = array<i64: 64, 128>}, {pipeline_mode = #tpu.pipeline_mode<synchronous>, transform_indices = @transform_15, window_bounds = array<i64: 1, 128>}, {pipeline_mode = #tpu.pipeline_mode<synchronous>, transform_indices = @transform_16, window_bounds = array<i64: 256, 1>}, {pipeline_mode = #tpu.pipeline_mode<synchronous>, transform_indices = @transform_17, window_bounds = array<i64: 256, 1>}, {transform_indices = @transform_18, window_bounds = array<i64: 1, 256, 128>}]} {
    %c0 = arith.constant 0 : index
    %c0_0 = arith.constant 0 : index
    %c0_1 = arith.constant 0 : index
    %0 = vector.load %arg1[%c0, %c0_0, %c0_1] : memref<1x256x64xf32, #tpu.memory_space<vmem>>, vector<1x256x64xf32>
    %1 = vector.shape_cast %0 : vector<1x256x64xf32> to vector<256x64xf32>
    %cst = arith.constant dense<0.000000e+00> : vector<64xf32>
    %2 = vector.multi_reduction <add>, %1, %cst [0] : vector<256x64xf32> to vector<64xf32>
    %3 = vector.shape_cast %2 : vector<64xf32> to vector<1x64xf32>
    %4 = arith.mulf %1, %1 : vector<256x64xf32>
    %cst_2 = arith.constant dense<0.000000e+00> : vector<64xf32>
    %5 = vector.multi_reduction <add>, %4, %cst_2 [0] : vector<256x64xf32> to vector<64xf32>
    %6 = vector.shape_cast %5 : vector<64xf32> to vector<1x64xf32>
    %c0_3 = arith.constant 0 : index
    %c0_4 = arith.constant 0 : index
    %7 = vector.load %arg3[%c0_3, %c0_4] : memref<64x32xf32, #tpu.memory_space<vmem>>, vector<64x32xf32>
    %cst_5 = arith.constant dense<0.000000e+00> : vector<1x32xf32>
    %8 = tpu.matmul %3, %7, %cst_5 {dimension_numbers = #tpu.dot_dimension_numbers<[1], [0], [0], [1], [0, 0, 1, 1], [], []>} : vector<1x64xf32>, vector<64x32xf32>, vector<1x32xf32> -> vector<1x32xf32>
    %c0_6 = arith.constant 0 : index
    %c0_7 = arith.constant 0 : index
    %9 = vector.load %arg4[%c0_6, %c0_7] : memref<32x64xf32, #tpu.memory_space<vmem>>, vector<32x64xf32>
    %cst_8 = arith.constant dense<0.000000e+00> : vector<1x64xf32>
    %10 = tpu.matmul %8, %9, %cst_8 {dimension_numbers = #tpu.dot_dimension_numbers<[1], [0], [0], [1], [0, 0, 1, 1], [], []>} : vector<1x32xf32>, vector<32x64xf32>, vector<1x64xf32> -> vector<1x64xf32>
    %c0_9 = arith.constant 0 : index
    %c0_10 = arith.constant 0 : index
    %11 = vector.load %arg3[%c0_9, %c0_10] : memref<64x32xf32, #tpu.memory_space<vmem>>, vector<64x32xf32>
    %cst_11 = arith.constant dense<0.000000e+00> : vector<1x32xf32>
    %12 = tpu.matmul %6, %11, %cst_11 {dimension_numbers = #tpu.dot_dimension_numbers<[1], [0], [0], [1], [0, 0, 1, 1], [], []>} : vector<1x64xf32>, vector<64x32xf32>, vector<1x32xf32> -> vector<1x32xf32>
    %c0_12 = arith.constant 0 : index
    %c0_13 = arith.constant 0 : index
    %13 = vector.load %arg4[%c0_12, %c0_13] : memref<32x64xf32, #tpu.memory_space<vmem>>, vector<32x64xf32>
    %cst_14 = arith.constant dense<0.000000e+00> : vector<1x64xf32>
    %14 = tpu.matmul %12, %13, %cst_14 {dimension_numbers = #tpu.dot_dimension_numbers<[1], [0], [0], [1], [0, 0, 1, 1], [], []>} : vector<1x32xf32>, vector<32x64xf32>, vector<1x64xf32> -> vector<1x64xf32>
    %15 = arith.mulf %10, %10 : vector<1x64xf32>
    %16 = arith.subf %14, %15 : vector<1x64xf32>
    %17 = vector.broadcast %10 : vector<1x64xf32> to vector<256x64xf32>
    %18 = arith.subf %1, %17 : vector<256x64xf32>
    %cst_15 = arith.constant 9.99999974E-6 : f32
    %19 = vector.broadcast %cst_15 : f32 to vector<1x64xf32>
    %20 = arith.addf %16, %19 : vector<1x64xf32>
    %21 = math.rsqrt %20 : vector<1x64xf32>
    %22 = vector.broadcast %21 : vector<1x64xf32> to vector<256x64xf32>
    %23 = arith.mulf %18, %22 : vector<256x64xf32>
    %c0_16 = arith.constant 0 : index
    %c0_17 = arith.constant 0 : index
    %24 = vector.load %arg5[%c0_16, %c0_17] : memref<1x64xf32, #tpu.memory_space<vmem>>, vector<1x64xf32>
    %25 = vector.broadcast %24 : vector<1x64xf32> to vector<256x64xf32>
    %26 = arith.mulf %23, %25 : vector<256x64xf32>
    %c0_18 = arith.constant 0 : index
    %c0_19 = arith.constant 0 : index
    %27 = vector.load %arg6[%c0_18, %c0_19] : memref<1x64xf32, #tpu.memory_space<vmem>>, vector<1x64xf32>
    %28 = vector.broadcast %27 : vector<1x64xf32> to vector<256x64xf32>
    %29 = arith.addf %26, %28 : vector<256x64xf32>
    %cst_20 = arith.constant 0.000000e+00 : f32
    %30 = vector.broadcast %cst_20 : f32 to vector<256x64xf32>
    %31 = arith.subf %30, %29 : vector<256x64xf32>
    %32 = math.exp %31 : vector<256x64xf32>
    %cst_21 = arith.constant 1.000000e+00 : f32
    %33 = vector.broadcast %cst_21 : f32 to vector<256x64xf32>
    %34 = arith.addf %33, %32 : vector<256x64xf32>
    %35 = tpu.reciprocal %34 {approx = true} : vector<256x64xf32> -> vector<256x64xf32>
    %36 = arith.mulf %29, %35 : vector<256x64xf32>
    %cst_22 = arith.constant 0.000000e+00 : f32
    %37 = vector.broadcast %cst_22 : f32 to vector<17x64xf32>
    %c0_23 = arith.constant 0 : index
    %c0_24 = arith.constant 0 : index
    %38 = vector.load %arg20[%c0_23, %c0_24] : memref<290x64xf32, #tpu.memory_space<vmem>>, vector<17x64xf32>
    tpu.vector_store %arg20[%c0_23, %c0_24], %37 {strides = array<i32>} : memref<290x64xf32, #tpu.memory_space<vmem>>, vector<17x64xf32>,
    %c273 = arith.constant 273 : index
    %c0_25 = arith.constant 0 : index
    %39 = vector.load %arg20[%c273, %c0_25] : memref<290x64xf32, #tpu.memory_space<vmem>>, vector<17x64xf32>
    tpu.vector_store %arg20[%c273, %c0_25], %37 {strides = array<i32>} : memref<290x64xf32, #tpu.memory_space<vmem>>, vector<17x64xf32>,
    %c17 = arith.constant 17 : index
    %c0_26 = arith.constant 0 : index
    %40 = vector.load %arg20[%c17, %c0_26] : memref<290x64xf32, #tpu.memory_space<vmem>>, vector<256x64xf32>
    tpu.vector_store %arg20[%c17, %c0_26], %36 {strides = array<i32>} : memref<290x64xf32, #tpu.memory_space<vmem>>, vector<256x64xf32>,
    %c0_27 = arith.constant 0 : index
    %c0_28 = arith.constant 0 : index
    %41 = vector.load %arg17[%c0_27, %c0_28] : memref<256x1xf32, #tpu.memory_space<vmem>>, vector<256x1xf32>
    %c0_29 = arith.constant 0 : index
    %c0_30 = arith.constant 0 : index
    %42 = vector.load %arg18[%c0_29, %c0_30] : memref<256x1xf32, #tpu.memory_space<vmem>>, vector<256x1xf32>
    %cst_31 = arith.constant 0.000000e+00 : f32
    %43 = vector.broadcast %cst_31 : f32 to vector<256x128xf32>
    %c0_32 = arith.constant 0 : index
    %c0_33 = arith.constant 0 : index
    %44 = vector.load %arg20[%c0_32, %c0_33] : memref<290x64xf32, #tpu.memory_space<vmem>>, vector<256x64xf32>
    %45 = vector.broadcast %41 : vector<256x1xf32> to vector<256x64xf32>
    %46 = arith.mulf %44, %45 : vector<256x64xf32>
    %47 = arith.truncf %46 : vector<256x64xf32> to vector<256x64xbf16>
    %c0_34 = arith.constant 0 : index
    %c0_35 = arith.constant 0 : index
    %c0_36 = arith.constant 0 : index
    %48 = vector.load %arg7[%c0_34, %c0_35, %c0_36] : memref<9x64x128xbf16, #tpu.memory_space<vmem>>, vector<1x64x128xbf16>
    %49 = vector.shape_cast %48 : vector<1x64x128xbf16> to vector<64x128xbf16>
    %cst_37 = arith.constant dense<0.000000e+00> : vector<256x128xf32>
    %50 = tpu.matmul %47, %49, %cst_37 {dimension_numbers = #tpu.dot_dimension_numbers<[1], [0], [0], [1], [0, 0, 1, 1], [], []>} : vector<256x64xbf16>, vector<64x128xbf16>, vector<256x128xf32> -> vector<256x128xf32>
    %51 = arith.addf %43, %50 : vector<256x128xf32>
    %c1 = arith.constant 1 : index
    %c0_38 = arith.constant 0 : index
    %52 = vector.load %arg20[%c1, %c0_38] : memref<290x64xf32, #tpu.memory_space<vmem>>, vector<256x64xf32>
    %53 = arith.truncf %52 : vector<256x64xf32> to vector<256x64xbf16>
    %c1_39 = arith.constant 1 : index
    %c0_40 = arith.constant 0 : index
    %c0_41 = arith.constant 0 : index
    %54 = vector.load %arg7[%c1_39, %c0_40, %c0_41] : memref<9x64x128xbf16, #tpu.memory_space<vmem>>, vector<1x64x128xbf16>
    %55 = vector.shape_cast %54 : vector<1x64x128xbf16> to vector<64x128xbf16>
    %cst_42 = arith.constant dense<0.000000e+00> : vector<256x128xf32>
    %56 = tpu.matmul %53, %55, %cst_42 {dimension_numbers = #tpu.dot_dimension_numbers<[1], [0], [0], [1], [0, 0, 1, 1], [], []>} : vector<256x64xbf16>, vector<64x128xbf16>, vector<256x128xf32> -> vector<256x128xf32>
    %57 = arith.addf %51, %56 : vector<256x128xf32>
    %c2 = arith.constant 2 : index
    %c0_43 = arith.constant 0 : index
    %58 = vector.load %arg20[%c2, %c0_43] : memref<290x64xf32, #tpu.memory_space<vmem>>, vector<256x64xf32>
    %59 = vector.broadcast %42 : vector<256x1xf32> to vector<256x64xf32>
    %60 = arith.mulf %58, %59 : vector<256x64xf32>
    %61 = arith.truncf %60 : vector<256x64xf32> to vector<256x64xbf16>
    %c2_44 = arith.constant 2 : index
    %c0_45 = arith.constant 0 : index
    %c0_46 = arith.constant 0 : index
    %62 = vector.load %arg7[%c2_44, %c0_45, %c0_46] : memref<9x64x128xbf16, #tpu.memory_space<vmem>>, vector<1x64x128xbf16>
    %63 = vector.shape_cast %62 : vector<1x64x128xbf16> to vector<64x128xbf16>
    %cst_47 = arith.constant dense<0.000000e+00> : vector<256x128xf32>
    %64 = tpu.matmul %61, %63, %cst_47 {dimension_numbers = #tpu.dot_dimension_numbers<[1], [0], [0], [1], [0, 0, 1, 1], [], []>} : vector<256x64xbf16>, vector<64x128xbf16>, vector<256x128xf32> -> vector<256x128xf32>
    %65 = arith.addf %57, %64 : vector<256x128xf32>
    %c16 = arith.constant 16 : index
    %c0_48 = arith.constant 0 : index
    %66 = vector.load %arg20[%c16, %c0_48] : memref<290x64xf32, #tpu.memory_space<vmem>>, vector<256x64xf32>
    %67 = vector.broadcast %41 : vector<256x1xf32> to vector<256x64xf32>
    %68 = arith.mulf %66, %67 : vector<256x64xf32>
    %69 = arith.truncf %68 : vector<256x64xf32> to vector<256x64xbf16>
    %c3 = arith.constant 3 : index
    %c0_49 = arith.constant 0 : index
    %c0_50 = arith.constant 0 : index
    %70 = vector.load %arg7[%c3, %c0_49, %c0_50] : memref<9x64x128xbf16, #tpu.memory_space<vmem>>, vector<1x64x128xbf16>
    %71 = vector.shape_cast %70 : vector<1x64x128xbf16> to vector<64x128xbf16>
    %cst_51 = arith.constant dense<0.000000e+00> : vector<256x128xf32>
    %72 = tpu.matmul %69, %71, %cst_51 {dimension_numbers = #tpu.dot_dimension_numbers<[1], [0], [0], [1], [0, 0, 1, 1], [], []>} : vector<256x64xbf16>, vector<64x128xbf16>, vector<256x128xf32> -> vector<256x128xf32>
    %73 = arith.addf %65, %72 : vector<256x128xf32>
    %c17_52 = arith.constant 17 : index
    %c0_53 = arith.constant 0 : index
    %74 = vector.load %arg20[%c17_52, %c0_53] : memref<290x64xf32, #tpu.memory_space<vmem>>, vector<256x64xf32>
    %75 = arith.truncf %74 : vector<256x64xf32> to vector<256x64xbf16>
    %c4 = arith.constant 4 : index
    %c0_54 = arith.constant 0 : index
    %c0_55 = arith.constant 0 : index
    %76 = vector.load %arg7[%c4, %c0_54, %c0_55] : memref<9x64x128xbf16, #tpu.memory_space<vmem>>, vector<1x64x128xbf16>
    %77 = vector.shape_cast %76 : vector<1x64x128xbf16> to vector<64x128xbf16>
    %cst_56 = arith.constant dense<0.000000e+00> : vector<256x128xf32>
    %78 = tpu.matmul %75, %77, %cst_56 {dimension_numbers = #tpu.dot_dimension_numbers<[1], [0], [0], [1], [0, 0, 1, 1], [], []>} : vector<256x64xbf16>, vector<64x128xbf16>, vector<256x128xf32> -> vector<256x128xf32>
    %79 = arith.addf %73, %78 : vector<256x128xf32>
    %c18 = arith.constant 18 : index
    %c0_57 = arith.constant 0 : index
    %80 = vector.load %arg20[%c18, %c0_57] : memref<290x64xf32, #tpu.memory_space<vmem>>, vector<256x64xf32>
    %81 = vector.broadcast %42 : vector<256x1xf32> to vector<256x64xf32>
    %82 = arith.mulf %80, %81 : vector<256x64xf32>
    %83 = arith.truncf %82 : vector<256x64xf32> to vector<256x64xbf16>
    %c5 = arith.constant 5 : index
    %c0_58 = arith.constant 0 : index
    %c0_59 = arith.constant 0 : index
    %84 = vector.load %arg7[%c5, %c0_58, %c0_59] : memref<9x64x128xbf16, #tpu.memory_space<vmem>>, vector<1x64x128xbf16>
    %85 = vector.shape_cast %84 : vector<1x64x128xbf16> to vector<64x128xbf16>
    %cst_60 = arith.constant dense<0.000000e+00> : vector<256x128xf32>
    %86 = tpu.matmul %83, %85, %cst_60 {dimension_numbers = #tpu.dot_dimension_numbers<[1], [0], [0], [1], [0, 0, 1, 1], [], []>} : vector<256x64xbf16>, vector<64x128xbf16>, vector<256x128xf32> -> vector<256x128xf32>
    %87 = arith.addf %79, %86 : vector<256x128xf32>
    %c32 = arith.constant 32 : index
    %c0_61 = arith.constant 0 : index
    %88 = vector.load %arg20[%c32, %c0_61] : memref<290x64xf32, #tpu.memory_space<vmem>>, vector<256x64xf32>
    %89 = vector.broadcast %41 : vector<256x1xf32> to vector<256x64xf32>
    %90 = arith.mulf %88, %89 : vector<256x64xf32>
    %91 = arith.truncf %90 : vector<256x64xf32> to vector<256x64xbf16>
    %c6 = arith.constant 6 : index
    %c0_62 = arith.constant 0 : index
    %c0_63 = arith.constant 0 : index
    %92 = vector.load %arg7[%c6, %c0_62, %c0_63] : memref<9x64x128xbf16, #tpu.memory_space<vmem>>, vector<1x64x128xbf16>
    %93 = vector.shape_cast %92 : vector<1x64x128xbf16> to vector<64x128xbf16>
    %cst_64 = arith.constant dense<0.000000e+00> : vector<256x128xf32>
    %94 = tpu.matmul %91, %93, %cst_64 {dimension_numbers = #tpu.dot_dimension_numbers<[1], [0], [0], [1], [0, 0, 1, 1], [], []>} : vector<256x64xbf16>, vector<64x128xbf16>, vector<256x128xf32> -> vector<256x128xf32>
    %95 = arith.addf %87, %94 : vector<256x128xf32>
    %c33 = arith.constant 33 : index
    %c0_65 = arith.constant 0 : index
    %96 = vector.load %arg20[%c33, %c0_65] : memref<290x64xf32, #tpu.memory_space<vmem>>, vector<256x64xf32>
    %97 = arith.truncf %96 : vector<256x64xf32> to vector<256x64xbf16>
    %c7 = arith.constant 7 : index
    %c0_66 = arith.constant 0 : index
    %c0_67 = arith.constant 0 : index
    %98 = vector.load %arg7[%c7, %c0_66, %c0_67] : memref<9x64x128xbf16, #tpu.memory_space<vmem>>, vector<1x64x128xbf16>
    %99 = vector.shape_cast %98 : vector<1x64x128xbf16> to vector<64x128xbf16>
    %cst_68 = arith.constant dense<0.000000e+00> : vector<256x128xf32>
    %100 = tpu.matmul %97, %99, %cst_68 {dimension_numbers = #tpu.dot_dimension_numbers<[1], [0], [0], [1], [0, 0, 1, 1], [], []>} : vector<256x64xbf16>, vector<64x128xbf16>, vector<256x128xf32> -> vector<256x128xf32>
    %101 = arith.addf %95, %100 : vector<256x128xf32>
    %c34 = arith.constant 34 : index
    %c0_69 = arith.constant 0 : index
    %102 = vector.load %arg20[%c34, %c0_69] : memref<290x64xf32, #tpu.memory_space<vmem>>, vector<256x64xf32>
    %103 = vector.broadcast %42 : vector<256x1xf32> to vector<256x64xf32>
    %104 = arith.mulf %102, %103 : vector<256x64xf32>
    %105 = arith.truncf %104 : vector<256x64xf32> to vector<256x64xbf16>
    %c8 = arith.constant 8 : index
    %c0_70 = arith.constant 0 : index
    %c0_71 = arith.constant 0 : index
    %106 = vector.load %arg7[%c8, %c0_70, %c0_71] : memref<9x64x128xbf16, #tpu.memory_space<vmem>>, vector<1x64x128xbf16>
    %107 = vector.shape_cast %106 : vector<1x64x128xbf16> to vector<64x128xbf16>
    %cst_72 = arith.constant dense<0.000000e+00> : vector<256x128xf32>
    %108 = tpu.matmul %105, %107, %cst_72 {dimension_numbers = #tpu.dot_dimension_numbers<[1], [0], [0], [1], [0, 0, 1, 1], [], []>} : vector<256x64xbf16>, vector<64x128xbf16>, vector<256x128xf32> -> vector<256x128xf32>
    %109 = arith.addf %101, %108 : vector<256x128xf32>
    %c0_73 = arith.constant 0 : index
    %c0_74 = arith.constant 0 : index
    %110 = vector.load %arg8[%c0_73, %c0_74] : memref<1x128xf32, #tpu.memory_space<vmem>>, vector<1x128xf32>
    %111 = vector.broadcast %110 : vector<1x128xf32> to vector<256x128xf32>
    %112 = arith.addf %109, %111 : vector<256x128xf32>
    %c0_75 = arith.constant 0 : index
    %c0_76 = arith.constant 0 : index
    %c0_77 = arith.constant 0 : index
    %113 = vector.load %arg2[%c0_75, %c0_76, %c0_77] : memref<1x1x128xf32, #tpu.memory_space<vmem>>, vector<1x1x128xf32>
    %114 = vector.shape_cast %113 : vector<1x1x128xf32> to vector<1x128xf32>
    %115 = vector.broadcast %114 : vector<1x128xf32> to vector<256x128xf32>
    %116 = arith.addf %112, %115 : vector<256x128xf32>
    %cst_78 = arith.constant dense<0.000000e+00> : vector<128xf32>
    %117 = vector.multi_reduction <add>, %116, %cst_78 [0] : vector<256x128xf32> to vector<128xf32>
    %118 = vector.shape_cast %117 : vector<128xf32> to vector<1x128xf32>
    %119 = arith.mulf %116, %116 : vector<256x128xf32>
    %cst_79 = arith.constant dense<0.000000e+00> : vector<128xf32>
    %120 = vector.multi_reduction <add>, %119, %cst_79 [0] : vector<256x128xf32> to vector<128xf32>
    %121 = vector.shape_cast %120 : vector<128xf32> to vector<1x128xf32>
    %c0_80 = arith.constant 0 : index
    %c0_81 = arith.constant 0 : index
    %122 = vector.load %arg9[%c0_80, %c0_81] : memref<128x32xf32, #tpu.memory_space<vmem>>, vector<128x32xf32>
    %cst_82 = arith.constant dense<0.000000e+00> : vector<1x32xf32>
    %123 = tpu.matmul %118, %122, %cst_82 {dimension_numbers = #tpu.dot_dimension_numbers<[1], [0], [0], [1], [0, 0, 1, 1], [], []>} : vector<1x128xf32>, vector<128x32xf32>, vector<1x32xf32> -> vector<1x32xf32>
    %c0_83 = arith.constant 0 : index
    %c0_84 = arith.constant 0 : index
    %124 = vector.load %arg10[%c0_83, %c0_84] : memref<32x128xf32, #tpu.memory_space<vmem>>, vector<32x128xf32>
    %cst_85 = arith.constant dense<0.000000e+00> : vector<1x128xf32>
    %125 = tpu.matmul %123, %124, %cst_85 {dimension_numbers = #tpu.dot_dimension_numbers<[1], [0], [0], [1], [0, 0, 1, 1], [], []>} : vector<1x32xf32>, vector<32x128xf32>, vector<1x128xf32> -> vector<1x128xf32>
    %c0_86 = arith.constant 0 : index
    %c0_87 = arith.constant 0 : index
    %126 = vector.load %arg9[%c0_86, %c0_87] : memref<128x32xf32, #tpu.memory_space<vmem>>, vector<128x32xf32>
    %cst_88 = arith.constant dense<0.000000e+00> : vector<1x32xf32>
    %127 = tpu.matmul %121, %126, %cst_88 {dimension_numbers = #tpu.dot_dimension_numbers<[1], [0], [0], [1], [0, 0, 1, 1], [], []>} : vector<1x128xf32>, vector<128x32xf32>, vector<1x32xf32> -> vector<1x32xf32>
    %c0_89 = arith.constant 0 : index
    %c0_90 = arith.constant 0 : index
    %128 = vector.load %arg10[%c0_89, %c0_90] : memref<32x128xf32, #tpu.memory_space<vmem>>, vector<32x128xf32>
    %cst_91 = arith.constant dense<0.000000e+00> : vector<1x128xf32>
    %129 = tpu.matmul %127, %128, %cst_91 {dimension_numbers = #tpu.dot_dimension_numbers<[1], [0], [0], [1], [0, 0, 1, 1], [], []>} : vector<1x32xf32>, vector<32x128xf32>, vector<1x128xf32> -> vector<1x128xf32>
    %130 = arith.mulf %125, %125 : vector<1x128xf32>
    %131 = arith.subf %129, %130 : vector<1x128xf32>
    %132 = vector.broadcast %125 : vector<1x128xf32> to vector<256x128xf32>
    %133 = arith.subf %116, %132 : vector<256x128xf32>
    %cst_92 = arith.constant 9.99999974E-6 : f32
    %134 = vector.broadcast %cst_92 : f32 to vector<1x128xf32>
    %135 = arith.addf %131, %134 : vector<1x128xf32>
    %136 = math.rsqrt %135 : vector<1x128xf32>
    %137 = vector.broadcast %136 : vector<1x128xf32> to vector<256x128xf32>
    %138 = arith.mulf %133, %137 : vector<256x128xf32>
    %c0_93 = arith.constant 0 : index
    %c0_94 = arith.constant 0 : index
    %139 = vector.load %arg11[%c0_93, %c0_94] : memref<1x128xf32, #tpu.memory_space<vmem>>, vector<1x128xf32>
    %140 = vector.broadcast %139 : vector<1x128xf32> to vector<256x128xf32>
    %141 = arith.mulf %138, %140 : vector<256x128xf32>
    %c0_95 = arith.constant 0 : index
    %c0_96 = arith.constant 0 : index
    %142 = vector.load %arg12[%c0_95, %c0_96] : memref<1x128xf32, #tpu.memory_space<vmem>>, vector<1x128xf32>
    %143 = vector.broadcast %142 : vector<1x128xf32> to vector<256x128xf32>
    %144 = arith.addf %141, %143 : vector<256x128xf32>
    %cst_97 = arith.constant 0.000000e+00 : f32
    %145 = vector.broadcast %cst_97 : f32 to vector<256x128xf32>
    %146 = arith.subf %145, %144 : vector<256x128xf32>
    %147 = math.exp %146 : vector<256x128xf32>
    %cst_98 = arith.constant 1.000000e+00 : f32
    %148 = vector.broadcast %cst_98 : f32 to vector<256x128xf32>
    %149 = arith.addf %148, %147 : vector<256x128xf32>
    %150 = tpu.reciprocal %149 {approx = true} : vector<256x128xf32> -> vector<256x128xf32>
    %151 = arith.mulf %144, %150 : vector<256x128xf32>
    %cst_99 = arith.constant 0.000000e+00 : f32
    %152 = vector.broadcast %cst_99 : f32 to vector<17x128xf32>
    %c0_100 = arith.constant 0 : index
    %c0_101 = arith.constant 0 : index
    %153 = vector.load %arg21[%c0_100, %c0_101] : memref<290x128xf32, #tpu.memory_space<vmem>>, vector<17x128xf32>
    tpu.vector_store %arg21[%c0_100, %c0_101], %152 {strides = array<i32>} : memref<290x128xf32, #tpu.memory_space<vmem>>, vector<17x128xf32>,
    %c273_102 = arith.constant 273 : index
    %c0_103 = arith.constant 0 : index
    %154 = vector.load %arg21[%c273_102, %c0_103] : memref<290x128xf32, #tpu.memory_space<vmem>>, vector<17x128xf32>
    tpu.vector_store %arg21[%c273_102, %c0_103], %152 {strides = array<i32>} : memref<290x128xf32, #tpu.memory_space<vmem>>, vector<17x128xf32>,
    %c17_104 = arith.constant 17 : index
    %c0_105 = arith.constant 0 : index
    %155 = vector.load %arg21[%c17_104, %c0_105] : memref<290x128xf32, #tpu.memory_space<vmem>>, vector<256x128xf32>
    tpu.vector_store %arg21[%c17_104, %c0_105], %151 {strides = array<i32>} : memref<290x128xf32, #tpu.memory_space<vmem>>, vector<256x128xf32>,
    %c0_106 = arith.constant 0 : index
    %c0_107 = arith.constant 0 : index
    %156 = vector.load %arg17[%c0_106, %c0_107] : memref<256x1xf32, #tpu.memory_space<vmem>>, vector<256x1xf32>
    %c0_108 = arith.constant 0 : index
    %c0_109 = arith.constant 0 : index
    %157 = vector.load %arg18[%c0_108, %c0_109] : memref<256x1xf32, #tpu.memory_space<vmem>>, vector<256x1xf32>
    %cst_110 = arith.constant 0.000000e+00 : f32
    %158 = vector.broadcast %cst_110 : f32 to vector<256x128xf32>
    %c0_111 = arith.constant 0 : index
    %c0_112 = arith.constant 0 : index
    %159 = vector.load %arg21[%c0_111, %c0_112] : memref<290x128xf32, #tpu.memory_space<vmem>>, vector<256x128xf32>
    %160 = vector.broadcast %156 : vector<256x1xf32> to vector<256x128xf32>
    %161 = arith.mulf %159, %160 : vector<256x128xf32>
    %162 = arith.truncf %161 : vector<256x128xf32> to vector<256x128xbf16>
    %c0_113 = arith.constant 0 : index
    %c0_114 = arith.constant 0 : index
    %c0_115 = arith.constant 0 : index
    %163 = vector.load %arg13[%c0_113, %c0_114, %c0_115] : memref<9x128x128xbf16, #tpu.memory_space<vmem>>, vector<1x128x128xbf16>
    %164 = vector.shape_cast %163 : vector<1x128x128xbf16> to vector<128x128xbf16>
    %cst_116 = arith.constant dense<0.000000e+00> : vector<256x128xf32>
    %165 = tpu.matmul %162, %164, %cst_116 {dimension_numbers = #tpu.dot_dimension_numbers<[1], [0], [0], [1], [0, 0, 1, 1], [], []>} : vector<256x128xbf16>, vector<128x128xbf16>, vector<256x128xf32> -> vector<256x128xf32>
    %166 = arith.addf %158, %165 : vector<256x128xf32>
    %c1_117 = arith.constant 1 : index
    %c0_118 = arith.constant 0 : index
    %167 = vector.load %arg21[%c1_117, %c0_118] : memref<290x128xf32, #tpu.memory_space<vmem>>, vector<256x128xf32>
    %168 = arith.truncf %167 : vector<256x128xf32> to vector<256x128xbf16>
    %c1_119 = arith.constant 1 : index
    %c0_120 = arith.constant 0 : index
    %c0_121 = arith.constant 0 : index
    %169 = vector.load %arg13[%c1_119, %c0_120, %c0_121] : memref<9x128x128xbf16, #tpu.memory_space<vmem>>, vector<1x128x128xbf16>
    %170 = vector.shape_cast %169 : vector<1x128x128xbf16> to vector<128x128xbf16>
    %cst_122 = arith.constant dense<0.000000e+00> : vector<256x128xf32>
    %171 = tpu.matmul %168, %170, %cst_122 {dimension_numbers = #tpu.dot_dimension_numbers<[1], [0], [0], [1], [0, 0, 1, 1], [], []>} : vector<256x128xbf16>, vector<128x128xbf16>, vector<256x128xf32> -> vector<256x128xf32>
    %172 = arith.addf %166, %171 : vector<256x128xf32>
    %c2_123 = arith.constant 2 : index
    %c0_124 = arith.constant 0 : index
    %173 = vector.load %arg21[%c2_123, %c0_124] : memref<290x128xf32, #tpu.memory_space<vmem>>, vector<256x128xf32>
    %174 = vector.broadcast %157 : vector<256x1xf32> to vector<256x128xf32>
    %175 = arith.mulf %173, %174 : vector<256x128xf32>
    %176 = arith.truncf %175 : vector<256x128xf32> to vector<256x128xbf16>
    %c2_125 = arith.constant 2 : index
    %c0_126 = arith.constant 0 : index
    %c0_127 = arith.constant 0 : index
    %177 = vector.load %arg13[%c2_125, %c0_126, %c0_127] : memref<9x128x128xbf16, #tpu.memory_space<vmem>>, vector<1x128x128xbf16>
    %178 = vector.shape_cast %177 : vector<1x128x128xbf16> to vector<128x128xbf16>
    %cst_128 = arith.constant dense<0.000000e+00> : vector<256x128xf32>
    %179 = tpu.matmul %176, %178, %cst_128 {dimension_numbers = #tpu.dot_dimension_numbers<[1], [0], [0], [1], [0, 0, 1, 1], [], []>} : vector<256x128xbf16>, vector<128x128xbf16>, vector<256x128xf32> -> vector<256x128xf32>
    %180 = arith.addf %172, %179 : vector<256x128xf32>
    %c16_129 = arith.constant 16 : index
    %c0_130 = arith.constant 0 : index
    %181 = vector.load %arg21[%c16_129, %c0_130] : memref<290x128xf32, #tpu.memory_space<vmem>>, vector<256x128xf32>
    %182 = vector.broadcast %156 : vector<256x1xf32> to vector<256x128xf32>
    %183 = arith.mulf %181, %182 : vector<256x128xf32>
    %184 = arith.truncf %183 : vector<256x128xf32> to vector<256x128xbf16>
    %c3_131 = arith.constant 3 : index
    %c0_132 = arith.constant 0 : index
    %c0_133 = arith.constant 0 : index
    %185 = vector.load %arg13[%c3_131, %c0_132, %c0_133] : memref<9x128x128xbf16, #tpu.memory_space<vmem>>, vector<1x128x128xbf16>
    %186 = vector.shape_cast %185 : vector<1x128x128xbf16> to vector<128x128xbf16>
    %cst_134 = arith.constant dense<0.000000e+00> : vector<256x128xf32>
    %187 = tpu.matmul %184, %186, %cst_134 {dimension_numbers = #tpu.dot_dimension_numbers<[1], [0], [0], [1], [0, 0, 1, 1], [], []>} : vector<256x128xbf16>, vector<128x128xbf16>, vector<256x128xf32> -> vector<256x128xf32>
    %188 = arith.addf %180, %187 : vector<256x128xf32>
    %c17_135 = arith.constant 17 : index
    %c0_136 = arith.constant 0 : index
    %189 = vector.load %arg21[%c17_135, %c0_136] : memref<290x128xf32, #tpu.memory_space<vmem>>, vector<256x128xf32>
    %190 = arith.truncf %189 : vector<256x128xf32> to vector<256x128xbf16>
    %c4_137 = arith.constant 4 : index
    %c0_138 = arith.constant 0 : index
    %c0_139 = arith.constant 0 : index
    %191 = vector.load %arg13[%c4_137, %c0_138, %c0_139] : memref<9x128x128xbf16, #tpu.memory_space<vmem>>, vector<1x128x128xbf16>
    %192 = vector.shape_cast %191 : vector<1x128x128xbf16> to vector<128x128xbf16>
    %cst_140 = arith.constant dense<0.000000e+00> : vector<256x128xf32>
    %193 = tpu.matmul %190, %192, %cst_140 {dimension_numbers = #tpu.dot_dimension_numbers<[1], [0], [0], [1], [0, 0, 1, 1], [], []>} : vector<256x128xbf16>, vector<128x128xbf16>, vector<256x128xf32> -> vector<256x128xf32>
    %194 = arith.addf %188, %193 : vector<256x128xf32>
    %c18_141 = arith.constant 18 : index
    %c0_142 = arith.constant 0 : index
    %195 = vector.load %arg21[%c18_141, %c0_142] : memref<290x128xf32, #tpu.memory_space<vmem>>, vector<256x128xf32>
    %196 = vector.broadcast %157 : vector<256x1xf32> to vector<256x128xf32>
    %197 = arith.mulf %195, %196 : vector<256x128xf32>
    %198 = arith.truncf %197 : vector<256x128xf32> to vector<256x128xbf16>
    %c5_143 = arith.constant 5 : index
    %c0_144 = arith.constant 0 : index
    %c0_145 = arith.constant 0 : index
    %199 = vector.load %arg13[%c5_143, %c0_144, %c0_145] : memref<9x128x128xbf16, #tpu.memory_space<vmem>>, vector<1x128x128xbf16>
    %200 = vector.shape_cast %199 : vector<1x128x128xbf16> to vector<128x128xbf16>
    %cst_146 = arith.constant dense<0.000000e+00> : vector<256x128xf32>
    %201 = tpu.matmul %198, %200, %cst_146 {dimension_numbers = #tpu.dot_dimension_numbers<[1], [0], [0], [1], [0, 0, 1, 1], [], []>} : vector<256x128xbf16>, vector<128x128xbf16>, vector<256x128xf32> -> vector<256x128xf32>
    %202 = arith.addf %194, %201 : vector<256x128xf32>
    %c32_147 = arith.constant 32 : index
    %c0_148 = arith.constant 0 : index
    %203 = vector.load %arg21[%c32_147, %c0_148] : memref<290x128xf32, #tpu.memory_space<vmem>>, vector<256x128xf32>
    %204 = vector.broadcast %156 : vector<256x1xf32> to vector<256x128xf32>
    %205 = arith.mulf %203, %204 : vector<256x128xf32>
    %206 = arith.truncf %205 : vector<256x128xf32> to vector<256x128xbf16>
    %c6_149 = arith.constant 6 : index
    %c0_150 = arith.constant 0 : index
    %c0_151 = arith.constant 0 : index
    %207 = vector.load %arg13[%c6_149, %c0_150, %c0_151] : memref<9x128x128xbf16, #tpu.memory_space<vmem>>, vector<1x128x128xbf16>
    %208 = vector.shape_cast %207 : vector<1x128x128xbf16> to vector<128x128xbf16>
    %cst_152 = arith.constant dense<0.000000e+00> : vector<256x128xf32>
    %209 = tpu.matmul %206, %208, %cst_152 {dimension_numbers = #tpu.dot_dimension_numbers<[1], [0], [0], [1], [0, 0, 1, 1], [], []>} : vector<256x128xbf16>, vector<128x128xbf16>, vector<256x128xf32> -> vector<256x128xf32>
    %210 = arith.addf %202, %209 : vector<256x128xf32>
    %c33_153 = arith.constant 33 : index
    %c0_154 = arith.constant 0 : index
    %211 = vector.load %arg21[%c33_153, %c0_154] : memref<290x128xf32, #tpu.memory_space<vmem>>, vector<256x128xf32>
    %212 = arith.truncf %211 : vector<256x128xf32> to vector<256x128xbf16>
    %c7_155 = arith.constant 7 : index
    %c0_156 = arith.constant 0 : index
    %c0_157 = arith.constant 0 : index
    %213 = vector.load %arg13[%c7_155, %c0_156, %c0_157] : memref<9x128x128xbf16, #tpu.memory_space<vmem>>, vector<1x128x128xbf16>
    %214 = vector.shape_cast %213 : vector<1x128x128xbf16> to vector<128x128xbf16>
    %cst_158 = arith.constant dense<0.000000e+00> : vector<256x128xf32>
    %215 = tpu.matmul %212, %214, %cst_158 {dimension_numbers = #tpu.dot_dimension_numbers<[1], [0], [0], [1], [0, 0, 1, 1], [], []>} : vector<256x128xbf16>, vector<128x128xbf16>, vector<256x128xf32> -> vector<256x128xf32>
    %216 = arith.addf %210, %215 : vector<256x128xf32>
    %c34_159 = arith.constant 34 : index
    %c0_160 = arith.constant 0 : index
    %217 = vector.load %arg21[%c34_159, %c0_160] : memref<290x128xf32, #tpu.memory_space<vmem>>, vector<256x128xf32>
    %218 = vector.broadcast %157 : vector<256x1xf32> to vector<256x128xf32>
    %219 = arith.mulf %217, %218 : vector<256x128xf32>
    %220 = arith.truncf %219 : vector<256x128xf32> to vector<256x128xbf16>
    %c8_161 = arith.constant 8 : index
    %c0_162 = arith.constant 0 : index
    %c0_163 = arith.constant 0 : index
    %221 = vector.load %arg13[%c8_161, %c0_162, %c0_163] : memref<9x128x128xbf16, #tpu.memory_space<vmem>>, vector<1x128x128xbf16>
    %222 = vector.shape_cast %221 : vector<1x128x128xbf16> to vector<128x128xbf16>
    %cst_164 = arith.constant dense<0.000000e+00> : vector<256x128xf32>
    %223 = tpu.matmul %220, %222, %cst_164 {dimension_numbers = #tpu.dot_dimension_numbers<[1], [0], [0], [1], [0, 0, 1, 1], [], []>} : vector<256x128xbf16>, vector<128x128xbf16>, vector<256x128xf32> -> vector<256x128xf32>
    %224 = arith.addf %216, %223 : vector<256x128xf32>
    %c0_165 = arith.constant 0 : index
    %c0_166 = arith.constant 0 : index
    %225 = vector.load %arg14[%c0_165, %c0_166] : memref<1x128xf32, #tpu.memory_space<vmem>>, vector<1x128xf32>
    %226 = vector.broadcast %225 : vector<1x128xf32> to vector<256x128xf32>
    %227 = arith.addf %224, %226 : vector<256x128xf32>
    %228 = arith.truncf %1 : vector<256x64xf32> to vector<256x64xbf16>
    %c0_167 = arith.constant 0 : index
    %c0_168 = arith.constant 0 : index
    %229 = vector.load %arg15[%c0_167, %c0_168] : memref<64x128xbf16, #tpu.memory_space<vmem>>, vector<64x128xbf16>
    %cst_169 = arith.constant dense<0.000000e+00> : vector<256x128xf32>
    %230 = tpu.matmul %228, %229, %cst_169 {dimension_numbers = #tpu.dot_dimension_numbers<[1], [0], [0], [1], [0, 0, 1, 1], [], []>} : vector<256x64xbf16>, vector<64x128xbf16>, vector<256x128xf32> -> vector<256x128xf32>
    %c0_170 = arith.constant 0 : index
    %c0_171 = arith.constant 0 : index
    %231 = vector.load %arg16[%c0_170, %c0_171] : memref<1x128xf32, #tpu.memory_space<vmem>>, vector<1x128xf32>
    %232 = vector.broadcast %231 : vector<1x128xf32> to vector<256x128xf32>
    %233 = arith.addf %230, %232 : vector<256x128xf32>
    %234 = arith.addf %233, %227 : vector<256x128xf32>
    %c0_172 = arith.constant 0 : index
    %c0_173 = arith.constant 0 : index
    %c0_174 = arith.constant 0 : index
    %235 = vector.load %arg19[%c0_172, %c0_173, %c0_174] : memref<1x256x128xf32, #tpu.memory_space<vmem>>, vector<1x256x128xf32>
    %236 = vector.shape_cast %235 : vector<1x256x128xf32> to vector<256x128xf32>
    %237 = vector.shape_cast %234 : vector<256x128xf32> to vector<1x256x128xf32>
    tpu.vector_store %arg19[%c0_172, %c0_173, %c0_174], %237 {strides = array<i32>} : memref<1x256x128xf32, #tpu.memory_space<vmem>>, vector<1x256x128xf32>,
    return
  }
  func.func @transform_0(%arg0: i32) -> (i32, i32, i32) {
    %c0_i32 = arith.constant 0 : i32
    %c0_i32_0 = arith.constant 0 : i32
    %c0_i32_1 = arith.constant 0 : i32
    return %arg0, %c0_i32, %c0_i32_0 : i32, i32, i32
  }
  func.func @transform_1(%arg0: i32) -> (i32, i32, i32) {
    %c0_i32 = arith.constant 0 : i32
    %c0_i32_0 = arith.constant 0 : i32
    %c0_i32_1 = arith.constant 0 : i32
    return %arg0, %c0_i32, %c0_i32_0 : i32, i32, i32
  }
  func.func @transform_2(%arg0: i32) -> (i32, i32) {
    %c0_i32 = arith.constant 0 : i32
    %c0_i32_0 = arith.constant 0 : i32
    %c0_i32_1 = arith.constant 0 : i32
    return %c0_i32, %c0_i32_0 : i32, i32
  }
  func.func @transform_3(%arg0: i32) -> (i32, i32) {
    %c0_i32 = arith.constant 0 : i32
    %c0_i32_0 = arith.constant 0 : i32
    %c0_i32_1 = arith.constant 0 : i32
    return %c0_i32, %c0_i32_0 : i32, i32
  }
  func.func @transform_4(%arg0: i32) -> (i32, i32) {
    %c0_i32 = arith.constant 0 : i32
    %c0_i32_0 = arith.constant 0 : i32
    %c0_i32_1 = arith.constant 0 : i32
    return %c0_i32, %c0_i32_0 : i32, i32
  }
  func.func @transform_5(%arg0: i32) -> (i32, i32) {
    %c0_i32 = arith.constant 0 : i32
    %c0_i32_0 = arith.constant 0 : i32
    %c0_i32_1 = arith.constant 0 : i32
    return %c0_i32, %c0_i32_0 : i32, i32
  }
  func.func @transform_6(%arg0: i32) -> (i32, i32, i32) {
    %c0_i32 = arith.constant 0 : i32
    %c0_i32_0 = arith.constant 0 : i32
    %c0_i32_1 = arith.constant 0 : i32
    %c0_i32_2 = arith.constant 0 : i32
    return %c0_i32, %c0_i32_0, %c0_i32_1 : i32, i32, i32
  }
  func.func @transform_7(%arg0: i32) -> (i32, i32) {
    %c0_i32 = arith.constant 0 : i32
    %c0_i32_0 = arith.constant 0 : i32
    %c0_i32_1 = arith.constant 0 : i32
    return %c0_i32, %c0_i32_0 : i32, i32
  }
  func.func @transform_8(%arg0: i32) -> (i32, i32) {
    %c0_i32 = arith.constant 0 : i32
    %c0_i32_0 = arith.constant 0 : i32
    %c0_i32_1 = arith.constant 0 : i32
    return %c0_i32, %c0_i32_0 : i32, i32
  }
  func.func @transform_9(%arg0: i32) -> (i32, i32) {
    %c0_i32 = arith.constant 0 : i32
    %c0_i32_0 = arith.constant 0 : i32
    %c0_i32_1 = arith.constant 0 : i32
    return %c0_i32, %c0_i32_0 : i32, i32
  }
  func.func @transform_10(%arg0: i32) -> (i32, i32) {
    %c0_i32 = arith.constant 0 : i32
    %c0_i32_0 = arith.constant 0 : i32
    %c0_i32_1 = arith.constant 0 : i32
    return %c0_i32, %c0_i32_0 : i32, i32
  }
  func.func @transform_11(%arg0: i32) -> (i32, i32) {
    %c0_i32 = arith.constant 0 : i32
    %c0_i32_0 = arith.constant 0 : i32
    %c0_i32_1 = arith.constant 0 : i32
    return %c0_i32, %c0_i32_0 : i32, i32
  }
  func.func @transform_12(%arg0: i32) -> (i32, i32, i32) {
    %c0_i32 = arith.constant 0 : i32
    %c0_i32_0 = arith.constant 0 : i32
    %c0_i32_1 = arith.constant 0 : i32
    %c0_i32_2 = arith.constant 0 : i32
    return %c0_i32, %c0_i32_0, %c0_i32_1 : i32, i32, i32
  }
  func.func @transform_13(%arg0: i32) -> (i32, i32) {
    %c0_i32 = arith.constant 0 : i32
    %c0_i32_0 = arith.constant 0 : i32
    %c0_i32_1 = arith.constant 0 : i32
    return %c0_i32, %c0_i32_0 : i32, i32
  }
  func.func @transform_14(%arg0: i32) -> (i32, i32) {
    %c0_i32 = arith.constant 0 : i32
    %c0_i32_0 = arith.constant 0 : i32
    %c0_i32_1 = arith.constant 0 : i32
    return %c0_i32, %c0_i32_0 : i32, i32
  }
  func.func @transform_15(%arg0: i32) -> (i32, i32) {
    %c0_i32 = arith.constant 0 : i32
    %c0_i32_0 = arith.constant 0 : i32
    %c0_i32_1 = arith.constant 0 : i32
    return %c0_i32, %c0_i32_0 : i32, i32
  }
  func.func @transform_16(%arg0: i32) -> (i32, i32) {
    %c0_i32 = arith.constant 0 : i32
    %c0_i32_0 = arith.constant 0 : i32
    %c0_i32_1 = arith.constant 0 : i32
    return %c0_i32, %c0_i32_0 : i32, i32
  }
  func.func @transform_17(%arg0: i32) -> (i32, i32) {
    %c0_i32 = arith.constant 0 : i32
    %c0_i32_0 = arith.constant 0 : i32
    %c0_i32_1 = arith.constant 0 : i32
    return %c0_i32, %c0_i32_0 : i32, i32
  }
  func.func @transform_18(%arg0: i32) -> (i32, i32, i32) {
    %c0_i32 = arith.constant 0 : i32
    %c0_i32_0 = arith.constant 0 : i32
    %c0_i32_1 = arith.constant 0 : i32
    return %arg0, %c0_i32, %c0_i32_0 : i32, i32, i32
  }
}

</mosaic_0001>

<bundles_post_ra>
// kernel: resblock_forward.1
= control target key start
LH: loop header
LB: loop body
LE: loop exit
PB: predicated region body
PF: predicated region fallthrough
CT: control target
= control target key end

     0   :  { %s17931_s0 = inlined_call_operand.vmem [shape: f32[2,256,64], index: 0, kind: input, shape index: {}]   ;;  %s17932_s1 = inlined_call_operand.vmem [shape: f32[2,1,128], index: 1, kind: input, shape index: {}]   ;;  %s17933_s2 = inlined_call_operand.vmem [shape: f32[64,32], index: 2, kind: input, shape index: {}]   ;;  %s17934_s3 = inlined_call_operand.vmem [shape: f32[32,64], index: 3, kind: input, shape index: {}]   ;;  %s17935_s4 = inlined_call_operand.vmem [shape: f32[1,64], index: 4, kind: input, shape index: {}]   ;;  %s17936_s5 = inlined_call_operand.vmem [shape: f32[1,64], index: 5, kind: input, shape index: {}]   ;;  %s17937_s6 = inlined_call_operand.vmem [shape: bf16[9,64,128], index: 6, kind: input, shape index: {}]   ;;  %s17938_s7 = inlined_call_operand.vmem [shape: f32[1,128], index: 7, kind: input, shape index: {}]   ;;  %s17939_s8 = inlined_call_operand.vmem [shape: f32[128,32], index: 8, kind: input, shape index: {}]   ;;  %s17940_s9 = inlined_call_operand.vmem [shape: f32[32,128], index: 9, kind: input, shape index: {}]   ;;  %s17941_s10 = inlined_call_operand.vmem [shape: f32[1,128], index: 10, kind: input, shape index: {}]   ;;  %s17942_s11 = inlined_call_operand.vmem [shape: f32[1,128], index: 11, kind: input, shape index: {}]   ;;  %s17943_s12 = inlined_call_operand.vmem [shape: bf16[9,128,128], index: 12, kind: input, shape index: {}]   ;;  %s17944_s13 = inlined_call_operand.vmem [shape: f32[1,128], index: 13, kind: input, shape index: {}]   ;;  %s17945_s14 = inlined_call_operand.vmem [shape: bf16[64,128], index: 14, kind: input, shape index: {}]   ;;  %s17946_s15 = inlined_call_operand.vmem [shape: f32[1,128], index: 15, kind: input, shape index: {}]   ;;  %s17947_s16 = inlined_call_operand.vmem [shape: f32[256,1], index: 16, kind: input, shape index: {}]   ;;  %s17948_s17 = inlined_call_operand.vmem [shape: f32[256,1], index: 17, kind: input, shape index: {}]   ;;  %s17949_s18 = inlined_call_operand.hbm [shape: f32[2,256,128], index: 18, kind: output, shape index: {}]  }
   0x1   :  { %18407 = sst [smem:[#allocation171_spill]] %s17931_s0 }
   0x2   :  { %18408 = sst [smem:[#allocation172_spill]] %s17932_s1 }
   0x3   :  { %18409 = sst [smem:[#allocation173_spill]] %s17933_s2 }
   0x4   :  { %18410 = sst [smem:[#allocation174_spill]] %s17934_s3 }
   0x5   :  { %23 = vsyncpa [#allocation5], 0 }
   0x6   :  { %25 = vsyncpa [#allocation5 + $0x1], 0  ;;  %s12095_s27 = smov 0   ;;  %s12097_s28 = smov 0  }
   0x7   :  { %s12099_s29 = smov 0   ;;  %s12101_s30 = smov 0  }
   0x8 LB: > { %18411 = sst [smem:[#allocation7_spill]] %s11980_s27  ;;  %s12116_s0 = sadd.s32 4294967295, %s11992_s30   ;;  %s11992_s30 = sphi %s12101_s30, %s19451_s30   ;;  %s11988_s29 = sphi %s12099_s29, %s19453_s29   ;;  %s11984_s28 = sphi %s12097_s28, %s19455_s28   ;;  %s11980_s27 = sphi %s12095_s27, %s19454_s27  }
   0x9   : > { %18412 = sst [smem:[#allocation8_spill]] %s11988_s29  ;;  %s9482_s19 = sadd.s32 4294967294, %s11992_s30  }
   0xa   : > { %s12120_s1 = sadd.s32 1, %s11992_s30   ;;  %s426_s20 = sadd.s32 1, %s11988_s29 }
   0xb   : > { %18413 = sst [smem:[#allocation9_spill]] %s12120_s1  ;;  %s423_s21 = ssub.s32 %s11992_s30, %s12120_s1 }
   0xc   : > { %p436_p0 = scmp.ne.s32.totalorder %s11988_s29, %s11984_s28  ;;  %p424_p1 = scmp.eq.s32.totalorder %s423_s21, 0 }
   0xd   : > { %p437_p2 = scmp.eq.s32.totalorder %s12116_s0, 1  ;;  %p442_p3 = scmp.ne.s32.totalorder %s11984_s28, %s11980_s27 }
   0xe   : > { %p443_p4 = scmp.eq.s32.totalorder %s9482_s19, 1  ;;  %p9485_p7 = scmp.ge.s32.totalorder %s11992_s30, 1 }
   0xf   : > { %s12131_s22 = scalar_select %p424_p1, %s11988_s29, %s426_s20  }
  0x10   : > { %p12133_p5 = por %p437_p2, %p436_p0  ;;  %p12137_p6 = por %p443_p4, %p442_p3 }
  0x11   : > { %18414 = sst [smem:[#allocation10_spill]] %s12131_s22  ;;  %p523_p8 = scmp.lt.s32.totalorder %s11992_s30, 3 }
  0x12   : > { %s18416_s23 = scalar_select %p12137_p6, 1, 0 }
  0x13   : > { %p524_p9 = pnand %p9485_p7, %p523_p8 }
  0x14   : > { %18417 = sst [smem:[#allocation11_spill]] %s18416_s23 }
  0x15   : > { %527 = sbr.rel (%p524_p9) target bundleno = 2459 (0x99b), region = 92 }
  0x1a   : > { %s18418_s26 = sld [smem:[#allocation173_spill]]  ;;  %p580_p10 = scmp.lt.s32.totalorder %s12116_s0, 1  ;;  %v17956_v1 = vmov 0.0   ;;  %vm621_vm0 = vcmask 523264   ;;  %vm11995_vm1 = vmmov 0   ;;  %vm1445_vm2 = vcmask 516096  }
  0x1b   : > { %10462 = vmatprep.subr.mxu0 %v17956_v1  ;;  %5727 = vst [vmem:[#allocation3] sm:$0xff] %v17956_v1  ;;  %5728 = vst [vmem:[#allocation3 + $0x8] sm:$0xff] %v17956_v1  ;;  %10492 = vmatprep.subr.mxu1 %v17956_v1  ;;  %s18419_s25 = sld [smem:[#allocation171_spill]]  ;;  %vm877_vm3 = vcmask 261120  }
  0x1c   : > { %5729 = vst [vmem:[#allocation3 + $0x10] sm:$0x1] %v17956_v1  ;;  %5730 = vst [vmem:[#allocation3 + $0x111] sm:$0xff] %v17956_v1  ;;  %s12161_s21 = scalar_select %p580_p10, %s12116_s0, 1  ;;  %10478 = vmatprep.mubr.msk.f32.mxu0 %vm11995_vm1, %v17956_v1  ;;  %10508 = vmatprep.mubr.msk.f32.mxu1 %vm11995_vm1, %v17956_v1 }
  0x1d   : > { %5731 = vst [vmem:[#allocation3 + $0x119] sm:$0xff] %v17956_v1  ;;  %5732 = vst [vmem:[#allocation3 + $0x121] sm:$0x1] %v17956_v1  ;;  %s18430_s3 = sld [smem:[#allocation174_spill]] }
  0x1e   : > { %1443 = vst.msk [vmem:[#allocation2] sm:$0xff] %vm621_vm0, %v17956_v1  ;;  %1444 = vst.msk [vmem:[#allocation2 + $0x8] sm:$0xff] %vm621_vm0, %v17956_v1  ;;  %s9972_s19 = sshll.u32 %s12161_s21, 8  ;;  %s18993_s22 = sld [smem:[#allocation172_spill]] }
  0x1f   : > { %1447 = vst.msk [vmem:[#allocation2 + $0x111] sm:$0xff] %vm621_vm0, %v17956_v1  ;;  %1448 = vst.msk [vmem:[#allocation2 + $0x119] sm:$0xff] %vm621_vm0, %v17956_v1 }
  0x20   : > { %v799_v0 = vld [vmem:[%s18418_s26 + $0x38] sm:$0xff]  ;;  %v798_v2 = vld [vmem:[%s18418_s26 + $0x30] sm:$0xff]  ;;  %v797_v3 = vld [vmem:[%s18418_s26 + $0x28] sm:$0xff] }
  0x21   : > { %10463 = vmatpush3.msra.mxu0 %v799_v0  ;;  %10493 = vmatpush3.msra.mxu1 %v799_v0  ;;  %v796_v4 = vld [vmem:[%s18418_s26 + $0x20] sm:$0xff]  ;;  %v795_v5 = vld [vmem:[%s18418_s26 + $0x18] sm:$0xff]  ;;  %s12188_s27 = scalar_lea.vmem %s18419_s25, %s9972_s19  ;;  %v794_v9 = vld [vmem:[%s18418_s26 + $0x10] sm:$0xff] }
  0x22   : > { %10464 = vmatprep.subr.mxu0 %v17956_v1  ;;  %10494 = vmatprep.subr.mxu1 %v17956_v1  ;;  %v589_v6 = vld [vmem:[%s12188_s27] sm:$0xff]  ;;  %v590_v7 = vld [vmem:[%s12188_s27 + $0x8] sm:$0xff]  ;;  %v591_v8 = vld [vmem:[%s12188_s27 + $0x10] sm:$0xff] }
  0x23   : > { %10465 = vmatpush3.msra.mxu0 %v798_v2  ;;  %10495 = vmatpush3.msra.mxu1 %v798_v2  ;;  %v12199_v10 = vld [vmem:[%s12188_s27 + $0x18] sm:$0xff]  ;;  %v12202_v11 = vld [vmem:[%s12188_s27 + $0x20] sm:$0xff]  ;;  %v12205_v12 = vld [vmem:[%s12188_s27 + $0x28] sm:$0xff]  ;;  %v622_v13 = vsel %vm621_vm0, %v589_v6, 0.0  ;;  %v623_v14 = vsel %vm621_vm0, %v590_v7, 0.0  ;;  %v625_v15 = vsel %vm621_vm0, %v591_v8, 0.0  ;;  %v12248_v31 = vmul.f32 %v589_v6, %v589_v6 }
  0x24   : > { %10466 = vmatprep.subr.mxu0 %v17956_v1  ;;  %10496 = vmatprep.subr.mxu1 %v17956_v1  ;;  %v12211_v16 = vld [vmem:[%s12188_s27 + $0x30] sm:$0xff]  ;;  %v12214_v17 = vld [vmem:[%s12188_s27 + $0x38] sm:$0xff]  ;;  %v12217_v18 = vld [vmem:[%s12188_s27 + $0x40] sm:$0xff]  ;;  %v624_v19 = vadd.f32 %v623_v14, %v622_v13  ;;  %v627_v24 = vsel %vm621_vm0, %v12199_v10, 0.0  ;;  %v629_v29 = vsel %vm621_vm0, %v12202_v11, 0.0  ;;  %v631_v30 = vsel %vm621_vm0, %v12205_v12, 0.0  ;;  %s587_s23 = scalar_lea.vmem %s18993_s22, %s12161_s21 }
  0x25   : > { %10467 = vmatpush3.msra.mxu0 %v797_v3  ;;  %10497 = vmatpush3.msra.mxu1 %v797_v3  ;;  %v793_v20 = vld [vmem:[%s18418_s26 + $0x8] sm:$0xff]  ;;  %v12228_v22 = vld [vmem:[%s12188_s27 + $0x50] sm:$0xff]  ;;  %v12231_v23 = vld [vmem:[%s12188_s27 + $0x58] sm:$0xff]  ;;  %v633_v36 = vsel %vm621_vm0, %v12211_v16, 0.0  ;;  %v12269_v37 = vsel %vm621_vm0, %v12214_v17, 0.0  ;;  %v12273_v38 = vsel %vm621_vm0, %v12217_v18, 0.0  ;;  %v12275_v39 = vmul.f32 %v590_v7, %v590_v7 }
  0x26   : > { %10468 = vmatprep.subr.mxu0 %v17956_v1  ;;  %10498 = vmatprep.subr.mxu1 %v17956_v1  ;;  %v12225_v21 = vld [vmem:[%s12188_s27 + $0x48] sm:$0xff]  ;;  %v12236_v25 = vld [vmem:[%s12188_s27 + $0x60] sm:$0xff]  ;;  %v12242_v27 = vld [vmem:[%s12188_s27 + $0x70] sm:$0xff]  ;;  %v626_v28 = vadd.f32 %v625_v15, %v624_v19  ;;  %v12293_v45 = vsel %vm621_vm0, %v12228_v22, 0.0  ;;  %v12297_v46 = vsel %vm621_vm0, %v12231_v23, 0.0  ;;  %v12321_v53 = vmul.f32 %v591_v8, %v591_v8  ;;  %s11997_s21 = smov [#allocation4]  }
  0x27   : > { %10469 = vmatpush3.msra.mxu0 %v796_v4  ;;  %10499 = vmatpush3.msra.mxu1 %v796_v4  ;;  %v12239_v26 = vld [vmem:[%s12188_s27 + $0x68] sm:$0xff]  ;;  %v792_v32 = vld [vmem:[%s18418_s26] sm:$0xff]  ;;  %v12257_v33 = vld [vmem:[%s12188_s27 + $0x78] sm:$0xff]  ;;  %v12289_v44 = vsel %vm621_vm0, %v12225_v21, 0.0  ;;  %v12311_v50 = vsel %vm621_vm0, %v12236_v25, 0.0  ;;  %v12319_v52 = vsel %vm621_vm0, %v12242_v27, 0.0  ;;  %v12369_v4 = vmul.f32 %v12199_v10, %v12199_v10 }
  0x28   : > { %10470 = vmatprep.subr.mxu0 %v17956_v1  ;;  %10500 = vmatprep.subr.mxu1 %v17956_v1  ;;  %v12260_v34 = vld [vmem:[%s12188_s27 + $0x80] sm:$0xff]  ;;  %v12263_v35 = vld [vmem:[%s12188_s27 + $0x88] sm:$0xff]  ;;  %v12279_v40 = vld [vmem:[%s12188_s27 + $0x90] sm:$0xff]  ;;  %v628_v43 = vadd.f32 %v627_v24, %v626_v28  ;;  %v12315_v51 = vsel %vm621_vm0, %v12239_v26, 0.0  ;;  %v12334_v58 = vsel %vm621_vm0, %v12257_v33, 0.0  ;;  %v695_v19 = vmul.f32 %v12202_v11, %v12202_v11  ;;  %s9973_s26 = sshll.u32 %s12116_s0, 12 }
  0x29   : > { %10471 = vmatpush3.msra.mxu0 %v795_v5  ;;  %10501 = vmatpush3.msra.mxu1 %v795_v5  ;;  %v12282_v41 = vld [vmem:[%s12188_s27 + $0x98] sm:$0xff]  ;;  %v12285_v42 = vld [vmem:[%s12188_s27 + $0xa0] sm:$0xff]  ;;  %v12301_v47 = vld [vmem:[%s12188_s27 + $0xa8] sm:$0xff]  ;;  %v12338_v59 = vsel %vm621_vm0, %v12260_v34, 0.0  ;;  %v12342_v60 = vsel %vm621_vm0, %v12263_v35, 0.0  ;;  %v12357_v0 = vsel %vm621_vm0, %v12279_v40, 0.0  ;;  %s17883_s19 = scalar_lea.hbm %s17949_s18, %s9973_s26 }
  0x2a   : > { %10472 = vmatprep.subr.mxu0 %v17956_v1  ;;  %10502 = vmatprep.subr.mxu1 %v17956_v1  ;;  %v12304_v48 = vld [vmem:[%s12188_s27 + $0xb0] sm:$0xff]  ;;  %v12307_v49 = vld [vmem:[%s12188_s27 + $0xb8] sm:$0xff]  ;;  %v12324_v54 = vld [vmem:[%s12188_s27 + $0xc0] sm:$0xff]  ;;  %v630_v57 = vadd.f32 %v629_v29, %v628_v43  ;;  %v12361_v2 = vsel %vm621_vm0, %v12282_v41, 0.0  ;;  %v12365_v3 = vsel %vm621_vm0, %v12285_v42, 0.0  ;;  %v12379_v8 = vsel %vm621_vm0, %v12301_v47, 0.0 }
  0x2b   : > { %10473 = vmatpush3.msra.mxu0 %v794_v9  ;;  %10503 = vmatpush3.msra.mxu1 %v794_v9  ;;  %v12327_v55 = vld [vmem:[%s12188_s27 + $0xc8] sm:$0xff]  ;;  %v12330_v56 = vld [vmem:[%s12188_s27 + $0xd0] sm:$0xff]  ;;  %v12347_v61 = vld [vmem:[%s12188_s27 + $0xd8] sm:$0xff]  ;;  %v12383_v9 = vsel %vm621_vm0, %v12304_v48, 0.0  ;;  %v12387_v13 = vsel %vm621_vm0, %v12307_v49, 0.0  ;;  %v12392_v10 = vsel %vm621_vm0, %v12324_v54, 0.0 }
  0x2c   : > { %10474 = vmatprep.subr.mxu0 %v17956_v1  ;;  %10504 = vmatprep.subr.mxu1 %v17956_v1  ;;  %v12350_v62 = vld [vmem:[%s12188_s27 + $0xe0] sm:$0xff]  ;;  %v12353_v63 = vld [vmem:[%s12188_s27 + $0xe8] sm:$0xff]  ;;  %v12372_v5 = vld [vmem:[%s12188_s27 + $0xf0] sm:$0xff]  ;;  %v632_v7 = vadd.f32 %v631_v30, %v630_v57  ;;  %v12396_v14 = vsel %vm621_vm0, %v12327_v55, 0.0  ;;  %v12400_v15 = vsel %vm621_vm0, %v12330_v56, 0.0  ;;  %v12413_v28 = vsel %vm621_vm0, %v12347_v61, 0.0 }
  0x2d   : > { %10475 = vmatpush3.msra.mxu0 %v793_v20  ;;  %18420 = vst [vmem:[#allocation12_spill] sm:$0xff] %v12353_v63  ;;  %10505 = vmatpush3.msra.mxu1 %v793_v20  ;;  %18421 = vst [vmem:[#allocation13_spill] sm:$0xff] %v12372_v5  ;;  %v12375_v6 = vld [vmem:[%s12188_s27 + $0xf8] sm:$0xff]  ;;  %v12409_v20 = vld [vmem:[%s17947_s16 + $0x10] sm:$0xff]  ;;  %v12417_v29 = vsel %vm621_vm0, %v12350_v62, 0.0  ;;  %v12421_v30 = vsel %vm621_vm0, %v12353_v63, 0.0  ;;  %v696_v57 = vmul.f32 %v12205_v12, %v12205_v12 }
  0x2e   : > { %10476 = vmatprep.subr.mxu0 %v17956_v1  ;;  %10506 = vmatprep.subr.mxu1 %v17956_v1  ;;  %18422 = vst [vmem:[#allocation14_spill] sm:$0xff] %v12409_v20  ;;  %v634_v24 = vadd.f32 %v633_v36, %v632_v7  ;;  %v12426_v11 = vld [vmem:[%s17947_s16] sm:$0xff]  ;;  %v12430_v36 = vsel %vm621_vm0, %v12372_v5, 0.0  ;;  %v12434_v43 = vsel %vm621_vm0, %v12375_v6, 0.0  ;;  %v697_v7 = vmul.f32 %v12211_v16, %v12211_v16  ;;  %s11936_s24 = sshll.u32 %s11997_s21, 4  ;;  %s11937_s24 = int_to_ptr.vmem [resolvable:$false] %s11936_s24 }
  0x2f   : > { %10477 = vmatpush3.msra.mxu0 %v792_v32  ;;  %10507 = vmatpush3.msra.mxu1 %v792_v32  ;;  %v11996_v32 = vmov 0   ;;  %18423 = vst [vmem:[#allocation15_spill] sm:$0xff] %v12426_v11  ;;  %18424 = vst [vmem:[#allocation16_spill] sm:$0xff] %v12430_v36  ;;  %v698_v63 = vmul.f32 %v12214_v17, %v12214_v17  ;;  %v699_v5 = vmul.f32 %v12217_v18, %v12217_v18  ;;  %v12460_v18 = vld [vmem:[%s17947_s16 + $0x18] sm:$0xff]  ;;  %s11938_s25 = scalar_lea.vmem %s11937_s24, 8192 }
  0x30   : > { %11491 = vset.pattern.permute.xlu1 %v11996_v32  ;;  %11490 = vset.pattern.permute.xlu0 %v11996_v32  ;;  %v636_v1 = vadd.f32 %v12269_v37, %v634_v24  ;;  %v700_v36 = vmul.f32 %v12225_v21, %v12225_v21  ;;  %v701_v12 = vmul.f32 %v12228_v22, %v12228_v22  ;;  %v18426_v24 = vmov 0.0  }
  0x31   : > { %1590 = vperm.xlu1 %11491, %v12409_v20   ;;  %v702_v16 = vmul.f32 %v12231_v23, %v12231_v23  ;;  %v703_v37 = vmul.f32 %v12236_v25, %v12236_v25  ;;  %v704_v17 = vmul.f32 %v12239_v26, %v12239_v26  ;;  %1580 = vperm.xlu0 %11490, %v12426_v11   ;;  %v12472_v26 = vld [vmem:[%s17947_s16 + $0x8] sm:$0xff] }
  0x32   : > { %18425 = vst [vmem:[#allocation17_spill] sm:$0xff] %v12460_v18  ;;  %v638_v21 = vadd.f32 %v12273_v38, %v636_v1  ;;  %v705_v22 = vmul.f32 %v12242_v27, %v12242_v27  ;;  %v706_v23 = vmul.f32 %v12257_v33, %v12257_v33  ;;  %v707_v25 = vmul.f32 %v12260_v34, %v12260_v34 }
  0x33   : > { %10481 = vmatprep.subr.mxu0 %v18426_v24  ;;  %v708_v32 = vmul.f32 %v12263_v35, %v12263_v35  ;;  %v709_v1 = vmul.f32 %v12279_v40, %v12279_v40  ;;  %v710_v27 = vmul.f32 %v12282_v41, %v12282_v41  ;;  %v711_v33 = vmul.f32 %v12285_v42, %v12285_v42 }
  0x34   : > { %v640_v34 = vadd.f32 %v12289_v44, %v638_v21  ;;  %v712_v38 = vmul.f32 %v12301_v47, %v12301_v47  ;;  %v713_v20 = vmul.f32 %v12304_v48, %v12304_v48  ;;  %v714_v35 = vmul.f32 %v12307_v49, %v12307_v49  ;;  %v12503_v47 = vld [vmem:[%s17948_s17 + $0x8] sm:$0xff] }
  0x35   : > { %1595 = vperm.xlu1 %11491, %v12460_v18   ;;  %v715_v40 = vmul.f32 %v12324_v54, %v12324_v54  ;;  %v723_v41 = vsel %vm621_vm0, %v12248_v31, 0.0  ;;  %v724_v42 = vsel %vm621_vm0, %v12275_v39, 0.0  ;;  %v726_v44 = vsel %vm621_vm0, %v12321_v53, 0.0  ;;  %1585 = vperm.xlu0 %11490, %v12472_v26   ;;  %v12513_v39 = vld [vmem:[%s17948_s17] sm:$0xff] }
  0x36   : > { %v642_v48 = vadd.f32 %v12293_v45, %v640_v34  ;;  %v716_v49 = vmul.f32 %v12327_v55, %v12327_v55  ;;  %v717_v31 = vmul.f32 %v12330_v56, %v12330_v56  ;;  %v725_v54 = vadd.f32 %v724_v42, %v723_v41 }
  0x37   : > { %v718_v53 = vmul.f32 %v12347_v61, %v12347_v61  ;;  %v719_v21 = vmul.f32 %v12350_v62, %v12350_v62  ;;  %v728_v45 = vsel %vm621_vm0, %v12369_v4, 0.0  ;;  %v730_v55 = vsel %vm621_vm0, %v695_v19, 0.0 }
  0x38   : > { %v644_v34 = vadd.f32 %v12297_v46, %v642_v48  ;;  %v727_v56 = vadd.f32 %v726_v44, %v725_v54  ;;  %v732_v41 = vsel %vm621_vm0, %v696_v57, 0.0  ;;  %v734_v42 = vsel %vm621_vm0, %v697_v7, 0.0  ;;  %v12534_v46 = vld [vmem:[%s17948_s17 + $0x18] sm:$0xff] }
  0x39   : > { %2356 = vperm.xlu1 %11491, %v12503_v47   ;;  %v736_v18 = vsel %vm621_vm0, %v698_v63, 0.0  ;;  %v738_v61 = vsel %vm621_vm0, %v699_v5, 0.0  ;;  %v740_v62 = vsel %vm621_vm0, %v700_v36, 0.0  ;;  %v742_v11 = vsel %vm621_vm0, %v701_v12, 0.0  ;;  %2351 = vperm.xlu0 %11490, %v12513_v39   ;;  %v12542_v5 = vld [vmem:[%s17948_s17 + $0x10] sm:$0xff] }
  0x3a   : > { %v646_v4 = vadd.f32 %v12311_v50, %v644_v34  ;;  %v729_v19 = vadd.f32 %v728_v45, %v727_v56  ;;  %v744_v57 = vsel %vm621_vm0, %v702_v16, 0.0  ;;  %v746_v63 = vsel %vm621_vm0, %v703_v37, 0.0  ;;  %v12624_v56 = vld [vmem:[%s17948_s17 + $0x20] sm:$0xff] }
  0x3b   : > { %v748_v36 = vsel %vm621_vm0, %v704_v17, 0.0  ;;  %v750_v7 = vsel %vm621_vm0, %v705_v22, 0.0  ;;  %v752_v12 = vsel %vm621_vm0, %v706_v23, 0.0  ;;  %v12548_v44 = vsel %vm621_vm0, %v707_v25, 0.0  ;;  %v12574_v25 = vld [vmem:[%s17947_s16 + $0x28] sm:$0xff] }
  0x3c   : > { %v648_v50 = vadd.f32 %v12315_v51, %v646_v4  ;;  %v731_v48 = vadd.f32 %v730_v55, %v729_v19  ;;  %v12552_v16 = vsel %vm621_vm0, %v708_v32, 0.0  ;;  %v12555_v37 = vsel %vm621_vm0, %v709_v1, 0.0  ;;  %v12645_v4 = vld [vmem:[%s17947_s16 + $0x48] sm:$0xff]  ;;  %v12652_v19 = vld [vmem:[%s17947_s16 + $0x40] sm:$0xff] }
  0x3d   : > { %2366 = vperm.xlu1 %11491, %v12534_v46   ;;  %v12559_v17 = vsel %vm621_vm0, %v710_v27, 0.0  ;;  %v12562_v22 = vsel %vm621_vm0, %v711_v33, 0.0  ;;  %v12565_v23 = vsel %vm621_vm0, %v712_v38, 0.0  ;;  %v12568_v51 = vsel %vm621_vm0, %v713_v20, 0.0  ;;  %2361 = vperm.xlu0 %11490, %v12542_v5   ;;  %v12586_v20 = vld [vmem:[%s17947_s16 + $0x20] sm:$0xff] }
  0x3e   : > { %v650_v32 = vadd.f32 %v12319_v52, %v648_v50  ;;  %v733_v1 = vadd.f32 %v732_v41, %v731_v48  ;;  %v12578_v27 = vsel %vm621_vm0, %v714_v35, 0.0  ;;  %v12581_v33 = vsel %vm621_vm0, %v715_v40, 0.0  ;;  %v12603_v40 = vld [vmem:[%s17947_s16 + $0x38] sm:$0xff]  ;;  %v12666_v48 = vld [vmem:[%s17947_s16 + $0x50] sm:$0xff] }
  0x3f   : > { %v12589_v38 = vsel %vm621_vm0, %v716_v49, 0.0  ;;  %v12592_v54 = vsel %vm621_vm0, %v717_v31, 0.0  ;;  %v12595_v52 = vsel %vm621_vm0, %v718_v53, 0.0  ;;  %v12598_v35 = vsel %vm621_vm0, %v719_v21, 0.0  ;;  %v12610_v49 = vld [vmem:[%s17947_s16 + $0x30] sm:$0xff]  ;;  %v12617_v21 = vld [vmem:[%s17948_s17 + $0x28] sm:$0xff] }
  0x40   : > { %v652_v45 = vadd.f32 %v12334_v58, %v650_v32  ;;  %v735_v55 = vadd.f32 %v734_v42, %v733_v1  ;;  %v12631_v41 = vld [vmem:[%s17948_s17 + $0x38] sm:$0xff]  ;;  %v12673_v32 = vld [vmem:[%s17948_s17 + $0x48] sm:$0xff]  ;;  %v12681_v1 = vld [vmem:[%s17948_s17 + $0x40] sm:$0xff] }
  0x41   : > { %1605 = vperm.xlu1 %11491, %v12574_v25   ;;  %1600 = vperm.xlu0 %11490, %v12586_v20   ;;  %v12659_v50 = vld [vmem:[%s17947_s16 + $0x58] sm:$0xff] }
  0x42   : > { %v654_v31 = vadd.f32 %v12338_v59, %v652_v45  ;;  %v737_v53 = vadd.f32 %v736_v18, %v735_v55  ;;  %v12689_v45 = vld [vmem:[%s17948_s17 + $0x58] sm:$0xff]  ;;  %v12697_v55 = vld [vmem:[%s17948_s17 + $0x50] sm:$0xff] }
  0x44   : > { %v656_v58 = vadd.f32 %v12342_v60, %v654_v31  ;;  %v739_v34 = vadd.f32 %v738_v61, %v737_v53  ;;  %v12638_v61 = vld [vmem:[%s17948_s17 + $0x30] sm:$0xff]  ;;  %v12705_v31 = vld [vmem:[%s17947_s16 + $0x68] sm:$0xff]  ;;  %v12713_v53 = vld [vmem:[%s17947_s16 + $0x60] sm:$0xff] }
  0x45   : > { %1615 = vperm.xlu1 %11491, %v12603_v40   ;;  %1610 = vperm.xlu0 %11490, %v12610_v49  }
  0x46   : > { %v658_v59 = vadd.f32 %v12357_v0, %v656_v58  ;;  %v741_v18 = vadd.f32 %v740_v62, %v739_v34  ;;  %v18428_v58 = vld [vmem:[#allocation12_spill] sm:$0xff] }
  0x47   : > { %v720_v34 = vmul.f32 %v18428_v58, %v18428_v58  ;;  %v12825_v58 = vld [vmem:[%s17948_s17 + $0x88] sm:$0xff] }
  0x48   : > { %v660_v60 = vadd.f32 %v12361_v2, %v658_v59  ;;  %v743_v42 = vadd.f32 %v742_v11, %v741_v18 }
  0x49   : > { %2376 = vperm.xlu1 %11491, %v12617_v21   ;;  %2371 = vperm.xlu0 %11490, %v12624_v56  }
  0x4a   : > { %v662_v0 = vadd.f32 %v12365_v3, %v660_v60  ;;  %v745_v62 = vadd.f32 %v744_v57, %v743_v42  ;;  %v12731_v60 = vld [vmem:[%s17947_s16 + $0x70] sm:$0xff] }
  0x4c   : > { %v664_v2 = vadd.f32 %v12379_v8, %v662_v0  ;;  %v747_v11 = vadd.f32 %v746_v63, %v745_v62 }
  0x4d   : > { %2386 = vperm.xlu1 %11491, %v12631_v41   ;;  %2381 = vperm.xlu0 %11490, %v12638_v61  }
  0x4e   : > { %v666_v3 = vadd.f32 %v12383_v9, %v664_v2  ;;  %v749_v57 = vadd.f32 %v748_v36, %v747_v11  ;;  %v780_v2 = vsel %vm621_vm0, %v720_v34, 0.0 }
  0x50   : > { %v668_v8 = vadd.f32 %v12387_v13, %v666_v3  ;;  %v751_v63 = vadd.f32 %v750_v7, %v749_v57  ;;  %v12748_v3 = vld [vmem:[%s17948_s17 + $0x60] sm:$0xff]  ;;  %v722_v57 = vmul.f32 %v12375_v6, %v12375_v6 }
  0x51   : > { %1625 = vperm.xlu1 %11491, %v12645_v4   ;;  %1620 = vperm.xlu0 %11490, %v12652_v19  }
  0x52   : > { %v670_v9 = vadd.f32 %v12392_v10, %v668_v8  ;;  %v753_v36 = vadd.f32 %v752_v12, %v751_v63 }
  0x54   : > { %v672_v13 = vadd.f32 %v12396_v14, %v670_v9  ;;  %v755_v7 = vadd.f32 %v12548_v44, %v753_v36 }
  0x55   : > { %1635 = vperm.xlu1 %11491, %v12659_v50   ;;  %1630 = vperm.xlu0 %11490, %v12666_v48  }
  0x56   : > { %v674_v10 = vadd.f32 %v12400_v15, %v672_v13  ;;  %v757_v12 = vadd.f32 %v12552_v16, %v755_v7  ;;  %v12765_v13 = vld [vmem:[%s17948_s17 + $0x70] sm:$0xff]  ;;  %v784_v7 = vsel %vm621_vm0, %v722_v57, 0.0  ;;  %v12878_v57 = vld [vmem:[%s17948_s17 + $0xa8] sm:$0xff] }
  0x58   : > { %v676_v14 = vadd.f32 %v12413_v28, %v674_v10  ;;  %v759_v44 = vadd.f32 %v12555_v37, %v757_v12  ;;  %v12773_v10 = vld [vmem:[%s18430_s3 + $0x18] sm:$0xff] }
  0x59   : > { %2396 = vperm.xlu1 %11491, %v12673_v32   ;;  %2391 = vperm.xlu0 %11490, %v12681_v1  }
  0x5a   : > { %v678_v15 = vadd.f32 %v12417_v29, %v676_v14  ;;  %v761_v16 = vadd.f32 %v12559_v17, %v759_v44  ;;  %v18427_v29 = vld [vmem:[#allocation16_spill] sm:$0xff] }
  0x5b   : > { %v12790_v44 = vld [vmem:[%s18430_s3 + $0x10] sm:$0xff] }
  0x5c   : > { %v680_v28 = vadd.f32 %v12421_v30, %v678_v15  ;;  %v763_v37 = vadd.f32 %v12562_v22, %v761_v16  ;;  %v12723_v30 = vld [vmem:[%s17947_s16 + $0x78] sm:$0xff] }
  0x5d   : > { %2406 = vperm.xlu1 %11491, %v12689_v45   ;;  %2401 = vperm.xlu0 %11490, %v12697_v55   ;;  %v12802_v16 = vld [vmem:[%s17947_s16 + $0x98] sm:$0xff] }
  0x5e   : > { %v682_v17 = vadd.f32 %v18427_v29, %v680_v28  ;;  %v765_v59 = vadd.f32 %v12565_v23, %v763_v37  ;;  %v18429_v23 = vld [vmem:[#allocation13_spill] sm:$0xff]  ;;  %v12811_v37 = vld [vmem:[%s17947_s16 + $0x90] sm:$0xff]  ;;  %v12817_v29 = vld [vmem:[%s18430_s3] sm:$0xff] }
  0x5f   : > { %v721_v0 = vmul.f32 %v18429_v23, %v18429_v23  ;;  %v12847_v23 = vld [vmem:[%s17948_s17 + $0x90] sm:$0xff] }
  0x60   : > { %v684_v22 = vadd.f32 %v12434_v43, %v682_v17  ;;  %v767_v18 = vadd.f32 %v12568_v51, %v765_v59  ;;  %v12741_v43 = vld [vmem:[%s17948_s17 + $0x68] sm:$0xff]  ;;  %v12832_v59 = vld [vmem:[%s17948_s17 + $0x80] sm:$0xff] }
  0x61   : > { %1645 = vperm.xlu1 %11491, %v12705_v31   ;;  %1640 = vperm.xlu0 %11490, %v12713_v53   ;;  %v782_v63 = vsel %vm621_vm0, %v721_v0, 0.0 }
  0x62   : > { %v685_v42 = vrot.slane %v684_v22, 4  ;;  %v769_v62 = vadd.f32 %v12578_v27, %v767_v18  ;;  %v12841_v18 = vld [vmem:[%s17948_s17 + $0x98] sm:$0xff] }
  0x64   : > { %v686_v51 = vadd.f32 %v685_v42, %v684_v22  ;;  %v771_v11 = vadd.f32 %v12581_v33, %v769_v62  ;;  %v12758_v33 = vld [vmem:[%s17948_s17 + $0x78] sm:$0xff] }
  0x65   : > { %1655 = vperm.xlu1 %11491, %v12723_v30   ;;  %1650 = vperm.xlu0 %11490, %v12731_v60  }
  0x66   : > { %v687_v27 = vrot.slane %v686_v51, 2  ;;  %v773_v8 = vadd.f32 %v12589_v38, %v771_v11  ;;  %v12865_v11 = vld [vmem:[%s17947_s16 + $0xb8] sm:$0xff] }
  0x68   : > { %v688_v9 = vadd.f32 %v687_v27, %v686_v51  ;;  %v775_v36 = vadd.f32 %v12592_v54, %v773_v8  ;;  %v12778_v54 = vld [vmem:[%s17947_s16 + $0x88] sm:$0xff]  ;;  %v12872_v27 = vld [vmem:[%s17947_s16 + $0xb0] sm:$0xff]  ;;  %v12884_v8 = vld [vmem:[%s17948_s17 + $0xa0] sm:$0xff] }
  0x69   : > { %2416 = vperm.xlu1 %11491, %v12741_v43   ;;  %2411 = vperm.xlu0 %11490, %v12748_v3  }
  0x6a   : > { %v689_v6 = vrot.slane %v688_v9, 1  ;;  %v777_v38 = vadd.f32 %v12595_v52, %v775_v36  ;;  %v12785_v52 = vld [vmem:[%s17947_s16 + $0x80] sm:$0xff]  ;;  %v12904_v36 = vld [vmem:[%s17947_s16 + $0xc8] sm:$0xff] }
  0x6c   : > { %v690_v12 = vadd.f32 %v689_v6, %v688_v9  ;;  %v779_v14 = vadd.f32 %v12598_v35, %v777_v38  ;;  %v12797_v35 = vld [vmem:[%s18430_s3 + $0x8] sm:$0xff]  ;;  %v12896_v9 = vld [vmem:[%s17948_s17 + $0xb0] sm:$0xff]  ;;  %v12909_v6 = vld [vmem:[%s17947_s16 + $0xc0] sm:$0xff] }
  0x6d   : > { %2426 = vperm.xlu1 %11491, %v12758_v33   ;;  %2421 = vperm.xlu0 %11490, %v12765_v13   ;;  %v1509_v38 = vld [vmem:[%s17947_s16 + $0xd8] sm:$0xff] }
  0x6e   : > { %10479 = vmatmul.mubr.msk.f32.vlgmr.msra.gmra.mxu0 %vm621_vm0, %v690_v12  ;;  %v781_v15 = vadd.f32 %v780_v2, %v779_v14  ;;  %v12859_v2 = vld [vmem:[%s17947_s16 + $0xa0] sm:$0xff]  ;;  %v12922_v12 = vld [vmem:[%s17948_s17 + $0xc8] sm:$0xff] }
  0x6f   : > { %10482 = vmatpush3.msra.mxu0 %v12773_v10  ;;  %10489 = vmatprep.mubr.msk.f32.mxu0 %vm11995_vm1, %v18426_v24  ;;  %v12927_v14 = vld [vmem:[%s17948_s17 + $0xc0] sm:$0xff] }
  0x70   : > { %v783_v28 = vadd.f32 %v782_v63, %v781_v15  ;;  %10483 = vmatprep.subr.mxu0 %v18426_v24  ;;  %v12890_v63 = vld [vmem:[%s17948_s17 + $0xb8] sm:$0xff]  ;;  %18431 = vst [vmem:[#allocation16_spill] sm:$0xff] %v12927_v14 }
  0x71   : > { %1665 = vperm.xlu1 %11491, %v12778_v54   ;;  %1660 = vperm.xlu0 %11490, %v12785_v52   ;;  %v12934_v15 = vld [vmem:[%s17948_s17 + $0xd8] sm:$0xff] }
  0x72   : > { %10484 = vmatpush3.msra.mxu0 %v12790_v44  ;;  %v785_v17 = vadd.f32 %v784_v7, %v783_v28  ;;  %v1508_v7 = vld [vmem:[%s17947_s16 + $0xd0] sm:$0xff]  ;;  %18432 = vst [vmem:[#allocation12_spill] sm:$0xff] %v12934_v15 }
  0x73   : > { %10485 = vmatprep.subr.mxu0 %v18426_v24  ;;  %v12939_v28 = vld [vmem:[%s17948_s17 + $0xd0] sm:$0xff] }
  0x74   : > { %10486 = vmatpush3.msra.mxu0 %v12797_v35  ;;  %v786_v34 = vrot.slane %v785_v17, 4  ;;  %18433 = vst [vmem:[#allocation13_spill] sm:$0xff] %v12939_v28 }
  0x75   : > { %1675 = vperm.xlu1 %11491, %v12802_v16   ;;  %10487 = vmatprep.subr.mxu0 %v18426_v24 }
  0x76   : > { %1670 = vperm.xlu0 %11490, %v12811_v37   ;;  %10488 = vmatpush3.msra.mxu0 %v12817_v29  ;;  %v787_v22 = vadd.f32 %v786_v34, %v785_v17  ;;  %v1511_v17 = vld [vmem:[%s17947_s16 + $0xe8] sm:$0xff]  ;;  %v1510_v34 = vld [vmem:[%s17947_s16 + $0xe0] sm:$0xff] }
  0x77   : > { %10511 = vmatprep.subr.mxu0 %v18426_v24  ;;  %v12853_v24 = vld [vmem:[%s17947_s16 + $0xa8] sm:$0xff] }
  0x78   : > { %v788_v42 = vrot.slane %v787_v22, 2 }
  0x79   : > { %2436 = vperm.xlu1 %11491, %v12825_v58  }
  0x7a   : > { %2431 = vperm.xlu0 %11490, %v12832_v59   ;;  %v789_v0 = vadd.f32 %v788_v42, %v787_v22  ;;  %v1513_v22 = vld [vmem:[%s17947_s16 + $0xf8] sm:$0xff]  ;;  %v1512_v42 = vld [vmem:[%s17947_s16 + $0xf0] sm:$0xff] }
  0x7c   : > { %v790_v62 = vrot.slane %v789_v0, 1 }
  0x7d   : > { %2446 = vperm.xlu1 %11491, %v12841_v18  }
  0x7e   : > { %2441 = vperm.xlu0 %11490, %v12847_v23   ;;  %v791_v51 = vadd.f32 %v790_v62, %v789_v0  ;;  %v12958_v0 = vld [vmem:[%s17948_s17 + $0xe8] sm:$0xff]  ;;  %v12963_v62 = vld [vmem:[%s17948_s17 + $0xe0] sm:$0xff] }
  0x7f   : > { %18434 = vst [vmem:[#allocation18_spill] sm:$0xff] %v12958_v0  ;;  %18435 = vst [vmem:[#allocation19_spill] sm:$0xff] %v12963_v62 }
  0x80   : > { %10509 = vmatmul.mubr.msk.f32.vlgmr.msra.gmra.mxu1 %vm621_vm0, %v791_v51  ;;  %v12967_v51 = vld [vmem:[#allocation3] sm:$0xff] }
  0x81   : > { %1685 = vperm.xlu1 %11491, %v12853_v24   ;;  %1446 = vst.msk [vmem:[#allocation2 + $0x10] sm:$0x1] %vm1445_vm2, %v12967_v51  ;;  %1449 = vst.msk [vmem:[#allocation2 + $0x121] sm:$0x1] %vm1445_vm2, %v12967_v51 }
  0x82   : > { %1680 = vperm.xlu0 %11490, %v12859_v2  }
  0x85   : > { %1695 = vperm.xlu1 %11491, %v12865_v11  }
  0x86   : > { %1690 = vperm.xlu0 %11490, %v12872_v27  }
  0x89   : > { %2456 = vperm.xlu1 %11491, %v12878_v57  }
  0x8a   : > { %2451 = vperm.xlu0 %11490, %v12884_v8  }
  0x8d   : > { %2466 = vperm.xlu1 %11491, %v12890_v63  }
  0x8e   : > { %2461 = vperm.xlu0 %11490, %v12896_v9  }
  0x91   : > { %1705 = vperm.xlu1 %11491, %v12904_v36  }
  0x92   : > { %1700 = vperm.xlu0 %11490, %v12909_v6  }
  0x95   : > { %1715 = vperm.xlu1 %11491, %v1509_v38  }
  0x96   : > { %1710 = vperm.xlu0 %11490, %v1508_v7  }
  0x99   : > { %2476 = vperm.xlu1 %11491, %v12922_v12  }
  0x9a   : > { %2471 = vperm.xlu0 %11490, %v12927_v14   ;;  %v18438_v14 = vld [vmem:[#allocation14_spill] sm:$0xff] }
  0x9d   : > { %2486 = vperm.xlu1 %11491, %v12934_v15   ;;  %v12979_v15 = vld [vmem:[%s17948_s17 + $0xf0] sm:$0xff] }
  0x9e   : > { %2481 = vperm.xlu0 %11490, %v12939_v28   ;;  %v12974_v28 = vld [vmem:[%s17948_s17 + $0xf8] sm:$0xff] }
  0xa1   : > { %1725 = vperm.xlu1 %11491, %v1511_v17  }
  0xa2   : > { %1720 = vperm.xlu0 %11490, %v1510_v34  }
  0xa5   : > { %1735 = vperm.xlu1 %11491, %v1513_v22  }
  0xa6   : > { %1730 = vperm.xlu0 %11490, %v1512_v42  }
  0xa9   : > { %2496 = vperm.xlu1 %11491, %v12958_v0   ;;  %v18437_v0 = vld [vmem:[#allocation17_spill] sm:$0xff] }
  0xaa   : > { %2491 = vperm.xlu0 %11490, %v12963_v62   ;;  %v18436_v62 = vld [vmem:[#allocation15_spill] sm:$0xff] }
  0xad   : > { %2506 = vperm.xlu1 %11491, %v12974_v28  }
  0xae   : > { %2501 = vperm.xlu0 %11490, %v12979_v15  }
  0xb1   : > { %5868 = vperm.xlu1 %11491, %v12472_v26   ;;  %v13003_v26 = vpop.permute.xlu1 %1590 }
  0xb2   : > { %5863 = vperm.xlu0 %11490, %v18436_v62   ;;  %18439 = vst [vmem:[#allocation15_spill] sm:$0xff] %v13003_v26 }
  0xb5   : > { %5878 = vperm.xlu1 %11491, %v18437_v0   ;;  %v13139_v0 = vld [vmem:[%s12188_s27 + $0x18] sm:$0xff] }
  0xb6   : > { %5873 = vperm.xlu0 %11490, %v18438_v14   ;;  %v13124_v14 = vld [vmem:[%s12188_s27] sm:$0xff] }
  0xb9   : > { %5888 = vperm.xlu1 %11491, %v12574_v25   ;;  %v13007_v25 = vpop.permute.xlu0 %1580 }
  0xba   : > { %5883 = vperm.xlu0 %11490, %v12586_v20   ;;  %18440 = vst [vmem:[#allocation17_spill] sm:$0xff] %v13007_v25  ;;  %v13011_v20 = vpop.permute.xlu1 %1595 }
  0xbb   : > { %18441 = vst [vmem:[#allocation14_spill] sm:$0xff] %v13011_v20 }
  0xbd   : > { %5898 = vperm.xlu1 %11491, %v12603_v40   ;;  %v13013_v40 = vpop.permute.xlu0 %1585 }
  0xbe   : > { %5893 = vperm.xlu0 %11490, %v12610_v49   ;;  %18442 = vst [vmem:[#allocation20_spill] sm:$0xff] %v13013_v40  ;;  %v13017_v49 = vpop.permute.xlu1 %2356 }
  0xbf   : > { %18443 = vst [vmem:[#allocation21_spill] sm:$0xff] %v13017_v49 }
  0xc1   : > { %5908 = vperm.xlu1 %11491, %v12645_v4   ;;  %v13019_v4 = vpop.permute.xlu0 %2351 }
  0xc2   : > { %5903 = vperm.xlu0 %11490, %v12652_v19   ;;  %18444 = vst [vmem:[#allocation22_spill] sm:$0xff] %v13019_v4  ;;  %v13021_v19 = vpop.permute.xlu1 %2366  ;;  %v11895_v4 = vld [vmem:[%s12188_s27 + $0xf0] sm:$0xff] }
  0xc3   : > { %18445 = vst [vmem:[#allocation23_spill] sm:$0xff] %v13021_v19 }
  0xc5   : > { %5918 = vperm.xlu1 %11491, %v12659_v50   ;;  %v13023_v50 = vpop.permute.xlu0 %2361 }
  0xc6   : > { %5913 = vperm.xlu0 %11490, %v12666_v48   ;;  %18446 = vst [vmem:[#allocation24_spill] sm:$0xff] %v13023_v50  ;;  %v13025_v48 = vpop.permute.xlu1 %1605 }
  0xc7   : > { %18447 = vst [vmem:[#allocation25_spill] sm:$0xff] %v13025_v48 }
  0xc9   : > { %5928 = vperm.xlu1 %11491, %v12705_v31   ;;  %v13029_v31 = vpop.permute.xlu0 %1600 }
  0xca   : > { %5923 = vperm.xlu0 %11490, %v12713_v53   ;;  %18448 = vst [vmem:[#allocation26_spill] sm:$0xff] %v13029_v31  ;;  %v13033_v53 = vpop.permute.xlu1 %1615 }
  0xcb   : > { %18449 = vst [vmem:[#allocation27_spill] sm:$0xff] %v13033_v53 }
  0xcd   : > { %5938 = vperm.xlu1 %11491, %v12723_v30   ;;  %v13035_v30 = vpop.permute.xlu0 %1610 }
  0xce   : > { %5933 = vperm.xlu0 %11490, %v12731_v60   ;;  %18450 = vst [vmem:[#allocation28_spill] sm:$0xff] %v13035_v30  ;;  %v13039_v60 = vpop.permute.xlu1 %2376 }
  0xcf   : > { %18451 = vst [vmem:[#allocation29_spill] sm:$0xff] %v13039_v60  ;;  %v11893_v60 = vld [vmem:[%s12188_s27 + $0xe0] sm:$0xff] }
  0xd1   : > { %5948 = vperm.xlu1 %11491, %v12778_v54  }
  0xd2   : > { %5943 = vperm.xlu0 %11490, %v12785_v52  }
  0xd5   : > { %5958 = vperm.xlu1 %11491, %v12802_v16  }
  0xd6   : > { %5953 = vperm.xlu0 %11490, %v12811_v37   ;;  %v18470_v37 = vld [vmem:[#allocation18_spill] sm:$0xff] }
  0xd9   : > { %5968 = vperm.xlu1 %11491, %v12853_v24  }
  0xda   : > { %5963 = vperm.xlu0 %11490, %v12859_v2  }
  0xdd   : > { %5978 = vperm.xlu1 %11491, %v12865_v11  }
  0xde   : > { %5973 = vperm.xlu0 %11490, %v12872_v27  }
  0xe1   : > { %5988 = vperm.xlu1 %11491, %v12904_v36   ;;  %v1546_v36 = vld [vmem:[#allocation2] sm:$0xff] }
  0xe2   : > { %5983 = vperm.xlu0 %11490, %v12909_v6  }
  0xe5   : > { %5998 = vperm.xlu1 %11491, %v1509_v38   ;;  %v1547_v38 = vld [vmem:[#allocation2 + $0x8] sm:$0xff] }
  0xe6   : > { %5993 = vperm.xlu0 %11490, %v1508_v7   ;;  %v13118_v7 = vmul.f32 %v13007_v25, %v1546_v36 }
  0xe9   : > { %6008 = vperm.xlu1 %11491, %v1511_v17   ;;  %v11887_v17 = vld [vmem:[%s12188_s27 + $0xb0] sm:$0xff] }
  0xea   : > { %6003 = vperm.xlu0 %11490, %v1510_v34   ;;  %v13134_v34 = vld [vmem:[%s12188_s27 + $0x10] sm:$0xff] }
  0xed   : > { %6018 = vperm.xlu1 %11491, %v1513_v22   ;;  %v11886_v22 = vld [vmem:[%s12188_s27 + $0xa8] sm:$0xff] }
  0xee   : > { %6013 = vperm.xlu0 %11490, %v1512_v42  }
  0xf1   : > { %6607 = vperm.xlu1 %11491, %v12503_v47   ;;  %v13043_v47 = vpop.permute.xlu0 %2371 }
  0xf2   : > { %6602 = vperm.xlu0 %11490, %v12513_v39   ;;  %18452 = vst [vmem:[#allocation30_spill] sm:$0xff] %v13043_v47  ;;  %v13047_v39 = vpop.permute.xlu1 %2386 }
  0xf3   : > { %18453 = vst [vmem:[#allocation31_spill] sm:$0xff] %v13047_v39 }
  0xf5   : > { %6617 = vperm.xlu1 %11491, %v12534_v46   ;;  %v13049_v46 = vpop.permute.xlu0 %2381 }
  0xf6   : > { %6612 = vperm.xlu0 %11490, %v12542_v5   ;;  %18454 = vst [vmem:[#allocation32_spill] sm:$0xff] %v13049_v46  ;;  %v13053_v5 = vpop.permute.xlu1 %1625 }
  0xf7   : > { %18455 = vst [vmem:[#allocation33_spill] sm:$0xff] %v13053_v5 }
  0xf9   : > { %6627 = vperm.xlu1 %11491, %v12617_v21   ;;  %v13057_v21 = vpop.permute.xlu0 %1620 }
  0xfa   : > { %6622 = vperm.xlu0 %11490, %v12624_v56   ;;  %18456 = vst [vmem:[#allocation34_spill] sm:$0xff] %v13057_v21  ;;  %v13061_v56 = vpop.permute.xlu1 %1635 }
  0xfb   : > { %18457 = vst [vmem:[#allocation35_spill] sm:$0xff] %v13061_v56 }
  0xfd   : > { %6637 = vperm.xlu1 %11491, %v12631_v41   ;;  %v13063_v41 = vpop.permute.xlu0 %1630 }
  0xfe   : > { %6632 = vperm.xlu0 %11490, %v12638_v61   ;;  %18458 = vst [vmem:[#allocation36_spill] sm:$0xff] %v13063_v41 }
 0x101   : > { %6647 = vperm.xlu1 %11491, %v12673_v32   ;;  %v13068_v32 = vpop.permute.xlu1 %2396 }
 0x102   : > { %6642 = vperm.xlu0 %11490, %v12681_v1   ;;  %18459 = vst [vmem:[#allocation37_spill] sm:$0xff] %v13068_v32  ;;  %v11891_v32 = vld [vmem:[%s12188_s27 + $0xd0] sm:$0xff] }
 0x105   : > { %6657 = vperm.xlu1 %11491, %v12689_v45   ;;  %v13075_v45 = vpop.permute.xlu0 %2391 }
 0x106   : > { %6652 = vperm.xlu0 %11490, %v12697_v55   ;;  %18460 = vst [vmem:[#allocation38_spill] sm:$0xff] %v13075_v45  ;;  %v13083_v55 = vpop.permute.xlu1 %2406  ;;  %v11892_v45 = vld [vmem:[%s12188_s27 + $0xd8] sm:$0xff] }
 0x107   : > { %18461 = vst [vmem:[#allocation39_spill] sm:$0xff] %v13083_v55 }
 0x109   : > { %6667 = vperm.xlu1 %11491, %v12741_v43   ;;  %v13087_v43 = vpop.permute.xlu0 %2401 }
 0x10a   : > { %6662 = vperm.xlu0 %11490, %v12748_v3   ;;  %18462 = vst [vmem:[#allocation40_spill] sm:$0xff] %v13087_v43  ;;  %v13091_v3 = vpop.permute.xlu1 %1645 }
 0x10b   : > { %18463 = vst [vmem:[#allocation41_spill] sm:$0xff] %v13091_v3  ;;  %v11896_v3 = vld [vmem:[%s12188_s27 + $0xf8] sm:$0xff] }
 0x10d   : > { %6677 = vperm.xlu1 %11491, %v12758_v33   ;;  %v13094_v33 = vpop.permute.xlu0 %1640 }
 0x10e   : > { %6672 = vperm.xlu0 %11490, %v12765_v13   ;;  %18464 = vst [vmem:[#allocation42_spill] sm:$0xff] %v13094_v33  ;;  %v18465_v13 = vld [vmem:[#allocation16_spill] sm:$0xff]  ;;  %v13099_v52 = vpop.permute.xlu1 %1655 }
 0x10f   : > { %18467 = vst [vmem:[#allocation16_spill] sm:$0xff] %v13099_v52 }
 0x111   : > { %6687 = vperm.xlu1 %11491, %v12825_v58   ;;  %v13102_v16 = vpop.permute.xlu0 %1650 }
 0x112   : > { %6682 = vperm.xlu0 %11490, %v12832_v59   ;;  %v13106_v58 = vpop.permute.xlu1 %2416 }
 0x115   : > { %6697 = vperm.xlu1 %11491, %v12841_v18   ;;  %v13109_v59 = vpop.permute.xlu0 %2411 }
 0x116   : > { %6692 = vperm.xlu0 %11490, %v12847_v23   ;;  %18473 = vst [vmem:[#allocation18_spill] sm:$0xff] %v13109_v59 }
 0x119   : > { %6707 = vperm.xlu1 %11491, %v12878_v57   ;;  %v1099_v57 = vlaneseq }
 0x11a   : > { %6702 = vperm.xlu0 %11490, %v12884_v8  }
 0x11d   : > { %6717 = vperm.xlu1 %11491, %v12890_v63   ;;  %v1100_v63 = vshrl.u32 %v1099_v57, 7  ;;  %v11877_v57 = vld [vmem:[%s12188_s27 + $0x60] sm:$0xff] }
 0x11e   : > { %6712 = vperm.xlu0 %11490, %v12896_v9  }
 0x11f   : > { %v13112_v9 = vsub.s32 0, %v1100_v63  ;;  %v11878_v63 = vld [vmem:[%s12188_s27 + $0x68] sm:$0xff] }
 0x121   : > { %6727 = vperm.xlu1 %11491, %v12922_v12   ;;  %v13121_v12 = vmul.f32 %v13013_v40, %v1547_v38  ;;  %v11879_v38 = vld [vmem:[%s12188_s27 + $0x70] sm:$0xff] }
 0x122   : > { %6722 = vperm.xlu0 %11490, %v18465_v13  }
 0x12e   : > { %v869_v61 = vpop.f32.mrf.mxu0 }
 0x12f   : > { %10490 = vmatmul.mubr.msk.f32.vlgmr.msra.gmra.mxu0 %vm877_vm3, %v869_v61 }
 0x130   : > { %10512 = vmatpush3.msra.mxu0 %v12773_v10  ;;  %v10480_v1 = vpop.f32.mrf.mxu0  ;;  %10519 = vmatprep.mubr.msk.f32.mxu0 %vm11995_vm1, %v12967_v51  ;;  %v18466_v10 = vld [vmem:[#allocation12_spill] sm:$0xff] }
 0x131   : > { %10513 = vmatprep.subr.mxu0 %v12967_v51  ;;  %6737 = vperm.xlu1 %11491, %v18466_v10   ;;  %18469 = vst [vmem:[#allocation12_spill] sm:$0xff] %v13102_v16  ;;  %v11870_v1 = vld [vmem:[%s12188_s27 + $0x28] sm:$0xff]  ;;  %v11871_v10 = vld [vmem:[%s12188_s27 + $0x30] sm:$0xff] }
 0x132   : > { %10514 = vmatpush3.msra.mxu0 %v12790_v44  ;;  %v18468_v44 = vld [vmem:[#allocation13_spill] sm:$0xff] }
 0x133   : > { %10515 = vmatprep.subr.mxu0 %v12967_v51  ;;  %6732 = vperm.xlu0 %11490, %v18468_v44   ;;  %18472 = vst [vmem:[#allocation13_spill] sm:$0xff] %v13106_v58  ;;  %v11872_v44 = vld [vmem:[%s12188_s27 + $0x38] sm:$0xff] }
 0x134   : > { %10516 = vmatpush3.msra.mxu0 %v12797_v35 }
 0x135   : > { %10517 = vmatprep.subr.mxu0 %v12967_v51  ;;  %6747 = vperm.xlu1 %11491, %v18470_v37   ;;  %v11869_v51 = vld [vmem:[%s12188_s27 + $0x20] sm:$0xff] }
 0x136   : > { %10518 = vmatpush3.msra.mxu0 %v12817_v29  ;;  %v18471_v29 = vld [vmem:[#allocation19_spill] sm:$0xff]  ;;  %v11873_v37 = vld [vmem:[%s12188_s27 + $0x40] sm:$0xff] }
 0x137   : > { %6742 = vperm.xlu0 %11490, %v18471_v29   ;;  %18474 = vst [vmem:[#allocation19_spill] sm:$0xff] %v13112_v9 }
 0x139   : > { %6757 = vperm.xlu1 %11491, %v12974_v28   ;;  %v13129_v28 = vld [vmem:[%s12188_s27 + $0x8] sm:$0xff] }
 0x13b   : > { %6752 = vperm.xlu0 %11490, %v12979_v15   ;;  %v11888_v15 = vld [vmem:[%s12188_s27 + $0xb8] sm:$0xff] }
 0x140   : > { %v1020_v54 = vpop.f32.mrf.mxu1 }
 0x141   : > { %10520 = vmatmul.mubr.msk.f32.vlgmr.msra.gmra.mxu0 %vm877_vm3, %v1020_v54 }
 0x142   : > { %v10510_v35 = vpop.f32.mrf.mxu1 }
 0x1ef   : > { %v947_v18 = vpop.f32.mrf.mxu0 }
 0x1f0   : > { %v1097_v2 = vmul.f32 %v947_v18, %v947_v18  ;;  %v13115_v6 = vrot.slane %v947_v18, %v13112_v9  ;;  %v11874_v18 = vld [vmem:[%s12188_s27 + $0x48] sm:$0xff] }
 0x1f1   : > { %v10491_v23 = vpop.f32.mrf.mxu0 }
 0x1f2   : > { %v1106_v62 = vsub.f32 %v13139_v0, %v13115_v6  ;;  %v1107_v61 = vsub.f32 %v11869_v51, %v13115_v6  ;;  %v1108_v13 = vsub.f32 %v11870_v1, %v13115_v6  ;;  %v1109_v54 = vsub.f32 %v11871_v10, %v13115_v6  ;;  %v11880_v51 = vld [vmem:[%s12188_s27 + $0x78] sm:$0xff]  ;;  %v11881_v10 = vld [vmem:[%s12188_s27 + $0x80] sm:$0xff] }
 0x1f3   : > { %v1110_v35 = vsub.f32 %v11872_v44, %v13115_v6  ;;  %v1111_v29 = vsub.f32 %v11873_v37, %v13115_v6  ;;  %v1112_v23 = vsub.f32 %v11874_v18, %v13115_v6  ;;  %v1116_v36 = vsub.f32 %v11878_v63, %v13115_v6  ;;  %v11882_v37 = vld [vmem:[%s12188_s27 + $0x88] sm:$0xff]  ;;  %v11884_v63 = vld [vmem:[%s12188_s27 + $0x98] sm:$0xff] }
 0x1f4   : > { %v1117_v0 = vsub.f32 %v11879_v38, %v13115_v6  ;;  %v1118_v1 = vsub.f32 %v11880_v51, %v13115_v6  ;;  %v1119_v44 = vsub.f32 %v11881_v10, %v13115_v6  ;;  %v1120_v18 = vsub.f32 %v11882_v37, %v13115_v6  ;;  %v11885_v51 = vld [vmem:[%s12188_s27 + $0xa0] sm:$0xff] }
 0x1f5   : > { %v1122_v38 = vsub.f32 %v11884_v63, %v13115_v6  ;;  %v1123_v10 = vsub.f32 %v11885_v51, %v13115_v6  ;;  %v1124_v37 = vsub.f32 %v11886_v22, %v13115_v6  ;;  %v11890_v63 = vld [vmem:[%s12188_s27 + $0xc8] sm:$0xff]  ;;  %v1129_v51 = vsub.f32 %v11891_v32, %v13115_v6 }
 0x1f6   : > { %v1128_v59 = vsub.f32 %v11890_v63, %v13115_v6  ;;  %v1130_v22 = vsub.f32 %v11892_v45, %v13115_v6  ;;  %v1131_v47 = vsub.f32 %v11893_v60, %v13115_v6  ;;  %v18475_v63 = vsub.f32 %v13124_v14, %v13115_v6  ;;  %v11492_v14 = vld [vmem:[%s17937_s6 + $0x38] sm:$0xff]  }
 0x1f7   : > { %v18476_v45 = vsub.f32 %v13129_v28, %v13115_v6  ;;  %v18477_v60 = vsub.f32 %v13134_v34, %v13115_v6  ;;  %10522 = vmatprep.subr.bf16.mxu0 %v11492_v14 }
 0x1f8   : > { %10523 = vmatpush3.bf16.msra.mxu0 %v11492_v14 }
 0x201   : > { %v1093_v24 = vpop.f32.mrf.mxu0 }
 0x202   : > { %v1098_v27 = vsub.f32 %v1093_v24, %v1097_v2  ;;  %v11875_v24 = vld [vmem:[%s12188_s27 + $0x50] sm:$0xff] }
 0x203   : > { %v10521_v11 = vpop.f32.mrf.mxu0  ;;  %v1113_v2 = vsub.f32 %v11875_v24, %v13115_v6 }
 0x204   : > { %v1135_v8 = vadd.f32 1e-05, %v1098_v27  ;;  %v11876_v11 = vld [vmem:[%s12188_s27 + $0x58] sm:$0xff] }
 0x205   : > { %v1114_v27 = vsub.f32 %v11876_v11, %v13115_v6  ;;  %v11883_v11 = vld [vmem:[%s12188_s27 + $0x90] sm:$0xff] }
 0x206   : > { %11604 = vrsqrt.f32 %v1135_v8  ;;  %v1115_v8 = vsub.f32 %v11877_v57, %v13115_v6  ;;  %v1121_v57 = vsub.f32 %v11883_v11, %v13115_v6  ;;  %v1126_v11 = vsub.f32 %v11888_v15, %v13115_v6 }
 0x207   : > { %v1133_v15 = vsub.f32 %v11895_v4, %v13115_v6 }
 0x213   : > { %v11605_v42 = vpop.eup %11604 }
 0x214   : > { %v13172_v24 = vrot.slane %v11605_v42, %v13112_v9  ;;  %v1125_v42 = vsub.f32 %v11887_v17, %v13115_v6  ;;  %v11889_v9 = vld [vmem:[%s12188_s27 + $0xc0] sm:$0xff]  ;;  %v11894_v17 = vld [vmem:[%s12188_s27 + $0xe8] sm:$0xff] }
 0x215   : > { %v1127_v58 = vsub.f32 %v11889_v9, %v13115_v6  ;;  %v1132_v49 = vsub.f32 %v11894_v17, %v13115_v6  ;;  %v1134_v9 = vsub.f32 %v11896_v3, %v13115_v6 }
 0x216   : > { %v1141_v32 = vmul.f32 %v13172_v24, %v18475_v63  ;;  %v1142_v33 = vmul.f32 %v13172_v24, %v18476_v45  ;;  %v1143_v17 = vmul.f32 %v13172_v24, %v18477_v60  ;;  %v1144_v4 = vmul.f32 %v13172_v24, %v1106_v62  ;;  %v11493_v60 = vld [vmem:[%s17937_s6 + $0x18] sm:$0xff]  }
 0x217   : > { %v1145_v40 = vmul.f32 %v13172_v24, %v1107_v61  ;;  %v1146_v3 = vmul.f32 %v13172_v24, %v1108_v13  ;;  %v1147_v63 = vmul.f32 %v13172_v24, %v1109_v54  ;;  %v1148_v28 = vmul.f32 %v13172_v24, %v1110_v35  ;;  %10562 = vmatprep.subr.bf16.mxu1 %v11493_v60 }
 0x218   : > { %v1149_v45 = vmul.f32 %v13172_v24, %v1111_v29  ;;  %v1150_v6 = vmul.f32 %v13172_v24, %v1112_v23  ;;  %v1151_v34 = vmul.f32 %v13172_v24, %v1113_v2  ;;  %v1152_v62 = vmul.f32 %v13172_v24, %v1114_v27  ;;  %v13238_v2 = vld [vmem:[%s17935_s4] ss:$0 sm:$0xff]  ;;  %10563 = vmatpush3.bf16.msra.mxu1 %v11493_v60 }
 0x219   : > { %v1153_v61 = vmul.f32 %v13172_v24, %v1115_v8  ;;  %v1154_v13 = vmul.f32 %v13172_v24, %v1116_v36  ;;  %v1155_v54 = vmul.f32 %v13172_v24, %v1117_v0  ;;  %v1156_v35 = vmul.f32 %v13172_v24, %v1118_v1  ;;  %v11494_v1 = vld [vmem:[%s17937_s6 + $0x30] sm:$0xff]  }
 0x21a   : > { %v1157_v29 = vmul.f32 %v13172_v24, %v1119_v44  ;;  %v1158_v23 = vmul.f32 %v13172_v24, %v1120_v18  ;;  %v1159_v27 = vmul.f32 %v13172_v24, %v1121_v57  ;;  %v1160_v8 = vmul.f32 %v13172_v24, %v1122_v38  ;;  %10524 = vmatprep.subr.bf16.mxu0 %v11494_v1 }
 0x21b   : > { %v1161_v36 = vmul.f32 %v13172_v24, %v1123_v10  ;;  %v1162_v0 = vmul.f32 %v13172_v24, %v1124_v37  ;;  %v1163_v44 = vmul.f32 %v13172_v24, %v1125_v42  ;;  %v1164_v18 = vmul.f32 %v13172_v24, %v1126_v11  ;;  %v11495_v42 = vld [vmem:[%s17937_s6 + $0x10] sm:$0xff]   ;;  %10525 = vmatpush3.bf16.msra.mxu0 %v11494_v1 }
 0x21c   : > { %v1165_v14 = vmul.f32 %v13172_v24, %v1127_v58  ;;  %v1166_v25 = vmul.f32 %v13172_v24, %v1128_v59  ;;  %v1167_v57 = vmul.f32 %v13172_v24, %v1129_v51  ;;  %v1168_v38 = vmul.f32 %v13172_v24, %v1130_v22  ;;  %10564 = vmatprep.subr.bf16.mxu1 %v11495_v42 }
 0x21d   : > { %v1169_v10 = vmul.f32 %v13172_v24, %v1131_v47  ;;  %v1170_v37 = vmul.f32 %v13172_v24, %v1132_v49  ;;  %v1171_v11 = vmul.f32 %v13172_v24, %v1133_v15  ;;  %v1172_v58 = vmul.f32 %v13172_v24, %v1134_v9  ;;  %v11496_v15 = vld [vmem:[%s17937_s6 + $0x28] sm:$0xff]   ;;  %v13272_v24 = vld [vmem:[%s17936_s5] ss:$0 sm:$0xff]  ;;  %10565 = vmatpush3.bf16.msra.mxu1 %v11495_v42 }
 0x21e   : > { %v1180_v59 = vmul.f32 %v13238_v2, %v1141_v32  ;;  %v1181_v60 = vmul.f32 %v13238_v2, %v1142_v33  ;;  %v1182_v51 = vmul.f32 %v13238_v2, %v1143_v17  ;;  %v1183_v47 = vmul.f32 %v13238_v2, %v1144_v4  ;;  %10526 = vmatprep.subr.bf16.mxu0 %v11496_v15 }
 0x21f   : > { %v1184_v49 = vmul.f32 %v13238_v2, %v1145_v40  ;;  %v1185_v22 = vmul.f32 %v13238_v2, %v1146_v3  ;;  %v1186_v33 = vmul.f32 %v13238_v2, %v1147_v63  ;;  %v1187_v9 = vmul.f32 %v13238_v2, %v1148_v28  ;;  %v11497_v63 = vld [vmem:[%s17937_s6 + $0x8] sm:$0xff]   ;;  %10527 = vmatpush3.bf16.msra.mxu0 %v11496_v15 }
 0x220   : > { %v1188_v32 = vmul.f32 %v13238_v2, %v1149_v45  ;;  %v1189_v40 = vmul.f32 %v13238_v2, %v1150_v6  ;;  %v1190_v17 = vmul.f32 %v13238_v2, %v1151_v34  ;;  %v1191_v4 = vmul.f32 %v13238_v2, %v1152_v62  ;;  %10566 = vmatprep.subr.bf16.mxu1 %v11497_v63 }
 0x221   : > { %v1192_v3 = vmul.f32 %v13238_v2, %v1153_v61  ;;  %v1193_v1 = vmul.f32 %v13238_v2, %v1154_v13  ;;  %v1194_v28 = vmul.f32 %v13238_v2, %v1155_v54  ;;  %v1195_v45 = vmul.f32 %v13238_v2, %v1156_v35  ;;  %v11498_v54 = vld [vmem:[%s17937_s6 + $0x20] sm:$0xff]   ;;  %10567 = vmatpush3.bf16.msra.mxu1 %v11497_v63 }
 0x222   : > { %v1196_v6 = vmul.f32 %v13238_v2, %v1157_v29  ;;  %v13289_v42 = vmul.f32 %v13238_v2, %v1158_v23  ;;  %v13292_v34 = vmul.f32 %v13238_v2, %v1159_v27  ;;  %v13295_v62 = vadd.f32 %v13272_v24, %v1180_v59  ;;  %10528 = vmatprep.subr.bf16.mxu0 %v11498_v54 }
 0x223   : > { %v13298_v61 = vadd.f32 %v13272_v24, %v1181_v60  ;;  %v13301_v13 = vadd.f32 %v13272_v24, %v1182_v51  ;;  %v13307_v35 = vmul.f32 %v13238_v2, %v1160_v8  ;;  %v13310_v29 = vmul.f32 %v13238_v2, %v1161_v36  ;;  %v11499_v36 = vld [vmem:[%s17937_s6] sm:$0xff]   ;;  %10529 = vmatpush3.bf16.msra.mxu0 %v11498_v54 }
 0x224   : > { %v13313_v23 = vmul.f32 %v13238_v2, %v1162_v0  ;;  %v13316_v27 = vadd.f32 %v13272_v24, %v1183_v47  ;;  %v13319_v59 = vmul.f32 %v13238_v2, %v1163_v44  ;;  %v13322_v60 = vmul.f32 %v13238_v2, %v1164_v18  ;;  %10568 = vmatprep.subr.bf16.mxu1 %v11499_v36 }
 0x225   : > { %v13325_v51 = vmul.f32 %v13238_v2, %v1165_v14  ;;  %v13328_v8 = vadd.f32 %v13272_v24, %v1184_v49  ;;  %v13334_v0 = vmul.f32 %v13238_v2, %v1166_v25  ;;  %v13337_v44 = vmul.f32 %v13238_v2, %v1167_v57  ;;  %10569 = vmatpush3.bf16.msra.mxu1 %v11499_v36 }
 0x226   : > { %v13340_v18 = vadd.f32 %v13272_v24, %v1185_v22  ;;  %v13343_v14 = vadd.f32 %v13272_v24, %v1186_v33  ;;  %v13346_v47 = vmul.f32 %v13238_v2, %v1168_v38  ;;  %v1251_v49 = vsub.f32 0.0, %v13295_v62 }
 0x227   : > { %v1252_v15 = vsub.f32 0.0, %v13298_v61  ;;  %v1253_v25 = vsub.f32 0.0, %v13301_v13  ;;  %v13352_v57 = vmul.f32 %v13238_v2, %v1169_v10  ;;  %v13355_v22 = vmul.f32 %v13238_v2, %v1170_v37  ;;  %v13374_v37 = vld [vmem:[%s17937_s6 + $0x58] sm:$0xff]  }
 0x228   : > { %v13358_v33 = vadd.f32 %v13272_v24, %v1187_v9  ;;  %v1254_v63 = vsub.f32 0.0, %v13316_v27  ;;  %v13362_v38 = vmul.f32 %v13238_v2, %v1171_v11  ;;  %v13365_v54 = vmul.f32 %v13238_v2, %v1172_v58  ;;  %18478 = vst [vmem:[#allocation43_spill] sm:$0xff] %v13374_v37  ;;  %10602 = vmatprep.subr.bf16.mxu0 %v13374_v37  ;;  %v1795_v37 = vld [vmem:[#allocation2 + $0x9] sm:$0xff] }
 0x229   : > { %v13368_v5 = vadd.f32 %v13272_v24, %v1188_v32  ;;  %v1255_v10 = vsub.f32 0.0, %v13328_v8  ;;  %v13377_v9 = vadd.f32 %v13272_v24, %v1189_v40  ;;  %v13380_v36 = vadd.f32 %v13272_v24, %v1190_v17 }
 0x22a   : > { %v1256_v11 = vsub.f32 0.0, %v13340_v18  ;;  %v1257_v2 = vsub.f32 0.0, %v13343_v14  ;;  %v13385_v58 = vadd.f32 %v13272_v24, %v1191_v4  ;;  %v1283_v32 = vmul.f32 1.442695, %v1251_v49 }
 0x22b   : > { %v1285_v55 = vmul.f32 1.442695, %v1252_v15  ;;  %v1287_v43 = vmul.f32 1.442695, %v1253_v25  ;;  %v13389_v39 = vadd.f32 %v13272_v24, %v1192_v3  ;;  %v13392_v40 = vadd.f32 %v13272_v24, %v1193_v1 }
 0x22c   : > { %v1258_v17 = vsub.f32 0.0, %v13358_v33  ;;  %v1289_v46 = vmul.f32 1.442695, %v1254_v63  ;;  %v13396_v19 = vadd.f32 %v13272_v24, %v1194_v28  ;;  %v1259_v4 = vsub.f32 0.0, %v13368_v5 }
 0x22d   : > { %v1291_v50 = vmul.f32 1.442695, %v1255_v10  ;;  %11606 = vpow2.f32 %v1283_v32  ;;  %v13400_v49 = vadd.f32 %v13272_v24, %v1195_v45  ;;  %v1260_v15 = vsub.f32 0.0, %v13377_v9 }
 0x22e   : > { %v1293_v3 = vmul.f32 1.442695, %v1256_v11  ;;  %11608 = vpow2.f32 %v1285_v55  ;;  %v13404_v1 = vadd.f32 %v13272_v24, %v1196_v6  ;;  %v1261_v25 = vsub.f32 0.0, %v13380_v36 }
 0x22f   : > { %v1295_v63 = vmul.f32 1.442695, %v1257_v2  ;;  %11610 = vpow2.f32 %v1287_v43  ;;  %v13409_v28 = vadd.f32 %v13272_v24, %v13289_v42  ;;  %v1262_v10 = vsub.f32 0.0, %v13385_v58 }
 0x230   : > { %v1297_v32 = vmul.f32 1.442695, %v1258_v17  ;;  %11612 = vpow2.f32 %v1289_v46  ;;  %v13414_v45 = vadd.f32 %v13272_v24, %v13292_v34  ;;  %v1263_v55 = vsub.f32 0.0, %v13389_v39  ;;  %v1794_v17 = vld [vmem:[#allocation2 + $0x1] sm:$0xff] }
 0x231   : > { %v1299_v6 = vmul.f32 1.442695, %v1259_v4  ;;  %11614 = vpow2.f32 %v1291_v50  ;;  %v13419_v11 = vadd.f32 %v13272_v24, %v13307_v35  ;;  %v1264_v43 = vsub.f32 0.0, %v13392_v40 }
 0x232   : > { %v1301_v42 = vmul.f32 1.442695, %v1260_v15  ;;  %11616 = vpow2.f32 %v1293_v3  ;;  %v13424_v2 = vadd.f32 %v13272_v24, %v13310_v29  ;;  %v1265_v46 = vsub.f32 0.0, %v13396_v19 }
 0x233   : > { %v1303_v34 = vmul.f32 1.442695, %v1261_v25  ;;  %11618 = vpow2.f32 %v1295_v63  ;;  %v13429_v50 = vadd.f32 %v13272_v24, %v13313_v23  ;;  %v1266_v35 = vsub.f32 0.0, %v13400_v49 }
 0x234   : > { %v1305_v4 = vmul.f32 1.442695, %v1262_v10  ;;  %11620 = vpow2.f32 %v1297_v32  ;;  %v1267_v15 = vsub.f32 0.0, %v13404_v1  ;;  %v1268_v3 = vsub.f32 0.0, %v13409_v28 }
 0x235   : > { %v1307_v29 = vmul.f32 1.442695, %v1263_v55  ;;  %11622 = vpow2.f32 %v1299_v6  ;;  %v1309_v52 = vmul.f32 1.442695, %v1264_v43  ;;  %v1770_v25 = vpack.c.bf16 %v13121_v12, %v13118_v7 }
 0x236   : > { %11624 = vpow2.f32 %v1301_v42  ;;  %v1826_v63 = vpack.c.bf16 %v1795_v37, %v1794_v17  ;;  %v13438_v23 = vadd.f32 %v13272_v24, %v13319_v59  ;;  %v1269_v16 = vsub.f32 0.0, %v13414_v45 }
 0x237   : > { %v1311_v10 = vmul.f32 1.442695, %v1265_v46  ;;  %11626 = vpow2.f32 %v1303_v34  ;;  %v13443_v32 = vadd.f32 %v13272_v24, %v13322_v60  ;;  %v1270_v55 = vsub.f32 0.0, %v13419_v11  ;;  %10570 = vmatprep.mubr.msk.bf16.mxu1 %vm621_vm0, %v1770_v25 }
 0x238   : > { %v1313_v6 = vmul.f32 1.442695, %v1266_v35  ;;  %11628 = vpow2.f32 %v1305_v4  ;;  %10530 = vmatprep.mubr.msk.bf16.mxu0 %vm621_vm0, %v1826_v63  ;;  %v13450_v7 = vadd.f32 %v13272_v24, %v13325_v51  ;;  %v1271_v12 = vsub.f32 0.0, %v13424_v2 }
 0x239   : > { %v1315_v59 = vmul.f32 1.442695, %v1267_v15  ;;  %11630 = vpow2.f32 %v1307_v29  ;;  %v13457_v60 = vadd.f32 %v13272_v24, %v13334_v0  ;;  %v1272_v43 = vsub.f32 0.0, %v13429_v50 }
 0x23a   : > { %v13453_v37 = vpop.eup %11606  ;;  %v1317_v42 = vmul.f32 1.442695, %v1268_v3  ;;  %11632 = vpow2.f32 %v1309_v52  ;;  %v13464_v51 = vadd.f32 %v13272_v24, %v13337_v44  ;;  %v1273_v34 = vsub.f32 0.0, %v13438_v23 }
 0x23b   : > { %v13460_v46 = vpop.eup %11608  ;;  %v1319_v17 = vmul.f32 1.442695, %v1269_v16  ;;  %11634 = vpow2.f32 %v1311_v10  ;;  %v13469_v4 = vadd.f32 %v13272_v24, %v13346_v47  ;;  %v1274_v0 = vsub.f32 0.0, %v13443_v32 }
 0x23c   : > { %v11611_v35 = vpop.eup %11610  ;;  %v1321_v15 = vmul.f32 1.442695, %v1270_v55  ;;  %11636 = vpow2.f32 %v1313_v6  ;;  %v13474_v3 = vadd.f32 %v13272_v24, %v13352_v57  ;;  %v1275_v44 = vsub.f32 0.0, %v13450_v7 }
 0x23d   : > { %v11613_v52 = vpop.eup %11612  ;;  %v1323_v29 = vmul.f32 1.442695, %v1271_v12  ;;  %11638 = vpow2.f32 %v1315_v59  ;;  %v13479_v25 = vadd.f32 %v13272_v24, %v13355_v22  ;;  %v1276_v47 = vsub.f32 0.0, %v13457_v60 }
 0x23e   : > { %v11615_v16 = vpop.eup %11614  ;;  %v1325_v63 = vmul.f32 1.442695, %v1272_v43  ;;  %11640 = vpow2.f32 %v1317_v42  ;;  %v13484_v55 = vadd.f32 %v13272_v24, %v13362_v38  ;;  %v1277_v57 = vsub.f32 0.0, %v13464_v51 }
 0x23f   : > { %v11617_v10 = vpop.eup %11616  ;;  %v1327_v6 = vmul.f32 1.442695, %v1273_v34  ;;  %11642 = vpow2.f32 %v1319_v17  ;;  %v13489_v59 = vadd.f32 %v13272_v24, %v13365_v54  ;;  %v1278_v22 = vsub.f32 0.0, %v13469_v4 }
 0x240   : > { %v11619_v12 = vpop.eup %11618  ;;  %v1329_v56 = vmul.f32 1.442695, %v1274_v0  ;;  %11644 = vpow2.f32 %v1321_v15  ;;  %v1279_v42 = vsub.f32 0.0, %v13474_v3  ;;  %v1331_v41 = vmul.f32 1.442695, %v1275_v44 }
 0x241   : > { %18479 = vst [vmem:[#allocation44_spill] sm:$0xff] %v13489_v59  ;;  %v11621_v43 = vpop.eup %11620  ;;  %11646 = vpow2.f32 %v1323_v29  ;;  %v1280_v21 = vsub.f32 0.0, %v13479_v25  ;;  %v1333_v53 = vmul.f32 1.442695, %v1276_v47  ;;  %v1281_v17 = vsub.f32 0.0, %v13484_v55 }
 0x242   : > { %v11623_v38 = vpop.eup %11622  ;;  %11648 = vpow2.f32 %v1325_v63  ;;  %v1335_v30 = vmul.f32 1.442695, %v1277_v57  ;;  %v1282_v54 = vsub.f32 0.0, %v13489_v59  ;;  %v1337_v0 = vmul.f32 1.442695, %v1278_v22  ;;  %v13496_v57 = vpop.permute.xlu1 %2426 }
 0x243   : > { %v11625_v34 = vpop.eup %11624  ;;  %11650 = vpow2.f32 %v1327_v6  ;;  %v1339_v48 = vmul.f32 1.442695, %v1279_v42  ;;  %v1341_v29 = vmul.f32 1.442695, %v1280_v21  ;;  %v1343_v20 = vmul.f32 1.442695, %v1281_v17  ;;  %v13498_v6 = vpop.permute.xlu0 %2421 }
 0x244   : > { %v11627_v24 = vpop.eup %11626  ;;  %11652 = vpow2.f32 %v1329_v56  ;;  %v1345_v63 = vmul.f32 1.442695, %v1282_v54  ;;  %18480 = vst [vmem:[#allocation45_spill] sm:$0xff] %v13496_v57  ;;  %18481 = vst [vmem:[#allocation46_spill] sm:$0xff] %v13498_v6  ;;  %v1347_v56 = vadd.f32 1.0, %v13453_v37  ;;  %v1351_v54 = vadd.f32 1.0, %v11615_v16 }
 0x245   : > { %v11629_v15 = vpop.eup %11628  ;;  %11654 = vpow2.f32 %v1331_v41  ;;  %v1348_v41 = vadd.f32 1.0, %v13460_v46  ;;  %v1352_v57 = vadd.f32 1.0, %v11617_v10  ;;  %v1354_v59 = vadd.f32 1.0, %v11621_v43 }
 0x246   : > { %v11631_v44 = vpop.eup %11630  ;;  %11656 = vpow2.f32 %v1333_v53  ;;  %v1349_v53 = vadd.f32 1.0, %v11611_v35  ;;  %v1355_v35 = vadd.f32 1.0, %v11623_v38  ;;  %v1356_v16 = vadd.f32 1.0, %v11625_v34 }
 0x247   : > { %v11633_v31 = vpop.eup %11632  ;;  %11658 = vpow2.f32 %v1335_v30  ;;  %v1350_v30 = vadd.f32 1.0, %v11613_v52  ;;  %v13504_v37 = vpop.permute.xlu0 %1660  ;;  %v1357_v10 = vadd.f32 1.0, %v11627_v24  ;;  %v1359_v38 = vadd.f32 1.0, %v11631_v44 }
 0x248   : > { %v11635_v47 = vpop.eup %11634  ;;  %11660 = vpow2.f32 %v1337_v0  ;;  %18483 = vst [vmem:[#allocation48_spill] sm:$0xff] %v13504_v37  ;;  %v1360_v34 = vadd.f32 1.0, %v11633_v31 }
 0x249   : > { %v11637_v26 = vpop.eup %11636  ;;  %11662 = vpow2.f32 %v1339_v48  ;;  %v13502_v48 = vpop.permute.xlu1 %1665  ;;  %v1361_v24 = vadd.f32 1.0, %v11635_v47 }
 0x24a   : > { %v11639_v22 = vpop.eup %11638  ;;  %11664 = vpow2.f32 %v1341_v29  ;;  %18482 = vst [vmem:[#allocation47_spill] sm:$0xff] %v13502_v48  ;;  %v1353_v29 = vadd.f32 1.0, %v11619_v12 }
 0x24b   : > { %v11641_v21 = vpop.eup %11640  ;;  %11666 = vpow2.f32 %v1343_v20  ;;  %v13516_v43 = vpop.permute.xlu0 %1670 }
 0x24c   : > { %v11643_v42 = vpop.eup %11642  ;;  %11668 = vpow2.f32 %v1345_v63  ;;  %18485 = vst [vmem:[#allocation50_spill] sm:$0xff] %v13516_v43  ;;  %v1364_v43 = vadd.f32 1.0, %v11641_v21 }
 0x24d   : > { %v11645_v17 = vpop.eup %11644  ;;  %11670 = vrcp.f32 %v1347_v56 }
 0x24e   : > { %v11647_v0 = vpop.eup %11646  ;;  %11672 = vrcp.f32 %v1348_v41  ;;  %v1358_v41 = vadd.f32 1.0, %v11629_v15  ;;  %v1362_v15 = vadd.f32 1.0, %v11637_v26  ;;  %v1366_v48 = vadd.f32 1.0, %v11645_v17 }
 0x24f   : > { %v11649_v6 = vpop.eup %11648  ;;  %11674 = vrcp.f32 %v1349_v53  ;;  %v13514_v53 = vpop.permute.xlu1 %1675 }
 0x250   : > { %v11651_v46 = vpop.eup %11650  ;;  %11676 = vrcp.f32 %v1350_v30  ;;  %18484 = vst [vmem:[#allocation49_spill] sm:$0xff] %v13514_v53  ;;  %v13528_v31 = vpop.permute.xlu0 %2431 }
 0x251   : > { %v11653_v20 = vpop.eup %11652  ;;  %11678 = vrcp.f32 %v1351_v54  ;;  %18487 = vst [vmem:[#allocation52_spill] sm:$0xff] %v13528_v31  ;;  %v1369_v17 = vadd.f32 1.0, %v11651_v46 }
 0x252   : > { %v13506_v52 = vpop.eup %11654  ;;  %11680 = vrcp.f32 %v1352_v57 }
 0x253   : > { %v13508_v63 = vpop.eup %11656  ;;  %11682 = vrcp.f32 %v1353_v29  ;;  %v1363_v29 = vadd.f32 1.0, %v11639_v22  ;;  %v1367_v22 = vadd.f32 1.0, %v11647_v0  ;;  %v1371_v46 = vadd.f32 1.0, %v13506_v52 }
 0x254   : > { %v13510_v56 = vpop.eup %11658  ;;  %11684 = vrcp.f32 %v1354_v59 }
 0x255   : > { %v13512_v12 = vpop.eup %11660  ;;  %11686 = vrcp.f32 %v1355_v35  ;;  %v13526_v35 = vpop.permute.xlu1 %2436 }
 0x256   : > { %v13518_v30 = vpop.eup %11662  ;;  %11688 = vrcp.f32 %v1356_v16  ;;  %18486 = vst [vmem:[#allocation51_spill] sm:$0xff] %v13526_v35  ;;  %v1365_v16 = vadd.f32 1.0, %v11643_v42 }
 0x257   : > { %v13520_v57 = vpop.eup %11664  ;;  %11690 = vrcp.f32 %v1357_v10 }
 0x258   : > { %v13522_v54 = vpop.eup %11666  ;;  %11692 = vrcp.f32 %v1358_v41 }
 0x259   : > { %v13524_v59 = vpop.eup %11668  ;;  %11694 = vrcp.f32 %v1359_v38  ;;  %v13537_v38 = vld [vmem:[%s17937_s6 + $0x78] sm:$0xff]  }
 0x25a   : > { %v11671_v53 = vpop.eup %11670  ;;  %11696 = vrcp.f32 %v1360_v34  ;;  %v1368_v34 = vadd.f32 1.0, %v11649_v6  ;;  %10642 = vmatprep.subr.bf16.mxu1 %v13537_v38 }
 0x25b   : > { %v11673_v44 = vpop.eup %11672  ;;  %11698 = vrcp.f32 %v1361_v24  ;;  %v1411_v47 = vmul.f32 %v11671_v53, %v13295_v62  ;;  %v1370_v53 = vadd.f32 1.0, %v11653_v20  ;;  %v1372_v20 = vadd.f32 1.0, %v13508_v63 }
 0x25c   : > { %v11675_v10 = vpop.eup %11674  ;;  %11700 = vrcp.f32 %v1362_v15  ;;  %v1412_v26 = vmul.f32 %v11673_v44, %v13298_v61 }
 0x25d   : > { %v11677_v41 = vpop.eup %11676  ;;  %11702 = vrcp.f32 %v1363_v29  ;;  %v1413_v21 = vmul.f32 %v11675_v10, %v13301_v13  ;;  %1450 = vst.msk [vmem:[#allocation2 + $0x11] sm:$0xff] %vm621_vm0, %v1411_v47  ;;  %v1373_v29 = vadd.f32 1.0, %v13510_v56 }
 0x25e   : > { %v11679_v42 = vpop.eup %11678  ;;  %11704 = vrcp.f32 %v1364_v43  ;;  %v1414_v62 = vmul.f32 %v11677_v41, %v13316_v27  ;;  %1451 = vst.msk [vmem:[#allocation2 + $0x19] sm:$0xff] %vm621_vm0, %v1412_v26  ;;  %v13546_v27 = vpop.permute.xlu1 %2446 }
 0x25f   : > { %v11681_v61 = vpop.eup %11680  ;;  %11706 = vrcp.f32 %v1365_v16  ;;  %v1415_v0 = vmul.f32 %v11679_v42, %v13328_v8  ;;  %1452 = vst.msk [vmem:[#allocation2 + $0x21] sm:$0xff] %vm621_vm0, %v1413_v21  ;;  %18488 = vst [vmem:[#allocation53_spill] sm:$0xff] %v13546_v27  ;;  %v13548_v43 = vpop.permute.xlu0 %2441 }
 0x260   : > { %v11683_v13 = vpop.eup %11682  ;;  %11708 = vrcp.f32 %v1366_v48  ;;  %v1416_v24 = vmul.f32 %v11681_v61, %v13340_v18  ;;  %1453 = vst.msk [vmem:[#allocation2 + $0x29] sm:$0xff] %vm621_vm0, %v1414_v62  ;;  %18489 = vst [vmem:[#allocation54_spill] sm:$0xff] %v13548_v43 }
 0x261   : > { %v11685_v6 = vpop.eup %11684  ;;  %11710 = vrcp.f32 %v1367_v22  ;;  %v1417_v8 = vmul.f32 %v11683_v13, %v13343_v14  ;;  %1454 = vst.msk [vmem:[#allocation2 + $0x31] sm:$0xff] %vm621_vm0, %v1415_v0  ;;  %v1374_v14 = vadd.f32 1.0, %v13512_v12 }
 0x262   : > { %v11687_v15 = vpop.eup %11686  ;;  %11712 = vrcp.f32 %v1368_v34  ;;  %v1418_v18 = vmul.f32 %v11685_v6, %v13358_v33  ;;  %1455 = vst.msk [vmem:[#allocation2 + $0x39] sm:$0xff] %vm621_vm0, %v1416_v24  ;;  %v1375_v33 = vadd.f32 1.0, %v13518_v30  ;;  %v1377_v30 = vadd.f32 1.0, %v13522_v54 }
 0x263   : > { %v11689_v48 = vpop.eup %11688  ;;  %11714 = vrcp.f32 %v1369_v17  ;;  %v1419_v44 = vmul.f32 %v11687_v15, %v13368_v5  ;;  %1456 = vst.msk [vmem:[#allocation2 + $0x41] sm:$0xff] %vm621_vm0, %v1417_v8  ;;  %v1376_v5 = vadd.f32 1.0, %v13520_v57  ;;  %v13570_v26 = vpop.permute.xlu0 %1680  ;;  %v1378_v57 = vadd.f32 1.0, %v13524_v59 }
 0x264   : > { %v11691_v52 = vpop.eup %11690  ;;  %11716 = vrcp.f32 %v1370_v53  ;;  %v1420_v16 = vmul.f32 %v11689_v48, %v13377_v9  ;;  %1457 = vst.msk [vmem:[#allocation2 + $0x49] sm:$0xff] %vm621_vm0, %v1418_v18  ;;  %v13568_v9 = vpop.permute.xlu1 %1685  ;;  %18491 = vst [vmem:[#allocation56_spill] sm:$0xff] %v13570_v26 }
 0x265   : > { %v11693_v63 = vpop.eup %11692  ;;  %11718 = vrcp.f32 %v1371_v46  ;;  %v1421_v47 = vmul.f32 %v11691_v52, %v13380_v36  ;;  %1458 = vst.msk [vmem:[#allocation2 + $0x51] sm:$0xff] %vm621_vm0, %v1419_v44  ;;  %18490 = vst [vmem:[#allocation55_spill] sm:$0xff] %v13568_v9 }
 0x266   : > { %v11695_v56 = vpop.eup %11694  ;;  %11720 = vrcp.f32 %v1372_v20  ;;  %v1422_v10 = vmul.f32 %v11693_v63, %v13385_v58  ;;  %1459 = vst.msk [vmem:[#allocation2 + $0x59] sm:$0xff] %vm621_vm0, %v1420_v16 }
 0x267   : > { %v11697_v12 = vpop.eup %11696  ;;  %11722 = vrcp.f32 %v1373_v29  ;;  %v1423_v36 = vmul.f32 %v11695_v56, %v13389_v39  ;;  %1460 = vst.msk [vmem:[#allocation2 + $0x61] sm:$0xff] %vm621_vm0, %v1421_v47  ;;  %v13588_v61 = vpop.permute.xlu0 %1690 }
 0x268   : > { %v11699_v41 = vpop.eup %11698  ;;  %11724 = vrcp.f32 %v1374_v14  ;;  %v1424_v58 = vmul.f32 %v11697_v12, %v13392_v40  ;;  %1461 = vst.msk [vmem:[#allocation2 + $0x69] sm:$0xff] %vm621_vm0, %v1422_v10  ;;  %v13586_v62 = vpop.permute.xlu1 %1695  ;;  %18493 = vst [vmem:[#allocation58_spill] sm:$0xff] %v13588_v61  ;;  %v13644_v12 = vld [vmem:[#allocation2 + $0x10] sm:$0xff] }
 0x269   : > { %v11701_v22 = vpop.eup %11700  ;;  %11726 = vrcp.f32 %v1375_v33  ;;  %v1425_v21 = vmul.f32 %v11699_v41, %v13396_v19  ;;  %1462 = vst.msk [vmem:[#allocation2 + $0x71] sm:$0xff] %vm621_vm0, %v1423_v36  ;;  %18492 = vst [vmem:[#allocation57_spill] sm:$0xff] %v13586_v62  ;;  %v13648_v36 = vld [vmem:[#allocation2 + $0x20] sm:$0xff]  ;;  %v13650_v41 = vld [vmem:[#allocation2 + $0x28] sm:$0xff] }
 0x26a   : > { %v11703_v54 = vpop.eup %11702  ;;  %11728 = vrcp.f32 %v1376_v5  ;;  %v1426_v39 = vmul.f32 %v11701_v22, %v13400_v49  ;;  %1463 = vst.msk [vmem:[#allocation2 + $0x79] sm:$0xff] %vm621_vm0, %v1424_v58  ;;  %18507 = vst [vmem:[#allocation70_spill] sm:$0xff] %v13644_v12  ;;  %v13654_v58 = vld [vmem:[#allocation2 + $0x38] sm:$0xff]  ;;  %v13656_v22 = vld [vmem:[#allocation2 + $0x40] sm:$0xff] }
 0x26b   : > { %v11705_v42 = vpop.eup %11704  ;;  %11730 = vrcp.f32 %v1377_v30  ;;  %v1427_v59 = vmul.f32 %v11703_v54, %v13404_v1  ;;  %1464 = vst.msk [vmem:[#allocation2 + $0x81] sm:$0xff] %vm621_vm0, %v1425_v21  ;;  %v13646_v30 = vld [vmem:[#allocation2 + $0x18] sm:$0xff]  ;;  %18509 = vst [vmem:[#allocation72_spill] sm:$0xff] %v13648_v36 }
 0x26c   : > { %v11707_v40 = vpop.eup %11706  ;;  %11732 = vrcp.f32 %v1378_v57  ;;  %v1428_v34 = vmul.f32 %v11705_v42, %v13409_v28  ;;  %1465 = vst.msk [vmem:[#allocation2 + $0x89] sm:$0xff] %vm621_vm0, %v1426_v39  ;;  %v13602_v8 = vpop.permute.xlu1 %2456  ;;  %18508 = vst [vmem:[#allocation71_spill] sm:$0xff] %v13646_v30  ;;  %v13652_v57 = vld [vmem:[#allocation2 + $0x30] sm:$0xff] }
 0x26d   : > { %v11709_v19 = vpop.eup %11708  ;;  %v1429_v49 = vmul.f32 %v11707_v40, %v13414_v45  ;;  %1466 = vst.msk [vmem:[#allocation2 + $0x91] sm:$0xff] %vm621_vm0, %v1427_v59  ;;  %18494 = vst [vmem:[#allocation59_spill] sm:$0xff] %v13602_v8 }
 0x26e   : > { %v11711_v17 = vpop.eup %11710  ;;  %v1430_v1 = vmul.f32 %v11709_v19, %v13419_v11  ;;  %1467 = vst.msk [vmem:[#allocation2 + $0x99] sm:$0xff] %vm621_vm0, %v1428_v34  ;;  %18510 = vst [vmem:[#allocation73_spill] sm:$0xff] %v13650_v41 }
 0x26f   : > { %v11713_v0 = vpop.eup %11712  ;;  %v1431_v13 = vmul.f32 %v11711_v17, %v13424_v2  ;;  %1468 = vst.msk [vmem:[#allocation2 + $0xa1] sm:$0xff] %vm621_vm0, %v1429_v49  ;;  %v13604_v2 = vpop.permute.xlu0 %2451  ;;  %18511 = vst [vmem:[#allocation74_spill] sm:$0xff] %v13652_v57  ;;  %v18522_v49 = vld [vmem:[#allocation15_spill] sm:$0xff] }
 0x270   : > { %v11715_v28 = vpop.eup %11714  ;;  %v1432_v53 = vmul.f32 %v11713_v0, %v13429_v50  ;;  %1469 = vst.msk [vmem:[#allocation2 + $0xa9] sm:$0xff] %vm621_vm0, %v1430_v1  ;;  %18495 = vst [vmem:[#allocation60_spill] sm:$0xff] %v13604_v2  ;;  %v13618_v14 = vpop.permute.xlu1 %2466  ;;  %v13658_v21 = vld [vmem:[#allocation2 + $0x70] sm:$0xff]  ;;  %v1740_v17 = vmul.f32 %v18522_v49, %v13644_v12  ;;  %v18523_v1 = vld [vmem:[#allocation14_spill] sm:$0xff] }
 0x271   : > { %v11717_v24 = vpop.eup %11716  ;;  %v1433_v45 = vmul.f32 %v11715_v28, %v13438_v23  ;;  %1470 = vst.msk [vmem:[#allocation2 + $0xb1] sm:$0xff] %vm621_vm0, %v1431_v13  ;;  %18496 = vst [vmem:[#allocation61_spill] sm:$0xff] %v13618_v14  ;;  %v13660_v54 = vld [vmem:[#allocation2 + $0x78] sm:$0xff]  ;;  %v1741_v0 = vmul.f32 %v18523_v1, %v13646_v30 }
 0x272   : > { %v11719_v6 = vpop.eup %11718  ;;  %v1434_v11 = vmul.f32 %v11717_v24, %v13443_v32  ;;  %1471 = vst.msk [vmem:[#allocation2 + $0xb9] sm:$0xff] %vm621_vm0, %v1432_v53  ;;  %18512 = vst [vmem:[#allocation75_spill] sm:$0xff] %v13654_v58  ;;  %v18527_v24 = vld [vmem:[#allocation26_spill] sm:$0xff] }
 0x273   : > { %v11721_v46 = vpop.eup %11720  ;;  %v1435_v15 = vmul.f32 %v11719_v6, %v13450_v7  ;;  %1472 = vst.msk [vmem:[#allocation2 + $0xc1] sm:$0xff] %vm621_vm0, %v1433_v45  ;;  %18513 = vst [vmem:[#allocation76_spill] sm:$0xff] %v13656_v22  ;;  %v13686_v45 = vmul.f32 %v18527_v24, %v13648_v36  ;;  %v18529_v6 = vld [vmem:[#allocation25_spill] sm:$0xff] }
 0x274   : > { %v11723_v50 = vpop.eup %11722  ;;  %v1436_v20 = vmul.f32 %v11721_v46, %v13457_v60  ;;  %1473 = vst.msk [vmem:[#allocation2 + $0xc9] sm:$0xff] %vm621_vm0, %v1434_v11  ;;  %18514 = vst [vmem:[#allocation77_spill] sm:$0xff] %v13658_v21  ;;  %v13662_v39 = vld [vmem:[#allocation2 + $0x90] sm:$0xff]  ;;  %v13690_v11 = vmul.f32 %v18529_v6, %v13650_v41  ;;  %v18551_v6 = vld [vmem:[#allocation35_spill] sm:$0xff] }
 0x275   : > { %v11725_v23 = vpop.eup %11724  ;;  %v1437_v18 = vmul.f32 %v11723_v50, %v13464_v51  ;;  %1474 = vst.msk [vmem:[#allocation2 + $0xd1] sm:$0xff] %vm621_vm0, %v1435_v15  ;;  %v13620_v51 = vpop.permute.xlu0 %2461  ;;  %18515 = vst [vmem:[#allocation78_spill] sm:$0xff] %v13660_v54  ;;  %v13668_v40 = vld [vmem:[#allocation2 + $0x98] sm:$0xff]  ;;  %v13743_v24 = vmul.f32 %v18551_v6, %v13660_v54  ;;  %v1771_v6 = vpack.c.bf16 %v1741_v0, %v1740_v17 }
 0x276   : > { %v11727_v32 = vpop.eup %11726  ;;  %v1438_v48 = vmul.f32 %v11725_v23, %v13469_v4  ;;  %1475 = vst.msk [vmem:[#allocation2 + $0xd9] sm:$0xff] %vm621_vm0, %v1436_v20  ;;  %18497 = vst [vmem:[#allocation62_spill] sm:$0xff] %v13620_v51  ;;  %v18498_v4 = vld [vmem:[#allocation44_spill] sm:$0xff]  ;;  %v13670_v34 = vld [vmem:[#allocation2 + $0xa0] sm:$0xff] }
 0x277   : > { %v11729_v29 = vpop.eup %11728  ;;  %v1439_v7 = vmul.f32 %v11727_v32, %v13474_v3  ;;  %1476 = vst.msk [vmem:[#allocation2 + $0xe1] sm:$0xff] %vm621_vm0, %v1437_v18  ;;  %v13628_v3 = vpop.permute.xlu1 %1705  ;;  %18516 = vst [vmem:[#allocation79_spill] sm:$0xff] %v13662_v39  ;;  %v13672_v19 = vld [vmem:[#allocation2 + $0xa8] sm:$0xff]  ;;  %v18534_v20 = vld [vmem:[#allocation28_spill] sm:$0xff]  ;;  %v13765_v54 = vmul.f32 %v13504_v37, %v13670_v34  ;;  %10571 = vmatmul.mubr.msk.bf16.vlgmr.msra.gmra.mxu1 %vm621_vm0, %v1771_v6 }
 0x278   : > { %v11731_v44 = vpop.eup %11730  ;;  %v1440_v60 = vmul.f32 %v11729_v29, %v13479_v25  ;;  %1477 = vst.msk [vmem:[#allocation2 + $0xe9] sm:$0xff] %vm621_vm0, %v1438_v48  ;;  %18499 = vst [vmem:[#allocation44_spill] sm:$0xff] %v13628_v3  ;;  %v13678_v13 = vld [vmem:[#allocation2 + $0xb0] sm:$0xff]  ;;  %v13700_v23 = vmul.f32 %v18534_v20, %v13652_v57  ;;  %v18536_v18 = vld [vmem:[#allocation27_spill] sm:$0xff]  ;;  %10643 = vmatpush3.bf16.msra.mxu1 %v13537_v38 }
 0x279   : > { %v11733_v52 = vpop.eup %11732  ;;  %v1441_v16 = vmul.f32 %v11731_v44, %v13484_v55  ;;  %1478 = vst.msk [vmem:[#allocation2 + $0xf1] sm:$0xff] %vm621_vm0, %v1439_v7  ;;  %v13630_v25 = vpop.permute.xlu0 %1700  ;;  %18519 = vst [vmem:[#allocation82_spill] sm:$0xff] %v13668_v40  ;;  %v13680_v28 = vld [vmem:[#allocation2 + $0xb8] sm:$0xff]  ;;  %v13704_v32 = vmul.f32 %v18536_v18, %v13654_v58  ;;  %v18538_v48 = vld [vmem:[#allocation34_spill] sm:$0xff]  ;;  %v13712_v7 = vmul.f32 %v18522_v49, %v13652_v57 }
 0x27a   : > { %v1442_v63 = vmul.f32 %v11733_v52, %v18498_v4  ;;  %1479 = vst.msk [vmem:[#allocation2 + $0xf9] sm:$0xff] %vm621_vm0, %v1440_v60  ;;  %18500 = vst [vmem:[#allocation63_spill] sm:$0xff] %v13630_v25  ;;  %v13682_v53 = vld [vmem:[#allocation2 + $0xc0] sm:$0xff]  ;;  %v13708_v29 = vmul.f32 %v18538_v48, %v13656_v22  ;;  %v13717_v44 = vld [vmem:[%s17937_s6 + $0x70] sm:$0xff]   ;;  %v13735_v57 = vmul.f32 %v18523_v1, %v13654_v58 }
 0x27b   : > { %1480 = vst.msk [vmem:[#allocation2 + $0x101] sm:$0xff] %vm621_vm0, %v1441_v16  ;;  %v13632_v33 = vpop.permute.xlu1 %1715  ;;  %18520 = vst [vmem:[#allocation83_spill] sm:$0xff] %v13670_v34  ;;  %v13692_v46 = vld [vmem:[#allocation2 + $0xc8] sm:$0xff]  ;;  %v13725_v4 = vld [vmem:[#allocation2 + $0x32] sm:$0xff]  ;;  %v13787_v34 = vmul.f32 %v13570_v26, %v13682_v53  ;;  %10644 = vmatprep.subr.bf16.mxu1 %v13717_v44 }
 0x27c   : > { %1481 = vst.msk [vmem:[#allocation2 + $0x109] sm:$0xff] %vm621_vm0, %v1442_v63  ;;  %18501 = vst [vmem:[#allocation64_spill] sm:$0xff] %v13632_v33  ;;  %v13694_v15 = vld [vmem:[#allocation2 + $0xd0] sm:$0xff]  ;;  %v13727_v63 = vld [vmem:[#allocation2 + $0x3a] sm:$0xff]  ;;  %v13791_v17 = vmul.f32 %v13568_v9, %v13692_v46  ;;  %10645 = vmatpush3.bf16.msra.mxu1 %v13717_v44 }
 0x27d   : > { %v13634_v47 = vpop.permute.xlu0 %1710  ;;  %18521 = vst [vmem:[#allocation84_spill] sm:$0xff] %v13672_v19  ;;  %18524 = vst [vmem:[#allocation85_spill] sm:$0xff] %v13678_v13  ;;  %v13696_v50 = vld [vmem:[#allocation2 + $0xd8] sm:$0xff]  ;;  %v18549_v49 = vld [vmem:[#allocation36_spill] sm:$0xff] }
 0x27e   : > { %18502 = vst [vmem:[#allocation65_spill] sm:$0xff] %v13634_v47  ;;  %18525 = vst [vmem:[#allocation86_spill] sm:$0xff] %v13680_v28  ;;  %v13719_v60 = vld [vmem:[#allocation2 + $0xe0] sm:$0xff]  ;;  %v13729_v48 = vld [vmem:[#allocation2 + $0x52] sm:$0xff]  ;;  %v13739_v20 = vmul.f32 %v18549_v49, %v13658_v21 }
 0x27f   : > { %v13636_v56 = vpop.permute.xlu1 %2476  ;;  %18526 = vst [vmem:[#allocation87_spill] sm:$0xff] %v13682_v53  ;;  %18528 = vst [vmem:[#allocation88_spill] sm:$0xff] %v13686_v45  ;;  %v13721_v52 = vld [vmem:[#allocation2 + $0xe8] sm:$0xff]  ;;  %v13731_v18 = vld [vmem:[#allocation2 + $0x5a] sm:$0xff]  ;;  %v13809_v53 = vmul.f32 %v13586_v62, %v13696_v50 }
 0x280   : > { %18503 = vst [vmem:[#allocation66_spill] sm:$0xff] %v13636_v56  ;;  %18530 = vst [vmem:[#allocation89_spill] sm:$0xff] %v13690_v11  ;;  %v13723_v16 = vld [vmem:[#allocation2 + $0xf0] sm:$0xff]  ;;  %v13773_v30 = vld [vmem:[#allocation2 + $0x9a] sm:$0xff] }
 0x281   : > { %v13638_v55 = vpop.permute.xlu0 %2471  ;;  %18531 = vst [vmem:[#allocation90_spill] sm:$0xff] %v13692_v46  ;;  %18532 = vst [vmem:[#allocation91_spill] sm:$0xff] %v13694_v15  ;;  %v18553_v22 = vld [vmem:[#allocation12_spill] sm:$0xff]  ;;  %v13749_v36 = vld [vmem:[#allocation2 + $0xf8] sm:$0xff]  ;;  %v13813_v46 = vmul.f32 %v13630_v25, %v13719_v60 }
 0x282   : > { %18504 = vst [vmem:[#allocation67_spill] sm:$0xff] %v13638_v55  ;;  %18533 = vst [vmem:[#allocation92_spill] sm:$0xff] %v13696_v50  ;;  %v13747_v41 = vmul.f32 %v18553_v22, %v13662_v39  ;;  %v13755_v58 = vld [vmem:[#allocation2 + $0x100] sm:$0xff]  ;;  %v18560_v21 = vld [vmem:[#allocation16_spill] sm:$0xff]  ;;  %v13828_v50 = vmul.f32 %v13634_v47, %v13723_v16 }
 0x283   : > { %v13640_v5 = vpop.permute.xlu1 %2486  ;;  %18535 = vst [vmem:[#allocation93_spill] sm:$0xff] %v13700_v23  ;;  %18537 = vst [vmem:[#allocation94_spill] sm:$0xff] %v13704_v32  ;;  %v13753_v32 = vld [vmem:[#allocation2 + $0x7a] sm:$0xff]  ;;  %v13757_v1 = vld [vmem:[#allocation2 + $0x108] sm:$0xff]  ;;  %v13761_v49 = vmul.f32 %v18560_v21, %v13668_v40 }
 0x284   : > { %18505 = vst [vmem:[#allocation68_spill] sm:$0xff] %v13640_v5  ;;  %18539 = vst [vmem:[#allocation95_spill] sm:$0xff] %v13708_v29  ;;  %v13751_v29 = vld [vmem:[#allocation2 + $0x72] sm:$0xff]  ;;  %v18563_v39 = vld [vmem:[#allocation47_spill] sm:$0xff] }
 0x285   : > { %v13642_v10 = vpop.permute.xlu0 %2481  ;;  %18540 = vst [vmem:[#allocation96_spill] sm:$0xff] %v13712_v7  ;;  %18541 = vst [vmem:[#allocation97_spill] sm:$0xff] %v13719_v60  ;;  %v13769_v22 = vmul.f32 %v18563_v39, %v13672_v19  ;;  %v13771_v23 = vld [vmem:[#allocation2 + $0x92] sm:$0xff]  ;;  %v13775_v12 = vld [vmem:[#allocation2 + $0xa2] sm:$0xff]  ;;  %v13832_v60 = vmul.f32 %v13632_v33, %v13749_v36 }
 0x286   : > { %18506 = vst [vmem:[#allocation69_spill] sm:$0xff] %v13642_v10  ;;  %18542 = vst [vmem:[#allocation98_spill] sm:$0xff] %v13721_v52  ;;  %v18568_v11 = vld [vmem:[#allocation50_spill] sm:$0xff]  ;;  %v18570_v40 = vld [vmem:[#allocation49_spill] sm:$0xff] }
 0x287   : > { %v13664_v42 = vpop.permute.xlu1 %1725  ;;  %18543 = vst [vmem:[#allocation99_spill] sm:$0xff] %v13723_v16  ;;  %18544 = vst [vmem:[#allocation100_spill] sm:$0xff] %v13725_v4  ;;  %v13779_v45 = vmul.f32 %v18568_v11, %v13678_v13  ;;  %v13783_v21 = vmul.f32 %v18570_v40, %v13680_v28  ;;  %v13797_v39 = vld [vmem:[#allocation2 + $0xaa] sm:$0xff]  ;;  %v13799_v13 = vld [vmem:[#allocation2 + $0xb2] sm:$0xff]  ;;  %v13805_v28 = vmul.f32 %v13588_v61, %v13694_v15 }
 0x288   : > { %18517 = vst [vmem:[#allocation80_spill] sm:$0xff] %v13664_v42  ;;  %18545 = vst [vmem:[#allocation101_spill] sm:$0xff] %v13727_v63  ;;  %v13801_v11 = vld [vmem:[#allocation2 + $0xba] sm:$0xff]  ;;  %v13822_v9 = vld [vmem:[#allocation2 + $0xca] sm:$0xff]  ;;  %v13840_v6 = vmul.f32 %v13757_v1, %v13664_v42 }
 0x289   : > { %v13666_v59 = vpop.permute.xlu0 %1720  ;;  %18546 = vst [vmem:[#allocation102_spill] sm:$0xff] %v13729_v48  ;;  %18547 = vst [vmem:[#allocation103_spill] sm:$0xff] %v13731_v18  ;;  %v13824_v15 = vld [vmem:[#allocation2 + $0xd2] sm:$0xff]  ;;  %v13845_v25 = vld [vmem:[#allocation2 + $0xe2] sm:$0xff] }
 0x28a   : > { %18518 = vst [vmem:[#allocation81_spill] sm:$0xff] %v13666_v59  ;;  %18548 = vst [vmem:[#allocation104_spill] sm:$0xff] %v13735_v57  ;;  %v18592_v16 = vld [vmem:[#allocation24_spill] sm:$0xff]  ;;  %v11506_v38 = vld [vmem:[%s17937_s6 + $0x68] sm:$0xff]  }
 0x28b   : > { %18550 = vst [vmem:[#allocation105_spill] sm:$0xff] %v13739_v20  ;;  %18552 = vst [vmem:[#allocation106_spill] sm:$0xff] %v13743_v24  ;;  %v13793_v0 = vpop.permute.xlu1 %1735  ;;  %v13849_v47 = vmul.f32 %v18592_v16, %v13725_v4  ;;  %v13867_v4 = vld [vmem:[#allocation2 + $0xea] sm:$0xff]  ;;  %v13869_v16 = vld [vmem:[#allocation2 + $0xf2] sm:$0xff]  ;;  %10646 = vmatprep.subr.bf16.mxu1 %v11506_v38 }
 0x28c   : > { %18554 = vst [vmem:[#allocation107_spill] sm:$0xff] %v13747_v41  ;;  %18555 = vst [vmem:[#allocation108_spill] sm:$0xff] %v13749_v36  ;;  %v18594_v36 = vld [vmem:[#allocation23_spill] sm:$0xff]  ;;  %v18609_v61 = vld [vmem:[#allocation45_spill] sm:$0xff]  ;;  %10647 = vmatpush3.bf16.msra.mxu1 %v11506_v38 }
 0x28d   : > { %18556 = vst [vmem:[#allocation109_spill] sm:$0xff] %v13751_v29  ;;  %18557 = vst [vmem:[#allocation110_spill] sm:$0xff] %v13753_v32  ;;  %v13795_v19 = vpop.permute.xlu0 %1730  ;;  %v13853_v33 = vmul.f32 %v18594_v36, %v13727_v63  ;;  %v13871_v63 = vld [vmem:[#allocation2 + $0xfa] sm:$0xff]  ;;  %v18603_v36 = vld [vmem:[#allocation40_spill] sm:$0xff]  ;;  %v13887_v26 = vmul.f32 %v18609_v61, %v13773_v30 }
 0x28e   : > { %18558 = vst [vmem:[#allocation111_spill] sm:$0xff] %v13755_v58  ;;  %18559 = vst [vmem:[#allocation112_spill] sm:$0xff] %v13757_v1  ;;  %v18598_v1 = vld [vmem:[#allocation31_spill] sm:$0xff]  ;;  %v11507_v44 = vld [vmem:[%s17937_s6 + $0x60] sm:$0xff]  }
 0x28f   : > { %18561 = vst [vmem:[#allocation113_spill] sm:$0xff] %v13761_v49  ;;  %18562 = vst [vmem:[#allocation114_spill] sm:$0xff] %v13765_v54  ;;  %v13861_v42 = vmul.f32 %v18598_v1, %v13731_v18  ;;  %v18607_v1 = vld [vmem:[#allocation46_spill] sm:$0xff]  ;;  %v13891_v37 = vld [vmem:[#allocation2 + $0x10a] sm:$0xff]  ;;  %10648 = vmatprep.subr.bf16.mxu1 %v11507_v44 }
 0x290   : > { %18564 = vst [vmem:[#allocation115_spill] sm:$0xff] %v13769_v22  ;;  %18565 = vst [vmem:[#allocation116_spill] sm:$0xff] %v13771_v23  ;;  %v13883_v62 = vmul.f32 %v18607_v1, %v13771_v23  ;;  %v13889_v40 = vld [vmem:[#allocation2 + $0x102] sm:$0xff]  ;;  %v13903_v23 = vmul.f32 %v13548_v43, %v13799_v13  ;;  %v1796_v41 = vld [vmem:[#allocation2 + $0x11] sm:$0xff]  ;;  %10649 = vmatpush3.bf16.msra.mxu1 %v11507_v44 }
 0x291   : > { %18566 = vst [vmem:[#allocation117_spill] sm:$0xff] %v13773_v30  ;;  %18567 = vst [vmem:[#allocation118_spill] sm:$0xff] %v13775_v12  ;;  %v13907_v30 = vmul.f32 %v13546_v27, %v13801_v11  ;;  %v13928_v27 = vpop.permute.xlu0 %2491  ;;  %v14026_v38 = vld [vmem:[#allocation2 + $0x22] sm:$0xff]  ;;  %v14090_v54 = vld [vmem:[#allocation2 + $0x6a] sm:$0xff] }
 0x292   : > { %18569 = vst [vmem:[#allocation119_spill] sm:$0xff] %v13779_v45  ;;  %18571 = vst [vmem:[#allocation120_spill] sm:$0xff] %v13783_v21  ;;  %v18640_v44 = vld [vmem:[#allocation94_spill] sm:$0xff]  ;;  %v1803_v21 = vld [vmem:[#allocation2 + $0x49] sm:$0xff] }
 0x293   : > { %18572 = vst [vmem:[#allocation121_spill] sm:$0xff] %v13787_v34  ;;  %18573 = vst [vmem:[#allocation122_spill] sm:$0xff] %v13791_v17  ;;  %v18655_v34 = vld [vmem:[#allocation25_spill] sm:$0xff]  ;;  %v18657_v17 = vld [vmem:[#allocation28_spill] sm:$0xff] }
 0x294   : > { %18574 = vst [vmem:[#allocation123_spill] sm:$0xff] %v13793_v0  ;;  %18575 = vst [vmem:[#allocation124_spill] sm:$0xff] %v13795_v19  ;;  %v13817_v0 = vmul.f32 %v13628_v3, %v13721_v52  ;;  %v13820_v19 = vld [vmem:[#allocation2 + $0xc2] sm:$0xff]  ;;  %v13836_v52 = vmul.f32 %v13755_v58, %v13666_v59  ;;  %v13843_v3 = vld [vmem:[#allocation2 + $0xda] sm:$0xff] }
 0x295   : > { %18576 = vst [vmem:[#allocation125_spill] sm:$0xff] %v13797_v39  ;;  %18577 = vst [vmem:[#allocation126_spill] sm:$0xff] %v13799_v13  ;;  %v18596_v58 = vld [vmem:[#allocation32_spill] sm:$0xff]  ;;  %v13911_v61 = vmul.f32 %v13604_v2, %v13820_v19  ;;  %v13923_v13 = vmul.f32 %v13618_v14, %v13843_v3  ;;  %v13949_v14 = vld [vmem:[#allocation2 + $0x48] sm:$0xff] }
 0x296   : > { %18578 = vst [vmem:[#allocation127_spill] sm:$0xff] %v13801_v11  ;;  %18579 = vst [vmem:[#allocation128_spill] sm:$0xff] %v13805_v28  ;;  %v13857_v59 = vmul.f32 %v18596_v58, %v13729_v48  ;;  %v13875_v48 = vmul.f32 %v18603_v36, %v13751_v29  ;;  %v18605_v58 = vld [vmem:[#allocation39_spill] sm:$0xff]  ;;  %v13895_v29 = vmul.f32 %v13528_v31, %v13775_v12  ;;  %v13926_v11 = vpop.permute.xlu1 %2496  ;;  %v18653_v28 = vld [vmem:[#allocation26_spill] sm:$0xff] }
 0x297   : > { %18580 = vst [vmem:[#allocation129_spill] sm:$0xff] %v13809_v53  ;;  %18581 = vst [vmem:[#allocation130_spill] sm:$0xff] %v13813_v46  ;;  %v13879_v18 = vmul.f32 %v18605_v58, %v13753_v32  ;;  %v13899_v32 = vmul.f32 %v13526_v35, %v13797_v39  ;;  %v13915_v12 = vmul.f32 %v13602_v8, %v13822_v9  ;;  %v1798_v46 = vld [vmem:[#allocation2 + $0x21] sm:$0xff]  ;;  %v18675_v2 = vld [vmem:[#allocation29_spill] sm:$0xff] }
 0x298   : > { %18582 = vst [vmem:[#allocation131_spill] sm:$0xff] %v13817_v0  ;;  %18583 = vst [vmem:[#allocation132_spill] sm:$0xff] %v13820_v19  ;;  %v13919_v39 = vmul.f32 %v13620_v51, %v13824_v15  ;;  %v13932_v19 = vmul.f32 %v13638_v55, %v13845_v25  ;;  %v18652_v0 = vld [vmem:[#allocation76_spill] sm:$0xff]  ;;  %v14092_v22 = vld [vmem:[#allocation2 + $0x82] sm:$0xff] }
 0x299   : > { %18584 = vst [vmem:[#allocation133_spill] sm:$0xff] %v13822_v9  ;;  %18585 = vst [vmem:[#allocation134_spill] sm:$0xff] %v13824_v15  ;;  %v13936_v9 = vmul.f32 %v13636_v56, %v13867_v4  ;;  %v13940_v15 = vmul.f32 %v13642_v10, %v13869_v16  ;;  %v1797_v10 = vld [vmem:[#allocation2 + $0x19] sm:$0xff]  ;;  %v14079_v53 = vmul.f32 %v18653_v28, %v18652_v0  ;;  %v18662_v49 = vld [vmem:[#allocation27_spill] sm:$0xff] }
 0x29a   : > { %18586 = vst [vmem:[#allocation135_spill] sm:$0xff] %v13828_v50  ;;  %18587 = vst [vmem:[#allocation136_spill] sm:$0xff] %v13832_v60  ;;  %v18650_v50 = vld [vmem:[#allocation73_spill] sm:$0xff]  ;;  %v18664_v24 = vld [vmem:[#allocation34_spill] sm:$0xff] }
 0x29b   : > { %18588 = vst [vmem:[#allocation137_spill] sm:$0xff] %v13836_v52  ;;  %18589 = vst [vmem:[#allocation138_spill] sm:$0xff] %v13840_v6  ;;  %v1802_v6 = vld [vmem:[#allocation2 + $0x41] sm:$0xff]  ;;  %v18671_v55 = vld [vmem:[#allocation21_spill] sm:$0xff] }
 0x29c   : > { %18590 = vst [vmem:[#allocation139_spill] sm:$0xff] %v13843_v3  ;;  %18591 = vst [vmem:[#allocation140_spill] sm:$0xff] %v13845_v25  ;;  %v13944_v3 = vmul.f32 %v13640_v5, %v13871_v63  ;;  %v13953_v25 = vmul.f32 %v13889_v40, %v13928_v27  ;;  %v13990_v5 = vld [vmem:[%s17937_s6 + $0xb8] sm:$0xff]   ;;  %v18673_v8 = vld [vmem:[#allocation30_spill] sm:$0xff] }
 0x29d   : > { %18593 = vst [vmem:[#allocation141_spill] sm:$0xff] %v13849_v47  ;;  %18595 = vst [vmem:[#allocation142_spill] sm:$0xff] %v13853_v33  ;;  %10722 = vmatprep.subr.bf16.mxu1 %v13990_v5  ;;  %v18646_v47 = vld [vmem:[#allocation41_spill] sm:$0xff]  ;;  %v18677_v35 = vld [vmem:[#allocation38_spill] sm:$0xff] }
 0x29e   : > { %18597 = vst [vmem:[#allocation143_spill] sm:$0xff] %v13857_v59  ;;  %18599 = vst [vmem:[#allocation144_spill] sm:$0xff] %v13861_v42  ;;  %v14021_v59 = vld [vmem:[#allocation2 + $0x60] sm:$0xff] }
 0x29f   : > { %18600 = vst [vmem:[#allocation145_spill] sm:$0xff] %v13867_v4  ;;  %18601 = vst [vmem:[#allocation146_spill] sm:$0xff] %v13869_v16  ;;  %v13957_v4 = vmul.f32 %v13891_v37, %v13926_v11  ;;  %v18632_v16 = vld [vmem:[#allocation88_spill] sm:$0xff]  ;;  %v14102_v7 = vmul.f32 %v18664_v24, %v14021_v59  ;;  %v11503_v58 = vld [vmem:[%s17937_s6 + $0x40] sm:$0xff]  }
 0x2a0   : > { %18602 = vst [vmem:[#allocation147_spill] sm:$0xff] %v13871_v63  ;;  %18604 = vst [vmem:[#allocation148_spill] sm:$0xff] %v13875_v48  ;;  %v1799_v63 = vld [vmem:[#allocation2 + $0x29] sm:$0xff] }
 0x2a1   : > { %18606 = vst [vmem:[#allocation149_spill] sm:$0xff] %v13879_v18  ;;  %18608 = vst [vmem:[#allocation150_spill] sm:$0xff] %v13883_v62  ;;  %v14008_v62 = vld [vmem:[#allocation2 + $0x50] sm:$0xff] }
 0x2a2   : > { %18610 = vst [vmem:[#allocation151_spill] sm:$0xff] %v13887_v26  ;;  %18611 = vst [vmem:[#allocation152_spill] sm:$0xff] %v13889_v40  ;;  %v18629_v40 = vld [vmem:[#allocation33_spill] sm:$0xff]  ;;  %v11501_v18 = vld [vmem:[%s17937_s6 + $0x50] sm:$0xff]  }
 0x2a3   : > { %18612 = vst [vmem:[#allocation153_spill] sm:$0xff] %v13891_v37  ;;  %18613 = vst [vmem:[#allocation154_spill] sm:$0xff] %v13895_v29  ;;  %v1747_v45 = vmul.f32 %v18629_v40, %v13949_v14  ;;  %v14012_v37 = vpack.c.bf16 %v1797_v10, %v1796_v41  ;;  %v18635_v10 = vld [vmem:[#allocation70_spill] sm:$0xff]  ;;  %v18636_v41 = vld [vmem:[#allocation17_spill] sm:$0xff] }
 0x2a4   : > { %18614 = vst [vmem:[#allocation155_spill] sm:$0xff] %v13899_v32  ;;  %18615 = vst [vmem:[#allocation156_spill] sm:$0xff] %v13903_v23  ;;  %v14014_v23 = vpack.c.bf16 %v1799_v63, %v1798_v46  ;;  %v14030_v46 = vmul.f32 %v18636_v41, %v18635_v10  ;;  %v18637_v63 = vld [vmem:[#allocation71_spill] sm:$0xff]  ;;  %v18641_v10 = vld [vmem:[#allocation36_spill] sm:$0xff] }
 0x2a5   : > { %18616 = vst [vmem:[#allocation157_spill] sm:$0xff] %v13907_v30  ;;  %18617 = vst [vmem:[#allocation158_spill] sm:$0xff] %v13911_v61  ;;  %v18633_v61 = vld [vmem:[#allocation89_spill] sm:$0xff]  ;;  %10531 = vmatmul.mubr.msk.bf16.vlgmr.msra.gmra.mxu0 %vm621_vm0, %v14012_v37  ;;  %v14054_v30 = vld [vmem:[#allocation2 + $0x80] sm:$0xff] }
 0x2a6   : > { %18618 = vst [vmem:[#allocation159_spill] sm:$0xff] %v13915_v12  ;;  %18619 = vst [vmem:[#allocation160_spill] sm:$0xff] %v13919_v39  ;;  %v1772_v48 = vpack.c.bf16 %v18633_v61, %v18632_v16  ;;  %v18639_v16 = vld [vmem:[#allocation93_spill] sm:$0xff]  ;;  %10534 = vmatprep.mubr.msk.bf16.mxu0 %vm621_vm0, %v14014_v23  ;;  %v14056_v29 = vld [vmem:[#allocation2 + $0x88] sm:$0xff] }
 0x2a7   : > { %18620 = vst [vmem:[#allocation161_spill] sm:$0xff] %v13923_v13  ;;  %18621 = vst [vmem:[#allocation162_spill] sm:$0xff] %v13926_v11  ;;  %v18643_v13 = vld [vmem:[#allocation43_spill] sm:$0xff]  ;;  %v1801_v12 = vld [vmem:[#allocation2 + $0x39] sm:$0xff] }
 0x2a8   : > { %18622 = vst [vmem:[#allocation163_spill] sm:$0xff] %v13928_v27  ;;  %18623 = vst [vmem:[#allocation164_spill] sm:$0xff] %v13932_v19  ;;  %v14010_v27 = vld [vmem:[#allocation2 + $0x58] sm:$0xff]  ;;  %10574 = vmatprep.mubr.msk.bf16.mxu1 %vm621_vm0, %v1772_v48  ;;  %v14044_v19 = vld [vmem:[#allocation2 + $0x2a] sm:$0xff]  ;;  %10603 = vmatpush3.bf16.msra.mxu0 %v18643_v13 }
 0x2a9   : > { %18624 = vst [vmem:[#allocation165_spill] sm:$0xff] %v13936_v9  ;;  %18625 = vst [vmem:[#allocation166_spill] sm:$0xff] %v13940_v15  ;;  %v14023_v15 = vld [vmem:[#allocation2 + $0x68] sm:$0xff]  ;;  %v1748_v9 = vmul.f32 %v18641_v10, %v14008_v62  ;;  %v1800_v48 = vld [vmem:[#allocation2 + $0x31] sm:$0xff]  ;;  %10604 = vmatprep.subr.bf16.mxu0 %v11501_v18  ;;  %v14098_v20 = vmul.f32 %v18662_v49, %v14010_v27  ;;  %v14124_v51 = vmul.f32 %v18671_v55, %v14044_v19 }
 0x2aa   : > { %18626 = vst [vmem:[#allocation167_spill] sm:$0xff] %v13944_v3  ;;  %18627 = vst [vmem:[#allocation168_spill] sm:$0xff] %v13953_v25  ;;  %v18638_v25 = vld [vmem:[#allocation20_spill] sm:$0xff]  ;;  %v11502_v3 = vld [vmem:[%s17937_s6 + $0x48] sm:$0xff]   ;;  %v1751_v33 = vmul.f32 %v18646_v47, %v14023_v15  ;;  %v14106_v57 = vmul.f32 %v18629_v40, %v14023_v15  ;;  %v14138_v1 = vpack.c.bf16 %v1801_v12, %v1800_v48 }
 0x2ab   : > { %18628 = vst [vmem:[#allocation169_spill] sm:$0xff] %v13957_v4  ;;  %18630 = vst [vmem:[#allocation33_spill] sm:$0xff] %v14012_v37  ;;  %v14034_v61 = vmul.f32 %v18638_v25, %v18637_v63  ;;  %v1773_v4 = vpack.c.bf16 %v18640_v44, %v18639_v16  ;;  %v18642_v63 = vld [vmem:[#allocation35_spill] sm:$0xff]  ;;  %v18645_v26 = vld [vmem:[#allocation42_spill] sm:$0xff]  ;;  %v14075_v60 = vmul.f32 %v18638_v25, %v18650_v50 }
 0x2ac   : > { %18631 = vst [vmem:[#allocation170_spill] sm:$0xff] %v14014_v23  ;;  %18634 = vst [vmem:[#allocation88_spill] sm:$0xff] %v14023_v15  ;;  %v1749_v39 = vmul.f32 %v18642_v63, %v14010_v27  ;;  %v18644_v16 = vld [vmem:[#allocation95_spill] sm:$0xff]  ;;  %v1750_v42 = vmul.f32 %v18645_v26, %v14021_v59  ;;  %v18647_v13 = vld [vmem:[#allocation72_spill] sm:$0xff]  ;;  %v14112_v23 = vmul.f32 %v18645_v26, %v14054_v30  ;;  %10605 = vmatpush3.bf16.msra.mxu0 %v11501_v18 }
 0x2ad   : > { %v1774_v44 = vpack.c.bf16 %v1747_v45, %v18644_v16  ;;  %v14058_v32 = vld [vmem:[#allocation2 + $0x42] sm:$0xff]  ;;  %v14066_v52 = vmul.f32 %v18636_v41, %v18647_v13  ;;  %10575 = vmatmul.mubr.msk.bf16.gmra.mxu1 %vm621_vm0, %v1773_v4  ;;  %v14069_v45 = vld [vmem:[#allocation2 + $0x4a] sm:$0xff]  ;;  %18651 = vst [vmem:[#allocation17_spill] sm:$0xff] %v14075_v60  ;;  %18654 = vst [vmem:[#allocation71_spill] sm:$0xff] %v14079_v53  ;;  %v14083_v41 = vmul.f32 %v18655_v34, %v13949_v14 }
 0x2ae   : > { %v14071_v16 = vld [vmem:[#allocation2 + $0x62] sm:$0xff]  ;;  %v14087_v4 = vmul.f32 %v18657_v17, %v14008_v62  ;;  %18659 = vst [vmem:[#allocation94_spill] sm:$0xff] %v14090_v54  ;;  %18660 = vst [vmem:[#allocation36_spill] sm:$0xff] %v14092_v22  ;;  %v14094_v25 = vld [vmem:[#allocation2 + $0x8a] sm:$0xff]  ;;  %v14116_v37 = vmul.f32 %v18646_v47, %v14056_v29  ;;  %v14132_v43 = vmul.f32 %v18675_v2, %v14069_v45  ;;  %10606 = vmatprep.subr.bf16.mxu0 %v11502_v3 }
 0x2af   : > { %18648 = vst [vmem:[#allocation89_spill] sm:$0xff] %v14066_v52  ;;  %18649 = vst [vmem:[#allocation70_spill] sm:$0xff] %v14071_v16  ;;  %10578 = vmatprep.mubr.msk.bf16.mxu1 %vm621_vm0, %v1774_v44  ;;  %v18669_v11 = vld [vmem:[#allocation22_spill] sm:$0xff]  ;;  %v14128_v44 = vmul.f32 %v18673_v8, %v14058_v32  ;;  %v14136_v31 = vmul.f32 %v18677_v35, %v14071_v16  ;;  %v18680_v18 = vld [vmem:[#allocation37_spill] sm:$0xff]  ;;  %v14155_v16 = vpack.c.bf16 %v1803_v21, %v1802_v6 }
 0x2b0   : > { %18656 = vst [vmem:[#allocation20_spill] sm:$0xff] %v14083_v41  ;;  %18658 = vst [vmem:[#allocation93_spill] sm:$0xff] %v14087_v4  ;;  %v14120_v56 = vmul.f32 %v18669_v11, %v14026_v38  ;;  %v14145_v36 = vmul.f32 %v18680_v18, %v14090_v54  ;;  %v18682_v47 = vld [vmem:[#allocation18_spill] sm:$0xff]  ;;  %v18684_v63 = vld [vmem:[#allocation13_spill] sm:$0xff]  ;;  %10535 = vmatmul.mubr.msk.bf16.gmra.mxu0 %vm621_vm0, %v14138_v1  ;;  %v1775_v12 = vpack.c.bf16 %v1749_v39, %v1748_v9 }
 0x2b1   : > { %18661 = vst [vmem:[#allocation43_spill] sm:$0xff] %v14094_v25  ;;  %18663 = vst [vmem:[#allocation95_spill] sm:$0xff] %v14098_v20  ;;  %v14149_v26 = vmul.f32 %v18682_v47, %v14092_v22  ;;  %v14153_v15 = vmul.f32 %v18684_v63, %v14094_v25  ;;  %v1776_v48 = vpack.c.bf16 %v1751_v33, %v1750_v42  ;;  %10538 = vmatprep.mubr.msk.bf16.mxu0 %vm621_vm0, %v14155_v16  ;;  %v14171_v9 = vld [vmem:[%s17937_s6 + $0x98] sm:$0xff]   ;;  %v18688_v22 = vld [vmem:[#allocation12_spill] sm:$0xff] }
 0x2b2   : > { %18665 = vst [vmem:[#allocation72_spill] sm:$0xff] %v14102_v7  ;;  %18666 = vst [vmem:[#allocation73_spill] sm:$0xff] %v14106_v57  ;;  %10607 = vmatpush3.bf16.msra.mxu0 %v11502_v3  ;;  %v1804_v39 = vld [vmem:[#allocation2 + $0x51] sm:$0xff]  ;;  %v1805_v42 = vld [vmem:[#allocation2 + $0x59] sm:$0xff] }
 0x2b3   : > { %18667 = vst [vmem:[#allocation76_spill] sm:$0xff] %v14112_v23  ;;  %18668 = vst [vmem:[#allocation26_spill] sm:$0xff] %v14116_v37  ;;  %10608 = vmatprep.subr.bf16.mxu0 %v11503_v58  ;;  %v18687_v3 = vld [vmem:[#allocation77_spill] sm:$0xff]  ;;  %v18689_v33 = vld [vmem:[#allocation78_spill] sm:$0xff] }
 0x2b4   : > { %18670 = vst [vmem:[#allocation25_spill] sm:$0xff] %v14120_v56  ;;  %18672 = vst [vmem:[#allocation28_spill] sm:$0xff] %v14124_v51  ;;  %v1752_v54 = vmul.f32 %v18688_v22, %v18687_v3  ;;  %v18690_v23 = vld [vmem:[#allocation16_spill] sm:$0xff]  ;;  %v1806_v21 = vld [vmem:[#allocation2 + $0x61] sm:$0xff] }
 0x2b5   : > { %18674 = vst [vmem:[#allocation27_spill] sm:$0xff] %v14128_v44  ;;  %18676 = vst [vmem:[#allocation34_spill] sm:$0xff] %v14132_v43  ;;  %10579 = vmatmul.mubr.msk.bf16.gmra.mxu1 %vm621_vm0, %v1775_v12  ;;  %v1753_v37 = vmul.f32 %v18690_v23, %v18689_v33  ;;  %v1807_v56 = vld [vmem:[#allocation2 + $0x69] sm:$0xff]  ;;  %v14194_v44 = vpack.c.bf16 %v1805_v42, %v1804_v39  ;;  %v18696_v39 = vld [vmem:[#allocation50_spill] sm:$0xff] }
 0x2b6   : > { %18678 = vst [vmem:[#allocation22_spill] sm:$0xff] %v14136_v31  ;;  %18679 = vst [vmem:[#allocation30_spill] sm:$0xff] %v14138_v1  ;;  %10582 = vmatprep.mubr.msk.bf16.mxu1 %vm621_vm0, %v1776_v48  ;;  %v18691_v51 = vld [vmem:[#allocation48_spill] sm:$0xff]  ;;  %v18692_v7 = vld [vmem:[#allocation47_spill] sm:$0xff]  ;;  %10609 = vmatpush3.bf16.msra.mxu0 %v11503_v58  ;;  %v14197_v25 = vpack.c.bf16 %v1807_v56, %v1806_v21 }
 0x2b7   : > { %18681 = vst [vmem:[#allocation29_spill] sm:$0xff] %v14145_v36  ;;  %18683 = vst [vmem:[#allocation38_spill] sm:$0xff] %v14149_v26  ;;  %v1754_v48 = vmul.f32 %v18691_v51, %v14054_v30  ;;  %v1755_v6 = vmul.f32 %v18692_v7, %v14056_v29  ;;  %10682 = vmatprep.subr.bf16.mxu0 %v14171_v9  ;;  %v1777_v12 = vpack.c.bf16 %v1753_v37, %v1752_v54  ;;  %v1809_v31 = vld [vmem:[#allocation2 + $0x79] sm:$0xff]  ;;  %v18695_v58 = vld [vmem:[#allocation79_spill] sm:$0xff] }
 0x2b8   : > { %18685 = vst [vmem:[#allocation37_spill] sm:$0xff] %v14153_v15  ;;  %18686 = vst [vmem:[#allocation18_spill] sm:$0xff] %v14155_v16  ;;  %10539 = vmatmul.mubr.msk.bf16.gmra.mxu0 %vm621_vm0, %v14194_v44  ;;  %v1808_v15 = vld [vmem:[#allocation2 + $0x71] sm:$0xff]  ;;  %v1756_v42 = vmul.f32 %v18696_v39, %v18695_v58  ;;  %v18697_v36 = vld [vmem:[#allocation82_spill] sm:$0xff] }
 0x2b9   : > { %18693 = vst [vmem:[#allocation13_spill] sm:$0xff] %v14194_v44  ;;  %18694 = vst [vmem:[#allocation77_spill] sm:$0xff] %v14197_v25  ;;  %v1778_v26 = vpack.c.bf16 %v1755_v6, %v1754_v48  ;;  %10542 = vmatprep.mubr.msk.bf16.mxu0 %vm621_vm0, %v14197_v25  ;;  %v18698_v56 = vld [vmem:[#allocation49_spill] sm:$0xff]  ;;  %v1810_v43 = vld [vmem:[#allocation2 + $0x81] sm:$0xff]  ;;  %v14213_v53 = vpack.c.bf16 %v1809_v31, %v1808_v15 }
 0x2ba   : > { %v1757_v21 = vmul.f32 %v18698_v56, %v18697_v36  ;;  %v1811_v57 = vld [vmem:[#allocation2 + $0x89] sm:$0xff]  ;;  %v1812_v52 = vld [vmem:[#allocation2 + $0x91] sm:$0xff]  ;;  %v1813_v60 = vld [vmem:[#allocation2 + $0x99] sm:$0xff] }
 0x2bb   : > { %v18699_v4 = vld [vmem:[#allocation83_spill] sm:$0xff]  ;;  %v18700_v37 = vld [vmem:[#allocation56_spill] sm:$0xff]  ;;  %18703 = vst [vmem:[#allocation12_spill] sm:$0xff] %v14213_v53  ;;  %v18705_v25 = vld [vmem:[#allocation85_spill] sm:$0xff] }
 0x2bc   : > { %v1758_v54 = vmul.f32 %v18700_v37, %v18699_v4  ;;  %v18701_v6 = vld [vmem:[#allocation84_spill] sm:$0xff]  ;;  %v18702_v48 = vld [vmem:[#allocation55_spill] sm:$0xff]  ;;  %v1779_v41 = vpack.c.bf16 %v1757_v21, %v1756_v42  ;;  %v18706_v44 = vld [vmem:[#allocation58_spill] sm:$0xff] }
 0x2bd   : > { %10583 = vmatmul.mubr.msk.bf16.gmra.mxu1 %vm621_vm0, %v1777_v12  ;;  %v1759_v20 = vmul.f32 %v18702_v48, %v18701_v6  ;;  %v14215_v12 = vpack.c.bf16 %v1811_v57, %v1810_v43  ;;  %v1760_v31 = vmul.f32 %v18706_v44, %v18705_v25  ;;  %v18707_v15 = vld [vmem:[#allocation86_spill] sm:$0xff]  ;;  %v18708_v43 = vld [vmem:[#allocation57_spill] sm:$0xff]  ;;  %v1815_v21 = vld [vmem:[#allocation2 + $0xa9] sm:$0xff]  ;;  %v14231_v48 = vpack.c.bf16 %v1813_v60, %v1812_v52 }
 0x2be   : > { %10586 = vmatprep.mubr.msk.bf16.mxu1 %vm621_vm0, %v1778_v26  ;;  %v1761_v57 = vmul.f32 %v18708_v43, %v18707_v15  ;;  %v1814_v42 = vld [vmem:[#allocation2 + $0xa1] sm:$0xff]  ;;  %v18712_v1 = vld [vmem:[#allocation44_spill] sm:$0xff]  ;;  %v1817_v44 = vld [vmem:[#allocation2 + $0xb9] sm:$0xff] }
 0x2bf   : > { %18704 = vst [vmem:[#allocation78_spill] sm:$0xff] %v14215_v12  ;;  %v1780_v26 = vpack.c.bf16 %v1759_v20, %v1758_v54  ;;  %v18709_v16 = vld [vmem:[#allocation87_spill] sm:$0xff]  ;;  %v18711_v54 = vld [vmem:[#allocation90_spill] sm:$0xff]  ;;  %18713 = vst [vmem:[#allocation16_spill] sm:$0xff] %v14231_v48 }
 0x2c0   : > { %10543 = vmatmul.mubr.msk.bf16.gmra.mxu0 %vm621_vm0, %v14213_v53  ;;  %v18710_v53 = vld [vmem:[#allocation63_spill] sm:$0xff]  ;;  %v1781_v37 = vpack.c.bf16 %v1761_v57, %v1760_v31  ;;  %v1816_v43 = vld [vmem:[#allocation2 + $0xb1] sm:$0xff] }
 0x2c1   : > { %10546 = vmatprep.mubr.msk.bf16.mxu0 %vm621_vm0, %v14215_v12  ;;  %v1762_v20 = vmul.f32 %v18710_v53, %v18709_v16  ;;  %v1763_v12 = vmul.f32 %v18712_v1, %v18711_v54  ;;  %v18715_v53 = vld [vmem:[#allocation91_spill] sm:$0xff]  ;;  %v18716_v1 = vld [vmem:[#allocation65_spill] sm:$0xff]  ;;  %v18717_v52 = vld [vmem:[#allocation92_spill] sm:$0xff]  ;;  %v14249_v15 = vpack.c.bf16 %v1817_v44, %v1816_v43 }
 0x2c2   : > { %v1764_v60 = vmul.f32 %v18716_v1, %v18715_v53  ;;  %v1818_v31 = vld [vmem:[#allocation2 + $0xc1] sm:$0xff]  ;;  %v1819_v57 = vld [vmem:[#allocation2 + $0xc9] sm:$0xff]  ;;  %v18719_v54 = vld [vmem:[#allocation97_spill] sm:$0xff] }
 0x2c3   : > { %v18722_v16 = vld [vmem:[#allocation80_spill] sm:$0xff]  ;;  %18723 = vst [vmem:[#allocation47_spill] sm:$0xff] %v14249_v15  ;;  %v1821_v1 = vld [vmem:[#allocation2 + $0xd9] sm:$0xff] }
 0x2c4   : > { %v18727_v43 = vld [vmem:[#allocation108_spill] sm:$0xff] }
 0x2c5   : > { %10587 = vmatmul.mubr.msk.bf16.gmra.mxu1 %vm621_vm0, %v1779_v41  ;;  %v14233_v41 = vpack.c.bf16 %v1815_v21, %v1814_v42  ;;  %v18718_v42 = vld [vmem:[#allocation64_spill] sm:$0xff] }
 0x2c6   : > { %10590 = vmatprep.mubr.msk.bf16.mxu1 %vm621_vm0, %v1780_v26  ;;  %v1782_v26 = vpack.c.bf16 %v1763_v12, %v1762_v20  ;;  %v1765_v21 = vmul.f32 %v18718_v42, %v18717_v52  ;;  %v18721_v20 = vld [vmem:[#allocation98_spill] sm:$0xff]  ;;  %v1820_v42 = vld [vmem:[#allocation2 + $0xd1] sm:$0xff] }
 0x2c7   : > { %18714 = vst [vmem:[#allocation48_spill] sm:$0xff] %v14233_v41 }
 0x2c8   : > { %10547 = vmatmul.mubr.msk.bf16.gmra.mxu0 %vm621_vm0, %v14231_v48  ;;  %v18720_v48 = vld [vmem:[#allocation81_spill] sm:$0xff]  ;;  %v1783_v25 = vpack.c.bf16 %v1765_v21, %v1764_v60  ;;  %v1822_v60 = vld [vmem:[#allocation2 + $0xe1] sm:$0xff]  ;;  %v1823_v21 = vld [vmem:[#allocation2 + $0xe9] sm:$0xff] }
 0x2c9   : > { %10550 = vmatprep.mubr.msk.bf16.mxu0 %vm621_vm0, %v14233_v41  ;;  %v1766_v12 = vmul.f32 %v18720_v48, %v18719_v54  ;;  %v1767_v41 = vmul.f32 %v18722_v16, %v18721_v20  ;;  %v18725_v48 = vld [vmem:[#allocation99_spill] sm:$0xff]  ;;  %v18726_v16 = vld [vmem:[#allocation124_spill] sm:$0xff]  ;;  %v14263_v20 = vpack.c.bf16 %v1821_v1, %v1820_v42  ;;  %v18731_v1 = vpack.c.bf16 %v14034_v61, %v14030_v46  ;;  %v14290_v46 = vld [vmem:[#allocation2 + $0x1a] sm:$0xff] }
 0x2ca   : > { %v1768_v44 = vmul.f32 %v18726_v16, %v18725_v48  ;;  %v18732_v42 = vld [vmem:[#allocation15_spill] sm:$0xff]  ;;  %v14288_v16 = vld [vmem:[#allocation2 + $0x12] sm:$0xff] }
 0x2cb   : > { %18729 = vst [vmem:[#allocation50_spill] sm:$0xff] %v14263_v20 }
 0x2cd   : > { %10591 = vmatmul.mubr.msk.bf16.gmra.mxu1 %vm621_vm0, %v1781_v37  ;;  %v14251_v37 = vpack.c.bf16 %v1819_v57, %v1818_v31  ;;  %v18728_v31 = vld [vmem:[#allocation123_spill] sm:$0xff] }
 0x2ce   : > { %10594 = vmatprep.mubr.msk.bf16.mxu1 %vm621_vm0, %v1782_v26  ;;  %v1784_v26 = vpack.c.bf16 %v1767_v41, %v1766_v12  ;;  %v1769_v57 = vmul.f32 %v18728_v31, %v18727_v43  ;;  %v14265_v41 = vpack.c.bf16 %v1823_v21, %v1822_v60  ;;  %v2318_v12 = vld [vmem:[#allocation2 + $0xa] sm:$0xff]  ;;  %v1825_v31 = vld [vmem:[#allocation2 + $0xf9] sm:$0xff] }
 0x2cf   : > { %18724 = vst [vmem:[#allocation79_spill] sm:$0xff] %v14251_v37 }
 0x2d0   : > { %10551 = vmatmul.mubr.msk.bf16.gmra.mxu0 %vm621_vm0, %v14249_v15  ;;  %18730 = vst [vmem:[#allocation82_spill] sm:$0xff] %v14265_v41  ;;  %v1824_v15 = vld [vmem:[#allocation2 + $0xf1] sm:$0xff] }
 0x2d1   : > { %10554 = vmatprep.mubr.msk.bf16.mxu0 %vm621_vm0, %v14251_v37  ;;  %v1785_v37 = vpack.c.bf16 %v1769_v57, %v1768_v44  ;;  %v2865_v44 = vmul.f32 %v18732_v42, %v18647_v13  ;;  %v18733_v57 = vld [vmem:[#allocation14_spill] sm:$0xff]  ;;  %v11514_v42 = vld [vmem:[%s17937_s6 + $0xa8] sm:$0xff]  }
 0x2d2   : > { %v2866_v60 = vmul.f32 %v18733_v57, %v18650_v50  ;;  %v11513_v50 = vld [vmem:[%s17937_s6 + $0xb0] sm:$0xff]   ;;  %v2872_v57 = vmul.f32 %v18629_v40, %v14010_v27 }
 0x2d3   : > { %v18740_v40 = vld [vmem:[#allocation32_spill] sm:$0xff] }
 0x2d5   : > { %10595 = vmatmul.mubr.msk.bf16.gmra.mxu1 %vm621_vm0, %v1783_v25  ;;  %v2317_v25 = vld [vmem:[#allocation2 + $0x2] sm:$0xff] }
 0x2d6   : > { %10598 = vmatprep.mubr.msk.bf16.mxu1 %vm621_vm0, %v1784_v26  ;;  %v2510_v26 = vmul.f32 %v18671_v55, %v2318_v12  ;;  %v2509_v21 = vmul.f32 %v18669_v11, %v2317_v25  ;;  %v14286_v55 = vpack.c.bf16 %v1825_v31, %v1824_v15  ;;  %v18738_v15 = vld [vmem:[#allocation23_spill] sm:$0xff]  ;;  %v2513_v31 = vmul.f32 %v18673_v8, %v14026_v38 }
 0x2d7   : > { %v2869_v25 = vmul.f32 %v18657_v17, %v18652_v0  ;;  %v18741_v0 = vld [vmem:[#allocation101_spill] sm:$0xff] }
 0x2d8   : > { %10555 = vmatmul.mubr.msk.bf16.gmra.mxu0 %vm621_vm0, %v14263_v20  ;;  %v18735_v20 = vld [vmem:[#allocation75_spill] sm:$0xff]  ;;  %18736 = vst [vmem:[#allocation49_spill] sm:$0xff] %v14286_v55  ;;  %v2541_v61 = vpack.c.bf16 %v2510_v26, %v2509_v21  ;;  %v2870_v26 = vmul.f32 %v18662_v49, %v13949_v14  ;;  %v11515_v49 = vld [vmem:[%s17937_s6 + $0xa0] sm:$0xff]  }
 0x2d9   : > { %10558 = vmatprep.mubr.msk.bf16.mxu0 %vm621_vm0, %v14265_v41  ;;  %v18734_v41 = vld [vmem:[#allocation74_spill] sm:$0xff]  ;;  %v2868_v12 = vmul.f32 %v18655_v34, %v18735_v20  ;;  %v18737_v34 = vld [vmem:[#allocation24_spill] sm:$0xff]  ;;  %v2512_v20 = vmul.f32 %v18738_v15, %v14290_v46  ;;  %v18742_v21 = vld [vmem:[#allocation31_spill] sm:$0xff] }
 0x2da   : > { %v2511_v13 = vmul.f32 %v18737_v34, %v14288_v16  ;;  %v2898_v14 = vpack.c.bf16 %v2870_v26, %v2869_v25  ;;  %v18746_v25 = vld [vmem:[#allocation41_spill] sm:$0xff] }
 0x2db   : > { %v2876_v26 = vmul.f32 %v18746_v25, %v18689_v33  ;;  %v18748_v33 = vld [vmem:[#allocation40_spill] sm:$0xff]  ;;  %v18756_v25 = vld [vmem:[#allocation45_spill] sm:$0xff] }
 0x2dd   : > { %10599 = vmatmul.mubr.msk.bf16.gmra.mxu1 %vm621_vm0, %v1785_v37  ;;  %v2867_v37 = vmul.f32 %v18653_v28, %v18734_v41  ;;  %v2514_v41 = vmul.f32 %v18675_v2, %v14044_v19 }
 0x2de   : > { %10650 = vmatprep.mubr.msk.bf16.mxu1 %vm621_vm0, %v18731_v1  ;;  %v2896_v1 = vpack.c.bf16 %v2866_v60, %v2865_v44  ;;  %v2871_v44 = vmul.f32 %v18664_v24, %v14008_v62  ;;  %v2542_v60 = vpack.c.bf16 %v2512_v20, %v2511_v13  ;;  %v18739_v62 = vld [vmem:[#allocation100_spill] sm:$0xff]  ;;  %v14349_v20 = vld [vmem:[%s17937_s6 + $0xf8] sm:$0xff]  }
 0x2df   : > { %v2897_v28 = vpack.c.bf16 %v2868_v12, %v2867_v37  ;;  %v2543_v17 = vpack.c.bf16 %v2514_v41, %v2513_v31  ;;  %v2515_v24 = vmul.f32 %v18740_v40, %v18739_v62  ;;  %v2516_v37 = vmul.f32 %v18742_v21, %v18741_v0  ;;  %v11510_v12 = vld [vmem:[%s17937_s6 + $0x88] sm:$0xff]   ;;  %v18745_v31 = vld [vmem:[#allocation42_spill] sm:$0xff] }
 0x2e0   : > { %10559 = vmatmul.mubr.msk.bf16.gmra.mxu0 %vm621_vm0, %v14286_v55  ;;  %v2899_v27 = vpack.c.bf16 %v2872_v57, %v2871_v44  ;;  %v2875_v41 = vmul.f32 %v18745_v31, %v18687_v3  ;;  %v18747_v57 = vld [vmem:[#allocation102_spill] sm:$0xff] }
 0x2e1   : > { %10610 = vmatprep.mubr.msk.bf16.mxu0 %vm621_vm0, %v2541_v61  ;;  %v2517_v61 = vmul.f32 %v18677_v35, %v14058_v32 }
 0x2e2   : > { %v2901_v3 = vpack.c.bf16 %v2876_v26, %v2875_v41  ;;  %v18759_v26 = vld [vmem:[#allocation43_spill] sm:$0xff] }
 0x2e5   : > { %10651 = vmatmul.mubr.msk.bf16.vlgmr.msra.gmra.mxu1 %vm621_vm0, %v2896_v1  ;;  %v2873_v1 = vmul.f32 %v18641_v10, %v14021_v59  ;;  %v11511_v59 = vld [vmem:[%s17937_s6 + $0x80] sm:$0xff]  }
 0x2e6   : > { %10654 = vmatprep.mubr.msk.bf16.mxu1 %vm621_vm0, %v2897_v28  ;;  %10723 = vmatpush3.bf16.msra.mxu1 %v13990_v5  ;;  %v11509_v5 = vld [vmem:[%s17937_s6 + $0x90] sm:$0xff]   ;;  %v18744_v28 = vld [vmem:[#allocation35_spill] sm:$0xff] }
 0x2e7   : > { %10724 = vmatprep.subr.bf16.mxu1 %v11513_v50 }
 0x2e8   : > { %10611 = vmatmul.mubr.msk.bf16.vlgmr.msra.gmra.mxu0 %vm621_vm0, %v2542_v60  ;;  %v2519_v60 = vmul.f32 %v18748_v33, %v18747_v57 }
 0x2e9   : > { %10683 = vmatpush3.bf16.msra.mxu0 %v14171_v9  ;;  %10614 = vmatprep.mubr.msk.bf16.mxu0 %vm621_vm0, %v2543_v17  ;;  %v2518_v9 = vmul.f32 %v18680_v18, %v14069_v45  ;;  %v18750_v17 = vld [vmem:[#allocation39_spill] sm:$0xff] }
 0x2ea   : > { %10725 = vmatpush3.bf16.msra.mxu1 %v11513_v50  ;;  %10684 = vmatprep.subr.bf16.mxu0 %v11509_v5  ;;  %v18743_v50 = vld [vmem:[#allocation88_spill] sm:$0xff] }
 0x2eb   : > { %10726 = vmatprep.subr.bf16.mxu1 %v11514_v42  ;;  %v2874_v13 = vmul.f32 %v18744_v28, %v18743_v50  ;;  %v2545_v10 = vpack.c.bf16 %v2518_v9, %v2517_v61  ;;  %v2877_v61 = vmul.f32 %v18688_v22, %v14054_v30  ;;  %v2878_v9 = vmul.f32 %v18690_v23, %v14056_v29  ;;  %v18753_v30 = vld [vmem:[#allocation109_spill] sm:$0xff]  ;;  %v18754_v22 = vld [vmem:[#allocation46_spill] sm:$0xff] }
 0x2ec   : > { %v2880_v50 = vmul.f32 %v18692_v7, %v18697_v36  ;;  %v2523_v23 = vmul.f32 %v18754_v22, %v18753_v30  ;;  %v18755_v29 = vld [vmem:[#allocation110_spill] sm:$0xff]  ;;  %v18757_v36 = vld [vmem:[#allocation36_spill] sm:$0xff] }
 0x2ed   : > { %10655 = vmatmul.mubr.msk.bf16.gmra.mxu1 %vm621_vm0, %v2898_v14  ;;  %10685 = vmatpush3.bf16.msra.mxu0 %v11509_v5  ;;  %v2900_v44 = vpack.c.bf16 %v2874_v13, %v2873_v1  ;;  %v18749_v5 = vld [vmem:[#allocation103_spill] sm:$0xff]  ;;  %v2879_v1 = vmul.f32 %v18691_v51, %v18695_v58  ;;  %v2902_v31 = vpack.c.bf16 %v2878_v9, %v2877_v61  ;;  %v18758_v7 = vld [vmem:[#allocation52_spill] sm:$0xff] }
 0x2ee   : > { %10658 = vmatprep.mubr.msk.bf16.mxu1 %vm621_vm0, %v2899_v27  ;;  %10727 = vmatpush3.bf16.msra.mxu1 %v11514_v42  ;;  %v2544_v42 = vpack.c.bf16 %v2516_v37, %v2515_v24  ;;  %v2520_v14 = vmul.f32 %v18750_v17, %v18749_v5  ;;  %v18751_v27 = vld [vmem:[#allocation70_spill] sm:$0xff]  ;;  %v2524_v51 = vmul.f32 %v18756_v25, %v18755_v29 }
 0x2ef   : > { %10728 = vmatprep.subr.bf16.mxu1 %v11515_v49  ;;  %10686 = vmatprep.subr.bf16.mxu0 %v11510_v12  ;;  %v2521_v24 = vmul.f32 %v18682_v47, %v18751_v27  ;;  %v18752_v37 = vld [vmem:[#allocation94_spill] sm:$0xff]  ;;  %v2903_v41 = vpack.c.bf16 %v2880_v50, %v2879_v1  ;;  %v2525_v58 = vmul.f32 %v18758_v7, %v18757_v36 }
 0x2f0   : > { %10615 = vmatmul.mubr.msk.bf16.gmra.mxu0 %vm621_vm0, %v2544_v42  ;;  %v2546_v28 = vpack.c.bf16 %v2520_v14, %v2519_v60  ;;  %v18760_v42 = vld [vmem:[#allocation51_spill] sm:$0xff]  ;;  %v18762_v60 = vld [vmem:[#allocation56_spill] sm:$0xff]  ;;  %v2548_v9 = vpack.c.bf16 %v2524_v51, %v2523_v23 }
 0x2f1   : > { %10618 = vmatprep.mubr.msk.bf16.mxu0 %vm621_vm0, %v2545_v10  ;;  %10687 = vmatpush3.bf16.msra.mxu0 %v11510_v12  ;;  %v2522_v12 = vmul.f32 %v18684_v63, %v18752_v37  ;;  %v2881_v10 = vmul.f32 %v18696_v39, %v18699_v4  ;;  %v18767_v39 = vld [vmem:[#allocation117_spill] sm:$0xff]  ;;  %v18772_v23 = vld [vmem:[#allocation59_spill] sm:$0xff] }
 0x2f2   : > { %10729 = vmatpush3.bf16.msra.mxu1 %v11515_v49  ;;  %10688 = vmatprep.subr.bf16.mxu0 %v11511_v59  ;;  %v14369_v49 = vld [vmem:[%s17937_s6 + $0xd8] sm:$0xff]  }
 0x2f3   : > { %10802 = vmatprep.subr.bf16.mxu1 %v14349_v20  ;;  %v2547_v13 = vpack.c.bf16 %v2522_v12, %v2521_v24  ;;  %v18763_v24 = vld [vmem:[#allocation86_spill] sm:$0xff]  ;;  %v18764_v12 = vld [vmem:[#allocation55_spill] sm:$0xff] }
 0x2f4   : > { %v2884_v61 = vmul.f32 %v18764_v12, %v18763_v24  ;;  %v18771_v24 = vld [vmem:[#allocation125_spill] sm:$0xff] }
 0x2f5   : > { %10659 = vmatmul.mubr.msk.bf16.gmra.mxu1 %vm621_vm0, %v2900_v44  ;;  %10689 = vmatpush3.bf16.msra.mxu0 %v11511_v59  ;;  %v2526_v59 = vmul.f32 %v18760_v42, %v18759_v26  ;;  %v2882_v44 = vmul.f32 %v18698_v56, %v18701_v6  ;;  %v18769_v6 = vld [vmem:[#allocation118_spill] sm:$0xff]  ;;  %v2530_v51 = vmul.f32 %v18772_v23, %v18771_v24 }
 0x2f6   : > { %10662 = vmatprep.mubr.msk.bf16.mxu1 %vm621_vm0, %v2901_v3  ;;  %10762 = vmatprep.subr.bf16.mxu0 %v14369_v49  ;;  %v18761_v3 = vld [vmem:[#allocation85_spill] sm:$0xff]  ;;  %v18780_v24 = vld [vmem:[#allocation62_spill] sm:$0xff] }
 0x2f7   : > { %v2883_v14 = vmul.f32 %v18762_v60, %v18761_v3  ;;  %v2549_v1 = vpack.c.bf16 %v2526_v59, %v2525_v58  ;;  %v2904_v50 = vpack.c.bf16 %v2882_v44, %v2881_v10  ;;  %v18770_v3 = vld [vmem:[#allocation60_spill] sm:$0xff]  ;;  %v18773_v58 = vld [vmem:[#allocation87_spill] sm:$0xff]  ;;  %v18774_v59 = vld [vmem:[#allocation58_spill] sm:$0xff] }
 0x2f8   : > { %10619 = vmatmul.mubr.msk.bf16.gmra.mxu0 %vm621_vm0, %v2546_v28  ;;  %v2529_v60 = vmul.f32 %v18770_v3, %v18769_v6  ;;  %v2885_v10 = vmul.f32 %v18774_v59, %v18773_v58  ;;  %v18775_v44 = vld [vmem:[#allocation90_spill] sm:$0xff]  ;;  %v18781_v59 = vld [vmem:[#allocation127_spill] sm:$0xff] }
 0x2f9   : > { %10622 = vmatprep.mubr.msk.bf16.mxu0 %vm621_vm0, %v2547_v13  ;;  %v2905_v28 = vpack.c.bf16 %v2884_v61, %v2883_v14  ;;  %v18765_v13 = vld [vmem:[#allocation116_spill] sm:$0xff]  ;;  %v18776_v14 = vld [vmem:[#allocation57_spill] sm:$0xff]  ;;  %v18777_v61 = vld [vmem:[#allocation63_spill] sm:$0xff] }
 0x2fa   : > { %v2886_v12 = vmul.f32 %v18776_v14, %v18775_v44  ;;  %v18784_v14 = vld [vmem:[#allocation67_spill] sm:$0xff] }
 0x2fc   : > { %v2906_v3 = vpack.c.bf16 %v2886_v12, %v2885_v10  ;;  %v18790_v12 = vld [vmem:[#allocation81_spill] sm:$0xff] }
 0x2fd   : > { %10663 = vmatmul.mubr.msk.bf16.gmra.mxu1 %vm621_vm0, %v2902_v31  ;;  %v18766_v31 = vld [vmem:[#allocation54_spill] sm:$0xff] }
 0x2fe   : > { %10666 = vmatprep.mubr.msk.bf16.mxu1 %vm621_vm0, %v2903_v41  ;;  %v2527_v4 = vmul.f32 %v18766_v31, %v18765_v13  ;;  %v18768_v41 = vld [vmem:[#allocation53_spill] sm:$0xff] }
 0x2ff   : > { %v2528_v56 = vmul.f32 %v18768_v41, %v18767_v39  ;;  %v2551_v41 = vpack.c.bf16 %v2530_v51, %v2529_v60  ;;  %v18782_v31 = vld [vmem:[#allocation61_spill] sm:$0xff]  ;;  %v18789_v51 = vld [vmem:[#allocation64_spill] sm:$0xff] }
 0x300   : > { %10623 = vmatmul.mubr.msk.bf16.gmra.mxu0 %vm621_vm0, %v2548_v9  ;;  %v2887_v9 = vmul.f32 %v18777_v61, %v18715_v53  ;;  %v2532_v44 = vmul.f32 %v18782_v31, %v18781_v59  ;;  %v18783_v53 = vld [vmem:[#allocation132_spill] sm:$0xff] }
 0x301   : > { %10626 = vmatprep.mubr.msk.bf16.mxu0 %vm621_vm0, %v2549_v1  ;;  %v18778_v1 = vld [vmem:[#allocation44_spill] sm:$0xff]  ;;  %v2550_v55 = vpack.c.bf16 %v2528_v56, %v2527_v4  ;;  %v2533_v61 = vmul.f32 %v18784_v14, %v18783_v53  ;;  %v18786_v4 = vld [vmem:[#allocation66_spill] sm:$0xff] }
 0x305   : > { %10667 = vmatmul.mubr.msk.bf16.gmra.mxu1 %vm621_vm0, %v2904_v50  ;;  %v2888_v50 = vmul.f32 %v18778_v1, %v18717_v52  ;;  %v18785_v52 = vld [vmem:[#allocation133_spill] sm:$0xff]  ;;  %v18791_v1 = vld [vmem:[#allocation80_spill] sm:$0xff] }
 0x306   : > { %10670 = vmatprep.mubr.msk.bf16.mxu1 %vm621_vm0, %v2905_v28  ;;  %v18779_v28 = vld [vmem:[#allocation126_spill] sm:$0xff]  ;;  %v2534_v56 = vmul.f32 %v18786_v4, %v18785_v52  ;;  %v18793_v52 = vld [vmem:[#allocation69_spill] sm:$0xff] }
 0x307   : > { %v2907_v23 = vpack.c.bf16 %v2888_v50, %v2887_v9  ;;  %v2531_v58 = vmul.f32 %v18780_v24, %v18779_v28  ;;  %v2891_v9 = vmul.f32 %v18790_v12, %v18725_v48  ;;  %v18795_v24 = vld [vmem:[#allocation68_spill] sm:$0xff] }
 0x308   : > { %10627 = vmatmul.mubr.msk.bf16.gmra.mxu0 %vm621_vm0, %v2550_v55  ;;  %v18787_v55 = vld [vmem:[#allocation65_spill] sm:$0xff]  ;;  %v2553_v31 = vpack.c.bf16 %v2534_v56, %v2533_v61  ;;  %v18796_v48 = vld [vmem:[#allocation140_spill] sm:$0xff]  ;;  %v18801_v56 = vld [vmem:[#allocation111_spill] sm:$0xff] }
 0x309   : > { %10630 = vmatprep.mubr.msk.bf16.mxu0 %vm621_vm0, %v2551_v41  ;;  %v2889_v60 = vmul.f32 %v18787_v55, %v18719_v54  ;;  %v18788_v41 = vld [vmem:[#allocation98_spill] sm:$0xff]  ;;  %v2552_v50 = vpack.c.bf16 %v2532_v44, %v2531_v58  ;;  %v18794_v55 = vld [vmem:[#allocation139_spill] sm:$0xff]  ;;  %v18800_v61 = vld [vmem:[#allocation124_spill] sm:$0xff] }
 0x30a   : > { %v2890_v10 = vmul.f32 %v18789_v51, %v18788_v41  ;;  %v2536_v41 = vmul.f32 %v18795_v24, %v18794_v55  ;;  %v18797_v51 = vld [vmem:[#allocation163_spill] sm:$0xff]  ;;  %v18799_v58 = vld [vmem:[#allocation162_spill] sm:$0xff] }
 0x30b   : > { %v2537_v12 = vmul.f32 %v18797_v51, %v18796_v48 }
 0x30c   : > { %v2908_v14 = vpack.c.bf16 %v2890_v10, %v2889_v60  ;;  %v2893_v60 = vmul.f32 %v18801_v56, %v18800_v61  ;;  %v18803_v10 = vld [vmem:[#allocation112_spill] sm:$0xff]  ;;  %v18805_v61 = vld [vmem:[#allocation146_spill] sm:$0xff] }
 0x30d   : > { %10671 = vmatmul.mubr.msk.bf16.gmra.mxu1 %vm621_vm0, %v2906_v3  ;;  %v2892_v3 = vmul.f32 %v18791_v1, %v18727_v43  ;;  %v18798_v43 = vld [vmem:[#allocation145_spill] sm:$0xff]  ;;  %v3539_v1 = vmul.f32 %v18669_v11, %v14288_v16  ;;  %v3541_v16 = vmul.f32 %v18737_v34, %v14026_v38  ;;  %v3547_v34 = vmul.f32 %v18677_v35, %v18747_v57  ;;  %v18809_v35 = vld [vmem:[#allocation30_spill] sm:$0xff] }
 0x30e   : > { %10674 = vmatprep.mubr.msk.bf16.mxu1 %vm621_vm0, %v2907_v23  ;;  %v18792_v23 = vld [vmem:[#allocation134_spill] sm:$0xff]  ;;  %v2538_v44 = vmul.f32 %v18799_v58, %v18798_v43  ;;  %v14466_v58 = vpop.permute.xlu1 %2506  ;;  %v3551_v57 = vmul.f32 %v18682_v47, %v18753_v30  ;;  %v3554_v30 = vmul.f32 %v18756_v25, %v18759_v26 }
 0x30f   : > { %v2909_v4 = vpack.c.bf16 %v2892_v3, %v2891_v9  ;;  %v2535_v54 = vmul.f32 %v18793_v52, %v18792_v23  ;;  %v18804_v3 = vld [vmem:[#allocation21_spill] sm:$0xff] }
 0x310   : > { %10631 = vmatmul.mubr.msk.bf16.gmra.mxu0 %vm621_vm0, %v2552_v50  ;;  %v2555_v24 = vpack.c.bf16 %v2538_v44, %v2537_v12  ;;  %v18807_v44 = vld [vmem:[#allocation33_spill] sm:$0xff] }
 0x311   : > { %10634 = vmatprep.mubr.msk.bf16.mxu0 %vm621_vm0, %v2553_v31  ;;  %v18802_v31 = vld [vmem:[#allocation123_spill] sm:$0xff]  ;;  %v2554_v50 = vpack.c.bf16 %v2536_v41, %v2535_v54  ;;  %v3544_v54 = vmul.f32 %v18675_v2, %v18741_v0  ;;  %v3546_v2 = vmul.f32 %v18742_v21, %v14069_v45  ;;  %v3549_v21 = vmul.f32 %v18748_v33, %v18751_v27 }
 0x312   : > { %v2894_v9 = vmul.f32 %v18803_v10, %v18802_v31  ;;  %v18806_v31 = vld [vmem:[#allocation147_spill] sm:$0xff] }
 0x313   : > { %v2540_v11 = vmul.f32 %v14466_v58, %v18806_v31  ;;  %v11518_v0 = vld [vmem:[%s17937_s6 + $0xc8] sm:$0xff]  }
 0x314   : > { %v2910_v51 = vpack.c.bf16 %v2894_v9, %v2893_v60  ;;  %v18810_v60 = vld [vmem:[#allocation18_spill] sm:$0xff]  ;;  %v14534_v27 = vld [vmem:[#allocation3] sm:$0xff]  ;;  %v3556_v9 = vmul.f32 %v18760_v42, %v18767_v39  ;;  %v18817_v42 = vld [vmem:[#allocation60_spill] sm:$0xff] }
 0x315   : > { %10675 = vmatmul.mubr.msk.bf16.gmra.mxu1 %vm621_vm0, %v2908_v14  ;;  %v3540_v14 = vmul.f32 %v18804_v3, %v14290_v46  ;;  %v3542_v46 = vmul.f32 %v18738_v15, %v14044_v19  ;;  %v11522_v19 = vld [vmem:[%s17937_s6 + $0xe8] sm:$0xff]   ;;  %v3548_v15 = vmul.f32 %v18680_v18, %v18749_v5  ;;  %v3552_v5 = vmul.f32 %v18684_v63, %v18755_v29  ;;  %v14543_v63 = vld [vmem:[%s17937_s6 + $0x118] sm:$0xff]  }
 0x316   : > { %10678 = vmatprep.mubr.msk.bf16.mxu1 %vm621_vm0, %v2909_v4  ;;  %v14468_v4 = vpop.permute.xlu0 %2501  ;;  %v3555_v29 = vmul.f32 %v18758_v7, %v18765_v13  ;;  %v18812_v3 = vld [vmem:[#allocation77_spill] sm:$0xff]  ;;  %v3559_v13 = vmul.f32 %v18817_v42, %v18779_v28  ;;  %v18818_v39 = vld [vmem:[#allocation59_spill] sm:$0xff] }
 0x317   : > { %v3571_v56 = vpack.c.bf16 %v3540_v14, %v3539_v1  ;;  %v2539_v10 = vmul.f32 %v14468_v4, %v18805_v61  ;;  %v3572_v12 = vpack.c.bf16 %v3542_v46, %v3541_v16  ;;  %v3575_v18 = vpack.c.bf16 %v3548_v15, %v3547_v34  ;;  %v18816_v7 = vld [vmem:[#allocation53_spill] sm:$0xff]  ;;  %v18820_v46 = vld [vmem:[#allocation16_spill] sm:$0xff]  ;;  %v18844_v42 = vld [vmem:[#allocation71_spill] sm:$0xff] }
 0x318   : > { %10635 = vmatmul.mubr.msk.bf16.gmra.mxu0 %vm621_vm0, %v2554_v50  ;;  %v3577_v47 = vpack.c.bf16 %v3552_v5, %v3551_v57  ;;  %v3579_v14 = vpack.c.bf16 %v3556_v9, %v3555_v29  ;;  %v18813_v50 = vld [vmem:[#allocation12_spill] sm:$0xff]  ;;  %v18823_v28 = vld [vmem:[#allocation61_spill] sm:$0xff] }
 0x319   : > { %10638 = vmatprep.mubr.msk.bf16.mxu0 %vm621_vm0, %v2555_v24  ;;  %v3543_v24 = vmul.f32 %v18673_v8, %v18739_v62  ;;  %v2556_v41 = vpack.c.bf16 %v2540_v11, %v2539_v10  ;;  %v3545_v8 = vmul.f32 %v18740_v40, %v14058_v32  ;;  %v11517_v62 = vld [vmem:[%s17937_s6 + $0xd0] sm:$0xff]   ;;  %v18808_v32 = vld [vmem:[#allocation170_spill] sm:$0xff]  ;;  %v18836_v57 = vld [vmem:[#allocation49_spill] sm:$0xff] }
 0x31a   : > { %v11523_v40 = vld [vmem:[%s17937_s6 + $0xe0] sm:$0xff]   ;;  %v18838_v29 = vld [vmem:[#allocation89_spill] sm:$0xff] }
 0x31b   : > { %v3573_v38 = vpack.c.bf16 %v3544_v54, %v3543_v24  ;;  %v3574_v45 = vpack.c.bf16 %v3546_v2, %v3545_v8  ;;  %v18819_v11 = vld [vmem:[#allocation78_spill] sm:$0xff]  ;;  %v18822_v54 = vld [vmem:[#allocation133_spill] sm:$0xff]  ;;  %v18826_v8 = vld [vmem:[#allocation48_spill] sm:$0xff] }
 0x31d   : > { %10679 = vmatmul.mubr.msk.bf16.gmra.mxu1 %vm621_vm0, %v2910_v51  ;;  %v11521_v51 = vld [vmem:[%s17937_s6 + $0xf0] sm:$0xff]  }
 0x31e   : > { %10730 = vmatprep.mubr.msk.bf16.mxu1 %vm621_vm0, %v3571_v56  ;;  %v3560_v56 = vmul.f32 %v18818_v39, %v18781_v59  ;;  %v18824_v59 = vld [vmem:[#allocation67_spill] sm:$0xff] }
 0x320   : > { %10639 = vmatmul.mubr.msk.bf16.gmra.mxu0 %vm621_vm0, %v2556_v41  ;;  %v3581_v16 = vpack.c.bf16 %v3560_v56, %v3559_v13  ;;  %v3562_v41 = vmul.f32 %v18823_v28, %v18822_v54  ;;  %v11526_v56 = vld [vmem:[%s17937_s6 + $0x108] sm:$0xff]  }
 0x321   : > { %10690 = vmatprep.mubr.msk.bf16.mxu0 %vm621_vm0, %v18807_v44 }
 0x325   : > { %10731 = vmatmul.mubr.msk.bf16.vlgmr.msra.gmra.mxu1 %vm621_vm0, %v3572_v12  ;;  %v3563_v12 = vmul.f32 %v18824_v59, %v18792_v23  ;;  %v18828_v23 = vld [vmem:[#allocation68_spill] sm:$0xff]  ;;  %v18846_v59 = vld [vmem:[#allocation95_spill] sm:$0xff] }
 0x326   : > { %10734 = vmatprep.mubr.msk.bf16.mxu1 %vm621_vm0, %v3573_v38  ;;  %10803 = vmatpush3.bf16.msra.mxu1 %v14349_v20  ;;  %v3550_v20 = vmul.f32 %v18750_v17, %v18752_v37  ;;  %v18811_v17 = vld [vmem:[#allocation13_spill] sm:$0xff]  ;;  %v3553_v37 = vmul.f32 %v18754_v22, %v18757_v36  ;;  %v18814_v22 = vld [vmem:[#allocation54_spill] sm:$0xff]  ;;  %v3566_v34 = vmul.f32 %v18828_v23, %v18798_v43 }
 0x327   : > { %10804 = vmatprep.subr.bf16.mxu1 %v11521_v51  ;;  %v3557_v25 = vmul.f32 %v18814_v22, %v18769_v6  ;;  %v18815_v36 = vld [vmem:[#allocation125_spill] sm:$0xff]  ;;  %v18821_v6 = vld [vmem:[#allocation62_spill] sm:$0xff] }
 0x328   : > { %10691 = vmatmul.mubr.msk.bf16.vlgmr.msra.gmra.mxu0 %vm621_vm0, %v18808_v32  ;;  %v3576_v33 = vpack.c.bf16 %v3550_v20, %v3549_v21  ;;  %v3578_v1 = vpack.c.bf16 %v3554_v30, %v3553_v37  ;;  %v3558_v26 = vmul.f32 %v18816_v7, %v18815_v36  ;;  %v3561_v24 = vmul.f32 %v18821_v6, %v18783_v53  ;;  %v18832_v21 = vld [vmem:[#allocation50_spill] sm:$0xff]  ;;  %v18834_v43 = vld [vmem:[#allocation153_spill] sm:$0xff]  ;;  %v18841_v36 = vld [vmem:[#allocation96_spill] sm:$0xff] }
 0x329   : > { %10763 = vmatpush3.bf16.msra.mxu0 %v14369_v49  ;;  %10694 = vmatprep.mubr.msk.bf16.mxu0 %vm621_vm0, %v18809_v35  ;;  %v11519_v49 = vld [vmem:[%s17937_s6 + $0xc0] sm:$0xff]   ;;  %v3565_v53 = vmul.f32 %v18793_v52, %v18796_v48  ;;  %v18833_v52 = vld [vmem:[#allocation152_spill] sm:$0xff]  ;;  %v18837_v30 = vld [vmem:[#allocation17_spill] sm:$0xff] }
 0x32a   : > { %10805 = vmatpush3.bf16.msra.mxu1 %v11521_v51  ;;  %10764 = vmatprep.subr.bf16.mxu0 %v11517_v62  ;;  %v3580_v10 = vpack.c.bf16 %v3558_v26, %v3557_v25  ;;  %v18825_v51 = vld [vmem:[#allocation66_spill] sm:$0xff]  ;;  %v3582_v38 = vpack.c.bf16 %v3562_v41, %v3561_v24  ;;  %v3569_v48 = vmul.f32 %v18833_v52, %v14468_v4  ;;  %v18840_v25 = vld [vmem:[#allocation104_spill] sm:$0xff] }
 0x32b   : > { %10806 = vmatprep.subr.bf16.mxu1 %v11522_v19  ;;  %v3564_v44 = vmul.f32 %v18825_v51, %v18794_v55  ;;  %v18829_v55 = vld [vmem:[#allocation163_spill] sm:$0xff]  ;;  %v18839_v9 = vpack.c.bf16 %v18837_v30, %v18838_v29  ;;  %v18842_v7 = vpack.c.bf16 %v18840_v25, %v18841_v36  ;;  %v18843_v26 = vld [vmem:[#allocation20_spill] sm:$0xff] }
 0x32c   : > { %v3567_v15 = vmul.f32 %v18829_v55, %v18805_v61  ;;  %v3570_v61 = vmul.f32 %v18834_v43, %v14466_v58  ;;  %v18852_v43 = vld [vmem:[#allocation106_spill] sm:$0xff] }
 0x32d   : > { %10735 = vmatmul.mubr.msk.bf16.gmra.mxu1 %vm621_vm0, %v3574_v45  ;;  %10765 = vmatpush3.bf16.msra.mxu0 %v11517_v62  ;;  %v3583_v2 = vpack.c.bf16 %v3564_v44, %v3563_v12  ;;  %v18830_v62 = vld [vmem:[#allocation162_spill] sm:$0xff]  ;;  %v18847_v12 = vld [vmem:[#allocation93_spill] sm:$0xff] }
 0x32e   : > { %10738 = vmatprep.mubr.msk.bf16.mxu1 %vm621_vm0, %v3575_v18  ;;  %10807 = vmatpush3.bf16.msra.mxu1 %v11522_v19  ;;  %v18827_v19 = vld [vmem:[#allocation47_spill] sm:$0xff]  ;;  %v3568_v45 = vmul.f32 %v18830_v62, %v18806_v31  ;;  %v3586_v20 = vpack.c.bf16 %v3570_v61, %v3569_v48  ;;  %v18835_v31 = vld [vmem:[#allocation82_spill] sm:$0xff]  ;;  %v18848_v51 = vpack.c.bf16 %v18846_v59, %v18847_v12  ;;  %v18849_v44 = vld [vmem:[#allocation73_spill] sm:$0xff] }
 0x32f   : > { %10808 = vmatprep.subr.bf16.mxu1 %v11523_v40  ;;  %10766 = vmatprep.subr.bf16.mxu0 %v11518_v0  ;;  %v18831_v18 = vld [vmem:[#allocation79_spill] sm:$0xff]  ;;  %v18853_v61 = vld [vmem:[#allocation105_spill] sm:$0xff] }
 0x330   : > { %10695 = vmatmul.mubr.msk.bf16.gmra.mxu0 %vm621_vm0, %v18810_v60 }
 0x331   : > { %10698 = vmatprep.mubr.msk.bf16.mxu0 %vm621_vm0, %v18811_v17  ;;  %10767 = vmatpush3.bf16.msra.mxu0 %v11518_v0  ;;  %v3585_v0 = vpack.c.bf16 %v3568_v45, %v3567_v15 }
 0x332   : > { %10809 = vmatpush3.bf16.msra.mxu1 %v11523_v40  ;;  %10768 = vmatprep.subr.bf16.mxu0 %v11519_v49  ;;  %v3584_v40 = vpack.c.bf16 %v3566_v34, %v3565_v53 }
 0x333   : > { %10882 = vmatprep.subr.mxu1 %v14534_v27 }
 0x335   : > { %10739 = vmatmul.mubr.msk.bf16.gmra.mxu1 %vm621_vm0, %v3576_v33  ;;  %10769 = vmatpush3.bf16.msra.mxu0 %v11519_v49  ;;  %v3215_v49 = vld [vmem:[#allocation2 + $0x101] sm:$0xff]  ;;  %v3216_v33 = vld [vmem:[#allocation2 + $0x109] sm:$0xff] }
 0x336   : > { %10742 = vmatprep.mubr.msk.bf16.mxu1 %vm621_vm0, %v3577_v47  ;;  %10842 = vmatprep.subr.bf16.mxu0 %v14543_v63  ;;  %v14614_v47 = vpack.c.bf16 %v3216_v33, %v3215_v49  ;;  %v18856_v49 = vld [vmem:[#allocation76_spill] sm:$0xff] }
 0x337   : > { %v10572_v5 = vpop.f32.mrf.mxu1 }
 0x338   : > { %10699 = vmatmul.mubr.msk.bf16.gmra.mxu0 %vm621_vm0, %v18812_v3 }
 0x339   : > { %10702 = vmatprep.mubr.msk.bf16.mxu0 %vm621_vm0, %v18813_v50  ;;  %v2190_v37 = vpop.f32.mrf.mxu1 }
 0x33d   : > { %10743 = vmatmul.mubr.msk.bf16.gmra.mxu1 %vm621_vm0, %v3578_v1  ;;  %v10573_v1 = vpop.f32.mrf.mxu1 }
 0x33e   : > { %10746 = vmatprep.mubr.msk.bf16.mxu1 %vm621_vm0, %v3579_v14 }
 0x33f   : > { %v2193_v14 = vpop.f32.mrf.mxu1 }
 0x340   : > { %10703 = vmatmul.mubr.msk.bf16.gmra.mxu0 %vm621_vm0, %v18819_v11 }
 0x341   : > { %10706 = vmatprep.mubr.msk.bf16.mxu0 %vm621_vm0, %v18820_v46 }
 0x345   : > { %10747 = vmatmul.mubr.msk.bf16.gmra.mxu1 %vm621_vm0, %v3580_v10 }
 0x346   : > { %10750 = vmatprep.mubr.msk.bf16.mxu1 %vm621_vm0, %v3581_v16 }
 0x348   : > { %10707 = vmatmul.mubr.msk.bf16.gmra.mxu0 %vm621_vm0, %v18826_v8 }
 0x349   : > { %10710 = vmatprep.mubr.msk.bf16.mxu0 %vm621_vm0, %v18827_v19 }
 0x34d   : > { %10751 = vmatmul.mubr.msk.bf16.gmra.mxu1 %vm621_vm0, %v3582_v38  ;;  %v18850_v38 = vld [vmem:[#allocation72_spill] sm:$0xff] }
 0x34e   : > { %10754 = vmatprep.mubr.msk.bf16.mxu1 %vm621_vm0, %v3583_v2  ;;  %v18851_v2 = vpack.c.bf16 %v18849_v44, %v18850_v38  ;;  %v18865_v44 = vld [vmem:[#allocation119_spill] sm:$0xff] }
 0x350   : > { %10711 = vmatmul.mubr.msk.bf16.gmra.mxu0 %vm621_vm0, %v18831_v18 }
 0x351   : > { %10714 = vmatprep.mubr.msk.bf16.mxu0 %vm621_vm0, %v18832_v21 }
 0x355   : > { %10755 = vmatmul.mubr.msk.bf16.gmra.mxu1 %vm621_vm0, %v3584_v40 }
 0x356   : > { %10758 = vmatprep.mubr.msk.bf16.mxu1 %vm621_vm0, %v3585_v0 }
 0x358   : > { %10715 = vmatmul.mubr.msk.bf16.gmra.mxu0 %vm621_vm0, %v18835_v31 }
 0x359   : > { %10718 = vmatprep.mubr.msk.bf16.mxu0 %vm621_vm0, %v18836_v57 }
 0x35d   : > { %10759 = vmatmul.mubr.msk.bf16.gmra.mxu1 %vm621_vm0, %v3586_v20  ;;  %v18854_v20 = vpack.c.bf16 %v18852_v43, %v18853_v61 }
 0x35e   : > { %10810 = vmatprep.mubr.msk.bf16.mxu1 %vm621_vm0, %v18808_v32  ;;  %v11525_v32 = vld [vmem:[%s17937_s6 + $0x110] sm:$0xff]  }
 0x360   : > { %10719 = vmatmul.mubr.msk.bf16.gmra.mxu0 %vm621_vm0, %v14614_v47 }
 0x361   : > { %10770 = vmatprep.mubr.msk.bf16.mxu0 %vm621_vm0, %v18839_v9 }
 0x365   : > { %10811 = vmatmul.mubr.msk.bf16.vlgmr.msra.gmra.mxu1 %vm621_vm0, %v18809_v35  ;;  %v10532_v22 = vpop.f32.mrf.mxu0  ;;  %v18845_v35 = vpack.c.bf16 %v18843_v26, %v18844_v42  ;;  %v18859_v26 = vld [vmem:[#allocation107_spill] sm:$0xff] }
 0x366   : > { %10814 = vmatprep.mubr.msk.bf16.mxu1 %vm621_vm0, %v18810_v60  ;;  %v14638_v13 = vadd.f32 %v10572_v5, %v10532_v22  ;;  %v18855_v5 = vld [vmem:[#allocation26_spill] sm:$0xff] }
 0x367   : > { %v1957_v60 = vpop.f32.mrf.mxu0  ;;  %v18857_v33 = vpack.c.bf16 %v18855_v5, %v18856_v49  ;;  %v18871_v5 = vld [vmem:[#allocation128_spill] sm:$0xff] }
 0x368   : > { %10771 = vmatmul.mubr.msk.bf16.vlgmr.msra.gmra.mxu0 %vm621_vm0, %v18842_v7  ;;  %v14645_v10 = vadd.f32 %v2190_v37, %v1957_v60  ;;  %v18858_v7 = vld [vmem:[#allocation113_spill] sm:$0xff]  ;;  %v18862_v60 = vld [vmem:[#allocation114_spill] sm:$0xff] }
 0x369   : > { %10843 = vmatpush3.bf16.msra.mxu0 %v14543_v63  ;;  %10774 = vmatprep.mubr.msk.bf16.mxu0 %vm621_vm0, %v18845_v35  ;;  %v10533_v63 = vpop.f32.mrf.mxu0  ;;  %v18860_v42 = vpack.c.bf16 %v18858_v7, %v18859_v26  ;;  %v18861_v35 = vld [vmem:[#allocation115_spill] sm:$0xff] }
 0x36a   : > { %10844 = vmatprep.subr.bf16.mxu0 %v11525_v32  ;;  %v14649_v6 = vadd.f32 %v10573_v1, %v10533_v63 }
 0x36b   : > { %v1960_v24 = vpop.f32.mrf.mxu0 }
 0x36c   : > { %v14654_v28 = vadd.f32 %v2193_v14, %v1960_v24 }
 0x36d   : > { %v10576_v39 = vpop.f32.mrf.mxu1  ;;  %10815 = vmatmul.mubr.msk.bf16.gmra.mxu1 %vm621_vm0, %v18811_v17  ;;  %10845 = vmatpush3.bf16.msra.mxu0 %v11525_v32  ;;  %v11527_v17 = vld [vmem:[%s17937_s6 + $0x100] sm:$0xff]  }
 0x36e   : > { %10818 = vmatprep.mubr.msk.bf16.mxu1 %vm621_vm0, %v18812_v3  ;;  %10846 = vmatprep.subr.bf16.mxu0 %v11526_v56 }
 0x36f   : > { %v2206_v16 = vpop.f32.mrf.mxu1 }
 0x370   : > { %v10536_v41 = vpop.f32.mrf.mxu0  ;;  %10775 = vmatmul.mubr.msk.bf16.gmra.mxu0 %vm621_vm0, %v18848_v51 }
 0x371   : > { %v10577_v54 = vpop.f32.mrf.mxu1  ;;  %10778 = vmatprep.mubr.msk.bf16.mxu0 %vm621_vm0, %v18851_v2  ;;  %v14664_v53 = vadd.f32 %v10576_v39, %v10536_v41  ;;  %10847 = vmatpush3.bf16.msra.mxu0 %v11526_v56  ;;  %v18863_v39 = vpack.c.bf16 %v18861_v35, %v18862_v60  ;;  %v18867_v2 = vld [vmem:[#allocation122_spill] sm:$0xff]  ;;  %v3891_v60 = vld [vmem:[#allocation2 + $0x110] sm:$0xff] }
 0x372   : > { %v1973_v23 = vpop.f32.mrf.mxu0  ;;  %10848 = vmatprep.subr.bf16.mxu0 %v11527_v17 }
 0x373   : > { %v2209_v3 = vpop.f32.mrf.mxu1  ;;  %v14668_v55 = vadd.f32 %v2206_v16, %v1973_v23  ;;  %v18868_v23 = vld [vmem:[#allocation121_spill] sm:$0xff] }
 0x374   : > { %v10537_v15 = vpop.f32.mrf.mxu0 }
 0x375   : > { %v10580_v34 = vpop.f32.mrf.mxu1  ;;  %10819 = vmatmul.mubr.msk.bf16.gmra.mxu1 %vm621_vm0, %v18813_v50  ;;  %v14672_v45 = vadd.f32 %v10577_v54, %v10537_v15  ;;  %10849 = vmatpush3.bf16.msra.mxu0 %v11527_v17 }
 0x376   : > { %10822 = vmatprep.mubr.msk.bf16.mxu1 %vm621_vm0, %v18819_v11  ;;  %v1976_v40 = vpop.f32.mrf.mxu0 }
 0x377   : > { %v2222_v62 = vpop.f32.mrf.mxu1  ;;  %v14674_v52 = vadd.f32 %v2209_v3, %v1976_v40  ;;  %v18864_v3 = vld [vmem:[#allocation120_spill] sm:$0xff] }
 0x378   : > { %v10540_v48 = vpop.f32.mrf.mxu0  ;;  %10779 = vmatmul.mubr.msk.bf16.gmra.mxu0 %vm621_vm0, %v18854_v20  ;;  %v18866_v38 = vpack.c.bf16 %v18864_v3, %v18865_v44  ;;  %v18885_v44 = vld [vmem:[#allocation124_spill] sm:$0xff] }
 0x379   : > { %v10581_v0 = vpop.f32.mrf.mxu1  ;;  %10782 = vmatprep.mubr.msk.bf16.mxu0 %vm621_vm0, %v18857_v33  ;;  %v14684_v11 = vadd.f32 %v10580_v34, %v10540_v48 }
 0x37a   : > { %v1989_v37 = vpop.f32.mrf.mxu0 }
 0x37b   : > { %v2225_v50 = vpop.f32.mrf.mxu1  ;;  %v14688_v29 = vadd.f32 %v2222_v62, %v1989_v37  ;;  %v18875_v37 = vld [vmem:[#allocation130_spill] sm:$0xff] }
 0x37c   : > { %v10541_v9 = vpop.f32.mrf.mxu0 }
 0x37d   : > { %v10584_v30 = vpop.f32.mrf.mxu1  ;;  %10823 = vmatmul.mubr.msk.bf16.gmra.mxu1 %vm621_vm0, %v18820_v46  ;;  %v14692_v14 = vadd.f32 %v10581_v0, %v10541_v9 }
 0x37e   : > { %10826 = vmatprep.mubr.msk.bf16.mxu1 %vm621_vm0, %v18826_v8  ;;  %v1992_v32 = vpop.f32.mrf.mxu0 }
 0x37f   : > { %v2238_v1 = vpop.f32.mrf.mxu1  ;;  %v14694_v25 = vadd.f32 %v2225_v50, %v1992_v32  ;;  %v18870_v50 = vld [vmem:[#allocation129_spill] sm:$0xff] }
 0x380   : > { %v10544_v36 = vpop.f32.mrf.mxu0  ;;  %10783 = vmatmul.mubr.msk.bf16.gmra.mxu0 %vm621_vm0, %v18860_v42  ;;  %v18872_v49 = vpack.c.bf16 %v18870_v50, %v18871_v5  ;;  %v4245_v32 = vld [vmem:[#allocation2 + $0x111] sm:$0xff] }
 0x381   : > { %v10585_v22 = vpop.f32.mrf.mxu1  ;;  %10786 = vmatprep.mubr.msk.bf16.mxu0 %vm621_vm0, %v18863_v39  ;;  %v14704_v8 = vadd.f32 %v10584_v30, %v10544_v36 }
 0x382   : > { %v2005_v56 = vpop.f32.mrf.mxu0 }
 0x383   : > { %v2241_v46 = vpop.f32.mrf.mxu1  ;;  %v14708_v16 = vadd.f32 %v2238_v1, %v2005_v56  ;;  %v18878_v56 = vld [vmem:[#allocation136_spill] sm:$0xff] }
 0x384   : > { %v10545_v24 = vpop.f32.mrf.mxu0 }
 0x385   : > { %v10588_v63 = vpop.f32.mrf.mxu1  ;;  %10827 = vmatmul.mubr.msk.bf16.gmra.mxu1 %vm621_vm0, %v18827_v19  ;;  %v14714_v17 = vadd.f32 %v10585_v22, %v10545_v24  ;;  %v4246_v22 = vld [vmem:[#allocation2 + $0x119] sm:$0xff] }
 0x386   : > { %10830 = vmatprep.mubr.msk.bf16.mxu1 %vm621_vm0, %v18831_v18  ;;  %v2008_v41 = vpop.f32.mrf.mxu0  ;;  %v18869_v18 = vpack.c.bf16 %v18867_v2, %v18868_v23  ;;  %v4262_v35 = vpack.c.bf16 %v4246_v22, %v4245_v32  ;;  %v18890_v32 = vld [vmem:[#allocation25_spill] sm:$0xff] }
 0x387   : > { %v14712_v54 = vpop.f32.mrf.mxu1  ;;  %v14716_v12 = vadd.f32 %v2241_v46, %v2008_v41  ;;  %v18882_v41 = vld [vmem:[#allocation138_spill] sm:$0xff] }
 0x388   : > { %v10548_v51 = vpop.f32.mrf.mxu0  ;;  %10787 = vmatmul.mubr.msk.bf16.gmra.mxu0 %vm621_vm0, %v18866_v38  ;;  %v3923_v38 = vmul.f32 %v3891_v60, %v18885_v44 }
 0x389   : > { %v10589_v59 = vpop.f32.mrf.mxu1  ;;  %10790 = vmatprep.mubr.msk.bf16.mxu0 %vm621_vm0, %v18869_v18  ;;  %v14728_v34 = vadd.f32 %v10588_v63, %v10548_v51  ;;  %v18879_v63 = vld [vmem:[#allocation135_spill] sm:$0xff] }
 0x38a   : > { %v14730_v15 = vpop.f32.mrf.mxu0  ;;  %v18880_v24 = vpack.c.bf16 %v18878_v56, %v18879_v63 }
 0x38b   : > { %v14722_v19 = vpop.f32.mrf.mxu1 }
 0x38c   : > { %v10549_v40 = vpop.f32.mrf.mxu0 }
 0x38d   : > { %v10592_v62 = vpop.f32.mrf.mxu1  ;;  %10831 = vmatmul.mubr.msk.bf16.gmra.mxu1 %vm621_vm0, %v18832_v21  ;;  %v14738_v48 = vadd.f32 %v10589_v59, %v10549_v40  ;;  %v18874_v21 = vld [vmem:[#allocation131_spill] sm:$0xff]  ;;  %v18883_v59 = vld [vmem:[#allocation137_spill] sm:$0xff] }
 0x38e   : > { %10834 = vmatprep.mubr.msk.bf16.mxu1 %vm621_vm0, %v18835_v31  ;;  %v14740_v43 = vpop.f32.mrf.mxu0  ;;  %v18876_v30 = vpack.c.bf16 %v18874_v21, %v18875_v37  ;;  %v18884_v51 = vpack.c.bf16 %v18882_v41, %v18883_v59  ;;  %v18893_v41 = vld [vmem:[#allocation142_spill] sm:$0xff]  ;;  %v18894_v59 = vld [vmem:[#allocation141_spill] sm:$0xff] }
 0x38f   : > { %v14736_v0 = vpop.f32.mrf.mxu1 }
 0x390   : > { %v10552_v20 = vpop.f32.mrf.mxu0  ;;  %10791 = vmatmul.mubr.msk.bf16.gmra.mxu0 %vm621_vm0, %v18872_v49 }
 0x391   : > { %v10593_v61 = vpop.f32.mrf.mxu1  ;;  %10794 = vmatprep.mubr.msk.bf16.mxu0 %vm621_vm0, %v18876_v30  ;;  %v14752_v31 = vadd.f32 %v10592_v62, %v10552_v20  ;;  %v18886_v62 = vld [vmem:[#allocation123_spill] sm:$0xff] }
 0x392   : > { %v14754_v9 = vpop.f32.mrf.mxu0 }
 0x393   : > { %v14746_v33 = vpop.f32.mrf.mxu1 }
 0x394   : > { %18873 = vst [vmem:[#allocation83_spill] sm:$0xff] %v14746_v33  ;;  %v10553_v36 = vpop.f32.mrf.mxu0 }
 0x395   : > { %v10596_v1 = vpop.f32.mrf.mxu1  ;;  %10835 = vmatmul.mubr.msk.bf16.gmra.mxu1 %vm621_vm0, %v18836_v57  ;;  %v14760_v26 = vadd.f32 %v10593_v61, %v10553_v36 }
 0x396   : > { %10838 = vmatprep.mubr.msk.bf16.mxu1 %vm621_vm0, %v14614_v47  ;;  %v14762_v42 = vpop.f32.mrf.mxu0  ;;  %v3892_v47 = vld [vmem:[#allocation2 + $0x118] sm:$0xff] }
 0x397   : > { %v2286_v7 = vpop.f32.mrf.mxu1  ;;  %18877 = vst [vmem:[#allocation84_spill] sm:$0xff] %v14762_v42  ;;  %v3924_v40 = vmul.f32 %v3892_v47, %v18886_v62  ;;  %v15243_v42 = vld [vmem:[#allocation3] sm:$0xff] }
 0x398   : > { %v10556_v39 = vpop.f32.mrf.mxu0  ;;  %10795 = vmatmul.mubr.msk.bf16.gmra.mxu0 %vm621_vm0, %v18880_v24  ;;  %18976 = vst [vmem:[#allocation44_spill] sm:$0xff] %v15243_v42 }
 0x399   : > { %v10597_v46 = vpop.f32.mrf.mxu1  ;;  %10798 = vmatprep.mubr.msk.bf16.mxu0 %vm621_vm0, %v18884_v51  ;;  %v14774_v3 = vadd.f32 %v10596_v1, %v10556_v39  ;;  %v3940_v5 = vpack.c.bf16 %v3924_v40, %v3923_v38  ;;  %v18889_v1 = vld [vmem:[#allocation28_spill] sm:$0xff]  ;;  %v18895_v51 = vpack.c.bf16 %v18893_v41, %v18894_v59  ;;  %v18900_v59 = vld [vmem:[#allocation143_spill] sm:$0xff] }
 0x39a   : > { %v2053_v2 = vpop.f32.mrf.mxu0  ;;  %v18891_v22 = vpack.c.bf16 %v18889_v1, %v18890_v32  ;;  %v18899_v41 = vld [vmem:[#allocation144_spill] sm:$0xff] }
 0x39b   : > { %v14768_v57 = vpop.f32.mrf.mxu1  ;;  %v14778_v18 = vadd.f32 %v2286_v7, %v2053_v2  ;;  %v18896_v2 = vld [vmem:[#allocation34_spill] sm:$0xff] }
 0x39c   : > { %18881 = vst [vmem:[#allocation91_spill] sm:$0xff] %v14768_v57  ;;  %v10557_v61 = vpop.f32.mrf.mxu0 }
 0x39d   : > { %v10600_v23 = vpop.f32.mrf.mxu1  ;;  %10839 = vmatmul.mubr.msk.bf16.gmra.mxu1 %vm621_vm0, %v4262_v35  ;;  %v14783_v50 = vadd.f32 %v10597_v46, %v10557_v61 }
 0x39e   : > { %10914 = vmatprep.mubr.msk.f32.mxu1 %vm11995_vm1, %v14534_v27  ;;  %v14785_v49 = vpop.f32.mrf.mxu0 }
 0x39f   : > { %v2302_v20 = vpop.f32.mrf.mxu1  ;;  %18887 = vst [vmem:[#allocation92_spill] sm:$0xff] %v14785_v49 }
 0x3a0   : > { %v10560_v37 = vpop.f32.mrf.mxu0  ;;  %10799 = vmatmul.mubr.msk.bf16.gmra.mxu0 %vm621_vm0, %v3940_v5 }
 0x3a1   : > { %v10601_v21 = vpop.f32.mrf.mxu1  ;;  %10850 = vmatprep.mubr.msk.bf16.mxu0 %vm621_vm0, %v18891_v22  ;;  %v14794_v36 = vadd.f32 %v10600_v23, %v10560_v37  ;;  %v18897_v23 = vld [vmem:[#allocation27_spill] sm:$0xff] }
 0x3a2   : > { %v2069_v7 = vpop.f32.mrf.mxu0  ;;  %v18898_v62 = vpack.c.bf16 %v18896_v2, %v18897_v23 }
 0x3a3   : > { %v14788_v30 = vpop.f32.mrf.mxu1  ;;  %v14796_v46 = vadd.f32 %v2302_v20, %v2069_v7 }
 0x3a4   : > { %18888 = vst [vmem:[#allocation97_spill] sm:$0xff] %v14788_v30  ;;  %v10561_v60 = vpop.f32.mrf.mxu0 }
 0x3a5   : > { %v10652_v35 = vpop.f32.mrf.mxu1  ;;  %v14798_v56 = vadd.f32 %v10601_v21, %v10561_v60 }
 0x3a6   : > { %v14800_v63 = vpop.f32.mrf.mxu0 }
 0x3a7   : > { %v3026_v39 = vpop.f32.mrf.mxu1  ;;  %18892 = vst [vmem:[#allocation99_spill] sm:$0xff] %v14800_v63 }
 0x3a8   : > { %v10612_v47 = vpop.f32.mrf.mxu0  ;;  %10851 = vmatmul.mubr.msk.bf16.vlgmr.msra.gmra.mxu0 %vm621_vm0, %v18895_v51  ;;  %v18901_v51 = vpack.c.bf16 %v18899_v41, %v18900_v59  ;;  %v18905_v59 = vld [vmem:[#allocation149_spill] sm:$0xff] }
 0x3a9   : > { %v10653_v24 = vpop.f32.mrf.mxu1  ;;  %v2801_v38 = vadd.f32 %v10612_v47, %v14638_v13  ;;  %10854 = vmatprep.mubr.msk.bf16.mxu0 %vm621_vm0, %v18898_v62 }
 0x3aa   : > { %v2672_v40 = vpop.f32.mrf.mxu0 }
 0x3ab   : > { %v14806_v44 = vpop.f32.mrf.mxu1  ;;  %v2799_v20 = vadd.f32 %v2672_v40, %v14645_v10  ;;  %v14814_v5 = vadd.f32 %v10652_v35, %v2801_v38 }
 0x3ac   : > { %v10613_v21 = vpop.f32.mrf.mxu0 }
 0x3ad   : > { %v10656_v61 = vpop.f32.mrf.mxu1  ;;  %v2802_v1 = vadd.f32 %v10613_v21, %v14649_v6  ;;  %v14817_v32 = vadd.f32 %v3026_v39, %v2799_v20  ;;  %v18902_v6 = vld [vmem:[#allocation29_spill] sm:$0xff]  ;;  %v18903_v39 = vld [vmem:[#allocation22_spill] sm:$0xff] }
 0x3ae   : > { %v2675_v22 = vpop.f32.mrf.mxu0  ;;  %v18904_v38 = vpack.c.bf16 %v18902_v6, %v18903_v39 }
 0x3af   : > { %v3042_v37 = vpop.f32.mrf.mxu1  ;;  %v14820_v13 = vadd.f32 %v2675_v22, %v14654_v28  ;;  %v14822_v60 = vadd.f32 %v10653_v24, %v2802_v1 }
 0x3b0   : > { %v10616_v47 = vpop.f32.mrf.mxu0  ;;  %10855 = vmatmul.mubr.msk.bf16.gmra.mxu0 %vm621_vm0, %v18901_v51  ;;  %v18906_v51 = vld [vmem:[#allocation148_spill] sm:$0xff] }
 0x3b1   : > { %v10657_v7 = vpop.f32.mrf.mxu1  ;;  %v2805_v35 = vadd.f32 %v10616_v47, %v14664_v53  ;;  %10858 = vmatprep.mubr.msk.bf16.mxu0 %vm621_vm0, %v18904_v38  ;;  %v18907_v6 = vpack.c.bf16 %v18905_v59, %v18906_v51 }
 0x3b2   : > { %v2688_v2 = vpop.f32.mrf.mxu0 }
 0x3b3   : > { %v14828_v10 = vpop.f32.mrf.mxu1  ;;  %v2803_v24 = vadd.f32 %v2688_v2, %v14668_v55  ;;  %v14836_v23 = vadd.f32 %v10656_v61, %v2805_v35 }
 0x3b4   : > { %v10617_v62 = vpop.f32.mrf.mxu0 }
 0x3b5   : > { %v10660_v28 = vpop.f32.mrf.mxu1  ;;  %v2806_v20 = vadd.f32 %v10617_v62, %v14672_v45  ;;  %v14839_v21 = vadd.f32 %v3042_v37, %v2803_v24  ;;  %v18908_v45 = vld [vmem:[#allocation37_spill] sm:$0xff]  ;;  %v18909_v37 = vld [vmem:[#allocation38_spill] sm:$0xff] }
 0x3b6   : > { %v2691_v1 = vpop.f32.mrf.mxu0  ;;  %v18910_v35 = vpack.c.bf16 %v18908_v45, %v18909_v37  ;;  %v18912_v45 = vld [vmem:[#allocation150_spill] sm:$0xff] }
 0x3b7   : > { %v3058_v40 = vpop.f32.mrf.mxu1  ;;  %v14842_v53 = vadd.f32 %v2691_v1, %v14674_v52  ;;  %v14844_v47 = vadd.f32 %v10657_v7, %v2806_v20 }
 0x3b8   : > { %v10620_v41 = vpop.f32.mrf.mxu0  ;;  %10859 = vmatmul.mubr.msk.bf16.gmra.mxu0 %vm621_vm0, %v18907_v6  ;;  %v18911_v6 = vld [vmem:[#allocation151_spill] sm:$0xff] }
 0x3b9   : > { %v10661_v22 = vpop.f32.mrf.mxu1  ;;  %v2809_v61 = vadd.f32 %v10620_v41, %v14684_v11  ;;  %10862 = vmatprep.mubr.msk.bf16.mxu0 %vm621_vm0, %v18910_v35  ;;  %v18913_v37 = vpack.c.bf16 %v18911_v6, %v18912_v45 }
 0x3ba   : > { %v2704_v39 = vpop.f32.mrf.mxu0 }
 0x3bb   : > { %v14850_v55 = vpop.f32.mrf.mxu1  ;;  %v2807_v7 = vadd.f32 %v2704_v39, %v14688_v29  ;;  %v14858_v38 = vadd.f32 %v10660_v28, %v2809_v61 }
 0x3bc   : > { %v10621_v2 = vpop.f32.mrf.mxu0 }
 0x3bd   : > { %v10664_v52 = vpop.f32.mrf.mxu1  ;;  %v2810_v62 = vadd.f32 %v10621_v2, %v14692_v14  ;;  %v14861_v20 = vadd.f32 %v3058_v40, %v2807_v7  ;;  %v18914_v14 = vld [vmem:[#allocation155_spill] sm:$0xff]  ;;  %v18915_v40 = vld [vmem:[#allocation154_spill] sm:$0xff] }
 0x3be   : > { %v2707_v1 = vpop.f32.mrf.mxu0  ;;  %v18916_v61 = vpack.c.bf16 %v18914_v14, %v18915_v40  ;;  %v18917_v14 = vld [vmem:[#allocation157_spill] sm:$0xff]  ;;  %v18918_v40 = vld [vmem:[#allocation156_spill] sm:$0xff] }
 0x3bf   : > { %v3074_v24 = vpop.f32.mrf.mxu1  ;;  %v14864_v11 = vadd.f32 %v2707_v1, %v14694_v25  ;;  %v14866_v41 = vadd.f32 %v10661_v22, %v2810_v62 }
 0x3c0   : > { %v10624_v51 = vpop.f32.mrf.mxu0  ;;  %10863 = vmatmul.mubr.msk.bf16.gmra.mxu0 %vm621_vm0, %v18913_v37 }
 0x3c1   : > { %v10665_v59 = vpop.f32.mrf.mxu1  ;;  %v2813_v28 = vadd.f32 %v10624_v51, %v14704_v8  ;;  %10866 = vmatprep.mubr.msk.bf16.mxu0 %vm621_vm0, %v18916_v61  ;;  %v18919_v61 = vpack.c.bf16 %v18917_v14, %v18918_v40 }
 0x3c2   : > { %v2720_v35 = vpop.f32.mrf.mxu0 }
 0x3c3   : > { %v14872_v29 = vpop.f32.mrf.mxu1  ;;  %v2811_v22 = vadd.f32 %v2720_v35, %v14708_v16  ;;  %v14880_v39 = vadd.f32 %v10664_v52, %v2813_v28  ;;  %v18922_v28 = vld [vmem:[#allocation158_spill] sm:$0xff] }
 0x3c4   : > { %v10625_v7 = vpop.f32.mrf.mxu0 }
 0x3c5   : > { %v10668_v25 = vpop.f32.mrf.mxu1  ;;  %v2814_v62 = vadd.f32 %v10625_v7, %v14714_v17  ;;  %v14883_v1 = vadd.f32 %v3074_v24, %v2811_v22  ;;  %v2255_v17 = vadd.f32 %v14712_v54, %v14730_v15  ;;  %v18921_v24 = vld [vmem:[#allocation159_spill] sm:$0xff] }
 0x3c6   : > { %v2723_v6 = vpop.f32.mrf.mxu0  ;;  %v18923_v35 = vpack.c.bf16 %v18921_v24, %v18922_v28  ;;  %v18925_v24 = vld [vmem:[#allocation160_spill] sm:$0xff] }
 0x3c7   : > { %v3090_v2 = vpop.f32.mrf.mxu1  ;;  %v14886_v8 = vadd.f32 %v2723_v6, %v14716_v12  ;;  %v14888_v51 = vadd.f32 %v10665_v59, %v2814_v62 }
 0x3c8   : > { %v10628_v37 = vpop.f32.mrf.mxu0  ;;  %10867 = vmatmul.mubr.msk.bf16.gmra.mxu0 %vm621_vm0, %v18919_v61 }
 0x3c9   : > { %v10669_v45 = vpop.f32.mrf.mxu1  ;;  %v2817_v52 = vadd.f32 %v10628_v37, %v14728_v34  ;;  %10870 = vmatprep.mubr.msk.bf16.mxu0 %vm621_vm0, %v18923_v35  ;;  %v18924_v37 = vld [vmem:[#allocation161_spill] sm:$0xff] }
 0x3ca   : > { %v2736_v12 = vpop.f32.mrf.mxu0  ;;  %v18926_v28 = vpack.c.bf16 %v18924_v37, %v18925_v24 }
 0x3cb   : > { %v14894_v16 = vpop.f32.mrf.mxu1  ;;  %v2815_v22 = vadd.f32 %v2736_v12, %v2255_v17  ;;  %v14903_v7 = vadd.f32 %v10668_v25, %v2817_v52  ;;  %v2271_v25 = vadd.f32 %v14736_v0, %v14754_v9  ;;  %v18929_v52 = vld [vmem:[#allocation164_spill] sm:$0xff] }
 0x3cc   : > { %18920 = vst [vmem:[#allocation108_spill] sm:$0xff] %v14894_v16  ;;  %v10629_v62 = vpop.f32.mrf.mxu0  ;;  %v4567_v9 = vld [vmem:[#allocation2 + $0x112] sm:$0xff] }
 0x3cd   : > { %v10672_v59 = vpop.f32.mrf.mxu1  ;;  %v2818_v14 = vadd.f32 %v10629_v62, %v14738_v48  ;;  %v14906_v40 = vadd.f32 %v3090_v2, %v2815_v22  ;;  %v18928_v2 = vld [vmem:[#allocation165_spill] sm:$0xff] }
 0x3ce   : > { %v14908_v61 = vpop.f32.mrf.mxu0  ;;  %v18930_v35 = vpack.c.bf16 %v18928_v2, %v18929_v52  ;;  %v18932_v52 = vld [vmem:[#allocation167_spill] sm:$0xff] }
 0x3cf   : > { %v3106_v6 = vpop.f32.mrf.mxu1  ;;  %v14910_v34 = vadd.f32 %v10669_v45, %v2818_v14 }
 0x3d0   : > { %v10632_v15 = vpop.f32.mrf.mxu0  ;;  %10871 = vmatmul.mubr.msk.bf16.gmra.mxu0 %vm621_vm0, %v18926_v28 }
 0x3d1   : > { %v10673_v54 = vpop.f32.mrf.mxu1  ;;  %v2821_v48 = vadd.f32 %v10632_v15, %v14752_v31  ;;  %10874 = vmatprep.mubr.msk.bf16.mxu0 %vm621_vm0, %v18930_v35  ;;  %v4568_v31 = vld [vmem:[#allocation2 + $0x11a] sm:$0xff] }
 0x3d2   : > { %v2752_v45 = vpop.f32.mrf.mxu0  ;;  %v18933_v35 = vld [vmem:[#allocation166_spill] sm:$0xff] }
 0x3d3   : > { %v14916_v17 = vpop.f32.mrf.mxu1  ;;  %v2819_v22 = vadd.f32 %v2752_v45, %v2271_v25  ;;  %v14925_v62 = vadd.f32 %v10672_v59, %v2821_v48  ;;  %v18934_v63 = vpack.c.bf16 %v18932_v52, %v18933_v35  ;;  %v4600_v45 = vmul.f32 %v4568_v31, %v14466_v58 }
 0x3d4   : > { %18927 = vst [vmem:[#allocation15_spill] sm:$0xff] %v14916_v17  ;;  %v10633_v14 = vpop.f32.mrf.mxu0 }
 0x3d5   : > { %v10676_v12 = vpop.f32.mrf.mxu1  ;;  %v2822_v24 = vadd.f32 %v10633_v14, %v14760_v26  ;;  %v14928_v28 = vadd.f32 %v3106_v6, %v2819_v22  ;;  %v18936_v26 = vld [vmem:[#allocation169_spill] sm:$0xff]  ;;  %v18937_v6 = vld [vmem:[#allocation168_spill] sm:$0xff] }
 0x3d6   : > { %v14930_v30 = vpop.f32.mrf.mxu0  ;;  %v18938_v48 = vpack.c.bf16 %v18936_v26, %v18937_v6 }
 0x3d7   : > { %v3122_v37 = vpop.f32.mrf.mxu1  ;;  %18931 = vst [vmem:[#allocation14_spill] sm:$0xff] %v14930_v30  ;;  %v14932_v15 = vadd.f32 %v10673_v54, %v2822_v24  ;;  %v4599_v54 = vmul.f32 %v4567_v9, %v14468_v4 }
 0x3d8   : > { %v10636_v2 = vpop.f32.mrf.mxu0  ;;  %10875 = vmatmul.mubr.msk.bf16.gmra.mxu0 %vm621_vm0, %v18934_v63 }
 0x3d9   : > { %v10677_v0 = vpop.f32.mrf.mxu1  ;;  %v2825_v25 = vadd.f32 %v10636_v2, %v14774_v3  ;;  %10878 = vmatprep.mubr.msk.bf16.mxu0 %vm621_vm0, %v18938_v48  ;;  %v4616_v2 = vpack.c.bf16 %v4600_v45, %v4599_v54 }
 0x3da   : > { %v2768_v22 = vpop.f32.mrf.mxu0 }
 0x3db   : > { %v14938_v59 = vpop.f32.mrf.mxu1  ;;  %v2823_v24 = vadd.f32 %v2768_v22, %v14778_v18  ;;  %v14948_v52 = vadd.f32 %v10676_v12, %v2825_v25 }
 0x3dc   : > { %18935 = vst [vmem:[#allocation74_spill] sm:$0xff] %v14938_v59  ;;  %v10637_v63 = vpop.f32.mrf.mxu0 }
 0x3dd   : > { %v10680_v14 = vpop.f32.mrf.mxu1  ;;  %v2826_v59 = vadd.f32 %v10637_v63, %v14783_v50  ;;  %v14951_v3 = vadd.f32 %v3122_v37, %v2823_v24 }
 0x3de   : > { %v14953_v26 = vpop.f32.mrf.mxu0 }
 0x3df   : > { %v3138_v35 = vpop.f32.mrf.mxu1  ;;  %18939 = vst [vmem:[#allocation75_spill] sm:$0xff] %v14953_v26  ;;  %v14955_v48 = vadd.f32 %v10677_v0, %v2826_v59 }
 0x3e0   : > { %v10640_v58 = vpop.f32.mrf.mxu0  ;;  %10879 = vmatmul.mubr.msk.bf16.gmra.mxu0 %vm621_vm0, %v4616_v2 }
 0x3e1   : > { %v10681_v6 = vpop.f32.mrf.mxu1  ;;  %v2829_v18 = vadd.f32 %v10640_v58, %v14794_v36 }
 0x3e2   : > { %v2784_v12 = vpop.f32.mrf.mxu0 }
 0x3e3   : > { %v14958_v4 = vpop.f32.mrf.mxu1  ;;  %v2827_v9 = vadd.f32 %v2784_v12, %v14796_v46  ;;  %v14962_v50 = vadd.f32 %v10680_v14, %v2829_v18 }
 0x3e4   : > { %18940 = vst [vmem:[#allocation24_spill] sm:$0xff] %v14958_v4  ;;  %v10641_v37 = vpop.f32.mrf.mxu0 }
 0x3e5   : > { %v10732_v31 = vpop.f32.mrf.mxu1  ;;  %v2830_v45 = vadd.f32 %v10641_v37, %v14798_v56  ;;  %v14965_v54 = vadd.f32 %v3138_v35, %v2827_v9 }
 0x3e6   : > { %v14967_v0 = vpop.f32.mrf.mxu0 }
 0x3e7   : > { %v3702_v25 = vpop.f32.mrf.mxu1  ;;  %18941 = vst [vmem:[#allocation23_spill] sm:$0xff] %v14967_v0  ;;  %v14969_v22 = vadd.f32 %v10681_v6, %v2830_v45 }
 0x3e8   : > { %v10692_v24 = vpop.f32.mrf.mxu0 }
 0x3e9   : > { %v10733_v59 = vpop.f32.mrf.mxu1  ;;  %v3477_v36 = vadd.f32 %v10692_v24, %v14814_v5 }
 0x3ea   : > { %v3348_v2 = vpop.f32.mrf.mxu0 }
 0x3eb   : > { %v14971_v63 = vpop.f32.mrf.mxu1  ;;  %v3475_v14 = vadd.f32 %v3348_v2, %v14817_v32  ;;  %v14975_v58 = vadd.f32 %v10732_v31, %v3477_v36 }
 0x3ec   : > { %v10693_v18 = vpop.f32.mrf.mxu0 }
 0x3ed   : > { %v10736_v46 = vpop.f32.mrf.mxu1  ;;  %v3478_v35 = vadd.f32 %v10693_v18, %v14822_v60  ;;  %v14980_v12 = vadd.f32 %v3702_v25, %v3475_v14 }
 0x3ee   : > { %v14982_v6 = vpop.f32.mrf.mxu0 }
 0x3ef   : > { %v14977_v56 = vpop.f32.mrf.mxu1  ;;  %v14984_v37 = vadd.f32 %v10733_v59, %v3478_v35 }
 0x3f0   : > { %v10696_v45 = vpop.f32.mrf.mxu0 }
 0x3f1   : > { %v10737_v9 = vpop.f32.mrf.mxu1  ;;  %v3481_v24 = vadd.f32 %v10696_v45, %v14836_v23 }
 0x3f2   : > { %v3364_v32 = vpop.f32.mrf.mxu0 }
 0x3f3   : > { %v14986_v5 = vpop.f32.mrf.mxu1  ;;  %v14990_v36 = vadd.f32 %v3364_v32, %v14839_v21  ;;  %v14992_v2 = vadd.f32 %v10736_v46, %v3481_v24 }
 0x3f4   : > { %v10697_v60 = vpop.f32.mrf.mxu0 }
 0x3f5   : > { %v10740_v31 = vpop.f32.mrf.mxu1  ;;  %v3482_v14 = vadd.f32 %v10697_v60, %v14844_v47 }
 0x3f6   : > { %v14997_v18 = vpop.f32.mrf.mxu0 }
 0x3f7   : > { %v14994_v25 = vpop.f32.mrf.mxu1  ;;  %v14999_v35 = vadd.f32 %v10737_v9, %v3482_v14 }
 0x3f8   : > { %v10700_v4 = vpop.f32.mrf.mxu0 }
 0x3f9   : > { %v10741_v59 = vpop.f32.mrf.mxu1  ;;  %v3485_v23 = vadd.f32 %v10700_v4, %v14858_v38 }
 0x3fa   : > { %v3380_v45 = vpop.f32.mrf.mxu0 }
 0x3fb   : > { %v15001_v0 = vpop.f32.mrf.mxu1  ;;  %v15005_v46 = vadd.f32 %v3380_v45, %v14861_v20  ;;  %v15007_v24 = vadd.f32 %v10740_v31, %v3485_v23 }
 0x3fc   : > { %v10701_v32 = vpop.f32.mrf.mxu0 }
 0x3fd   : > { %v10744_v21 = vpop.f32.mrf.mxu1  ;;  %v3486_v47 = vadd.f32 %v10701_v32, %v14866_v41 }
 0x3fe   : > { %v15012_v60 = vpop.f32.mrf.mxu0 }
 0x3ff   : > { %v15009_v26 = vpop.f32.mrf.mxu1  ;;  %v15014_v14 = vadd.f32 %v10741_v59, %v3486_v47 }
 0x400   : > { %v10704_v57 = vpop.f32.mrf.mxu0 }
 0x401   : > { %v10745_v9 = vpop.f32.mrf.mxu1  ;;  %v3489_v38 = vadd.f32 %v10704_v57, %v14880_v39 }
 0x402   : > { %v3396_v4 = vpop.f32.mrf.mxu0 }
 0x403   : > { %v15016_v49 = vpop.f32.mrf.mxu1  ;;  %v15020_v31 = vadd.f32 %v3396_v4, %v14883_v1  ;;  %v15022_v23 = vadd.f32 %v10744_v21, %v3489_v38  ;;  %v15037_v21 = vld [vmem:[%s17939_s8 + $0x78] sm:$0xff] }
 0x404   : > { %18942 = vst [vmem:[#allocation100_spill] sm:$0xff] %v15016_v49  ;;  %v10705_v45 = vpop.f32.mrf.mxu0  ;;  %18945 = vst [vmem:[#allocation31_spill] sm:$0xff] %v15037_v21  ;;  %10883 = vmatpush3.msra.mxu1 %v15037_v21  ;;  %v15066_v21 = vld [vmem:[%s17939_s8 + $0x68] sm:$0xff] }
 0x405   : > { %v10748_v20 = vpop.f32.mrf.mxu1  ;;  %v3490_v41 = vadd.f32 %v10705_v45, %v14888_v51  ;;  %10884 = vmatprep.subr.mxu1 %v14534_v27  ;;  %18951 = vst [vmem:[#allocation40_spill] sm:$0xff] %v15066_v21 }
 0x406   : > { %v15027_v32 = vpop.f32.mrf.mxu0 }
 0x407   : > { %v15024_v17 = vpop.f32.mrf.mxu1  ;;  %v15029_v47 = vadd.f32 %v10745_v9, %v3490_v41  ;;  %v15054_v41 = vld [vmem:[%s17939_s8 + $0x70] sm:$0xff] }
 0x408   : > { %18943 = vst [vmem:[#allocation32_spill] sm:$0xff] %v15024_v17  ;;  %v10708_v30 = vpop.f32.mrf.mxu0  ;;  %18949 = vst [vmem:[#allocation41_spill] sm:$0xff] %v15054_v41  ;;  %10885 = vmatpush3.msra.mxu1 %v15054_v41 }
 0x409   : > { %v10749_v59 = vpop.f32.mrf.mxu1  ;;  %v3493_v57 = vadd.f32 %v10708_v30, %v14903_v7  ;;  %10886 = vmatprep.subr.mxu1 %v14534_v27 }
 0x40a   : > { %v3412_v39 = vpop.f32.mrf.mxu0  ;;  %10887 = vmatpush3.msra.mxu1 %v15066_v21  ;;  %v15095_v21 = vld [vmem:[%s17939_s8 + $0x58] sm:$0xff] }
 0x40b   : > { %v15031_v33 = vpop.f32.mrf.mxu1  ;;  %v15040_v38 = vadd.f32 %v3412_v39, %v14906_v40  ;;  %v15042_v51 = vadd.f32 %v10748_v20, %v3493_v57  ;;  %10888 = vmatprep.subr.mxu1 %v14534_v27  ;;  %18957 = vst [vmem:[#allocation46_spill] sm:$0xff] %v15095_v21 }
 0x40c   : > { %18944 = vst [vmem:[#allocation101_spill] sm:$0xff] %v15031_v33  ;;  %v10709_v9 = vpop.f32.mrf.mxu0  ;;  %v15083_v33 = vld [vmem:[%s17939_s8 + $0x60] sm:$0xff] }
 0x40d   : > { %v10752_v1 = vpop.f32.mrf.mxu1  ;;  %18946 = vst [vmem:[#allocation88_spill] sm:$0xff] %v15040_v38  ;;  %v3494_v30 = vadd.f32 %v10709_v9, %v14910_v34  ;;  %18955 = vst [vmem:[#allocation94_spill] sm:$0xff] %v15083_v33  ;;  %10889 = vmatpush3.msra.mxu1 %v15083_v33 }
 0x40e   : > { %v15049_v7 = vpop.f32.mrf.mxu0  ;;  %10890 = vmatprep.subr.mxu1 %v14534_v27 }
 0x40f   : > { %v15045_v4 = vpop.f32.mrf.mxu1  ;;  %18948 = vst [vmem:[#allocation42_spill] sm:$0xff] %v15049_v7  ;;  %v15056_v40 = vadd.f32 %v10749_v59, %v3494_v30  ;;  %10891 = vmatpush3.msra.mxu1 %v15095_v21 }
 0x410   : > { %18947 = vst [vmem:[#allocation35_spill] sm:$0xff] %v15045_v4  ;;  %v10712_v20 = vpop.f32.mrf.mxu0  ;;  %10892 = vmatprep.subr.mxu1 %v14534_v27 }
 0x411   : > { %v10753_v45 = vpop.f32.mrf.mxu1  ;;  %v3497_v39 = vadd.f32 %v10712_v20, %v14925_v62 }
 0x412   : > { %v3428_v34 = vpop.f32.mrf.mxu0 }
 0x413   : > { %v15059_v57 = vpop.f32.mrf.mxu1  ;;  %v15069_v4 = vadd.f32 %v3428_v34, %v14928_v28  ;;  %v15071_v59 = vadd.f32 %v10752_v1, %v3497_v39 }
 0x414   : > { %18950 = vst [vmem:[#allocation102_spill] sm:$0xff] %v15059_v57  ;;  %v10713_v30 = vpop.f32.mrf.mxu0 }
 0x415   : > { %v10756_v9 = vpop.f32.mrf.mxu1  ;;  %18952 = vst [vmem:[#allocation103_spill] sm:$0xff] %v15069_v4  ;;  %v3498_v62 = vadd.f32 %v10713_v30, %v14932_v15 }
 0x416   : > { %v15078_v20 = vpop.f32.mrf.mxu0 }
 0x417   : > { %v15074_v41 = vpop.f32.mrf.mxu1  ;;  %18954 = vst [vmem:[#allocation70_spill] sm:$0xff] %v15078_v20  ;;  %v15085_v28 = vadd.f32 %v10753_v45, %v3498_v62  ;;  %v15112_v20 = vld [vmem:[%s17939_s8 + $0x50] sm:$0xff] }
 0x418   : > { %18953 = vst [vmem:[#allocation39_spill] sm:$0xff] %v15074_v41  ;;  %v10716_v1 = vpop.f32.mrf.mxu0  ;;  %18961 = vst [vmem:[#allocation52_spill] sm:$0xff] %v15112_v20  ;;  %10893 = vmatpush3.msra.mxu1 %v15112_v20 }
 0x419   : > { %v10757_v57 = vpop.f32.mrf.mxu1  ;;  %v3501_v34 = vadd.f32 %v10716_v1, %v14948_v52  ;;  %10894 = vmatprep.subr.mxu1 %v14534_v27 }
 0x41a   : > { %v3444_v15 = vpop.f32.mrf.mxu0 }
 0x41b   : > { %v15088_v39 = vpop.f32.mrf.mxu1  ;;  %v15098_v41 = vadd.f32 %v3444_v15, %v14951_v3  ;;  %v15100_v45 = vadd.f32 %v10756_v9, %v3501_v34 }
 0x41c   : > { %18956 = vst [vmem:[#allocation109_spill] sm:$0xff] %v15088_v39  ;;  %v10717_v62 = vpop.f32.mrf.mxu0 }
 0x41d   : > { %v10760_v30 = vpop.f32.mrf.mxu1  ;;  %18958 = vst [vmem:[#allocation110_spill] sm:$0xff] %v15098_v41  ;;  %v3502_v52 = vadd.f32 %v10717_v62, %v14955_v48  ;;  %v15124_v48 = vld [vmem:[%s17939_s8 + $0x48] sm:$0xff] }
 0x41e   : > { %v15107_v1 = vpop.f32.mrf.mxu0  ;;  %18963 = vst [vmem:[#allocation51_spill] sm:$0xff] %v15124_v48  ;;  %10895 = vmatpush3.msra.mxu1 %v15124_v48 }
 0x41f   : > { %v15103_v33 = vpop.f32.mrf.mxu1  ;;  %18960 = vst [vmem:[#allocation36_spill] sm:$0xff] %v15107_v1  ;;  %v15114_v3 = vadd.f32 %v10757_v57, %v3502_v52  ;;  %10896 = vmatprep.subr.mxu1 %v14534_v27 }
 0x420   : > { %18959 = vst [vmem:[#allocation45_spill] sm:$0xff] %v15103_v33  ;;  %v10720_v9 = vpop.f32.mrf.mxu0 }
 0x421   : > { %v10761_v39 = vpop.f32.mrf.mxu1  ;;  %v3505_v34 = vadd.f32 %v10720_v9, %v14962_v50 }
 0x422   : > { %v3460_v15 = vpop.f32.mrf.mxu0 }
 0x423   : > { %v15119_v21 = vpop.f32.mrf.mxu1  ;;  %v15127_v62 = vadd.f32 %v3460_v15, %v14965_v54  ;;  %v15129_v57 = vadd.f32 %v10760_v30, %v3505_v34 }
 0x424   : > { %18962 = vst [vmem:[#allocation43_spill] sm:$0xff] %v15119_v21  ;;  %v10721_v52 = vpop.f32.mrf.mxu0  ;;  %v15141_v21 = vld [vmem:[%s17939_s8 + $0x40] sm:$0xff] }
 0x425   : > { %18964 = vst [vmem:[#allocation85_spill] sm:$0xff] %v15127_v62  ;;  %v3506_v50 = vadd.f32 %v10721_v52, %v14969_v22  ;;  %v15136_v20 = vpop.f32.mrf.mxu1  ;;  %18966 = vst [vmem:[#allocation86_spill] sm:$0xff] %v15141_v21  ;;  %10897 = vmatpush3.msra.mxu1 %v15141_v21  ;;  %v15155_v52 = vld [vmem:[%s17939_s8 + $0x38] sm:$0xff]  ;;  %v15172_v21 = vld [vmem:[%s17939_s8 + $0x30] sm:$0xff] }
 0x426   : > { %v15134_v9 = vpop.f32.mrf.mxu0  ;;  %10898 = vmatprep.subr.mxu1 %v14534_v27  ;;  %18967 = vst [vmem:[#allocation55_spill] sm:$0xff] %v15155_v52  ;;  %18968 = vst [vmem:[#allocation116_spill] sm:$0xff] %v15172_v21 }
 0x427   : > { %18965 = vst [vmem:[#allocation56_spill] sm:$0xff] %v15134_v9  ;;  %v15143_v54 = vadd.f32 %v10761_v39, %v3506_v50  ;;  %v15150_v15 = vpop.f32.mrf.mxu1  ;;  %10899 = vmatpush3.msra.mxu1 %v15155_v52 }
 0x428   : > { %v10772_v30 = vpop.f32.mrf.mxu0  ;;  %10900 = vmatprep.subr.mxu1 %v14534_v27 }
 0x429   : > { %v15148_v34 = vadd.f32 %v10772_v30, %v14975_v58  ;;  %v15167_v30 = vpop.f32.mrf.mxu1  ;;  %10901 = vmatpush3.msra.mxu1 %v15172_v21 }
 0x42a   : > { %v4056_v22 = vpop.f32.mrf.mxu0  ;;  %10902 = vmatprep.subr.mxu1 %v14534_v27 }
 0x42b   : > { %v15158_v48 = vadd.f32 %v4056_v22, %v14980_v12  ;;  %v15179_v52 = vpop.f32.mrf.mxu1 }
 0x42c   : > { %v10773_v39 = vpop.f32.mrf.mxu0 }
 0x42d   : > { %v15163_v50 = vadd.f32 %v10773_v39, %v14984_v37  ;;  %v15186_v33 = vpop.f32.mrf.mxu1 }
 0x42e   : > { %v15165_v58 = vpop.f32.mrf.mxu0 }
 0x42f   : > { %v15193_v41 = vpop.f32.mrf.mxu1 }
 0x430   : > { %v10776_v12 = vpop.f32.mrf.mxu0 }
 0x431   : > { %v15177_v22 = vadd.f32 %v10776_v12, %v14992_v2  ;;  %v15200_v12 = vld [vmem:[%s17939_s8 + $0x28] sm:$0xff]  ;;  %v15218_v4 = vpop.f32.mrf.mxu1 }
 0x432   : > { %v15181_v37 = vpop.f32.mrf.mxu0  ;;  %18969 = vst [vmem:[#allocation117_spill] sm:$0xff] %v15200_v12  ;;  %10903 = vmatpush3.msra.mxu1 %v15200_v12  ;;  %v15226_v12 = vld [vmem:[%s17939_s8 + $0x10] sm:$0xff] }
 0x433   : > { %10904 = vmatprep.subr.mxu1 %v14534_v27  ;;  %18972 = vst [vmem:[#allocation58_spill] sm:$0xff] %v15226_v12 }
 0x434   : > { %v10777_v39 = vpop.f32.mrf.mxu0 }
 0x435   : > { %v15184_v9 = vadd.f32 %v10777_v39, %v14999_v35  ;;  %v15205_v35 = vld [vmem:[%s17939_s8 + $0x20] sm:$0xff] }
 0x436   : > { %v15188_v62 = vpop.f32.mrf.mxu0  ;;  %18970 = vst [vmem:[#allocation118_spill] sm:$0xff] %v15205_v35  ;;  %10905 = vmatpush3.msra.mxu1 %v15205_v35  ;;  %v15239_v35 = vpop.f32.mrf.mxu1 }
 0x437   : > { %10906 = vmatprep.subr.mxu1 %v14534_v27 }
 0x438   : > { %v10780_v1 = vpop.f32.mrf.mxu0 }
 0x439   : > { %v15191_v21 = vadd.f32 %v10780_v1, %v15007_v24  ;;  %v15212_v24 = vld [vmem:[%s17939_s8 + $0x18] sm:$0xff] }
 0x43a   : > { %v15195_v2 = vpop.f32.mrf.mxu0  ;;  %18971 = vst [vmem:[#allocation87_spill] sm:$0xff] %v15212_v24  ;;  %10907 = vmatpush3.msra.mxu1 %v15212_v24 }
 0x43b   : > { %10908 = vmatprep.subr.mxu1 %v14534_v27  ;;  %v15249_v27 = vld [vmem:[%s17939_s8] sm:$0xff] }
 0x43c   : > { %v10781_v39 = vpop.f32.mrf.mxu0  ;;  %10909 = vmatpush3.msra.mxu1 %v15226_v12  ;;  %18977 = vst [vmem:[#allocation126_spill] sm:$0xff] %v15249_v27 }
 0x43d   : > { %v15215_v1 = vadd.f32 %v10781_v39, %v15014_v14  ;;  %v15233_v14 = vld [vmem:[%s17939_s8 + $0x8] sm:$0xff]  ;;  %10910 = vmatprep.subr.mxu1 %v15243_v42 }
 0x43e   : > { %v15220_v7 = vpop.f32.mrf.mxu0  ;;  %18973 = vst [vmem:[#allocation90_spill] sm:$0xff] %v15233_v14  ;;  %10911 = vmatpush3.msra.mxu1 %v15233_v14 }
 0x43f   : > { %10912 = vmatprep.subr.mxu1 %v15243_v42 }
 0x440   : > { %v10784_v17 = vpop.f32.mrf.mxu0  ;;  %10913 = vmatpush3.msra.mxu1 %v15249_v27 }
 0x441   : > { %v15236_v39 = vadd.f32 %v10784_v17, %v15022_v23  ;;  %v15257_v23 = vpop.f32.mrf.mxu1  ;;  %10917 = vmatprep.subr.mxu1 %v15243_v42 }
 0x442   : > { %v15241_v38 = vpop.f32.mrf.mxu0 }
 0x443   : > { %18974 = vst [vmem:[#allocation57_spill] sm:$0xff] %v15236_v39  ;;  %18975 = vst [vmem:[#allocation63_spill] sm:$0xff] %v15241_v38  ;;  %v15265_v49 = vpop.f32.mrf.mxu1 }
 0x444   : > { %v10785_v24 = vpop.f32.mrf.mxu0 }
 0x445   : > { %v15254_v17 = vadd.f32 %v10785_v24, %v15029_v47  ;;  %v15272_v24 = vpop.f32.mrf.mxu1 }
 0x446   : > { %v15259_v12 = vpop.f32.mrf.mxu0 }
 0x447   : > { %18978 = vst [vmem:[#allocation127_spill] sm:$0xff] %v15254_v17  ;;  %18979 = vst [vmem:[#allocation132_spill] sm:$0xff] %v15259_v12  ;;  %v15279_v42 = vpop.f32.mrf.mxu1 }
 0x448   : > { %v10788_v16 = vpop.f32.mrf.mxu0 }
 0x449   : > { %v15263_v39 = vadd.f32 %v10788_v16, %v15042_v51 }
 0x44a   : > { %v15267_v14 = vpop.f32.mrf.mxu0 }
 0x44b   : > { %18980 = vst [vmem:[#allocation65_spill] sm:$0xff] %v15263_v39  ;;  %18981 = vst [vmem:[#allocation98_spill] sm:$0xff] %v15267_v14  ;;  %v15286_v14 = vpop.f32.mrf.mxu1 }
 0x44c   : > { %v10789_v38 = vpop.f32.mrf.mxu0 }
 0x44d   : > { %v15270_v47 = vadd.f32 %v10789_v38, %v15056_v40 }
 0x44e   : > { %v15274_v27 = vpop.f32.mrf.mxu0 }
 0x44f   : > { %18982 = vst [vmem:[#allocation64_spill] sm:$0xff] %v15270_v47  ;;  %18983 = vst [vmem:[#allocation81_spill] sm:$0xff] %v15274_v27  ;;  %v15293_v27 = vpop.f32.mrf.mxu1 }
 0x450   : > { %v10792_v17 = vpop.f32.mrf.mxu0 }
 0x451   : > { %v15277_v12 = vadd.f32 %v10792_v17, %v15071_v59 }
 0x452   : > { %v15281_v16 = vpop.f32.mrf.mxu0 }
 0x453   : > { %18984 = vst [vmem:[#allocation80_spill] sm:$0xff] %v15277_v12  ;;  %18985 = vst [vmem:[#allocation134_spill] sm:$0xff] %v15281_v16  ;;  %v15300_v16 = vpop.f32.mrf.mxu1 }
 0x454   : > { %v10793_v51 = vpop.f32.mrf.mxu0 }
 0x455   : > { %v15284_v39 = vadd.f32 %v10793_v51, %v15085_v28  ;;  %v3154_v51 = vadd.f32 %v14806_v44, %v14820_v13  ;;  %v4507_v44 = vadd.f32 %v15136_v20, %v15148_v34  ;;  %v3833_v34 = vadd.f32 %v14977_v56, %v14990_v36 }
 0x456   : > { %v15288_v38 = vpop.f32.mrf.mxu0 }
 0x457   : > { %18986 = vst [vmem:[#allocation69_spill] sm:$0xff] %v15284_v39  ;;  %18987 = vst [vmem:[#allocation139_spill] sm:$0xff] %v15288_v38 }
 0x458   : > { %v10796_v40 = vpop.f32.mrf.mxu0 }
 0x459   : > { %v15291_v47 = vadd.f32 %v10796_v40, %v15100_v45  ;;  %v3476_v40 = vadd.f32 %v14982_v6, %v3154_v51  ;;  %v15340_v51 = vld [vmem:[%s587_s23] ss:$0 sm:$0xff] }
 0x45a   : > { %v15295_v59 = vpop.f32.mrf.mxu0 }
 0x45b   : > { %18988 = vst [vmem:[#allocation140_spill] sm:$0xff] %v15291_v47  ;;  %18989 = vst [vmem:[#allocation145_spill] sm:$0xff] %v15295_v59  ;;  %v15310_v47 = vpop.f32.mrf.mxu1 }
 0x45c   : > { %v10797_v17 = vpop.f32.mrf.mxu0 }
 0x45d   : > { %v15298_v12 = vadd.f32 %v10797_v17, %v15114_v3  ;;  %v3830_v17 = vadd.f32 %v14971_v63, %v3476_v40  ;;  %v4505_v63 = vadd.f32 %v15150_v15, %v15158_v48 }
 0x45e   : > { %v15302_v28 = vpop.f32.mrf.mxu0 }
 0x45f   : > { %18990 = vst [vmem:[#allocation111_spill] sm:$0xff] %v15298_v12  ;;  %18991 = vst [vmem:[#allocation112_spill] sm:$0xff] %v15302_v28  ;;  %v15318_v12 = vpop.f32.mrf.mxu1  ;;  %v4184_v13 = vadd.f32 %v15165_v58, %v3830_v17  ;;  %v4508_v58 = vadd.f32 %v15167_v30, %v15163_v50  ;;  %v4511_v50 = vadd.f32 %v15186_v33, %v15177_v22 }
 0x460   : > { %v10800_v39 = vpop.f32.mrf.mxu0  ;;  %v3837_v22 = vadd.f32 %v14994_v25, %v15005_v46 }
 0x461   : > { %v15307_v45 = vadd.f32 %v10800_v39, %v15129_v57  ;;  %v15332_v57 = vld [vmem:[%s17938_s7] ss:$0 sm:$0xff]  ;;  %v3158_v39 = vadd.f32 %v14828_v10, %v14842_v53  ;;  %v4506_v15 = vadd.f32 %v15179_v52, %v4184_v13  ;;  %v4187_v10 = vadd.f32 %v15181_v37, %v3833_v34 }
 0x462   : > { %v15312_v59 = vpop.f32.mrf.mxu0  ;;  %v3162_v37 = vadd.f32 %v14850_v55, %v14864_v11 }
 0x463   : > { %v3480_v48 = vadd.f32 %v14997_v18, %v3158_v39 }
 0x464   : > { %v10801_v38 = vpop.f32.mrf.mxu0  ;;  %v3484_v55 = vadd.f32 %v15012_v60, %v3162_v37 }
 0x465   : > { %v15315_v3 = vadd.f32 %v10801_v38, %v15143_v54  ;;  %v15338_v38 = vpop.f32.mrf.mxu1  ;;  %v3834_v13 = vadd.f32 %v14986_v5, %v3480_v48  ;;  %v4191_v48 = vadd.f32 %v15195_v2, %v3837_v22 }
 0x466   : > { %v15320_v28 = vpop.f32.mrf.mxu0 }
 0x467   : > { %18992 = vst [vmem:[#allocation21_spill] sm:$0xff] %v15315_v3  ;;  %v15354_v56 = vpop.f32.mrf.mxu1 }
 0x468   : > { %v10852_v6 = vpop.f32.mrf.mxu0 }
 0x469   : > { %v4861_v54 = vadd.f32 %v10852_v6, %v4507_v44  ;;  %v15373_v34 = vpop.f32.mrf.mxu1 }
 0x46a   : > { %v4732_v20 = vpop.f32.mrf.mxu0 }
 0x46b   : > { %v4900_v40 = vadd.f32 %v15332_v57, %v4861_v54  ;;  %v4859_v17 = vadd.f32 %v4732_v20, %v4505_v63  ;;  %v4509_v54 = vadd.f32 %v15193_v41, %v4187_v10 }
 0x46c   : > { %v10853_v44 = vpop.f32.mrf.mxu0 }
 0x46d   : > { %v15351_v53 = vadd.f32 %v15340_v51, %v4900_v40  ;;  %v4898_v6 = vadd.f32 %v15332_v57, %v4859_v17  ;;  %v4862_v3 = vadd.f32 %v10853_v44, %v4508_v58  ;;  %v4512_v40 = vadd.f32 %v15218_v4, %v15184_v9 }
 0x46e   : > { %v4735_v36 = vpop.f32.mrf.mxu0  ;;  %v4515_v4 = vadd.f32 %v15257_v23, %v15191_v21 }
 0x46f   : > { %v15359_v30 = vadd.f32 %v15340_v51, %v4898_v6  ;;  %v4901_v18 = vadd.f32 %v15332_v57, %v4862_v3  ;;  %v4860_v52 = vadd.f32 %v4735_v36, %v4506_v15  ;;  %v4188_v3 = vadd.f32 %v15188_v62, %v3834_v13  ;;  %v15390_v15 = vpop.f32.mrf.mxu1 }
 0x470   : > { %v10856_v63 = vpop.f32.mrf.mxu0  ;;  %v3838_v6 = vadd.f32 %v15001_v0, %v3484_v55  ;;  %v2258_v36 = vadd.f32 %v14722_v19, %v14740_v43  ;;  %v4513_v0 = vadd.f32 %v15265_v49, %v4191_v48  ;;  %v3841_v13 = vadd.f32 %v15009_v26, %v15020_v31  ;;  %v18994_v31 = vld [vmem:[#allocation63_spill] sm:$0xff]  ;;  %v18995_v55 = vld [vmem:[#allocation100_spill] sm:$0xff] }
 0x471   : > { %v15367_v39 = vadd.f32 %v15340_v51, %v4901_v18  ;;  %v4899_v20 = vadd.f32 %v15332_v57, %v4860_v52  ;;  %v4865_v33 = vadd.f32 %v10856_v63, %v4511_v50  ;;  %v4510_v62 = vadd.f32 %v15239_v35, %v4188_v3  ;;  %v15410_v19 = vpop.f32.mrf.mxu1 }
 0x472   : > { %v4748_v58 = vpop.f32.mrf.mxu0  ;;  %v3166_v35 = vadd.f32 %v14872_v29, %v14886_v8  ;;  %v4192_v37 = vadd.f32 %v15220_v7, %v3838_v6  ;;  %v4516_v49 = vadd.f32 %v15272_v24, %v15215_v1  ;;  %v2816_v26 = vadd.f32 %v14908_v61, %v2258_v36 }
 0x473   : > { %v15377_v11 = vadd.f32 %v15340_v51, %v4899_v20  ;;  %v4904_v5 = vadd.f32 %v15332_v57, %v4865_v33  ;;  %v4863_v41 = vadd.f32 %v4748_v58, %v4509_v54 }
 0x474   : > { %v10857_v17 = vpop.f32.mrf.mxu0  ;;  %v3488_v63 = vadd.f32 %v15027_v32, %v3166_v35  ;;  %v4195_v32 = vadd.f32 %v18994_v31, %v3841_v13  ;;  %v4514_v3 = vadd.f32 %v15279_v42, %v4192_v37  ;;  %v19001_v37 = vld [vmem:[#allocation88_spill] sm:$0xff]  ;;  %v19003_v13 = vld [vmem:[#allocation42_spill] sm:$0xff] }
 0x475   : > { %v4969_v25 = vadd.f32 %v15377_v11, %v15359_v30  ;;  %v15386_v46 = vadd.f32 %v15340_v51, %v4904_v5  ;;  %v4902_v60 = vadd.f32 %v15332_v57, %v4863_v41  ;;  %v4866_v44 = vadd.f32 %v10857_v17, %v4512_v40  ;;  %v15431_v41 = vpop.f32.mrf.mxu1  ;;  %v18996_v17 = vld [vmem:[#allocation57_spill] sm:$0xff]  ;;  %v19005_v31 = vld [vmem:[#allocation14_spill] sm:$0xff] }
 0x476   : > { %v4751_v10 = vpop.f32.mrf.mxu0  ;;  %v3842_v5 = vadd.f32 %v18995_v55, %v3488_v63  ;;  %v4519_v48 = vadd.f32 %v15286_v14, %v18996_v17 }
 0x477   : > { %v4970_v9 = vadd.f32 %v4969_v25, %v15351_v53  ;;  %v15397_v2 = vadd.f32 %v15340_v51, %v4902_v60  ;;  %v4905_v50 = vadd.f32 %v15332_v57, %v4866_v44  ;;  %v4864_v18 = vadd.f32 %v4751_v10, %v4510_v62  ;;  %v18997_v62 = vld [vmem:[#allocation108_spill] sm:$0xff] }
 0x478   : > { %v10860_v52 = vpop.f32.mrf.mxu0  ;;  %v3170_v44 = vadd.f32 %v18997_v62, %v2816_v26  ;;  %v4517_v10 = vadd.f32 %v15293_v27, %v4195_v32  ;;  %v15453_v27 = vpop.f32.mrf.mxu1  ;;  %v19008_v62 = vld [vmem:[#allocation65_spill] sm:$0xff] }
 0x479   : > { %v4971_v21 = vadd.f32 %v4970_v9, %v15367_v39  ;;  %v4869_v23 = vadd.f32 %v10860_v52, %v4515_v4  ;;  %v15413_v43 = vadd.f32 %v15340_v51, %v4905_v50  ;;  %v4903_v29 = vadd.f32 %v15332_v57, %v4864_v18  ;;  %v18998_v9 = vld [vmem:[#allocation132_spill] sm:$0xff]  ;;  %v19000_v52 = vld [vmem:[#allocation83_spill] sm:$0xff] }
 0x47a   : > { %v4764_v8 = vpop.f32.mrf.mxu0  ;;  %v4196_v36 = vadd.f32 %v18998_v9, %v3842_v5  ;;  %v18999_v18 = vld [vmem:[#allocation84_spill] sm:$0xff]  ;;  %v3492_v63 = vadd.f32 %v19003_v13, %v3170_v44  ;;  %v4523_v44 = vadd.f32 %v15318_v12, %v19008_v62 }
 0x47b   : > { %v4972_v7 = vadd.f32 %v4971_v21, %v15397_v2  ;;  %v4908_v54 = vadd.f32 %v15332_v57, %v4869_v23  ;;  %v4867_v20 = vadd.f32 %v4764_v8, %v4513_v0  ;;  %v15423_v33 = vadd.f32 %v15340_v51, %v4903_v29  ;;  %v19002_v21 = vld [vmem:[#allocation32_spill] sm:$0xff] }
 0x47c   : > { %v10861_v22 = vpop.f32.mrf.mxu0  ;;  %v2274_v0 = vadd.f32 %v19000_v52, %v18999_v18  ;;  %v3845_v23 = vadd.f32 %v19002_v21, %v19001_v37  ;;  %v4518_v55 = vadd.f32 %v15310_v47, %v4196_v36  ;;  %v19010_v18 = vld [vmem:[#allocation81_spill] sm:$0xff]  ;;  %v19011_v21 = vld [vmem:[#allocation92_spill] sm:$0xff] }
 0x47d   : > { %v15427_v58 = vadd.f32 %v15340_v51, %v4908_v54  ;;  %v4906_v1 = vadd.f32 %v15332_v57, %v4867_v20  ;;  %v4870_v24 = vadd.f32 %v10861_v22, %v4516_v49  ;;  %v4973_v61 = vadd.f32 %v4972_v7, %v15423_v33  ;;  %v19004_v49 = vld [vmem:[#allocation127_spill] sm:$0xff]  ;;  %v19006_v22 = vld [vmem:[#allocation98_spill] sm:$0xff] }
 0x47e   : > { %v4767_v40 = vpop.f32.mrf.mxu0  ;;  %v4520_v7 = vadd.f32 %v15300_v16, %v19004_v49  ;;  %v2820_v32 = vadd.f32 %v19005_v31, %v2274_v0  ;;  %v19015_v49 = vld [vmem:[#allocation70_spill] sm:$0xff]  ;;  %v19016_v31 = vld [vmem:[#allocation64_spill] sm:$0xff] }
 0x47f   : > { %v15437_v25 = vadd.f32 %v15340_v51, %v4906_v1  ;;  %v4909_v42 = vadd.f32 %v15332_v57, %v4870_v24  ;;  %v4868_v60 = vadd.f32 %v4767_v40, %v4514_v3  ;;  %v4974_v6 = vadd.f32 %v4973_v61, %v15386_v46  ;;  %v19007_v40 = vld [vmem:[#allocation101_spill] sm:$0xff] }
 0x480   : > { %v10864_v4 = vpop.f32.mrf.mxu0  ;;  %v4199_v3 = vadd.f32 %v19006_v22, %v3845_v23  ;;  %v3846_v17 = vadd.f32 %v19007_v40, %v3492_v63  ;;  %v19012_v23 = vld [vmem:[#allocation91_spill] sm:$0xff] }
 0x481   : > { %v15445_v35 = vadd.f32 %v15340_v51, %v4909_v42  ;;  %v4907_v14 = vadd.f32 %v15332_v57, %v4868_v60  ;;  %v4873_v50 = vadd.f32 %v10864_v4, %v4519_v48  ;;  %v4975_v29 = vadd.f32 %v4974_v6, %v15413_v43  ;;  %v15471_v48 = vpop.f32.mrf.mxu1  ;;  %v19009_v4 = vld [vmem:[#allocation15_spill] sm:$0xff] }
 0x482   : > { %v4780_v8 = vpop.f32.mrf.mxu0  ;;  %v3174_v9 = vadd.f32 %v19009_v4, %v2820_v32  ;;  %v4521_v36 = vadd.f32 %v15338_v38, %v4199_v3  ;;  %v4200_v52 = vadd.f32 %v19010_v18, %v3846_v17  ;;  %v2290_v13 = vadd.f32 %v19012_v23, %v19011_v21  ;;  %v19013_v63 = vld [vmem:[#allocation103_spill] sm:$0xff] }
 0x483   : > { %v15459_v54 = vadd.f32 %v15340_v51, %v4907_v14  ;;  %v4912_v20 = vadd.f32 %v15332_v57, %v4873_v50  ;;  %v4871_v26 = vadd.f32 %v4780_v8, %v4517_v10  ;;  %v4976_v1 = vadd.f32 %v4975_v29, %v15437_v25  ;;  %v19014_v29 = vld [vmem:[#allocation35_spill] sm:$0xff]  ;;  %v4474_v38 = vpop.f32.mrf.mxu1 }
 0x484   : > { %v10865_v24 = vpop.f32.mrf.mxu0  ;;  %v3849_v8 = vadd.f32 %v19014_v29, %v19013_v63  ;;  %v4524_v32 = vadd.f32 %v15354_v56, %v19016_v31  ;;  %v19026_v31 = vld [vmem:[#allocation39_spill] sm:$0xff] }
 0x485   : > { %v15467_v5 = vadd.f32 %v15340_v51, %v4912_v20  ;;  %v4910_v16 = vadd.f32 %v15332_v57, %v4871_v26  ;;  %v4874_v61 = vadd.f32 %v10865_v24, %v4520_v7  ;;  %v4977_v42 = vadd.f32 %v4976_v1, %v15459_v54  ;;  %v19017_v24 = vld [vmem:[#allocation75_spill] sm:$0xff] }
 0x486   : > { %v4783_v60 = vpop.f32.mrf.mxu0  ;;  %v3496_v7 = vadd.f32 %v19015_v49, %v3174_v9  ;;  %v19023_v49 = vld [vmem:[#allocation99_spill] sm:$0xff] }
 0x487   : > { %v15477_v10 = vadd.f32 %v15340_v51, %v4910_v16  ;;  %v4913_v47 = vadd.f32 %v15332_v57, %v4874_v61  ;;  %v4872_v6 = vadd.f32 %v4783_v60, %v4518_v55  ;;  %v4978_v14 = vadd.f32 %v4977_v42, %v15427_v58  ;;  %v19018_v16 = vld [vmem:[#allocation134_spill] sm:$0xff] }
 0x488   : > { %v10868_v50 = vpop.f32.mrf.mxu0  ;;  %v2824_v55 = vadd.f32 %v19017_v24, %v2290_v13  ;;  %v4203_v61 = vadd.f32 %v19018_v16, %v3849_v8  ;;  %v4522_v42 = vadd.f32 %v15373_v34, %v4200_v52  ;;  %v19021_v52 = vld [vmem:[#allocation74_spill] sm:$0xff]  ;;  %v19022_v13 = vld [vmem:[#allocation139_spill] sm:$0xff]  ;;  %v19028_v16 = vld [vmem:[#allocation69_spill] sm:$0xff] }
 0x489   : > { %v15485_v0 = vadd.f32 %v15340_v51, %v4913_v47  ;;  %v4911_v12 = vadd.f32 %v15332_v57, %v4872_v6  ;;  %v4877_v37 = vadd.f32 %v10868_v50, %v4523_v44  ;;  %v4979_v20 = vadd.f32 %v4978_v14, %v15445_v35  ;;  %v19019_v44 = vld [vmem:[#allocation102_spill] sm:$0xff]  ;;  %v10837_v6 = vpop.f32.mrf.mxu1 }
 0x48a   : > { %v4796_v26 = vpop.f32.mrf.mxu0  ;;  %v3850_v47 = vadd.f32 %v19019_v44, %v3496_v7  ;;  %v19024_v7 = vld [vmem:[#allocation97_spill] sm:$0xff] }
 0x48b   : > { %v15497_v22 = vadd.f32 %v15340_v51, %v4911_v12  ;;  %v4916_v3 = vadd.f32 %v15332_v57, %v4877_v37  ;;  %v4875_v1 = vadd.f32 %v4796_v26, %v4521_v36  ;;  %v4980_v40 = vadd.f32 %v4979_v20, %v15477_v10  ;;  %v19020_v36 = vld [vmem:[#allocation80_spill] sm:$0xff]  ;;  %v19025_v26 = vld [vmem:[#allocation110_spill] sm:$0xff]  ;;  %v19030_v44 = vld [vmem:[#allocation145_spill] sm:$0xff] }
 0x48c   : > { %v10869_v17 = vpop.f32.mrf.mxu0  ;;  %v4527_v14 = vadd.f32 %v15390_v15, %v19020_v36  ;;  %v3178_v12 = vadd.f32 %v19021_v52, %v2824_v55  ;;  %v4525_v37 = vadd.f32 %v15410_v19, %v4203_v61  ;;  %v4204_v63 = vadd.f32 %v19022_v13, %v3850_v47  ;;  %v4477_v19 = vpop.f32.mrf.mxu1 }
 0x48d   : > { %v15505_v60 = vadd.f32 %v15340_v51, %v4916_v3  ;;  %v4914_v56 = vadd.f32 %v15332_v57, %v4875_v1  ;;  %v4878_v62 = vadd.f32 %v10869_v17, %v4524_v32  ;;  %v4981_v4 = vadd.f32 %v4980_v40, %v15497_v22  ;;  %v19027_v3 = vld [vmem:[#allocation36_spill] sm:$0xff] }
 0x48e   : > { %v4799_v9 = vpop.f32.mrf.mxu0  ;;  %v2306_v20 = vadd.f32 %v19024_v7, %v19023_v49  ;;  %v3853_v32 = vadd.f32 %v19026_v31, %v19025_v26  ;;  %v3500_v1 = vadd.f32 %v19027_v3, %v3178_v12  ;;  %v4528_v61 = vadd.f32 %v15431_v41, %v19028_v16  ;;  %v10840_v12 = vpop.f32.mrf.mxu1  ;;  %v19034_v31 = vld [vmem:[#allocation112_spill] sm:$0xff] }
 0x48f   : > { %v15513_v50 = vadd.f32 %v15340_v51, %v4914_v56  ;;  %v4917_v34 = vadd.f32 %v15332_v57, %v4878_v62  ;;  %v4876_v18 = vadd.f32 %v4799_v9, %v4522_v42  ;;  %v4982_v21 = vadd.f32 %v4981_v4, %v15467_v5  ;;  %v19029_v56 = vld [vmem:[#allocation23_spill] sm:$0xff] }
 0x490   : > { %v10872_v23 = vpop.f32.mrf.mxu0  ;;  %v2828_v62 = vadd.f32 %v19029_v56, %v2306_v20  ;;  %v4207_v47 = vadd.f32 %v19030_v44, %v3853_v32  ;;  %v4526_v36 = vadd.f32 %v15453_v27, %v4204_v63 }
 0x491   : > { %v15521_v29 = vadd.f32 %v15340_v51, %v4917_v34  ;;  %v4915_v15 = vadd.f32 %v15332_v57, %v4876_v18  ;;  %v4881_v8 = vadd.f32 %v10872_v23, %v4527_v14  ;;  %v4983_v24 = vadd.f32 %v4982_v21, %v15485_v0  ;;  %v19031_v18 = vld [vmem:[#allocation109_spill] sm:$0xff]  ;;  %v19032_v23 = vld [vmem:[#allocation140_spill] sm:$0xff] }
 0x492   : > { %v4812_v55 = vpop.f32.mrf.mxu0  ;;  %v3854_v52 = vadd.f32 %v19031_v18, %v3500_v1  ;;  %v4531_v13 = vadd.f32 %v15471_v48, %v19032_v23  ;;  %v4529_v7 = vadd.f32 %v4474_v38, %v4207_v47  ;;  %v19039_v23 = vld [vmem:[#allocation43_spill] sm:$0xff] }
 0x493   : > { %v15533_v40 = vadd.f32 %v15340_v51, %v4915_v15  ;;  %v4920_v17 = vadd.f32 %v15332_v57, %v4881_v8  ;;  %v4879_v42 = vadd.f32 %v4812_v55, %v4525_v37  ;;  %v4984_v4 = vadd.f32 %v4983_v24, %v15513_v50  ;;  %v19033_v8 = vld [vmem:[#allocation24_spill] sm:$0xff]  ;;  %v19035_v24 = vld [vmem:[#allocation85_spill] sm:$0xff] }
 0x494   : > { %v10873_v9 = vpop.f32.mrf.mxu0  ;;  %v3182_v49 = vadd.f32 %v19033_v8, %v2828_v62  ;;  %v4208_v32 = vadd.f32 %v19034_v31, %v3854_v52  ;;  %v19036_v55 = vld [vmem:[#allocation45_spill] sm:$0xff]  ;;  %v19038_v62 = vld [vmem:[#allocation111_spill] sm:$0xff]  ;;  %v4535_v8 = vadd.f32 %v10840_v12, %v15307_v45 }
 0x495   : > { %v15541_v14 = vadd.f32 %v15340_v51, %v4920_v17  ;;  %v4918_v41 = vadd.f32 %v15332_v57, %v4879_v42  ;;  %v4882_v34 = vadd.f32 %v10873_v9, %v4528_v61  ;;  %v4985_v37 = vadd.f32 %v4984_v4, %v15533_v40  ;;  %v19037_v61 = vld [vmem:[#allocation56_spill] sm:$0xff]  ;;  %v4490_v42 = vpop.f32.mrf.mxu1 }
 0x496   : > { %v4815_v21 = vpop.f32.mrf.mxu0  ;;  %v3857_v16 = vadd.f32 %v19036_v55, %v19035_v24  ;;  %v3504_v17 = vadd.f32 %v19037_v61, %v3182_v49  ;;  %v4532_v44 = vadd.f32 %v10837_v6, %v19038_v62  ;;  %v4530_v18 = vadd.f32 %v4477_v19, %v4208_v32  ;;  %v19040_v55 = vld [vmem:[#allocation21_spill] sm:$0xff] }
 0x497   : > { %v15549_v15 = vadd.f32 %v15340_v51, %v4918_v41  ;;  %v4921_v27 = vadd.f32 %v15332_v57, %v4882_v34  ;;  %v4880_v63 = vadd.f32 %v4815_v21, %v4526_v36  ;;  %v4986_v20 = vadd.f32 %v4985_v37, %v15505_v60 }
 0x498   : > { %v10876_v26 = vpop.f32.mrf.mxu0  ;;  %v4211_v36 = vadd.f32 %v15312_v59, %v3857_v16  ;;  %v3858_v6 = vadd.f32 %v19039_v23, %v3504_v17 }
 0x499   : > { %v15556_v3 = vadd.f32 %v15340_v51, %v4921_v27  ;;  %v4919_v1 = vadd.f32 %v15332_v57, %v4880_v63  ;;  %v4885_v48 = vadd.f32 %v10876_v26, %v4531_v13  ;;  %v4987_v56 = vadd.f32 %v4986_v20, %v15521_v29  ;;  %v10841_v13 = vpop.f32.mrf.mxu1 }
 0x49a   : > { %v4828_v38 = vpop.f32.mrf.mxu0  ;;  %v4212_v31 = vadd.f32 %v15320_v28, %v3858_v6  ;;  %v4536_v16 = vadd.f32 %v10841_v13, %v19040_v55  ;;  %v5006_v55 = vmul.f32 %v15359_v30, %v15359_v30 }
 0x49b   : > { %v15565_v47 = vadd.f32 %v15340_v51, %v4919_v1  ;;  %v4924_v4 = vadd.f32 %v15332_v57, %v4885_v48  ;;  %v4883_v9 = vadd.f32 %v4828_v38, %v4529_v7  ;;  %v4988_v41 = vadd.f32 %v4987_v56, %v15549_v15  ;;  %v4493_v24 = vpop.f32.mrf.mxu1 }
 0x49c   : > { %v10877_v34 = vpop.f32.mrf.mxu0  ;;  %v4533_v7 = vadd.f32 %v4490_v42, %v4211_v36  ;;  %v4534_v38 = vadd.f32 %v4493_v24, %v4212_v31  ;;  %v15633_v24 = vld [vmem:[%s17940_s9 + $0x8] sm:$0xff] }
 0x49d   : > { %v15571_v52 = vadd.f32 %v15340_v51, %v4924_v4  ;;  %v4922_v37 = vadd.f32 %v15332_v57, %v4883_v9  ;;  %v4886_v21 = vadd.f32 %v10877_v34, %v4532_v44  ;;  %v4989_v27 = vadd.f32 %v4988_v41, %v15565_v47 }
 0x49e   : > { %v4831_v63 = vpop.f32.mrf.mxu0 }
 0x49f   : > { %v15578_v59 = vadd.f32 %v15340_v51, %v4922_v37  ;;  %v4925_v49 = vadd.f32 %v15332_v57, %v4886_v21  ;;  %v4884_v19 = vadd.f32 %v4831_v63, %v4530_v18  ;;  %v4990_v20 = vadd.f32 %v4989_v27, %v15541_v14 }
 0x4a0   : > { %v10880_v26 = vpop.f32.mrf.mxu0 }
 0x4a1   : > { %v15584_v32 = vadd.f32 %v15340_v51, %v4925_v49  ;;  %v4923_v1 = vadd.f32 %v15332_v57, %v4884_v19  ;;  %v4889_v48 = vadd.f32 %v10880_v26, %v4535_v8  ;;  %v4991_v45 = vadd.f32 %v4990_v20, %v15556_v3 }
 0x4a2   : > { %v4844_v12 = vpop.f32.mrf.mxu0 }
 0x4a3   : > { %v15590_v61 = vadd.f32 %v15340_v51, %v4923_v1  ;;  %v4928_v17 = vadd.f32 %v15332_v57, %v4889_v48  ;;  %v4887_v42 = vadd.f32 %v4844_v12, %v4533_v7  ;;  %v4992_v28 = vadd.f32 %v4991_v45, %v15578_v59  ;;  %v19041_v48 = vld [vmem:[#allocation44_spill] sm:$0xff]  ;;  %v15640_v45 = vld [vmem:[%s17940_s9] sm:$0xff] }
 0x4a4   : > { %v10881_v56 = vpop.f32.mrf.mxu0  ;;  %v5007_v12 = vmul.f32 %v15377_v11, %v15377_v11 }
 0x4a5   : > { %v15595_v62 = vadd.f32 %v15340_v51, %v4928_v17  ;;  %v4926_v44 = vadd.f32 %v15332_v57, %v4887_v42  ;;  %v4890_v4 = vadd.f32 %v10881_v56, %v4536_v16  ;;  %v4993_v9 = vadd.f32 %v4992_v28, %v15590_v61 }
 0x4a6   : > { %v4847_v36 = vpop.f32.mrf.mxu0  ;;  %v5038_v16 = vadd.f32 %v5007_v12, %v5006_v55  ;;  %v5008_v17 = vmul.f32 %v15351_v53, %v15351_v53  ;;  %v5009_v28 = vmul.f32 %v15367_v39, %v15367_v39  ;;  %v5020_v12 = vmul.f32 %v15467_v5, %v15467_v5 }
 0x4a7   : > { %v15600_v41 = vadd.f32 %v15340_v51, %v4926_v44  ;;  %v4929_v34 = vadd.f32 %v15332_v57, %v4890_v4  ;;  %v4888_v18 = vadd.f32 %v4847_v36, %v4534_v38  ;;  %v4994_v37 = vadd.f32 %v4993_v9, %v15571_v52 }
 0x4a8   : > { %v5039_v42 = vadd.f32 %v5038_v16, %v5008_v17  ;;  %v5010_v38 = vmul.f32 %v15397_v2, %v15397_v2  ;;  %v5011_v4 = vmul.f32 %v15423_v33, %v15423_v33  ;;  %v5012_v36 = vmul.f32 %v15386_v46, %v15386_v46 }
 0x4a9   : > { %v15605_v21 = vadd.f32 %v15340_v51, %v4929_v34  ;;  %v4927_v23 = vadd.f32 %v15332_v57, %v4888_v18  ;;  %v4995_v6 = vadd.f32 %v4994_v37, %v15584_v32  ;;  %v15619_v57 = vld [vmem:[%s17940_s9 + $0x18] sm:$0xff]  ;;  %v5013_v18 = vmul.f32 %v15413_v43, %v15413_v43 }
 0x4aa   : > { %v5040_v56 = vadd.f32 %v5039_v42, %v5009_v28  ;;  %v5021_v16 = vmul.f32 %v15485_v0, %v15485_v0  ;;  %v5022_v42 = vmul.f32 %v15513_v50, %v15513_v50 }
 0x4ab   : > { %v15610_v13 = vadd.f32 %v15340_v51, %v4927_v23  ;;  %v4996_v27 = vadd.f32 %v4995_v6, %v15600_v41  ;;  %v15624_v51 = vld [vmem:[%s17940_s9 + $0x10] sm:$0xff]  ;;  %v5014_v23 = vmul.f32 %v15437_v25, %v15437_v25 }
 0x4ac   : > { %v5041_v44 = vadd.f32 %v5040_v56, %v5010_v38  ;;  %v5023_v56 = vmul.f32 %v15533_v40, %v15533_v40 }
 0x4ad   : > { %v4997_v63 = vadd.f32 %v4996_v27, %v15610_v13  ;;  %v5015_v27 = vmul.f32 %v15459_v54, %v15459_v54 }
 0x4ae   : > { %v5042_v9 = vadd.f32 %v5041_v44, %v5011_v4  ;;  %v5024_v44 = vmul.f32 %v15505_v60, %v15505_v60 }
 0x4af   : > { %v4998_v8 = vadd.f32 %v4997_v63, %v15595_v62 }
 0x4b0   : > { %v5043_v34 = vadd.f32 %v5042_v9, %v5012_v36  ;;  %v5025_v9 = vmul.f32 %v15521_v29, %v15521_v29 }
 0x4b1   : > { %v4999_v49 = vadd.f32 %v4998_v8, %v15605_v21  ;;  %v5016_v8 = vmul.f32 %v15427_v58, %v15427_v58 }
 0x4b2   : > { %v5044_v37 = vadd.f32 %v5043_v34, %v5013_v18  ;;  %v5026_v34 = vmul.f32 %v15549_v15, %v15549_v15 }
 0x4b3   : > { %v5000_v19 = vrot.slane %v4999_v49, 4 }
 0x4b4   : > { %v5045_v6 = vadd.f32 %v5044_v37, %v5014_v23  ;;  %v5027_v37 = vmul.f32 %v15565_v47, %v15565_v47 }
 0x4b5   : > { %v5001_v7 = vadd.f32 %v5000_v19, %v4999_v49  ;;  %v5017_v19 = vmul.f32 %v15445_v35, %v15445_v35 }
 0x4b6   : > { %v5046_v63 = vadd.f32 %v5045_v6, %v5015_v27  ;;  %v5028_v6 = vmul.f32 %v15541_v14, %v15541_v14 }
 0x4b7   : > { %v5002_v20 = vrot.slane %v5001_v7, 2 }
 0x4b8   : > { %v5047_v49 = vadd.f32 %v5046_v63, %v5016_v8  ;;  %v5029_v63 = vmul.f32 %v15556_v3, %v15556_v3 }
 0x4b9   : > { %v5003_v26 = vadd.f32 %v5002_v20, %v5001_v7  ;;  %v5018_v20 = vmul.f32 %v15477_v10, %v15477_v10 }
 0x4ba   : > { %v5048_v7 = vadd.f32 %v5047_v49, %v5017_v19  ;;  %v5030_v49 = vmul.f32 %v15578_v59, %v15578_v59 }
 0x4bb   : > { %v5004_v31 = vrot.slane %v5003_v26, 1 }
 0x4bd   : > { %v5005_v1 = vadd.f32 %v5004_v31, %v5003_v26  ;;  %v5049_v26 = vadd.f32 %v5048_v7, %v5018_v20  ;;  %v5019_v31 = vmul.f32 %v15497_v22, %v15497_v22  ;;  %v5031_v7 = vmul.f32 %v15590_v61, %v15590_v61 }
 0x4bf   : > { %10915 = vmatmul.mubr.f32.vlgmr.msra.gmra.mxu1 %v5005_v1  ;;  %v5050_v1 = vadd.f32 %v5049_v26, %v5019_v31  ;;  %v5032_v26 = vmul.f32 %v15571_v52, %v15571_v52 }
 0x4c0   : > { %10918 = vmatpush3.msra.mxu1 %v15619_v57  ;;  %10925 = vmatprep.mubr.msk.f32.mxu1 %vm11995_vm1, %v19041_v48 }
 0x4c1   : > { %10919 = vmatprep.subr.mxu1 %v19041_v48  ;;  %v5051_v55 = vadd.f32 %v5050_v1, %v5020_v12  ;;  %v5033_v1 = vmul.f32 %v15584_v32, %v15584_v32 }
 0x4c2   : > { %10920 = vmatpush3.msra.mxu1 %v15624_v51 }
 0x4c3   : > { %10921 = vmatprep.subr.mxu1 %v19041_v48  ;;  %v5052_v17 = vadd.f32 %v5051_v55, %v5021_v16  ;;  %v5034_v55 = vmul.f32 %v15600_v41, %v15600_v41 }
 0x4c4   : > { %10922 = vmatpush3.msra.mxu1 %v15633_v24 }
 0x4c5   : > { %10923 = vmatprep.subr.mxu1 %v19041_v48  ;;  %v5053_v28 = vadd.f32 %v5052_v17, %v5022_v42  ;;  %v5035_v17 = vmul.f32 %v15610_v13, %v15610_v13 }
 0x4c6   : > { %10924 = vmatpush3.msra.mxu1 %v15640_v45 }
 0x4c7   : > { %10928 = vmatprep.subr.mxu1 %v19041_v48  ;;  %v5054_v38 = vadd.f32 %v5053_v28, %v5023_v56  ;;  %v5036_v56 = vmul.f32 %v15595_v62, %v15595_v62 }
 0x4c9   : > { %v5055_v4 = vadd.f32 %v5054_v38, %v5024_v44  ;;  %v19042_v38 = vld [vmem:[#allocation31_spill] sm:$0xff] }
 0x4cb   : > { %v5056_v36 = vadd.f32 %v5055_v4, %v5025_v9  ;;  %v19043_v9 = vld [vmem:[#allocation41_spill] sm:$0xff] }
 0x4cd   : > { %v5057_v18 = vadd.f32 %v5056_v36, %v5026_v34  ;;  %v5037_v36 = vmul.f32 %v15605_v21, %v15605_v21  ;;  %v19044_v34 = vld [vmem:[#allocation40_spill] sm:$0xff] }
 0x4cf   : > { %v5058_v23 = vadd.f32 %v5057_v18, %v5027_v37  ;;  %v19045_v37 = vld [vmem:[#allocation94_spill] sm:$0xff] }
 0x4d1   : > { %v5059_v27 = vadd.f32 %v5058_v23, %v5028_v6  ;;  %v19046_v23 = vld [vmem:[#allocation46_spill] sm:$0xff] }
 0x4d3   : > { %v5060_v8 = vadd.f32 %v5059_v27, %v5029_v63  ;;  %v19047_v27 = vld [vmem:[#allocation52_spill] sm:$0xff]  ;;  %v19048_v63 = vld [vmem:[#allocation51_spill] sm:$0xff] }
 0x4d5   : > { %v5061_v19 = vadd.f32 %v5060_v8, %v5030_v49  ;;  %v19049_v49 = vld [vmem:[#allocation86_spill] sm:$0xff] }
 0x4d7   : > { %v5062_v20 = vadd.f32 %v5061_v19, %v5031_v7  ;;  %v19050_v19 = vld [vmem:[#allocation55_spill] sm:$0xff] }
 0x4d9   : > { %v5063_v31 = vadd.f32 %v5062_v20, %v5032_v26  ;;  %v19051_v20 = vld [vmem:[#allocation116_spill] sm:$0xff]  ;;  %v19052_v26 = vld [vmem:[#allocation117_spill] sm:$0xff] }
 0x4db   : > { %v5064_v12 = vadd.f32 %v5063_v31, %v5033_v1  ;;  %v19053_v1 = vld [vmem:[#allocation118_spill] sm:$0xff] }
 0x4dd   : > { %v5065_v16 = vadd.f32 %v5064_v12, %v5034_v55  ;;  %v19054_v12 = vld [vmem:[#allocation87_spill] sm:$0xff] }
 0x4df   : > { %v5066_v42 = vadd.f32 %v5065_v16, %v5035_v17  ;;  %v19055_v16 = vld [vmem:[#allocation58_spill] sm:$0xff] }
 0x4e0   : > { %v19056_v17 = vld [vmem:[#allocation90_spill] sm:$0xff] }
 0x4e1   : > { %v5067_v4 = vadd.f32 %v5066_v42, %v5036_v56 }
 0x4e3   : > { %v5068_v18 = vadd.f32 %v5067_v4, %v5037_v36 }
 0x4e5   : > { %v5069_v6 = vrot.slane %v5068_v18, 4 }
 0x4e7   : > { %v5070_v8 = vadd.f32 %v5069_v6, %v5068_v18  ;;  %v11533_v18 = vld [vmem:[%s17943_s12 + $0x38] sm:$0xff]  }
 0x4e8   : > { %v11532_v6 = vld [vmem:[%s17943_s12 + $0x58] sm:$0xff]  }
 0x4e9   : > { %v5071_v7 = vrot.slane %v5070_v8, 2 }
 0x4eb   : > { %v5072_v31 = vadd.f32 %v5071_v7, %v5070_v8  ;;  %v11537_v8 = vld [vmem:[%s17943_s12 + $0x20] sm:$0xff]   ;;  %v11538_v7 = vld [vmem:[%s17943_s12 + $0x48] sm:$0xff]  }
 0x4ed   : > { %v5073_v55 = vrot.slane %v5072_v31, 1 }
 0x4ef   : > { %v5074_v42 = vadd.f32 %v5073_v55, %v5072_v31 }
 0x57f   : > { %v5157_v28 = vpop.f32.mrf.mxu1 }
 0x580   : > { %10926 = vmatmul.mubr.msk.f32.vlgmr.msra.gmra.mxu1 %vm877_vm3, %v5157_v28  ;;  %v19057_v28 = vld [vmem:[#allocation126_spill] sm:$0xff] }
 0x581   : > { %10929 = vmatpush3.msra.mxu1 %v19042_v38  ;;  %v10916_v44 = vpop.f32.mrf.mxu1  ;;  %10960 = vmatprep.mubr.msk.f32.mxu1 %vm11995_vm1, %v19041_v48 }
 0x582   : > { %10930 = vmatprep.subr.mxu1 %v19041_v48  ;;  %v15756_v44 = vpop.permute.xlu1 %5868 }
 0x583   : > { %10931 = vmatpush3.msra.mxu1 %v19043_v9  ;;  %19058 = vst [vmem:[#allocation146_spill] sm:$0xff] %v15756_v44  ;;  %v6022_v4 = vmul.f32 %v19041_v48, %v15756_v44 }
 0x584   : > { %10932 = vmatprep.subr.mxu1 %v19041_v48 }
 0x585   : > { %10933 = vmatpush3.msra.mxu1 %v19044_v34  ;;  %v11529_v34 = vld [vmem:[%s17943_s12 + $0x70] sm:$0xff]  }
 0x586   : > { %10934 = vmatprep.subr.mxu1 %v19041_v48 }
 0x587   : > { %10935 = vmatpush3.msra.mxu1 %v19045_v37  ;;  %v11531_v37 = vld [vmem:[%s17943_s12 + $0x60] sm:$0xff]  }
 0x588   : > { %10936 = vmatprep.subr.mxu1 %v19041_v48 }
 0x589   : > { %10937 = vmatpush3.msra.mxu1 %v19046_v23  ;;  %v11534_v23 = vld [vmem:[%s17943_s12 + $0x30] sm:$0xff]  }
 0x58a   : > { %10938 = vmatprep.subr.mxu1 %v19041_v48 }
 0x58b   : > { %10939 = vmatpush3.msra.mxu1 %v19047_v27  ;;  %v11536_v27 = vld [vmem:[%s17943_s12 + $0x28] sm:$0xff]  }
 0x58c   : > { %10940 = vmatprep.subr.mxu1 %v19041_v48 }
 0x58d   : > { %10941 = vmatpush3.msra.mxu1 %v19048_v63  ;;  %v11535_v63 = vld [vmem:[%s17943_s12 + $0x50] sm:$0xff]  }
 0x58e   : > { %10942 = vmatprep.subr.mxu1 %v19041_v48 }
 0x58f   : > { %10943 = vmatpush3.msra.mxu1 %v19049_v49  ;;  %v15795_v49 = vpop.permute.xlu1 %5878 }
 0x590   : > { %10944 = vmatprep.subr.mxu1 %v19041_v48  ;;  %19060 = vst [vmem:[#allocation33_spill] sm:$0xff] %v15795_v49 }
 0x591   : > { %10945 = vmatpush3.msra.mxu1 %v19050_v19 }
 0x592   : > { %10946 = vmatprep.subr.mxu1 %v19041_v48 }
 0x593   : > { %10947 = vmatpush3.msra.mxu1 %v19051_v20  ;;  %v15810_v55 = vpop.permute.xlu1 %5888 }
 0x594   : > { %10948 = vmatprep.subr.mxu1 %v19041_v48 }
 0x595   : > { %10949 = vmatpush3.msra.mxu1 %v19052_v26  ;;  %v11539_v26 = vld [vmem:[%s17943_s12 + $0x18] sm:$0xff]  }
 0x596   : > { %10950 = vmatprep.subr.mxu1 %v19041_v48 }
 0x597   : > { %10951 = vmatpush3.msra.mxu1 %v19053_v1  ;;  %v11541_v1 = vld [vmem:[%s17943_s12 + $0x40] sm:$0xff]  }
 0x598   : > { %10952 = vmatprep.subr.mxu1 %v19041_v48 }
 0x599   : > { %10953 = vmatpush3.msra.mxu1 %v19054_v12 }
 0x59a   : > { %10954 = vmatprep.subr.mxu1 %v19041_v48 }
 0x59b   : > { %10955 = vmatpush3.msra.mxu1 %v19055_v16 }
 0x59c   : > { %10956 = vmatprep.subr.mxu1 %v19041_v48 }
 0x59d   : > { %10957 = vmatpush3.msra.mxu1 %v19056_v17  ;;  %v11540_v17 = vld [vmem:[%s17943_s12 + $0x10] sm:$0xff]  }
 0x59e   : > { %10958 = vmatprep.subr.mxu1 %v19041_v48 }
 0x59f   : > { %10959 = vmatpush3.msra.mxu1 %v19057_v28  ;;  %v6086_v28 = vld [vmem:[#allocation3 + $0x9] sm:$0xff] }
 0x5a0   : > { %10961 = vmatmul.mubr.f32.vlgmr.msra.gmra.mxu1 %v5074_v42  ;;  %10963 = vmatprep.subr.mxu1 %v19041_v48  ;;  %v6085_v42 = vld [vmem:[#allocation3 + $0x1] sm:$0xff] }
 0x5a1   : > { %10964 = vmatpush3.msra.mxu1 %v15619_v57  ;;  %10971 = vmatprep.mubr.msk.f32.mxu1 %vm11995_vm1, %v19041_v48  ;;  %v15758_v57 = vpop.permute.xlu0 %5863 }
 0x5a2   : > { %10965 = vmatprep.subr.mxu1 %v19041_v48  ;;  %19059 = vst [vmem:[#allocation147_spill] sm:$0xff] %v15758_v57 }
 0x5a3   : > { %10966 = vmatpush3.msra.mxu1 %v15624_v51  ;;  %v6021_v51 = vmul.f32 %v19041_v48, %v15758_v57 }
 0x5a4   : > { %10967 = vmatprep.subr.mxu1 %v19041_v48 }
 0x5a5   : > { %10968 = vmatpush3.msra.mxu1 %v15633_v24  ;;  %v6053_v36 = vpack.c.bf16 %v6022_v4, %v6021_v51  ;;  %v15797_v19 = vpop.permute.xlu0 %5873  ;;  %v6117_v4 = vpack.c.bf16 %v6086_v28, %v6085_v42  ;;  %v11542_v51 = vld [vmem:[%s17943_s12 + $0x8] sm:$0xff]  }
 0x5a6   : > { %10969 = vmatprep.subr.mxu1 %v19041_v48  ;;  %v11530_v48 = vld [vmem:[%s17943_s12 + $0x68] sm:$0xff]  }
 0x5a7   : > { %10970 = vmatpush3.msra.mxu1 %v15640_v45  ;;  %v11528_v45 = vld [vmem:[%s17943_s12 + $0x78] sm:$0xff]   ;;  %10990 = vmatprep.mubr.bf16.mxu0 %v6117_v4 }
 0x5a8   : > { %10974 = vmatprep.subr.bf16.mxu0 %v11528_v45  ;;  %11022 = vmatprep.subr.bf16.mxu1 %v11533_v18 }
 0x5a9   : > { %10975 = vmatpush3.bf16.msra.mxu0 %v11528_v45  ;;  %v15812_v16 = vpop.permute.xlu0 %5883  ;;  %v15829_v45 = vpop.permute.xlu1 %5898 }
 0x5aa   : > { %10976 = vmatprep.subr.bf16.mxu0 %v11529_v34  ;;  %19061 = vst [vmem:[#allocation170_spill] sm:$0xff] %v15829_v45 }
 0x5ad   : > { %10977 = vmatpush3.bf16.msra.mxu0 %v11529_v34  ;;  %v15831_v34 = vpop.permute.xlu0 %5893 }
 0x5ae   : > { %10978 = vmatprep.subr.bf16.mxu0 %v11530_v48  ;;  %19062 = vst [vmem:[#allocation30_spill] sm:$0xff] %v15831_v34 }
 0x5b1   : > { %10979 = vmatpush3.bf16.msra.mxu0 %v11530_v48  ;;  %v15836_v48 = vld [vmem:[%s17943_s12 + $0xf8] sm:$0xff]  }
 0x5b2   : > { %10980 = vmatprep.subr.bf16.mxu0 %v11531_v37 }
 0x5b5   : > { %10981 = vmatpush3.bf16.msra.mxu0 %v11531_v37  ;;  %v15840_v37 = vpop.permute.xlu0 %5903 }
 0x5b6   : > { %10982 = vmatprep.subr.bf16.mxu0 %v11532_v6  ;;  %19064 = vst [vmem:[#allocation13_spill] sm:$0xff] %v15840_v37 }
 0x5b9   : > { %10983 = vmatpush3.bf16.msra.mxu0 %v11532_v6 }
 0x5ba   : > { %10984 = vmatprep.subr.bf16.mxu0 %v11535_v63 }
 0x5bd   : > { %10985 = vmatpush3.bf16.msra.mxu0 %v11535_v63  ;;  %v15849_v63 = vpop.permute.xlu0 %5913 }
 0x5be   : > { %10986 = vmatprep.subr.bf16.mxu0 %v11538_v7  ;;  %19067 = vst [vmem:[#allocation12_spill] sm:$0xff] %v15849_v63 }
 0x5c1   : > { %10987 = vmatpush3.bf16.msra.mxu0 %v11538_v7 }
 0x5c2   : > { %10988 = vmatprep.subr.bf16.mxu0 %v11541_v1 }
 0x5c5   : > { %10989 = vmatpush3.bf16.msra.mxu0 %v11541_v1 }
 0x640   : > { %v15754_v56 = vpop.f32.mrf.mxu1 }
 0x641   : > { %v5381_v12 = vmul.f32 %v15754_v56, %v15754_v56 }
 0x642   : > { %v10927_v38 = vpop.f32.mrf.mxu1 }
 0x660   : > { %v5304_v9 = vpop.f32.mrf.mxu1 }
 0x661   : > { %10972 = vmatmul.mubr.msk.f32.vlgmr.msra.gmra.mxu1 %vm877_vm3, %v5304_v9  ;;  %v15823_v9 = vld [vmem:[%s17943_s12 + $0xb8] sm:$0xff]  }
 0x662   : > { %v10962_v24 = vpop.f32.mrf.mxu1  ;;  %11038 = vmatprep.mubr.bf16.mxu1 %v6053_v36  ;;  %11023 = vmatpush3.bf16.msra.mxu1 %v11533_v18  ;;  %v11543_v36 = vld [vmem:[%s17943_s12] sm:$0xff]   ;;  %v15838_v18 = vpop.permute.xlu1 %5908 }
 0x663   : > { %11024 = vmatprep.subr.bf16.mxu1 %v11534_v23  ;;  %11070 = vmatprep.subr.bf16.mxu0 %v15823_v9  ;;  %19063 = vst [vmem:[#allocation18_spill] sm:$0xff] %v15838_v18 }
 0x666   : > { %11025 = vmatpush3.bf16.msra.mxu1 %v11534_v23  ;;  %v19065_v23 = vld [vmem:[#allocation19_spill] sm:$0xff] }
 0x667   : > { %11026 = vmatprep.subr.bf16.mxu1 %v11536_v27  ;;  %v15845_v6 = vrot.slane %v15754_v56, %v19065_v23 }
 0x669   : > { %v5388_v7 = vsub.f32 %v15377_v11, %v15845_v6  ;;  %v5391_v56 = vsub.f32 %v15397_v2, %v15845_v6  ;;  %v5392_v1 = vsub.f32 %v15423_v33, %v15845_v6  ;;  %v5395_v11 = vsub.f32 %v15437_v25, %v15845_v6 }
 0x66a   : > { %11027 = vmatpush3.bf16.msra.mxu1 %v11536_v27  ;;  %v15847_v27 = vpop.permute.xlu1 %5918  ;;  %v5398_v2 = vsub.f32 %v15445_v35, %v15845_v6  ;;  %v5399_v33 = vsub.f32 %v15477_v10, %v15845_v6  ;;  %v5401_v25 = vsub.f32 %v15467_v5, %v15845_v6  ;;  %v5404_v35 = vsub.f32 %v15533_v40, %v15845_v6 }
 0x66b   : > { %11028 = vmatprep.subr.bf16.mxu1 %v11537_v8  ;;  %19066 = vst [vmem:[#allocation77_spill] sm:$0xff] %v15847_v27  ;;  %v5405_v10 = vsub.f32 %v15505_v60, %v15845_v6  ;;  %v5406_v42 = vsub.f32 %v15521_v29, %v15845_v6  ;;  %v5407_v5 = vsub.f32 %v15549_v15, %v15845_v6 }
 0x66c   : > { %v5410_v40 = vsub.f32 %v15556_v3, %v15845_v6  ;;  %v5411_v60 = vsub.f32 %v15578_v59, %v15845_v6  ;;  %v5412_v29 = vsub.f32 %v15590_v61, %v15845_v6  ;;  %v5413_v28 = vsub.f32 %v15571_v52, %v15845_v6 }
 0x66d   : > { %v5414_v15 = vsub.f32 %v15584_v32, %v15845_v6  ;;  %v5417_v3 = vsub.f32 %v15595_v62, %v15845_v6  ;;  %v5418_v59 = vsub.f32 %v15605_v21, %v15845_v6 }
 0x66e   : > { %11029 = vmatpush3.bf16.msra.mxu1 %v11537_v8  ;;  %v5387_v8 = vsub.f32 %v15359_v30, %v15845_v6  ;;  %v5394_v30 = vsub.f32 %v15413_v43, %v15845_v6  ;;  %v5400_v43 = vsub.f32 %v15497_v22, %v15845_v6 }
 0x66f   : > { %11030 = vmatprep.subr.bf16.mxu1 %v11539_v26 }
 0x672   : > { %11031 = vmatpush3.bf16.msra.mxu1 %v11539_v26  ;;  %v5390_v26 = vsub.f32 %v15367_v39, %v15845_v6  ;;  %v5397_v39 = vsub.f32 %v15427_v58, %v15845_v6  ;;  %v5403_v58 = vsub.f32 %v15513_v50, %v15845_v6  ;;  %v5409_v50 = vsub.f32 %v15541_v14, %v15845_v6 }
 0x673   : > { %11032 = vmatprep.subr.bf16.mxu1 %v11540_v17  ;;  %v5416_v14 = vsub.f32 %v15610_v13, %v15845_v6 }
 0x676   : > { %11033 = vmatpush3.bf16.msra.mxu1 %v11540_v17  ;;  %v15877_v17 = vpop.permute.xlu1 %5928 }
 0x677   : > { %11034 = vmatprep.subr.bf16.mxu1 %v11542_v51  ;;  %19068 = vst [vmem:[#allocation54_spill] sm:$0xff] %v15877_v17 }
 0x67a   : > { %11035 = vmatpush3.bf16.msra.mxu1 %v11542_v51  ;;  %v15920_v52 = vpop.permute.xlu1 %5938 }
 0x67b   : > { %11036 = vmatprep.subr.bf16.mxu1 %v11543_v36  ;;  %19070 = vst [vmem:[#allocation53_spill] sm:$0xff] %v15920_v52 }
 0x67e   : > { %11037 = vmatpush3.bf16.msra.mxu1 %v11543_v36 }
 0x67f   : > { %11118 = vmatprep.subr.bf16.mxu1 %v15836_v48 }
 0x721   : > { %v5377_v20 = vpop.f32.mrf.mxu1 }
 0x722   : > { %v5382_v38 = vsub.f32 %v5377_v20, %v5381_v12  ;;  %v5389_v20 = vsub.f32 %v15351_v53, %v15845_v6  ;;  %v5393_v12 = vsub.f32 %v15386_v46, %v15845_v6  ;;  %v5396_v53 = vsub.f32 %v15459_v54, %v15845_v6  ;;  %v15879_v46 = vpop.permute.xlu0 %5923 }
 0x723   : > { %v10973_v31 = vpop.f32.mrf.mxu1  ;;  %19069 = vst [vmem:[#allocation125_spill] sm:$0xff] %v15879_v46  ;;  %v5402_v54 = vsub.f32 %v15485_v0, %v15845_v6  ;;  %v5408_v0 = vsub.f32 %v15565_v47, %v15845_v6  ;;  %v5415_v47 = vsub.f32 %v15600_v41, %v15845_v6 }
 0x724   : > { %v5419_v24 = vadd.f32 1e-05, %v5382_v38 }
 0x726   : > { %11734 = vrsqrt.f32 %v5419_v24  ;;  %v15922_v36 = vpop.permute.xlu0 %5933 }
 0x727   : > { %19071 = vst [vmem:[#allocation60_spill] sm:$0xff] %v15922_v36 }
 0x733   : > { %v11735_v31 = vpop.eup %11734 }
 0x734   : > { %v5424_v22 = vrot.slane %v11735_v31, %v19065_v23 }
 0x736   : > { %v5425_v38 = vmul.f32 %v5424_v22, %v5387_v8  ;;  %v5426_v61 = vmul.f32 %v5424_v22, %v5388_v7  ;;  %v5427_v4 = vmul.f32 %v5424_v22, %v5389_v20  ;;  %v5428_v51 = vmul.f32 %v5424_v22, %v5390_v26  ;;  %v15927_v26 = vld [vmem:[%s17941_s10] ss:$0 sm:$0xff] }
 0x737   : > { %v5429_v32 = vmul.f32 %v5424_v22, %v5391_v56  ;;  %v5430_v24 = vmul.f32 %v5424_v22, %v5392_v1  ;;  %v5431_v41 = vmul.f32 %v5424_v22, %v5393_v12  ;;  %v5432_v23 = vmul.f32 %v5424_v22, %v5394_v30 }
 0x738   : > { %v5433_v31 = vmul.f32 %v5424_v22, %v5395_v11  ;;  %v5434_v13 = vmul.f32 %v5424_v22, %v5396_v53  ;;  %v5435_v44 = vmul.f32 %v5424_v22, %v5397_v39  ;;  %v5436_v57 = vmul.f32 %v5424_v22, %v5398_v2 }
 0x739   : > { %v5437_v62 = vmul.f32 %v5424_v22, %v5399_v33  ;;  %v5438_v17 = vmul.f32 %v5424_v22, %v5400_v43  ;;  %v5439_v46 = vmul.f32 %v5424_v22, %v5401_v25  ;;  %v5440_v21 = vmul.f32 %v5424_v22, %v5402_v54  ;;  %v15929_v33 = vpop.permute.xlu1 %5948  ;;  %v15931_v43 = vpop.permute.xlu0 %5943 }
 0x73a   : > { %v5441_v6 = vmul.f32 %v5424_v22, %v5403_v58  ;;  %v5442_v8 = vmul.f32 %v5424_v22, %v5404_v35  ;;  %v5443_v7 = vmul.f32 %v5424_v22, %v5405_v10  ;;  %v5444_v20 = vmul.f32 %v5424_v22, %v5406_v42  ;;  %19072 = vst [vmem:[#allocation59_spill] sm:$0xff] %v15929_v33 }
 0x73b   : > { %v5445_v56 = vmul.f32 %v5424_v22, %v5407_v5  ;;  %v5446_v1 = vmul.f32 %v5424_v22, %v5408_v0  ;;  %v5447_v12 = vmul.f32 %v5424_v22, %v5409_v50  ;;  %v5448_v30 = vmul.f32 %v5424_v22, %v5410_v40  ;;  %19073 = vst [vmem:[#allocation78_spill] sm:$0xff] %v15931_v43  ;;  %v15940_v50 = vld [vmem:[%s17942_s11] ss:$0 sm:$0xff] }
 0x73c   : > { %v5449_v11 = vmul.f32 %v5424_v22, %v5411_v60  ;;  %v5450_v53 = vmul.f32 %v5424_v22, %v5412_v29  ;;  %v5451_v39 = vmul.f32 %v5424_v22, %v5413_v28  ;;  %v5452_v2 = vmul.f32 %v5424_v22, %v5414_v15 }
 0x73d   : > { %v5453_v25 = vmul.f32 %v5424_v22, %v5415_v47  ;;  %v5454_v54 = vmul.f32 %v5424_v22, %v5416_v14  ;;  %v5455_v58 = vmul.f32 %v5424_v22, %v5417_v3  ;;  %v5456_v35 = vmul.f32 %v5424_v22, %v5418_v59 }
 0x73e   : > { %v5464_v10 = vmul.f32 %v15927_v26, %v5425_v38  ;;  %v5465_v42 = vmul.f32 %v15927_v26, %v5426_v61  ;;  %v5466_v5 = vmul.f32 %v15927_v26, %v5427_v4  ;;  %v5467_v0 = vmul.f32 %v15927_v26, %v5428_v51 }
 0x73f   : > { %v5468_v40 = vmul.f32 %v15927_v26, %v5429_v32  ;;  %v5469_v60 = vmul.f32 %v15927_v26, %v5430_v24  ;;  %v5470_v29 = vmul.f32 %v15927_v26, %v5431_v41  ;;  %v5471_v22 = vmul.f32 %v15927_v26, %v5432_v23  ;;  %v15966_v24 = vpop.permute.xlu0 %5953 }
 0x740   : > { %v5472_v28 = vmul.f32 %v15927_v26, %v5433_v31  ;;  %v5473_v15 = vmul.f32 %v15927_v26, %v5434_v13  ;;  %v5474_v47 = vmul.f32 %v15927_v26, %v5435_v44  ;;  %v5475_v14 = vmul.f32 %v15927_v26, %v5436_v57  ;;  %v15964_v57 = vpop.permute.xlu1 %5958  ;;  %19075 = vst [vmem:[#allocation62_spill] sm:$0xff] %v15966_v24 }
 0x741   : > { %v5476_v3 = vmul.f32 %v15927_v26, %v5437_v62  ;;  %v5477_v59 = vmul.f32 %v15927_v26, %v5438_v17  ;;  %v5478_v38 = vmul.f32 %v15927_v26, %v5439_v46  ;;  %v5479_v61 = vmul.f32 %v15927_v26, %v5440_v21  ;;  %19074 = vst [vmem:[#allocation16_spill] sm:$0xff] %v15964_v57 }
 0x742   : > { %v5480_v4 = vmul.f32 %v15927_v26, %v5441_v6  ;;  %v15956_v51 = vadd.f32 %v15940_v50, %v5464_v10  ;;  %v15959_v32 = vadd.f32 %v15940_v50, %v5465_v42  ;;  %v15962_v44 = vadd.f32 %v15940_v50, %v5466_v5 }
 0x743   : > { %v5481_v17 = vmul.f32 %v15927_v26, %v5442_v8  ;;  %v15970_v46 = vmul.f32 %v15927_v26, %v5443_v7  ;;  %v15973_v41 = vmul.f32 %v15927_v26, %v5444_v20  ;;  %v15976_v23 = vadd.f32 %v15940_v50, %v5467_v0 }
 0x744   : > { %v15979_v31 = vmul.f32 %v15927_v26, %v5445_v56  ;;  %v15982_v13 = vmul.f32 %v15927_v26, %v5446_v1  ;;  %v15985_v62 = vmul.f32 %v15927_v26, %v5447_v12  ;;  %v15988_v21 = vadd.f32 %v15940_v50, %v5468_v40 }
 0x745   : > { %v15991_v6 = vmul.f32 %v15927_v26, %v5448_v30  ;;  %v15994_v8 = vmul.f32 %v15927_v26, %v5449_v11  ;;  %v15997_v7 = vadd.f32 %v15940_v50, %v5469_v60  ;;  %v16000_v20 = vadd.f32 %v15940_v50, %v5470_v29  ;;  %v16028_v60 = vpop.permute.xlu1 %5968 }
 0x746   : > { %v16003_v56 = vmul.f32 %v15927_v26, %v5450_v53  ;;  %v5535_v1 = vsub.f32 0.0, %v15956_v51  ;;  %v5536_v12 = vsub.f32 0.0, %v15959_v32  ;;  %v5537_v10 = vsub.f32 0.0, %v15962_v44  ;;  %19076 = vst [vmem:[#allocation133_spill] sm:$0xff] %v16028_v60 }
 0x747   : > { %v16009_v30 = vmul.f32 %v15927_v26, %v5451_v39  ;;  %v16012_v11 = vmul.f32 %v15927_v26, %v5452_v2  ;;  %v16015_v42 = vadd.f32 %v15940_v50, %v5471_v22  ;;  %v5538_v5 = vsub.f32 0.0, %v15976_v23  ;;  %v16030_v2 = vpop.permute.xlu0 %5963 }
 0x748   : > { %v16019_v53 = vmul.f32 %v15927_v26, %v5453_v25  ;;  %v16022_v0 = vmul.f32 %v15927_v26, %v5454_v54  ;;  %v16025_v40 = vadd.f32 %v15940_v50, %v5472_v28  ;;  %v5539_v39 = vsub.f32 0.0, %v15988_v21  ;;  %19077 = vst [vmem:[#allocation61_spill] sm:$0xff] %v16030_v2 }
 0x749   : > { %v16033_v29 = vmul.f32 %v15927_v26, %v5455_v58  ;;  %v16036_v22 = vadd.f32 %v15940_v50, %v5473_v15  ;;  %v5540_v25 = vsub.f32 0.0, %v15997_v7  ;;  %v5541_v54 = vsub.f32 0.0, %v16000_v20 }
 0x74a   : > { %v16041_v57 = vadd.f32 %v15940_v50, %v5474_v47  ;;  %v5567_v28 = vmul.f32 1.442695, %v5535_v1  ;;  %v5569_v24 = vmul.f32 1.442695, %v5536_v12  ;;  %v5571_v33 = vmul.f32 1.442695, %v5537_v10 }
 0x74b   : > { %v16044_v60 = vmul.f32 %v15927_v26, %v5456_v35  ;;  %v16047_v2 = vadd.f32 %v15940_v50, %v5475_v14  ;;  %v5542_v58 = vsub.f32 0.0, %v16015_v42  ;;  %v5573_v15 = vmul.f32 1.442695, %v5538_v5  ;;  %v16064_v5 = vpop.permute.xlu0 %5973 }
 0x74c   : > { %v16051_v43 = vadd.f32 %v15940_v50, %v5476_v3  ;;  %v5543_v52 = vsub.f32 0.0, %v16025_v40  ;;  %11736 = vpow2.f32 %v5567_v28  ;;  %v5575_v47 = vmul.f32 1.442695, %v5539_v39  ;;  %v16062_v3 = vpop.permute.xlu1 %5978  ;;  %19079 = vst [vmem:[#allocation66_spill] sm:$0xff] %v16064_v5 }
 0x74d   : > { %v16055_v1 = vadd.f32 %v15940_v50, %v5477_v59  ;;  %v5544_v12 = vsub.f32 0.0, %v16036_v22  ;;  %11738 = vpow2.f32 %v5569_v24  ;;  %v5577_v26 = vmul.f32 1.442695, %v5540_v25  ;;  %19078 = vst [vmem:[#allocation67_spill] sm:$0xff] %v16062_v3 }
 0x74e   : > { %v16059_v35 = vadd.f32 %v15940_v50, %v5478_v38  ;;  %v5545_v14 = vsub.f32 0.0, %v16041_v57  ;;  %11740 = vpow2.f32 %v5571_v33  ;;  %v5579_v10 = vmul.f32 1.442695, %v5541_v54 }
 0x74f   : > { %v16067_v39 = vadd.f32 %v15940_v50, %v5479_v61  ;;  %v5546_v59 = vsub.f32 0.0, %v16047_v2  ;;  %11742 = vpow2.f32 %v5573_v15  ;;  %v5581_v28 = vmul.f32 1.442695, %v5542_v58 }
 0x750   : > { %v16071_v24 = vadd.f32 %v15940_v50, %v5480_v4  ;;  %v5547_v38 = vsub.f32 0.0, %v16051_v43  ;;  %11744 = vpow2.f32 %v5575_v47  ;;  %v5583_v25 = vmul.f32 1.442695, %v5543_v52 }
 0x751   : > { %v16075_v33 = vadd.f32 %v15940_v50, %v5481_v17  ;;  %v5548_v54 = vsub.f32 0.0, %v16055_v1  ;;  %11746 = vpow2.f32 %v5577_v26  ;;  %v5585_v3 = vmul.f32 1.442695, %v5544_v12  ;;  %v16093_v26 = vpop.permute.xlu1 %5988 }
 0x752   : > { %v16080_v61 = vadd.f32 %v15940_v50, %v15970_v46  ;;  %v5549_v58 = vsub.f32 0.0, %v16059_v35  ;;  %11748 = vpow2.f32 %v5579_v10  ;;  %v5587_v4 = vmul.f32 1.442695, %v5545_v14  ;;  %19080 = vst [vmem:[#allocation48_spill] sm:$0xff] %v16093_v26  ;;  %v16095_v10 = vpop.permute.xlu0 %5983 }
 0x753   : > { %v16085_v15 = vadd.f32 %v15940_v50, %v15973_v41  ;;  %v5550_v52 = vsub.f32 0.0, %v16067_v39  ;;  %11750 = vpow2.f32 %v5581_v28  ;;  %v5589_v17 = vmul.f32 1.442695, %v5546_v59  ;;  %19081 = vst [vmem:[#allocation47_spill] sm:$0xff] %v16095_v10 }
 0x754   : > { %v16090_v47 = vadd.f32 %v15940_v50, %v15979_v31  ;;  %v5551_v12 = vsub.f32 0.0, %v16071_v24  ;;  %11752 = vpow2.f32 %v5583_v25  ;;  %v5591_v46 = vmul.f32 1.442695, %v5547_v38 }
 0x755   : > { %v16099_v41 = vadd.f32 %v15940_v50, %v15982_v13  ;;  %v5552_v14 = vsub.f32 0.0, %v16075_v33  ;;  %11754 = vpow2.f32 %v5585_v3  ;;  %v5593_v59 = vmul.f32 1.442695, %v5548_v54  ;;  %v16133_v5 = vpop.permute.xlu1 %5998 }
 0x756   : > { %v16104_v31 = vadd.f32 %v15940_v50, %v15985_v62  ;;  %v5553_v28 = vsub.f32 0.0, %v16080_v61  ;;  %11756 = vpow2.f32 %v5587_v4  ;;  %v5595_v38 = vmul.f32 1.442695, %v5549_v58  ;;  %19088 = vst [vmem:[#allocation153_spill] sm:$0xff] %v16133_v5 }
 0x757   : > { %19082 = vst [vmem:[#allocation68_spill] sm:$0xff] %v16099_v41  ;;  %v16109_v25 = vadd.f32 %v15940_v50, %v15991_v6  ;;  %v5554_v26 = vsub.f32 0.0, %v16085_v15  ;;  %11758 = vpow2.f32 %v5589_v17  ;;  %v5597_v13 = vmul.f32 1.442695, %v5550_v52 }
 0x758   : > { %19083 = vst [vmem:[#allocation163_spill] sm:$0xff] %v16104_v31  ;;  %v16114_v3 = vadd.f32 %v15940_v50, %v15994_v8  ;;  %v5555_v54 = vsub.f32 0.0, %v16090_v47  ;;  %11760 = vpow2.f32 %v5591_v46  ;;  %v5599_v62 = vmul.f32 1.442695, %v5551_v12 }
 0x759   : > { %19084 = vst [vmem:[#allocation162_spill] sm:$0xff] %v16109_v25  ;;  %v16117_v10 = vpop.eup %11736  ;;  %v16121_v58 = vadd.f32 %v15940_v50, %v16003_v56  ;;  %v5556_v6 = vsub.f32 0.0, %v16099_v41  ;;  %11762 = vpow2.f32 %v5593_v59  ;;  %v5601_v4 = vmul.f32 1.442695, %v5552_v14  ;;  %v16135_v56 = vpop.permute.xlu0 %5993 }
 0x75a   : > { %19085 = vst [vmem:[#allocation79_spill] sm:$0xff] %v16114_v3  ;;  %v16124_v17 = vpop.eup %11738  ;;  %v16128_v8 = vadd.f32 %v15940_v50, %v16009_v30  ;;  %v5557_v52 = vsub.f32 0.0, %v16104_v31  ;;  %11764 = vpow2.f32 %v5595_v38  ;;  %v5603_v12 = vmul.f32 1.442695, %v5553_v28  ;;  %19089 = vst [vmem:[#allocation82_spill] sm:$0xff] %v16135_v56  ;;  %v16163_v31 = vpop.permute.xlu1 %6008 }
 0x75b   : > { %19086 = vst [vmem:[#allocation50_spill] sm:$0xff] %v16121_v58  ;;  %v16131_v46 = vpop.eup %11740  ;;  %v16139_v59 = vadd.f32 %v15940_v50, %v16012_v11  ;;  %v5558_v14 = vsub.f32 0.0, %v16109_v25  ;;  %11766 = vpow2.f32 %v5597_v13  ;;  %v5605_v36 = vmul.f32 1.442695, %v5554_v26  ;;  %19095 = vst [vmem:[#allocation20_spill] sm:$0xff] %v16163_v31 }
 0x75c   : > { %19087 = vst [vmem:[#allocation152_spill] sm:$0xff] %v16128_v8  ;;  %v11743_v30 = vpop.eup %11742  ;;  %v16144_v27 = vadd.f32 %v15940_v50, %v16019_v53  ;;  %v5559_v28 = vsub.f32 0.0, %v16114_v3  ;;  %11768 = vpow2.f32 %v5599_v62  ;;  %v5607_v38 = vmul.f32 1.442695, %v5555_v54 }
 0x75d   : > { %19090 = vst [vmem:[#allocation49_spill] sm:$0xff] %v16139_v59  ;;  %v11745_v5 = vpop.eup %11744  ;;  %v16149_v56 = vadd.f32 %v15940_v50, %v16022_v0  ;;  %v5560_v11 = vsub.f32 0.0, %v16121_v58  ;;  %11770 = vpow2.f32 %v5601_v4  ;;  %v5609_v63 = vmul.f32 1.442695, %v5556_v6 }
 0x75e   : > { %19091 = vst [vmem:[#allocation17_spill] sm:$0xff] %v16144_v27  ;;  %v11747_v13 = vpop.eup %11746  ;;  %v16154_v26 = vadd.f32 %v15940_v50, %v16033_v29  ;;  %v5561_v53 = vsub.f32 0.0, %v16128_v8  ;;  %11772 = vpow2.f32 %v5603_v12  ;;  %v5611_v3 = vmul.f32 1.442695, %v5557_v52  ;;  %v16165_v8 = vpop.permute.xlu0 %6003 }
 0x75f   : > { %19092 = vst [vmem:[#allocation89_spill] sm:$0xff] %v16149_v56  ;;  %v11749_v62 = vpop.eup %11748  ;;  %v16159_v54 = vadd.f32 %v15940_v50, %v16044_v60  ;;  %v5562_v0 = vsub.f32 0.0, %v16139_v59  ;;  %11774 = vpow2.f32 %v5605_v36  ;;  %v5613_v58 = vmul.f32 1.442695, %v5558_v14  ;;  %19096 = vst [vmem:[#allocation71_spill] sm:$0xff] %v16165_v8 }
 0x760   : > { %19093 = vst [vmem:[#allocation104_spill] sm:$0xff] %v16154_v26  ;;  %v11751_v4 = vpop.eup %11750  ;;  %v5563_v6 = vsub.f32 0.0, %v16144_v27  ;;  %11776 = vpow2.f32 %v5607_v38  ;;  %v5615_v25 = vmul.f32 1.442695, %v5559_v28  ;;  %v5564_v52 = vsub.f32 0.0, %v16149_v56  ;;  %v16170_v56 = vpop.permute.xlu1 %6018 }
 0x761   : > { %19094 = vst [vmem:[#allocation96_spill] sm:$0xff] %v16159_v54  ;;  %v11753_v29 = vpop.eup %11752  ;;  %11778 = vpow2.f32 %v5609_v63  ;;  %v5617_v12 = vmul.f32 1.442695, %v5560_v11  ;;  %v5565_v60 = vsub.f32 0.0, %v16154_v26  ;;  %v5619_v36 = vmul.f32 1.442695, %v5561_v53 }
 0x762   : > { %v11755_v50 = vpop.eup %11754  ;;  %11780 = vpow2.f32 %v5611_v3  ;;  %v5566_v59 = vsub.f32 0.0, %v16159_v54  ;;  %v5621_v38 = vmul.f32 1.442695, %v5562_v0  ;;  %v5623_v27 = vmul.f32 1.442695, %v5563_v6  ;;  %19097 = vst [vmem:[#allocation95_spill] sm:$0xff] %v16170_v56  ;;  %v16172_v26 = vpop.permute.xlu0 %6013 }
 0x763   : > { %v11757_v14 = vpop.eup %11756  ;;  %11782 = vpow2.f32 %v5613_v58  ;;  %v5625_v8 = vmul.f32 1.442695, %v5564_v52  ;;  %v5627_v63 = vmul.f32 1.442695, %v5565_v60  ;;  %19098 = vst [vmem:[#allocation93_spill] sm:$0xff] %v16172_v26  ;;  %v5631_v58 = vadd.f32 1.0, %v16117_v10 }
 0x764   : > { %v11759_v28 = vpop.eup %11758  ;;  %11784 = vpow2.f32 %v5615_v25  ;;  %v5629_v3 = vmul.f32 1.442695, %v5566_v59  ;;  %v5632_v25 = vadd.f32 1.0, %v16124_v17  ;;  %v5633_v52 = vadd.f32 1.0, %v16131_v46  ;;  %v16177_v59 = vpop.permute.xlu1 %6607 }
 0x765   : > { %v11761_v31 = vpop.eup %11760  ;;  %11786 = vpow2.f32 %v5617_v12  ;;  %v5634_v60 = vadd.f32 1.0, %v11743_v30  ;;  %v5635_v56 = vadd.f32 1.0, %v11745_v5  ;;  %19099 = vst [vmem:[#allocation73_spill] sm:$0xff] %v16177_v59  ;;  %v5636_v10 = vadd.f32 1.0, %v11747_v13 }
 0x766   : > { %v11763_v41 = vpop.eup %11762  ;;  %11788 = vpow2.f32 %v5619_v36  ;;  %v5637_v26 = vadd.f32 1.0, %v11749_v62  ;;  %v5639_v54 = vadd.f32 1.0, %v11753_v29  ;;  %v5640_v5 = vadd.f32 1.0, %v11755_v50 }
 0x767   : > { %v11765_v11 = vpop.eup %11764  ;;  %11790 = vpow2.f32 %v5621_v38  ;;  %v5643_v29 = vadd.f32 1.0, %v11761_v31  ;;  %v5644_v50 = vadd.f32 1.0, %v11763_v41 }
 0x768   : > { %v11767_v53 = vpop.eup %11766  ;;  %11792 = vpow2.f32 %v5623_v27  ;;  %v16179_v27 = vpop.permute.xlu0 %6602 }
 0x769   : > { %v11769_v0 = vpop.eup %11768  ;;  %11794 = vpow2.f32 %v5625_v8  ;;  %19100 = vst [vmem:[#allocation72_spill] sm:$0xff] %v16179_v27  ;;  %v16187_v13 = vpop.permute.xlu1 %6617 }
 0x76a   : > { %v11771_v6 = vpop.eup %11770  ;;  %11796 = vpow2.f32 %v5627_v63  ;;  %v5638_v63 = vadd.f32 1.0, %v11751_v4  ;;  %19101 = vst [vmem:[#allocation106_spill] sm:$0xff] %v16187_v13 }
 0x76b   : > { %v11773_v12 = vpop.eup %11772  ;;  %11798 = vpow2.f32 %v5629_v3 }
 0x76c   : > { %v11775_v36 = vpop.eup %11774  ;;  %11800 = vrcp.f32 %v5631_v58  ;;  %v5641_v58 = vadd.f32 1.0, %v11757_v14  ;;  %v16189_v62 = vpop.permute.xlu0 %6612  ;;  %v5645_v14 = vadd.f32 1.0, %v11765_v11 }
 0x76d   : > { %v11777_v38 = vpop.eup %11776  ;;  %11802 = vrcp.f32 %v5632_v25  ;;  %19102 = vst [vmem:[#allocation105_spill] sm:$0xff] %v16189_v62  ;;  %v5642_v25 = vadd.f32 1.0, %v11759_v28  ;;  %v5647_v28 = vadd.f32 1.0, %v11769_v0  ;;  %v16201_v13 = vpop.permute.xlu1 %6627  ;;  %v5650_v62 = vadd.f32 1.0, %v11775_v36 }
 0x76e   : > { %v11779_v8 = vpop.eup %11778  ;;  %11804 = vrcp.f32 %v5633_v52  ;;  %19103 = vst [vmem:[#allocation26_spill] sm:$0xff] %v16201_v13  ;;  %v5651_v0 = vadd.f32 1.0, %v11777_v38 }
 0x76f   : > { %v11781_v17 = vpop.eup %11780  ;;  %11806 = vrcp.f32 %v5634_v60  ;;  %v5646_v60 = vadd.f32 1.0, %v11767_v53 }
 0x770   : > { %v11783_v46 = vpop.eup %11782  ;;  %11808 = vrcp.f32 %v5635_v56  ;;  %v16203_v31 = vpop.permute.xlu0 %6622 }
 0x771   : > { %v16181_v30 = vpop.eup %11784  ;;  %11810 = vrcp.f32 %v5636_v10  ;;  %19104 = vst [vmem:[#allocation76_spill] sm:$0xff] %v16203_v31  ;;  %v5652_v31 = vadd.f32 1.0, %v11779_v8  ;;  %v16215_v38 = vpop.permute.xlu1 %6637 }
 0x772   : > { %v16183_v3 = vpop.eup %11786  ;;  %11812 = vrcp.f32 %v5637_v26  ;;  %19105 = vst [vmem:[#allocation113_spill] sm:$0xff] %v16215_v38 }
 0x773   : > { %v16185_v27 = vpop.eup %11788  ;;  %11814 = vrcp.f32 %v5638_v63 }
 0x774   : > { %v16191_v4 = vpop.eup %11790  ;;  %11816 = vrcp.f32 %v5639_v54  ;;  %v5648_v54 = vadd.f32 1.0, %v11771_v6  ;;  %v16217_v8 = vpop.permute.xlu0 %6632 }
 0x775   : > { %v16193_v56 = vpop.eup %11792  ;;  %11818 = vrcp.f32 %v5640_v5  ;;  %v5649_v5 = vadd.f32 1.0, %v11773_v12  ;;  %19106 = vst [vmem:[#allocation107_spill] sm:$0xff] %v16217_v8 }
 0x776   : > { %v16195_v52 = vpop.eup %11794  ;;  %11820 = vrcp.f32 %v5641_v58 }
 0x777   : > { %v16197_v26 = vpop.eup %11796  ;;  %11822 = vrcp.f32 %v5642_v25 }
 0x778   : > { %v16199_v10 = vpop.eup %11798  ;;  %11824 = vrcp.f32 %v5643_v29 }
 0x779   : > { %v11801_v63 = vpop.eup %11800  ;;  %11826 = vrcp.f32 %v5644_v50  ;;  %v5653_v50 = vadd.f32 1.0, %v11781_v17  ;;  %v5655_v17 = vadd.f32 1.0, %v16181_v30 }
 0x77a   : > { %v11803_v41 = vpop.eup %11802  ;;  %11828 = vrcp.f32 %v5645_v14  ;;  %v5695_v11 = vmul.f32 %v11801_v63, %v15956_v51  ;;  %v11546_v51 = vld [vmem:[%s17943_s12 + $0xb0] sm:$0xff]   ;;  %v5654_v14 = vadd.f32 1.0, %v11783_v46  ;;  %v5656_v46 = vadd.f32 1.0, %v16183_v3 }
 0x77b   : > { %v11805_v58 = vpop.eup %11804  ;;  %11830 = vrcp.f32 %v5646_v60  ;;  %v5696_v53 = vmul.f32 %v11803_v41, %v15959_v32  ;;  %v5658_v63 = vadd.f32 1.0, %v16191_v4 }
 0x77c   : > { %v11807_v25 = vpop.eup %11806  ;;  %11832 = vrcp.f32 %v5647_v28  ;;  %v5697_v29 = vmul.f32 %v11805_v58, %v15962_v44  ;;  %5733 = vst [vmem:[#allocation3 + $0x11] sm:$0xff] %v5695_v11 }
 0x77d   : > { %v11809_v13 = vpop.eup %11808  ;;  %11834 = vrcp.f32 %v5648_v54  ;;  %v5698_v6 = vmul.f32 %v11807_v25, %v15976_v23  ;;  %5734 = vst [vmem:[#allocation3 + $0x19] sm:$0xff] %v5696_v53  ;;  %v6118_v12 = vpack.c.bf16 %v5696_v53, %v5695_v11  ;;  %v16259_v11 = vpop.permute.xlu0 %6642  ;;  %v11550_v25 = vld [vmem:[%s17943_s12 + $0xa0] sm:$0xff]  }
 0x77e   : > { %v11811_v36 = vpop.eup %11810  ;;  %11836 = vrcp.f32 %v5649_v5  ;;  %v16213_v32 = vmul.f32 %v11809_v13, %v15988_v21  ;;  %5735 = vst [vmem:[#allocation3 + $0x21] sm:$0xff] %v5697_v29  ;;  %19108 = vst [vmem:[#allocation114_spill] sm:$0xff] %v16259_v11 }
 0x77f   : > { %v11813_v44 = vpop.eup %11812  ;;  %11838 = vrcp.f32 %v5650_v62  ;;  %v16220_v23 = vmul.f32 %v11811_v36, %v15997_v7  ;;  %5736 = vst [vmem:[#allocation3 + $0x29] sm:$0xff] %v5698_v6  ;;  %10991 = vmatmul.mubr.bf16.vlgmr.msra.gmra.mxu0 %v6118_v12  ;;  %v6119_v60 = vpack.c.bf16 %v5698_v6, %v5697_v29  ;;  %v5657_v7 = vadd.f32 1.0, %v16185_v27 }
 0x780   : > { %v11815_v28 = vpop.eup %11814  ;;  %11840 = vrcp.f32 %v5651_v0  ;;  %v16224_v21 = vmul.f32 %v11813_v44, %v16000_v20  ;;  %5737 = vst [vmem:[#allocation3 + $0x31] sm:$0xff] %v16213_v32  ;;  %11071 = vmatpush3.bf16.msra.mxu0 %v15823_v9  ;;  %v11548_v20 = vld [vmem:[%s17943_s12 + $0xa8] sm:$0xff]   ;;  %v5659_v9 = vadd.f32 1.0, %v16193_v56  ;;  %v5660_v27 = vadd.f32 1.0, %v16195_v52 }
 0x781   : > { %v11817_v13 = vpop.eup %11816  ;;  %11842 = vrcp.f32 %v5652_v31  ;;  %v5702_v62 = vmul.f32 %v11815_v28, %v16015_v42  ;;  %5738 = vst [vmem:[#allocation3 + $0x39] sm:$0xff] %v16220_v23  ;;  %10994 = vmatprep.mubr.bf16.mxu0 %v6119_v60  ;;  %11072 = vmatprep.subr.bf16.mxu0 %v11546_v51  ;;  %v5661_v31 = vadd.f32 1.0, %v16197_v26  ;;  %v5662_v56 = vadd.f32 1.0, %v16199_v10  ;;  %v16257_v26 = vpop.permute.xlu1 %6647 }
 0x782   : > { %v11819_v30 = vpop.eup %11818  ;;  %11844 = vrcp.f32 %v5653_v50  ;;  %v16238_v3 = vmul.f32 %v11817_v13, %v16025_v40  ;;  %5739 = vst [vmem:[#allocation3 + $0x41] sm:$0xff] %v16224_v21  ;;  %19107 = vst [vmem:[#allocation115_spill] sm:$0xff] %v16257_v26  ;;  %v6120_v53 = vpack.c.bf16 %v16220_v23, %v16213_v32  ;;  %v11547_v32 = vld [vmem:[%s17943_s12 + $0xf0] sm:$0xff]  }
 0x783   : > { %v11821_v42 = vpop.eup %11820  ;;  %11846 = vrcp.f32 %v5654_v14  ;;  %v16244_v54 = vmul.f32 %v11819_v30, %v16036_v22  ;;  %5740 = vst [vmem:[#allocation3 + $0x49] sm:$0xff] %v5702_v62  ;;  %v16246_v41 = vld [vmem:[#allocation3 + $0x10] sm:$0xff]  ;;  %v6121_v12 = vpack.c.bf16 %v5702_v62, %v16224_v21 }
 0x784   : > { %v11823_v4 = vpop.eup %11822  ;;  %11848 = vrcp.f32 %v5655_v17  ;;  %v16250_v40 = vmul.f32 %v11821_v42, %v16041_v57  ;;  %5741 = vst [vmem:[#allocation3 + $0x51] sm:$0xff] %v16238_v3  ;;  %v16253_v5 = vld [vmem:[#allocation3 + $0x18] sm:$0xff]  ;;  %v6023_v52 = vmul.f32 %v15797_v19, %v16246_v41  ;;  %11073 = vmatpush3.bf16.msra.mxu0 %v11546_v51 }
 0x785   : > { %v11825_v22 = vpop.eup %11824  ;;  %11850 = vrcp.f32 %v5656_v46  ;;  %v16262_v10 = vmul.f32 %v11823_v4, %v16047_v2  ;;  %5742 = vst [vmem:[#allocation3 + $0x59] sm:$0xff] %v16244_v54  ;;  %v6024_v57 = vmul.f32 %v15795_v49, %v16253_v5  ;;  %v16267_v58 = vld [vmem:[#allocation3 + $0x20] sm:$0xff]  ;;  %11074 = vmatprep.subr.bf16.mxu0 %v11548_v20  ;;  %v16316_v62 = vpop.permute.xlu1 %6657 }
 0x786   : > { %v11827_v0 = vpop.eup %11826  ;;  %11852 = vrcp.f32 %v5657_v7  ;;  %v16275_v2 = vmul.f32 %v11825_v22, %v16051_v43  ;;  %5743 = vst [vmem:[#allocation3 + $0x61] sm:$0xff] %v16250_v40  ;;  %v16278_v29 = vld [vmem:[#allocation3 + $0x28] sm:$0xff]  ;;  %v6025_v6 = vmul.f32 %v15812_v16, %v16267_v58  ;;  %19111 = vst [vmem:[#allocation122_spill] sm:$0xff] %v16316_v62 }
 0x787   : > { %v11829_v51 = vpop.eup %11828  ;;  %11854 = vrcp.f32 %v5658_v63  ;;  %v16284_v36 = vmul.f32 %v11827_v0, %v16055_v1  ;;  %5744 = vst [vmem:[#allocation3 + $0x69] sm:$0xff] %v16262_v10  ;;  %v6054_v50 = vpack.c.bf16 %v6024_v57, %v6023_v52  ;;  %v6026_v43 = vmul.f32 %v15810_v55, %v16278_v29  ;;  %10995 = vmatmul.mubr.bf16.gmra.mxu0 %v6120_v53  ;;  %v16296_v1 = vld [vmem:[#allocation3 + $0x30] sm:$0xff]  ;;  %v11549_v63 = vld [vmem:[%s17943_s12 + $0xe8] sm:$0xff]   ;;  %v19113_v53 = vld [vmem:[#allocation68_spill] sm:$0xff] }
 0x788   : > { %v11831_v44 = vpop.eup %11830  ;;  %11856 = vrcp.f32 %v5659_v9  ;;  %v16293_v14 = vmul.f32 %v11829_v51, %v16059_v35  ;;  %5745 = vst [vmem:[#allocation3 + $0x71] sm:$0xff] %v16275_v2  ;;  %10998 = vmatprep.mubr.bf16.mxu0 %v6121_v12  ;;  %v16298_v23 = vld [vmem:[#allocation3 + $0x38] sm:$0xff]  ;;  %11075 = vmatpush3.bf16.msra.mxu0 %v11548_v20  ;;  %v11552_v35 = vld [vmem:[%s17943_s12 + $0x98] sm:$0xff]   ;;  %v16318_v20 = vpop.permute.xlu0 %6652  ;;  %v19114_v0 = vld [vmem:[#allocation163_spill] sm:$0xff] }
 0x789   : > { %v11833_v60 = vpop.eup %11832  ;;  %11858 = vrcp.f32 %v5660_v27  ;;  %v16301_v28 = vmul.f32 %v11831_v44, %v16067_v39  ;;  %5746 = vst [vmem:[#allocation3 + $0x79] sm:$0xff] %v16284_v36  ;;  %11039 = vmatmul.mubr.bf16.vlgmr.msra.gmra.mxu1 %v6054_v50  ;;  %v6055_v17 = vpack.c.bf16 %v6026_v43, %v6025_v6  ;;  %v16304_v21 = vld [vmem:[#allocation3 + $0x40] sm:$0xff]  ;;  %11076 = vmatprep.subr.bf16.mxu0 %v11550_v25  ;;  %19112 = vst [vmem:[#allocation121_spill] sm:$0xff] %v16318_v20  ;;  %v16369_v50 = vpop.permute.xlu1 %6667 }
 0x78a   : > { %19109 = vst [vmem:[#allocation120_spill] sm:$0xff] %v16304_v21  ;;  %v11835_v13 = vpop.eup %11834  ;;  %11860 = vrcp.f32 %v5661_v31  ;;  %v16310_v46 = vmul.f32 %v11833_v60, %v16071_v24  ;;  %5747 = vst [vmem:[#allocation3 + $0x81] sm:$0xff] %v16293_v14  ;;  %11119 = vmatpush3.bf16.msra.mxu1 %v15836_v48  ;;  %v16314_v39 = vld [vmem:[#allocation3 + $0x48] sm:$0xff]  ;;  %v6027_v24 = vmul.f32 %v15831_v34, %v16296_v1 }
 0x78b   : > { %19110 = vst [vmem:[#allocation119_spill] sm:$0xff] %v16314_v39  ;;  %v11837_v7 = vpop.eup %11836  ;;  %11862 = vrcp.f32 %v5662_v56  ;;  %v16321_v30 = vmul.f32 %v11835_v13, %v16075_v33  ;;  %5748 = vst [vmem:[#allocation3 + $0x89] sm:$0xff] %v16301_v28  ;;  %11042 = vmatprep.mubr.bf16.mxu1 %v6055_v17  ;;  %11120 = vmatprep.subr.bf16.mxu1 %v11547_v32  ;;  %v6028_v48 = vmul.f32 %v15829_v45, %v16298_v23 }
 0x78c   : > { %v11839_v9 = vpop.eup %11838  ;;  %v16332_v42 = vmul.f32 %v11837_v7, %v16080_v61  ;;  %5749 = vst [vmem:[#allocation3 + $0x91] sm:$0xff] %v16310_v46  ;;  %v6029_v33 = vmul.f32 %v15840_v37, %v16304_v21  ;;  %v6030_v27 = vmul.f32 %v15838_v18, %v16314_v39  ;;  %11077 = vmatpush3.bf16.msra.mxu0 %v11550_v25  ;;  %v11554_v61 = vld [vmem:[%s17943_s12 + $0x90] sm:$0xff]   ;;  %v16367_v12 = vld [vmem:[#allocation3 + $0x58] sm:$0xff]  ;;  %19117 = vst [vmem:[#allocation131_spill] sm:$0xff] %v16369_v50  ;;  %v16371_v43 = vpop.permute.xlu0 %6662 }
 0x78d   : > { %v11841_v31 = vpop.eup %11840  ;;  %v16340_v4 = vmul.f32 %v11839_v9, %v16085_v15  ;;  %5750 = vst [vmem:[#allocation3 + $0x99] sm:$0xff] %v16321_v30  ;;  %v6122_v56 = vpack.c.bf16 %v16244_v54, %v16238_v3  ;;  %11078 = vmatprep.subr.bf16.mxu0 %v11552_v35  ;;  %v6123_v15 = vpack.c.bf16 %v16262_v10, %v16250_v40  ;;  %v16365_v10 = vld [vmem:[#allocation3 + $0x50] sm:$0xff]  ;;  %19116 = vst [vmem:[#allocation128_spill] sm:$0xff] %v16367_v12  ;;  %v16377_v60 = vld [vmem:[#allocation3 + $0x60] sm:$0xff] }
 0x78e   : > { %v11843_v52 = vpop.eup %11842  ;;  %v16349_v22 = vmul.f32 %v11841_v31, %v16090_v47  ;;  %5751 = vst [vmem:[#allocation3 + $0xa1] sm:$0xff] %v16332_v42  ;;  %11121 = vmatpush3.bf16.msra.mxu1 %v11547_v32  ;;  %v6056_v3 = vpack.c.bf16 %v6028_v48, %v6027_v24  ;;  %v11551_v47 = vld [vmem:[%s17943_s12 + $0xe0] sm:$0xff]   ;;  %v6057_v40 = vpack.c.bf16 %v6030_v27, %v6029_v33  ;;  %19115 = vst [vmem:[#allocation129_spill] sm:$0xff] %v16365_v10  ;;  %v16379_v17 = vld [vmem:[#allocation3 + $0x68] sm:$0xff] }
 0x78f   : > { %v11845_v57 = vpop.eup %11844  ;;  %v16355_v25 = vmul.f32 %v11843_v52, %v19113_v53  ;;  %5752 = vst [vmem:[#allocation3 + $0xa9] sm:$0xff] %v16340_v4  ;;  %10999 = vmatmul.mubr.bf16.gmra.mxu0 %v6122_v56  ;;  %11122 = vmatprep.subr.bf16.mxu1 %v11549_v63  ;;  %19118 = vst [vmem:[#allocation130_spill] sm:$0xff] %v16371_v43  ;;  %v19119_v32 = vld [vmem:[#allocation162_spill] sm:$0xff]  ;;  %v19122_v7 = vld [vmem:[#allocation79_spill] sm:$0xff] }
 0x790   : > { %v11847_v54 = vpop.eup %11846  ;;  %v16362_v6 = vmul.f32 %v11845_v57, %v19114_v0  ;;  %5753 = vst [vmem:[#allocation3 + $0xb1] sm:$0xff] %v16349_v22  ;;  %11002 = vmatprep.mubr.bf16.mxu0 %v6123_v15  ;;  %11079 = vmatpush3.bf16.msra.mxu0 %v11552_v35  ;;  %19120 = vst [vmem:[#allocation136_spill] sm:$0xff] %v16377_v60  ;;  %v11556_v35 = vld [vmem:[%s17943_s12 + $0x88] sm:$0xff]   ;;  %v19123_v9 = vld [vmem:[#allocation50_spill] sm:$0xff] }
 0x791   : > { %v11849_v51 = vpop.eup %11848  ;;  %v16374_v44 = vmul.f32 %v11847_v54, %v19119_v32  ;;  %5754 = vst [vmem:[#allocation3 + $0xb9] sm:$0xff] %v16355_v25  ;;  %11043 = vmatmul.mubr.bf16.gmra.mxu1 %v6056_v3  ;;  %19121 = vst [vmem:[#allocation135_spill] sm:$0xff] %v16379_v17  ;;  %11080 = vmatprep.subr.bf16.mxu0 %v11554_v61  ;;  %v19124_v27 = vld [vmem:[#allocation12_spill] sm:$0xff]  ;;  %v19125_v56 = vld [vmem:[#allocation77_spill] sm:$0xff] }
 0x792   : > { %v11851_v13 = vpop.eup %11850  ;;  %v16385_v24 = vmul.f32 %v11849_v51, %v19122_v7  ;;  %5755 = vst [vmem:[#allocation3 + $0xc1] sm:$0xff] %v16362_v6  ;;  %11046 = vmatprep.mubr.bf16.mxu1 %v6057_v40  ;;  %11123 = vmatpush3.bf16.msra.mxu1 %v11549_v63  ;;  %v6031_v31 = vmul.f32 %v19124_v27, %v16365_v10  ;;  %v11553_v15 = vld [vmem:[%s17943_s12 + $0xd8] sm:$0xff]   ;;  %v19126_v53 = vld [vmem:[#allocation152_spill] sm:$0xff]  ;;  %v19128_v0 = vld [vmem:[#allocation54_spill] sm:$0xff] }
 0x793   : > { %v11853_v48 = vpop.eup %11852  ;;  %v16389_v33 = vmul.f32 %v11851_v13, %v19123_v9  ;;  %5756 = vst [vmem:[#allocation3 + $0xc9] sm:$0xff] %v16374_v44  ;;  %v6032_v52 = vmul.f32 %v19125_v56, %v16367_v12  ;;  %11124 = vmatprep.subr.bf16.mxu1 %v11551_v47  ;;  %v19127_v3 = vld [vmem:[#allocation125_spill] sm:$0xff]  ;;  %v6034_v40 = vmul.f32 %v19128_v0, %v16379_v17  ;;  %v16424_v0 = vpop.permute.xlu0 %6672  ;;  %v16604_v45 = vld [vmem:[#allocation3 + $0x62] sm:$0xff] }
 0x794   : > { %v11855_v57 = vpop.eup %11854  ;;  %v16400_v63 = vmul.f32 %v11853_v48, %v19126_v53  ;;  %5757 = vst [vmem:[#allocation3 + $0xd1] sm:$0xff] %v16385_v24  ;;  %v6033_v54 = vmul.f32 %v19127_v3, %v16377_v60  ;;  %11081 = vmatpush3.bf16.msra.mxu0 %v11554_v61  ;;  %v19129_v32 = vld [vmem:[#allocation49_spill] sm:$0xff]  ;;  %v6124_v7 = vpack.c.bf16 %v16284_v36, %v16275_v2  ;;  %v11558_v48 = vld [vmem:[%s17943_s12 + $0x80] sm:$0xff]   ;;  %19132 = vst [vmem:[#allocation137_spill] sm:$0xff] %v16424_v0 }
 0x795   : > { %v11857_v51 = vpop.eup %11856  ;;  %v16408_v13 = vmul.f32 %v11855_v57, %v19129_v32  ;;  %5758 = vst [vmem:[#allocation3 + $0xd9] sm:$0xff] %v16389_v33  ;;  %11082 = vmatprep.subr.bf16.mxu0 %v11556_v35  ;;  %v19130_v53 = vld [vmem:[#allocation17_spill] sm:$0xff]  ;;  %v6125_v61 = vpack.c.bf16 %v16301_v28, %v16293_v14  ;;  %v16422_v32 = vpop.permute.xlu1 %6677  ;;  %v6058_v56 = vpack.c.bf16 %v6032_v52, %v6031_v31  ;;  %v19134_v14 = vld [vmem:[#allocation104_spill] sm:$0xff]  ;;  %v16441_v52 = vld [vmem:[#allocation3 + $0x80] sm:$0xff] }
 0x796   : > { %v11859_v9 = vpop.eup %11858  ;;  %v16417_v3 = vmul.f32 %v11857_v51, %v19130_v53  ;;  %5759 = vst [vmem:[#allocation3 + $0xe1] sm:$0xff] %v16400_v63  ;;  %11125 = vmatpush3.bf16.msra.mxu1 %v11551_v47  ;;  %19131 = vst [vmem:[#allocation138_spill] sm:$0xff] %v16422_v32  ;;  %v19133_v2 = vld [vmem:[#allocation89_spill] sm:$0xff]  ;;  %v11555_v51 = vld [vmem:[%s17943_s12 + $0xd0] sm:$0xff]   ;;  %v6059_v47 = vpack.c.bf16 %v6034_v40, %v6033_v54 }
 0x797   : > { %v11861_v57 = vpop.eup %11860  ;;  %v16427_v36 = vmul.f32 %v11859_v9, %v19133_v2  ;;  %5760 = vst [vmem:[#allocation3 + $0xe9] sm:$0xff] %v16408_v13  ;;  %11003 = vmatmul.mubr.bf16.gmra.mxu0 %v6124_v7  ;;  %11126 = vmatprep.subr.bf16.mxu1 %v11553_v15  ;;  %v16435_v17 = vld [vmem:[#allocation3 + $0x70] sm:$0xff]  ;;  %v16437_v9 = vld [vmem:[#allocation3 + $0x78] sm:$0xff]  ;;  %v19137_v2 = vld [vmem:[#allocation96_spill] sm:$0xff] }
 0x798   : > { %v11863_v53 = vpop.eup %11862  ;;  %v5725_v28 = vmul.f32 %v11861_v57, %v19134_v14  ;;  %5761 = vst [vmem:[#allocation3 + $0xf1] sm:$0xff] %v16417_v3  ;;  %11006 = vmatprep.mubr.bf16.mxu0 %v6125_v61  ;;  %19135 = vst [vmem:[#allocation124_spill] sm:$0xff] %v16435_v17  ;;  %11083 = vmatpush3.bf16.msra.mxu0 %v11556_v35  ;;  %v16443_v7 = vld [vmem:[#allocation3 + $0x88] sm:$0xff]  ;;  %v16448_v54 = vld [vmem:[%s17943_s12 + $0x138] sm:$0xff]  }
 0x799   : > { %19136 = vst [vmem:[#allocation123_spill] sm:$0xff] %v16437_v9  ;;  %v5726_v31 = vmul.f32 %v11863_v53, %v19137_v2  ;;  %5762 = vst [vmem:[#allocation3 + $0xf9] sm:$0xff] %v16427_v36  ;;  %11047 = vmatmul.mubr.bf16.gmra.mxu1 %v6058_v56  ;;  %11084 = vmatprep.subr.bf16.mxu0 %v11558_v48  ;;  %v19140_v35 = vld [vmem:[#allocation60_spill] sm:$0xff]  ;;  %v19141_v61 = vld [vmem:[#allocation53_spill] sm:$0xff] }
 0x79a   : > { %19138 = vst [vmem:[#allocation28_spill] sm:$0xff] %v16441_v52  ;;  %19139 = vst [vmem:[#allocation25_spill] sm:$0xff] %v16443_v7  ;;  %11050 = vmatprep.mubr.bf16.mxu1 %v6059_v47  ;;  %11127 = vmatpush3.bf16.msra.mxu1 %v11553_v15  ;;  %v6035_v40 = vmul.f32 %v19140_v35, %v16435_v17  ;;  %v6036_v56 = vmul.f32 %v19141_v61, %v16437_v9  ;;  %v11557_v57 = vld [vmem:[%s17943_s12 + $0xc8] sm:$0xff]   ;;  %v19142_v53 = vld [vmem:[#allocation78_spill] sm:$0xff]  ;;  %v16461_v15 = vpop.permute.xlu1 %6687  ;;  %v16463_v47 = vpop.permute.xlu0 %6682 }
 0x79b   : > { %5763 = vst [vmem:[#allocation3 + $0x101] sm:$0xff] %v5725_v28  ;;  %5764 = vst [vmem:[#allocation3 + $0x109] sm:$0xff] %v5726_v31  ;;  %11128 = vmatprep.subr.bf16.mxu1 %v11555_v51  ;;  %v6037_v14 = vmul.f32 %v19142_v53, %v16441_v52  ;;  %v19143_v2 = vld [vmem:[#allocation59_spill] sm:$0xff]  ;;  %v6126_v31 = vpack.c.bf16 %v16321_v30, %v16310_v46  ;;  %v6127_v61 = vpack.c.bf16 %v16340_v4, %v16332_v42  ;;  %v16473_v53 = vld [vmem:[#allocation3 + $0x90] sm:$0xff] }
 0x79c   : > { %v6038_v28 = vmul.f32 %v19143_v2, %v16443_v7  ;;  %11085 = vmatpush3.bf16.msra.mxu0 %v11558_v48  ;;  %19144 = vst [vmem:[#allocation142_spill] sm:$0xff] %v16461_v15  ;;  %19145 = vst [vmem:[#allocation141_spill] sm:$0xff] %v16463_v47  ;;  %v6060_v35 = vpack.c.bf16 %v6036_v56, %v6035_v40  ;;  %v11559_v48 = vld [vmem:[%s17943_s12 + $0xc0] sm:$0xff]   ;;  %v16477_v46 = vld [vmem:[#allocation3 + $0xa0] sm:$0xff] }
 0x79d   : > { %11166 = vmatprep.subr.bf16.mxu0 %v16448_v54  ;;  %19146 = vst [vmem:[#allocation34_spill] sm:$0xff] %v16473_v53  ;;  %v16475_v7 = vld [vmem:[#allocation3 + $0x98] sm:$0xff]  ;;  %19148 = vst [vmem:[#allocation144_spill] sm:$0xff] %v16477_v46  ;;  %v16479_v30 = vld [vmem:[#allocation3 + $0xa8] sm:$0xff] }
 0x79e   : > { %11129 = vmatpush3.bf16.msra.mxu1 %v11555_v51  ;;  %v6061_v2 = vpack.c.bf16 %v6038_v28, %v6037_v14  ;;  %19147 = vst [vmem:[#allocation27_spill] sm:$0xff] %v16475_v7  ;;  %19149 = vst [vmem:[#allocation143_spill] sm:$0xff] %v16479_v30  ;;  %v16481_v42 = vpop.permute.xlu1 %6697  ;;  %v16483_v4 = vpop.permute.xlu0 %6692  ;;  %v19152_v51 = vld [vmem:[#allocation62_spill] sm:$0xff]  ;;  %v19155_v14 = vld [vmem:[#allocation61_spill] sm:$0xff] }
 0x79f   : > { %11007 = vmatmul.mubr.bf16.gmra.mxu0 %v6126_v31  ;;  %11130 = vmatprep.subr.bf16.mxu1 %v11557_v57  ;;  %19150 = vst [vmem:[#allocation29_spill] sm:$0xff] %v16481_v42  ;;  %19151 = vst [vmem:[#allocation22_spill] sm:$0xff] %v16483_v4  ;;  %v6039_v40 = vmul.f32 %v19152_v51, %v16473_v53  ;;  %v6128_v31 = vpack.c.bf16 %v16355_v25, %v16349_v22  ;;  %v16503_v53 = vld [vmem:[#allocation3 + $0xb0] sm:$0xff]  ;;  %v16505_v52 = vld [vmem:[#allocation3 + $0xb8] sm:$0xff] }
 0x7a0   : > { %11010 = vmatprep.mubr.bf16.mxu0 %v6127_v61  ;;  %v19153_v61 = vld [vmem:[#allocation16_spill] sm:$0xff]  ;;  %v6129_v51 = vpack.c.bf16 %v16374_v44, %v16362_v6  ;;  %19157 = vst [vmem:[#allocation148_spill] sm:$0xff] %v16503_v53  ;;  %19158 = vst [vmem:[#allocation37_spill] sm:$0xff] %v16505_v52  ;;  %v16511_v22 = vld [vmem:[#allocation3 + $0xc0] sm:$0xff] }
 0x7a1   : > { %11051 = vmatmul.mubr.bf16.gmra.mxu1 %v6060_v35  ;;  %v6040_v56 = vmul.f32 %v19153_v61, %v16475_v7  ;;  %v16492_v35 = vld [vmem:[%s17943_s12 + $0x178] sm:$0xff]   ;;  %19161 = vst [vmem:[#allocation150_spill] sm:$0xff] %v16511_v22  ;;  %v16513_v25 = vld [vmem:[#allocation3 + $0xc8] sm:$0xff]  ;;  %v19163_v6 = vld [vmem:[#allocation66_spill] sm:$0xff] }
 0x7a2   : > { %11054 = vmatprep.mubr.bf16.mxu1 %v6061_v2  ;;  %11131 = vmatpush3.bf16.msra.mxu1 %v11557_v57  ;;  %19154 = vst [vmem:[#allocation149_spill] sm:$0xff] %v16492_v35  ;;  %v6041_v2 = vmul.f32 %v19155_v14, %v16477_v46  ;;  %v19156_v57 = vld [vmem:[#allocation133_spill] sm:$0xff]  ;;  %v16507_v14 = vpop.permute.xlu1 %6707  ;;  %19162 = vst [vmem:[#allocation155_spill] sm:$0xff] %v16513_v25  ;;  %v6043_v44 = vmul.f32 %v19163_v6, %v16503_v53  ;;  %v6571_v46 = vld [vmem:[#allocation3 + $0x1a] sm:$0xff] }
 0x7a3   : > { %11132 = vmatprep.subr.bf16.mxu1 %v11559_v48  ;;  %v6042_v28 = vmul.f32 %v19156_v57, %v16479_v30  ;;  %v6062_v61 = vpack.c.bf16 %v6040_v56, %v6039_v40  ;;  %19159 = vst [vmem:[#allocation38_spill] sm:$0xff] %v16507_v14  ;;  %v16509_v57 = vpop.permute.xlu0 %6702  ;;  %v19165_v40 = vld [vmem:[#allocation47_spill] sm:$0xff]  ;;  %v6570_v30 = vld [vmem:[#allocation3 + $0x12] sm:$0xff]  ;;  %v16553_v60 = vld [vmem:[#allocation3 + $0xe8] sm:$0xff] }
 0x7a4   : > { %19160 = vst [vmem:[#allocation151_spill] sm:$0xff] %v16509_v57  ;;  %v6045_v56 = vmul.f32 %v19165_v40, %v16511_v22  ;;  %v6568_v9 = vld [vmem:[#allocation3 + $0x2] sm:$0xff]  ;;  %v16531_v40 = vld [vmem:[#allocation3 + $0xd0] sm:$0xff]  ;;  %v16533_v22 = vld [vmem:[#allocation3 + $0xd8] sm:$0xff] }
 0x7a5   : > { %v6063_v7 = vpack.c.bf16 %v6042_v28, %v6041_v2  ;;  %v19166_v2 = vld [vmem:[#allocation48_spill] sm:$0xff]  ;;  %19169 = vst [vmem:[#allocation156_spill] sm:$0xff] %v16531_v40  ;;  %19170 = vst [vmem:[#allocation159_spill] sm:$0xff] %v16533_v22  ;;  %v16616_v34 = vld [vmem:[#allocation3 + $0xf0] sm:$0xff] }
 0x7a6   : > { %11133 = vmatpush3.bf16.msra.mxu1 %v11559_v48  ;;  %v19164_v48 = vld [vmem:[#allocation67_spill] sm:$0xff]  ;;  %v6046_v28 = vmul.f32 %v19166_v2, %v16513_v25  ;;  %v16527_v6 = vpop.permute.xlu1 %6717  ;;  %v19172_v25 = vld [vmem:[#allocation146_spill] sm:$0xff]  ;;  %19177 = vst [vmem:[#allocation161_spill] sm:$0xff] %v16553_v60  ;;  %v16606_v39 = vld [vmem:[#allocation3 + $0x6a] sm:$0xff] }
 0x7a7   : > { %11011 = vmatmul.mubr.bf16.gmra.mxu0 %v6128_v31  ;;  %11214 = vmatprep.subr.bf16.mxu1 %v16492_v35  ;;  %v6569_v31 = vld [vmem:[#allocation3 + $0xa] sm:$0xff]  ;;  %19167 = vst [vmem:[#allocation154_spill] sm:$0xff] %v16527_v6  ;;  %v16529_v53 = vpop.permute.xlu0 %6712  ;;  %19191 = vst [vmem:[#allocation100_spill] sm:$0xff] %v16606_v39  ;;  %v16637_v21 = vld [vmem:[#allocation3 + $0x82] sm:$0xff] }
 0x7a8   : > { %11014 = vmatprep.mubr.bf16.mxu0 %v6129_v51  ;;  %v6044_v51 = vmul.f32 %v19164_v48, %v16505_v52  ;;  %19168 = vst [vmem:[#allocation157_spill] sm:$0xff] %v16529_v53  ;;  %v6761_v2 = vmul.f32 %v16177_v59, %v6569_v31  ;;  %v16542_v52 = vmul.f32 %v19172_v25, %v16253_v5  ;;  %v16551_v31 = vld [vmem:[#allocation3 + $0xe0] sm:$0xff]  ;;  %v6573_v25 = vld [vmem:[#allocation3 + $0x2a] sm:$0xff]  ;;  %19195 = vst [vmem:[#allocation132_spill] sm:$0xff] %v16616_v34 }
 0x7a9   : > { %11055 = vmatmul.mubr.bf16.gmra.mxu1 %v6062_v61  ;;  %v6130_v61 = vpack.c.bf16 %v16389_v33, %v16385_v24  ;;  %v19171_v24 = vld [vmem:[#allocation147_spill] sm:$0xff]  ;;  %19176 = vst [vmem:[#allocation158_spill] sm:$0xff] %v16551_v31  ;;  %v16639_v35 = vld [vmem:[#allocation3 + $0x8a] sm:$0xff] }
 0x7aa   : > { %11058 = vmatprep.mubr.bf16.mxu1 %v6063_v7  ;;  %v6131_v7 = vpack.c.bf16 %v16408_v13, %v16400_v63  ;;  %v6064_v48 = vpack.c.bf16 %v6044_v51, %v6043_v44  ;;  %v16538_v33 = vmul.f32 %v19171_v24, %v16246_v41  ;;  %v6065_v63 = vpack.c.bf16 %v6046_v28, %v6045_v56  ;;  %v19173_v13 = vld [vmem:[#allocation105_spill] sm:$0xff]  ;;  %v19174_v44 = vld [vmem:[#allocation106_spill] sm:$0xff] }
 0x7ab   : > { %v16545_v17 = vmul.f32 %v19173_v13, %v6570_v30  ;;  %v16548_v51 = vmul.f32 %v19174_v44, %v6571_v46  ;;  %v19178_v41 = vld [vmem:[#allocation82_spill] sm:$0xff]  ;;  %v19179_v56 = vld [vmem:[#allocation153_spill] sm:$0xff]  ;;  %19201 = vst [vmem:[#allocation127_spill] sm:$0xff] %v16639_v35 }
 0x7ac   : > { %v6047_v5 = vmul.f32 %v19178_v41, %v16531_v40  ;;  %v6048_v28 = vmul.f32 %v19179_v56, %v16533_v22  ;;  %v16559_v24 = vld [vmem:[#allocation3 + $0x32] sm:$0xff]  ;;  %v19182_v41 = vld [vmem:[#allocation20_spill] sm:$0xff] }
 0x7ad   : > { %v6050_v40 = vmul.f32 %v19182_v41, %v16553_v60  ;;  %v16574_v22 = vld [vmem:[#allocation3 + $0x42] sm:$0xff]  ;;  %v16589_v60 = vld [vmem:[#allocation3 + $0x5a] sm:$0xff]  ;;  %v16595_v41 = vmul.f32 %v19174_v44, %v6573_v25 }
 0x7ae   : > { %v19193_v44 = vld [vmem:[#allocation26_spill] sm:$0xff] }
 0x7af   : > { %11015 = vmatmul.mubr.bf16.gmra.mxu0 %v6130_v61  ;;  %v19175_v61 = vld [vmem:[#allocation72_spill] sm:$0xff]  ;;  %19188 = vst [vmem:[#allocation168_spill] sm:$0xff] %v16595_v41  ;;  %v16647_v41 = vmul.f32 %v16257_v26, %v16589_v60 }
 0x7b0   : > { %11018 = vmatprep.mubr.bf16.mxu0 %v6131_v7  ;;  %v6760_v27 = vmul.f32 %v19175_v61, %v6568_v9  ;;  %v6572_v7 = vld [vmem:[#allocation3 + $0x22] sm:$0xff]  ;;  %v16566_v12 = vmul.f32 %v19175_v61, %v6570_v30  ;;  %v16581_v9 = vmul.f32 %v16177_v59, %v6571_v46  ;;  %v16583_v30 = vpop.permute.xlu1 %6727  ;;  %v16585_v61 = vpop.permute.xlu0 %6722  ;;  %v6066_v46 = vpack.c.bf16 %v6048_v28, %v6047_v5  ;;  %v16618_v5 = vld [vmem:[#allocation3 + $0xf8] sm:$0xff] }
 0x7b1   : > { %11059 = vmatmul.mubr.bf16.gmra.mxu1 %v6064_v48  ;;  %v16563_v48 = vld [vmem:[#allocation3 + $0x3a] sm:$0xff]  ;;  %19185 = vst [vmem:[#allocation167_spill] sm:$0xff] %v16583_v30  ;;  %19186 = vst [vmem:[#allocation166_spill] sm:$0xff] %v16585_v61  ;;  %v16592_v56 = vmul.f32 %v19173_v13, %v6572_v7 }
 0x7b2   : > { %11062 = vmatprep.mubr.bf16.mxu1 %v6065_v63  ;;  %v6792_v18 = vpack.c.bf16 %v6761_v2, %v6760_v27  ;;  %19180 = vst [vmem:[#allocation160_spill] sm:$0xff] %v16566_v12  ;;  %v19181_v63 = vld [vmem:[#allocation71_spill] sm:$0xff]  ;;  %v16576_v27 = vld [vmem:[#allocation3 + $0x4a] sm:$0xff]  ;;  %v16578_v2 = vld [vmem:[#allocation3 + $0x52] sm:$0xff]  ;;  %v16614_v13 = vmul.f32 %v19193_v44, %v16563_v48 }
 0x7b3   : > { %v6049_v37 = vmul.f32 %v19181_v63, %v16551_v31  ;;  %19183 = vst [vmem:[#allocation165_spill] sm:$0xff] %v16578_v2  ;;  %19184 = vst [vmem:[#allocation164_spill] sm:$0xff] %v16581_v9  ;;  %v6132_v31 = vpack.c.bf16 %v16427_v36, %v16417_v3  ;;  %v19189_v63 = vld [vmem:[#allocation76_spill] sm:$0xff]  ;;  %v16608_v3 = vld [vmem:[#allocation3 + $0x72] sm:$0xff]  ;;  %v16630_v36 = vmul.f32 %v16215_v38, %v16576_v27 }
 0x7b4   : > { %19187 = vst [vmem:[#allocation169_spill] sm:$0xff] %v16592_v56  ;;  %v16599_v10 = vmul.f32 %v19189_v63, %v16559_v24  ;;  %v16602_v59 = vmul.f32 %v19189_v63, %v6572_v7  ;;  %19192 = vst [vmem:[#allocation57_spill] sm:$0xff] %v16608_v3  ;;  %v16620_v28 = vld [vmem:[#allocation3 + $0x7a] sm:$0xff]  ;;  %v16626_v63 = vmul.f32 %v16217_v8, %v16574_v22  ;;  %v16641_v7 = vld [vmem:[#allocation3 + $0x92] sm:$0xff] }
 0x7b5   : > { %19194 = vst [vmem:[#allocation108_spill] sm:$0xff] %v16614_v13  ;;  %19196 = vst [vmem:[#allocation84_spill] sm:$0xff] %v16618_v5  ;;  %v6067_v12 = vpack.c.bf16 %v6050_v40, %v6049_v37  ;;  %v6765_v9 = vmul.f32 %v19193_v44, %v6573_v25  ;;  %v16655_v37 = vmul.f32 %v16318_v20, %v16604_v45  ;;  %v19209_v44 = vld [vmem:[#allocation95_spill] sm:$0xff] }
 0x7b6   : > { %19190 = vst [vmem:[#allocation63_spill] sm:$0xff] %v16599_v10  ;;  %19197 = vst [vmem:[#allocation83_spill] sm:$0xff] %v16620_v28  ;;  %v16659_v25 = vmul.f32 %v16316_v62, %v16606_v39  ;;  %v16663_v40 = vmul.f32 %v16371_v43, %v16608_v3  ;;  %v6052_v10 = vmul.f32 %v19209_v44, %v16618_v5  ;;  %v16683_v39 = vpop.permute.xlu0 %6732  ;;  %v16706_v44 = vld [vmem:[#allocation3 + $0xca] sm:$0xff] }
 0x7b7   : > { %11019 = vmatmul.mubr.bf16.gmra.mxu0 %v6132_v31  ;;  %19198 = vst [vmem:[#allocation88_spill] sm:$0xff] %v16626_v63  ;;  %19199 = vst [vmem:[#allocation32_spill] sm:$0xff] %v16630_v36  ;;  %v16634_v31 = vmul.f32 %v16259_v11, %v16578_v2  ;;  %v16649_v2 = vld [vmem:[#allocation3 + $0x9a] sm:$0xff]  ;;  %v16671_v63 = vld [vmem:[#allocation3 + $0xaa] sm:$0xff]  ;;  %v16679_v3 = vmul.f32 %v16369_v50, %v16620_v28  ;;  %v16691_v5 = vmul.f32 %v16424_v0, %v16637_v21 }
 0x7b8   : > { %11086 = vmatprep.mubr.bf16.mxu0 %v6792_v18  ;;  %19202 = vst [vmem:[#allocation14_spill] sm:$0xff] %v16641_v7  ;;  %19203 = vst [vmem:[#allocation98_spill] sm:$0xff] %v16647_v41  ;;  %v16669_v18 = vld [vmem:[#allocation3 + $0xa2] sm:$0xff]  ;;  %v16673_v36 = vld [vmem:[#allocation3 + $0xb2] sm:$0xff]  ;;  %v16695_v13 = vmul.f32 %v16422_v32, %v16639_v35  ;;  %v6794_v41 = vpack.c.bf16 %v6765_v9, %v16602_v59  ;;  %v16714_v35 = vmul.f32 %v16461_v15, %v16649_v2 }
 0x7b9   : > { %19200 = vst [vmem:[#allocation42_spill] sm:$0xff] %v16634_v31  ;;  %11063 = vmatmul.mubr.bf16.gmra.mxu1 %v6066_v46  ;;  %19204 = vst [vmem:[#allocation101_spill] sm:$0xff] %v16649_v2  ;;  %v19208_v46 = vld [vmem:[#allocation93_spill] sm:$0xff]  ;;  %v16699_v31 = vmul.f32 %v16463_v47, %v16641_v7  ;;  %v16704_v28 = vld [vmem:[#allocation3 + $0xc2] sm:$0xff]  ;;  %v6767_v2 = vmul.f32 %v16215_v38, %v16563_v48 }
 0x7ba   : > { %19205 = vst [vmem:[#allocation65_spill] sm:$0xff] %v16655_v37  ;;  %19206 = vst [vmem:[#allocation15_spill] sm:$0xff] %v16659_v25  ;;  %11066 = vmatprep.mubr.bf16.mxu1 %v6067_v12  ;;  %v6051_v56 = vmul.f32 %v19208_v46, %v16616_v34  ;;  %v16681_v12 = vpop.permute.xlu1 %6737  ;;  %v16685_v46 = vld [vmem:[#allocation3 + $0xba] sm:$0xff]  ;;  %v6766_v34 = vmul.f32 %v16217_v8, %v16559_v24  ;;  %v16708_v37 = vld [vmem:[#allocation3 + $0xd2] sm:$0xff]  ;;  %v16725_v8 = vmul.f32 %v16483_v4, %v16669_v18 }
 0x7bb   : > { %19207 = vst [vmem:[#allocation81_spill] sm:$0xff] %v16663_v40  ;;  %19210 = vst [vmem:[#allocation92_spill] sm:$0xff] %v16671_v63  ;;  %v11562_v59 = vld [vmem:[%s17943_s12 + $0x130] sm:$0xff]   ;;  %v16719_v9 = vld [vmem:[#allocation3 + $0xda] sm:$0xff]  ;;  %v16729_v25 = vmul.f32 %v16481_v42, %v16671_v63  ;;  %v16733_v40 = vmul.f32 %v16509_v57, %v16673_v36  ;;  %v16758_v48 = vmul.f32 %v16529_v53, %v16704_v28 }
 0x7bc   : > { %19211 = vst [vmem:[#allocation91_spill] sm:$0xff] %v16673_v36  ;;  %19212 = vst [vmem:[#allocation103_spill] sm:$0xff] %v16679_v3  ;;  %v6068_v3 = vpack.c.bf16 %v6052_v10, %v6051_v56  ;;  %v16737_v7 = vld [vmem:[#allocation3 + $0xe2] sm:$0xff]  ;;  %v16748_v63 = vld [vmem:[#allocation3 + $0xea] sm:$0xff]  ;;  %v16762_v24 = vmul.f32 %v16527_v6, %v16706_v44  ;;  %v16775_v56 = vmul.f32 %v16583_v30, %v16719_v9 }
 0x7bd   : > { %19213 = vst [vmem:[#allocation35_spill] sm:$0xff] %v16681_v12  ;;  %19214 = vst [vmem:[#allocation70_spill] sm:$0xff] %v16683_v39  ;;  %v16750_v36 = vld [vmem:[#allocation3 + $0xf2] sm:$0xff]  ;;  %v16752_v10 = vld [vmem:[#allocation3 + $0xfa] sm:$0xff] }
 0x7be   : > { %19215 = vst [vmem:[#allocation64_spill] sm:$0xff] %v16691_v5  ;;  %19216 = vst [vmem:[#allocation75_spill] sm:$0xff] %v16695_v13  ;;  %v16743_v5 = vmul.f32 %v16507_v14, %v16685_v46  ;;  %v19218_v13 = vpack.c.bf16 %v16548_v51, %v16545_v17  ;;  %v16766_v17 = vmul.f32 %v16585_v61, %v16708_v37  ;;  %v16777_v38 = vpop.permute.xlu1 %6747 }
 0x7bf   : > { %19217 = vst [vmem:[#allocation134_spill] sm:$0xff] %v16725_v8  ;;  %19219 = vst [vmem:[#allocation102_spill] sm:$0xff] %v16758_v48  ;;  %v16779_v8 = vpop.permute.xlu0 %6742  ;;  %v16790_v51 = vmul.f32 %v16683_v39, %v16737_v7  ;;  %v7100_v48 = vmul.f32 %v15797_v19, %v16267_v58  ;;  %v11566_v58 = vld [vmem:[%s17943_s12 + $0x120] sm:$0xff]  }
 0x7c0   : > { %11087 = vmatmul.mubr.bf16.vlgmr.msra.gmra.mxu0 %v19218_v13  ;;  %19220 = vst [vmem:[#allocation80_spill] sm:$0xff] %v16766_v17  ;;  %v6768_v13 = vmul.f32 %v16259_v11, %v16574_v22  ;;  %19221 = vst [vmem:[#allocation74_spill] sm:$0xff] %v16775_v56  ;;  %v11564_v22 = vld [vmem:[%s17943_s12 + $0x128] sm:$0xff]   ;;  %v19224_v11 = vpack.c.bf16 %v16542_v52, %v16538_v33  ;;  %v7102_v52 = vmul.f32 %v15812_v16, %v16296_v1  ;;  %v11563_v1 = vld [vmem:[%s17943_s12 + $0x170] sm:$0xff]  }
 0x7c1   : > { %11167 = vmatpush3.bf16.msra.mxu0 %v16448_v54  ;;  %11090 = vmatprep.mubr.bf16.mxu0 %v6794_v41  ;;  %19222 = vst [vmem:[#allocation139_spill] sm:$0xff] %v16777_v38  ;;  %19223 = vst [vmem:[#allocation99_spill] sm:$0xff] %v16779_v8  ;;  %v6769_v54 = vmul.f32 %v16257_v26, %v16576_v27  ;;  %v16799_v27 = vmul.f32 %v16681_v12, %v16748_v63 }
 0x7c2   : > { %11067 = vmatmul.mubr.bf16.gmra.mxu1 %v6068_v3  ;;  %11168 = vmatprep.subr.bf16.mxu0 %v11562_v59  ;;  %v16803_v26 = vmul.f32 %v16779_v8, %v16750_v36  ;;  %v16807_v41 = vmul.f32 %v16777_v38, %v16752_v10  ;;  %v7103_v33 = vmul.f32 %v15810_v55, %v16298_v23  ;;  %v19234_v3 = vld [vmem:[#allocation128_spill] sm:$0xff] }
 0x7c3   : > { %11134 = vmatprep.mubr.bf16.mxu1 %v19224_v11  ;;  %v7101_v11 = vmul.f32 %v15795_v49, %v16278_v29  ;;  %v6795_v56 = vpack.c.bf16 %v6767_v2, %v6766_v34  ;;  %v6796_v29 = vpack.c.bf16 %v6769_v54, %v6768_v13  ;;  %v6771_v34 = vmul.f32 %v16316_v62, %v16589_v60  ;;  %v11568_v2 = vld [vmem:[%s17943_s12 + $0x118] sm:$0xff]   ;;  %v19227_v13 = vld [vmem:[#allocation100_spill] sm:$0xff]  ;;  %v19231_v60 = vld [vmem:[#allocation170_spill] sm:$0xff] }
 0x7c4   : > { %v7132_v23 = vpack.c.bf16 %v7103_v33, %v7102_v52  ;;  %v19228_v54 = vld [vmem:[#allocation120_spill] sm:$0xff]  ;;  %v19230_v52 = vld [vmem:[#allocation119_spill] sm:$0xff]  ;;  %v19235_v62 = vld [vmem:[#allocation18_spill] sm:$0xff] }
 0x7c5   : > { %11169 = vmatpush3.bf16.msra.mxu0 %v11562_v59  ;;  %v7131_v49 = vpack.c.bf16 %v7101_v11, %v7100_v48  ;;  %v19225_v59 = vld [vmem:[#allocation165_spill] sm:$0xff]  ;;  %v6772_v48 = vmul.f32 %v16371_v43, %v16604_v45  ;;  %v7105_v33 = vmul.f32 %v19231_v60, %v19230_v52  ;;  %v7107_v45 = vmul.f32 %v19235_v62, %v19234_v3  ;;  %v16850_v43 = vld [vmem:[#allocation3 + $0x100] sm:$0xff]  ;;  %v11567_v3 = vld [vmem:[%s17943_s12 + $0x160] sm:$0xff]  }
 0x7c6   : > { %11170 = vmatprep.subr.bf16.mxu0 %v11564_v22  ;;  %v6770_v17 = vmul.f32 %v16318_v20, %v19225_v59  ;;  %v19232_v59 = vld [vmem:[#allocation129_spill] sm:$0xff]  ;;  %v19238_v62 = vld [vmem:[#allocation20_spill] sm:$0xff] }
 0x7c8   : > { %11091 = vmatmul.mubr.bf16.gmra.mxu0 %v6795_v56  ;;  %v19226_v56 = vld [vmem:[#allocation149_spill] sm:$0xff] }
 0x7c9   : > { %11094 = vmatprep.mubr.bf16.mxu0 %v6796_v29  ;;  %11171 = vmatpush3.bf16.msra.mxu0 %v11564_v22  ;;  %v19229_v22 = vld [vmem:[#allocation30_spill] sm:$0xff]  ;;  %v11565_v29 = vld [vmem:[%s17943_s12 + $0x168] sm:$0xff]  }
 0x7ca   : > { %11135 = vmatmul.mubr.bf16.vlgmr.msra.gmra.mxu1 %v7131_v49  ;;  %11172 = vmatprep.subr.bf16.mxu0 %v11566_v58  ;;  %v6773_v49 = vmul.f32 %v16369_v50, %v19227_v13  ;;  %v7104_v11 = vmul.f32 %v19229_v22, %v19228_v54  ;;  %v16852_v13 = vld [vmem:[#allocation3 + $0x108] sm:$0xff]  ;;  %v6797_v50 = vpack.c.bf16 %v6771_v34, %v6770_v17 }
 0x7cb   : > { %11215 = vmatpush3.bf16.msra.mxu1 %v19226_v56  ;;  %11138 = vmatprep.mubr.bf16.mxu1 %v7132_v23  ;;  %v19233_v56 = vld [vmem:[#allocation13_spill] sm:$0xff]  ;;  %v11570_v54 = vld [vmem:[%s17943_s12 + $0x110] sm:$0xff]   ;;  %v16866_v17 = vmul.f32 %v16852_v13, %v19238_v62 }
 0x7cc   : > { %11216 = vmatprep.subr.bf16.mxu1 %v11563_v1  ;;  %v7106_v23 = vmul.f32 %v19233_v56, %v19232_v59  ;;  %v6798_v52 = vpack.c.bf16 %v6773_v49, %v6772_v48  ;;  %v7133_v20 = vpack.c.bf16 %v7105_v33, %v7104_v11  ;;  %v19241_v48 = vld [vmem:[#allocation83_spill] sm:$0xff]  ;;  %v11569_v56 = vld [vmem:[%s17943_s12 + $0x158] sm:$0xff]   ;;  %v19247_v33 = vld [vmem:[#allocation124_spill] sm:$0xff] }
 0x7cd   : > { %11173 = vmatpush3.bf16.msra.mxu0 %v11566_v58  ;;  %v19236_v58 = vld [vmem:[#allocation71_spill] sm:$0xff]  ;;  %19239 = vst [vmem:[#allocation110_spill] sm:$0xff] %v16866_v17  ;;  %v6775_v49 = vmul.f32 %v16422_v32, %v19241_v48  ;;  %v19246_v32 = vld [vmem:[#allocation77_spill] sm:$0xff]  ;;  %v19250_v17 = vld [vmem:[#allocation54_spill] sm:$0xff] }
 0x7ce   : > { %11174 = vmatprep.subr.bf16.mxu0 %v11568_v2  ;;  %v16862_v59 = vmul.f32 %v16850_v43, %v19236_v58  ;;  %v7134_v34 = vpack.c.bf16 %v7107_v45, %v7106_v23  ;;  %v11572_v11 = vld [vmem:[%s17943_s12 + $0x108] sm:$0xff]   ;;  %v19243_v45 = vld [vmem:[#allocation136_spill] sm:$0xff] }
 0x7cf   : > { %11217 = vmatpush3.bf16.msra.mxu1 %v11563_v1  ;;  %v19240_v1 = vld [vmem:[#allocation57_spill] sm:$0xff]  ;;  %v19245_v48 = vld [vmem:[#allocation135_spill] sm:$0xff] }
 0x7d0   : > { %11095 = vmatmul.mubr.bf16.gmra.mxu0 %v6797_v50  ;;  %11218 = vmatprep.subr.bf16.mxu1 %v11565_v29  ;;  %19237 = vst [vmem:[#allocation97_spill] sm:$0xff] %v16862_v59  ;;  %v6774_v50 = vmul.f32 %v16424_v0, %v19240_v1  ;;  %v7109_v0 = vmul.f32 %v19246_v32, %v19245_v48  ;;  %v19249_v59 = vld [vmem:[#allocation123_spill] sm:$0xff] }
 0x7d1   : > { %11098 = vmatprep.mubr.bf16.mxu0 %v6798_v52  ;;  %11175 = vmatpush3.bf16.msra.mxu0 %v11568_v2  ;;  %v6776_v2 = vmul.f32 %v16463_v47, %v16637_v21  ;;  %v19244_v52 = vld [vmem:[#allocation12_spill] sm:$0xff]  ;;  %v7111_v21 = vmul.f32 %v19250_v17, %v19249_v59 }
 0x7d2   : > { %11139 = vmatmul.mubr.bf16.gmra.mxu1 %v7133_v20  ;;  %11176 = vmatprep.subr.bf16.mxu0 %v11570_v54  ;;  %v19242_v20 = vld [vmem:[#allocation127_spill] sm:$0xff]  ;;  %v7108_v1 = vmul.f32 %v19244_v52, %v19243_v45  ;;  %v6799_v47 = vpack.c.bf16 %v6775_v49, %v6774_v50  ;;  %v19252_v50 = vld [vmem:[#allocation101_spill] sm:$0xff] }
 0x7d3   : > { %11142 = vmatprep.mubr.bf16.mxu1 %v7134_v34  ;;  %11219 = vmatpush3.bf16.msra.mxu1 %v11565_v29  ;;  %v6777_v23 = vmul.f32 %v16461_v15, %v19242_v20  ;;  %v19248_v34 = vld [vmem:[#allocation125_spill] sm:$0xff]  ;;  %v11574_v20 = vld [vmem:[%s17943_s12 + $0x100] sm:$0xff]   ;;  %v11571_v15 = vld [vmem:[%s17943_s12 + $0x150] sm:$0xff]   ;;  %v6779_v49 = vmul.f32 %v16481_v42, %v19252_v50 }
 0x7d4   : > { %11220 = vmatprep.subr.bf16.mxu1 %v11567_v3  ;;  %v7110_v29 = vmul.f32 %v19248_v34, %v19247_v33  ;;  %v7135_v48 = vpack.c.bf16 %v7109_v0, %v7108_v1  ;;  %v16905_v0 = vld [vmem:[%s17943_s12 + $0x1b8] sm:$0xff]   ;;  %v19260_v42 = vld [vmem:[#allocation27_spill] sm:$0xff] }
 0x7d5   : > { %11177 = vmatpush3.bf16.msra.mxu0 %v11570_v54  ;;  %v6800_v45 = vpack.c.bf16 %v6777_v23, %v6776_v2  ;;  %v19251_v54 = vld [vmem:[#allocation14_spill] sm:$0xff]  ;;  %v19254_v2 = vld [vmem:[#allocation28_spill] sm:$0xff] }
 0x7d6   : > { %11178 = vmatprep.subr.bf16.mxu0 %v11572_v11  ;;  %v7136_v33 = vpack.c.bf16 %v7111_v21, %v7110_v29  ;;  %v6778_v59 = vmul.f32 %v16483_v4, %v19251_v54  ;;  %v19255_v23 = vld [vmem:[#allocation60_spill] sm:$0xff]  ;;  %v19256_v29 = vld [vmem:[#allocation25_spill] sm:$0xff]  ;;  %v19258_v54 = vld [vmem:[#allocation34_spill] sm:$0xff] }
 0x7d7   : > { %11221 = vmatpush3.bf16.msra.mxu1 %v11567_v3  ;;  %v19253_v3 = vld [vmem:[#allocation92_spill] sm:$0xff]  ;;  %v7112_v1 = vmul.f32 %v19255_v23, %v19254_v2  ;;  %v19257_v21 = vld [vmem:[#allocation53_spill] sm:$0xff] }
 0x7d8   : > { %11099 = vmatmul.mubr.bf16.gmra.mxu0 %v6799_v47  ;;  %11222 = vmatprep.subr.bf16.mxu1 %v11569_v56  ;;  %v6780_v47 = vmul.f32 %v16509_v57, %v16669_v18  ;;  %v19261_v18 = vld [vmem:[#allocation59_spill] sm:$0xff] }
 0x7d9   : > { %11102 = vmatprep.mubr.bf16.mxu0 %v6800_v45  ;;  %11179 = vmatpush3.bf16.msra.mxu0 %v11572_v11  ;;  %v6781_v11 = vmul.f32 %v16507_v14, %v19253_v3  ;;  %v7113_v45 = vmul.f32 %v19257_v21, %v19256_v29  ;;  %v7115_v57 = vmul.f32 %v19261_v18, %v19260_v42  ;;  %v11575_v29 = vld [vmem:[%s17943_s12 + $0x140] sm:$0xff]  }
 0x7da   : > { %11143 = vmatmul.mubr.bf16.gmra.mxu1 %v7135_v48  ;;  %11180 = vmatprep.subr.bf16.mxu0 %v11574_v20  ;;  %v11573_v48 = vld [vmem:[%s17943_s12 + $0x148] sm:$0xff]   ;;  %v6801_v3 = vpack.c.bf16 %v6779_v49, %v6778_v59  ;;  %v6783_v42 = vmul.f32 %v16527_v6, %v16685_v46  ;;  %v19263_v59 = vld [vmem:[#allocation144_spill] sm:$0xff]  ;;  %v19264_v49 = vld [vmem:[#allocation62_spill] sm:$0xff] }
 0x7db   : > { %11146 = vmatprep.mubr.bf16.mxu1 %v7136_v33  ;;  %11223 = vmatpush3.bf16.msra.mxu1 %v11569_v56  ;;  %v19259_v33 = vld [vmem:[#allocation78_spill] sm:$0xff]  ;;  %v6802_v56 = vpack.c.bf16 %v6781_v11, %v6780_v47  ;;  %v7137_v2 = vpack.c.bf16 %v7113_v45, %v7112_v1  ;;  %v7116_v47 = vmul.f32 %v19264_v49, %v19263_v59  ;;  %v19266_v11 = vld [vmem:[#allocation16_spill] sm:$0xff]  ;;  %v16941_v45 = vld [vmem:[%s17943_s12 + $0x1f8] sm:$0xff]  }
 0x7dc   : > { %11224 = vmatprep.subr.bf16.mxu1 %v11571_v15  ;;  %v7114_v50 = vmul.f32 %v19259_v33, %v19258_v54  ;;  %v19262_v54 = vld [vmem:[#allocation91_spill] sm:$0xff]  ;;  %v19268_v46 = vld [vmem:[#allocation61_spill] sm:$0xff]  ;;  %v6786_v59 = vmul.f32 %v16683_v39, %v16708_v37 }
 0x7dd   : > { %11181 = vmatpush3.bf16.msra.mxu0 %v11574_v20  ;;  %v6782_v4 = vmul.f32 %v16529_v53, %v19262_v54  ;;  %v6785_v20 = vmul.f32 %v16583_v30, %v16706_v44  ;;  %v19277_v37 = vld [vmem:[#allocation159_spill] sm:$0xff]  ;;  %v8050_v53 = vld [vmem:[#allocation3 + $0x30] sm:$0xff] }
 0x7de   : > { %11262 = vmatprep.subr.bf16.mxu0 %v16905_v0  ;;  %v7138_v14 = vpack.c.bf16 %v7115_v57, %v7114_v50  ;;  %v19265_v57 = vld [vmem:[#allocation143_spill] sm:$0xff] }
 0x7df   : > { %11225 = vmatpush3.bf16.msra.mxu1 %v11571_v15  ;;  %v6784_v15 = vmul.f32 %v16585_v61, %v16704_v28  ;;  %v7117_v1 = vmul.f32 %v19266_v11, %v19265_v57  ;;  %v19269_v28 = vld [vmem:[#allocation37_spill] sm:$0xff]  ;;  %v6803_v44 = vpack.c.bf16 %v6783_v42, %v6782_v4  ;;  %v6787_v57 = vmul.f32 %v16681_v12, %v16719_v9  ;;  %v19272_v42 = vld [vmem:[#allocation66_spill] sm:$0xff]  ;;  %v19286_v39 = vld [vmem:[#allocation95_spill] sm:$0xff] }
 0x7e0   : > { %11103 = vmatmul.mubr.bf16.gmra.mxu0 %v6801_v3  ;;  %11226 = vmatprep.subr.bf16.mxu1 %v11573_v48  ;;  %v19270_v3 = vld [vmem:[#allocation133_spill] sm:$0xff]  ;;  %v6789_v4 = vmul.f32 %v16777_v38, %v16748_v63  ;;  %v7129_v30 = vmul.f32 %v16852_v13, %v19286_v39  ;;  %v19287_v13 = vld [vmem:[#allocation164_spill] sm:$0xff]  ;;  %v8051_v39 = vld [vmem:[#allocation3 + $0x38] sm:$0xff] }
 0x7e1   : > { %11106 = vmatprep.mubr.bf16.mxu0 %v6802_v56  ;;  %v7119_v56 = vmul.f32 %v19270_v3, %v19269_v28  ;;  %v19276_v28 = vld [vmem:[#allocation47_spill] sm:$0xff]  ;;  %v6805_v9 = vpack.c.bf16 %v6787_v57, %v6786_v59  ;;  %v19281_v57 = vld [vmem:[#allocation161_spill] sm:$0xff] }
 0x7e2   : > { %11147 = vmatmul.mubr.bf16.gmra.mxu1 %v7137_v2  ;;  %v7139_v2 = vpack.c.bf16 %v7117_v1, %v7116_v47  ;;  %v19274_v47 = vld [vmem:[#allocation67_spill] sm:$0xff]  ;;  %v19285_v12 = vld [vmem:[#allocation93_spill] sm:$0xff] }
 0x7e3   : > { %11150 = vmatprep.mubr.bf16.mxu1 %v7138_v14  ;;  %11227 = vmatpush3.bf16.msra.mxu1 %v11573_v48  ;;  %v19267_v14 = vld [vmem:[#allocation148_spill] sm:$0xff]  ;;  %v6804_v48 = vpack.c.bf16 %v6785_v20, %v6784_v15  ;;  %v19273_v20 = vld [vmem:[#allocation155_spill] sm:$0xff] }
 0x7e4   : > { %11228 = vmatprep.subr.bf16.mxu1 %v11575_v29  ;;  %v7118_v50 = vmul.f32 %v19268_v46, %v19267_v14  ;;  %v6788_v14 = vmul.f32 %v16779_v8, %v16737_v7  ;;  %v7121_v1 = vmul.f32 %v19274_v47, %v19273_v20  ;;  %v16964_v7 = vpop.permute.xlu1 %6757  ;;  %v16966_v8 = vpop.permute.xlu0 %6752 }
 0x7e5   : > { %v6791_v20 = vmul.f32 %v16964_v7, %v16752_v10 }
 0x7e6   : > { %v7140_v54 = vpack.c.bf16 %v7119_v56, %v7118_v50  ;;  %v19275_v50 = vld [vmem:[#allocation156_spill] sm:$0xff] }
 0x7e7   : > { %11229 = vmatpush3.bf16.msra.mxu1 %v11575_v29  ;;  %v19271_v29 = vld [vmem:[#allocation150_spill] sm:$0xff]  ;;  %v7122_v56 = vmul.f32 %v19276_v28, %v19275_v50 }
 0x7e8   : > { %11107 = vmatmul.mubr.bf16.gmra.mxu0 %v6803_v44  ;;  %11310 = vmatprep.subr.bf16.mxu1 %v16941_v45  ;;  %v7120_v15 = vmul.f32 %v19272_v42, %v19271_v29  ;;  %v19278_v44 = vld [vmem:[#allocation48_spill] sm:$0xff]  ;;  %v6790_v29 = vmul.f32 %v16966_v8, %v16750_v36  ;;  %v19279_v50 = vld [vmem:[#allocation158_spill] sm:$0xff] }
 0x7e9   : > { %11110 = vmatprep.mubr.bf16.mxu0 %v6804_v48  ;;  %v7123_v48 = vmul.f32 %v19278_v44, %v19277_v37  ;;  %v19280_v37 = vld [vmem:[#allocation82_spill] sm:$0xff] }
 0x7ea   : > { %11151 = vmatmul.mubr.bf16.gmra.mxu1 %v7139_v2  ;;  %v6806_v2 = vpack.c.bf16 %v6789_v4, %v6788_v14  ;;  %v7124_v59 = vmul.f32 %v19280_v37, %v19279_v50  ;;  %v19282_v14 = vld [vmem:[#allocation153_spill] sm:$0xff] }
 0x7eb   : > { %11154 = vmatprep.mubr.bf16.mxu1 %v7140_v54  ;;  %v7141_v54 = vpack.c.bf16 %v7121_v1, %v7120_v15  ;;  %v7142_v63 = vpack.c.bf16 %v7123_v48, %v7122_v56  ;;  %v7125_v4 = vmul.f32 %v19282_v14, %v19281_v57  ;;  %v7404_v15 = vld [vmem:[#allocation3 + $0x11] sm:$0xff]  ;;  %v7405_v1 = vld [vmem:[#allocation3 + $0x19] sm:$0xff]  ;;  %v19284_v48 = vld [vmem:[#allocation84_spill] sm:$0xff]  ;;  %v7128_v57 = vmul.f32 %v16850_v43, %v19285_v12 }
 0x7ec   : > { %v7436_v36 = vpack.c.bf16 %v7405_v1, %v7404_v15  ;;  %v7407_v50 = vld [vmem:[#allocation3 + $0x29] sm:$0xff]  ;;  %v11580_v43 = vld [vmem:[%s17943_s12 + $0x1a8] sm:$0xff]   ;;  %v7412_v1 = vld [vmem:[#allocation3 + $0x51] sm:$0xff] }
 0x7ed   : > { %v7143_v38 = vpack.c.bf16 %v7125_v4, %v7124_v59  ;;  %v7410_v4 = vld [vmem:[#allocation3 + $0x41] sm:$0xff]  ;;  %v7411_v15 = vld [vmem:[#allocation3 + $0x49] sm:$0xff] }
 0x7f0   : > { %11111 = vmatmul.mubr.bf16.gmra.mxu0 %v6805_v9  ;;  %v19283_v9 = vld [vmem:[#allocation132_spill] sm:$0xff] }
 0x7f1   : > { %11114 = vmatprep.mubr.bf16.mxu0 %v6806_v2  ;;  %v7126_v56 = vmul.f32 %v19236_v58, %v19283_v9  ;;  %v7127_v2 = vmul.f32 %v19238_v62, %v19284_v48  ;;  %v7408_v58 = vld [vmem:[#allocation3 + $0x31] sm:$0xff]  ;;  %v7409_v9 = vld [vmem:[#allocation3 + $0x39] sm:$0xff]  ;;  %v11578_v62 = vld [vmem:[%s17943_s12 + $0x1b0] sm:$0xff]  }
 0x7f2   : > { %11155 = vmatmul.mubr.bf16.gmra.mxu1 %v7141_v54  ;;  %v6807_v54 = vpack.c.bf16 %v6791_v20, %v6790_v29  ;;  %v16989_v29 = vpack.c.bf16 %v7409_v9, %v7408_v58  ;;  %v19288_v20 = vld [vmem:[#allocation160_spill] sm:$0xff] }
 0x7f3   : > { %11158 = vmatprep.mubr.bf16.mxu1 %v7142_v63  ;;  %v7144_v10 = vpack.c.bf16 %v7127_v2, %v7126_v56  ;;  %v7406_v63 = vld [vmem:[#allocation3 + $0x21] sm:$0xff]  ;;  %v19289_v59 = vpack.c.bf16 %v19287_v13, %v19288_v20  ;;  %v17000_v56 = vpack.c.bf16 %v7411_v15, %v7410_v4  ;;  %v11583_v4 = vld [vmem:[%s17943_s12 + $0x1e0] sm:$0xff]  }
 0x7f4   : > { %v16984_v61 = vpack.c.bf16 %v7407_v50, %v7406_v63  ;;  %v11579_v2 = vld [vmem:[%s17943_s12 + $0x1f0] sm:$0xff]   ;;  %v11584_v63 = vld [vmem:[%s17943_s12 + $0x198] sm:$0xff]   ;;  %v11581_v13 = vld [vmem:[%s17943_s12 + $0x1e8] sm:$0xff]  }
 0x7f5   : > { %v19293_v50 = vld [vmem:[#allocation108_spill] sm:$0xff] }
 0x7f6   : > { %v7414_v9 = vld [vmem:[#allocation3 + $0x61] sm:$0xff] }
 0x7f7   : > { %v19296_v15 = vld [vmem:[#allocation32_spill] sm:$0xff] }
 0x7f8   : > { %11115 = vmatmul.mubr.bf16.gmra.mxu0 %v6807_v54  ;;  %v19290_v54 = vld [vmem:[#allocation168_spill] sm:$0xff] }
 0x7f9   : > { %11182 = vmatprep.mubr.bf16.mxu0 %v7436_v36  ;;  %v19291_v36 = vld [vmem:[#allocation169_spill] sm:$0xff] }
 0x7fa   : > { %11159 = vmatmul.mubr.bf16.gmra.mxu1 %v7143_v38  ;;  %v7145_v38 = vpack.c.bf16 %v7129_v30, %v7128_v57  ;;  %v7413_v30 = vld [vmem:[#allocation3 + $0x59] sm:$0xff] }
 0x7fb   : > { %11162 = vmatprep.mubr.bf16.mxu1 %v7144_v10  ;;  %v17005_v48 = vpack.c.bf16 %v7413_v30, %v7412_v1  ;;  %v19292_v10 = vpack.c.bf16 %v19290_v54, %v19291_v36  ;;  %v19294_v57 = vld [vmem:[#allocation63_spill] sm:$0xff]  ;;  %v19297_v1 = vld [vmem:[#allocation88_spill] sm:$0xff]  ;;  %v19300_v54 = vld [vmem:[#allocation42_spill] sm:$0xff] }
 0x7fc   : > { %v19295_v58 = vpack.c.bf16 %v19293_v50, %v19294_v57  ;;  %v19298_v30 = vpack.c.bf16 %v19296_v15, %v19297_v1  ;;  %v7419_v50 = vld [vmem:[#allocation3 + $0x89] sm:$0xff]  ;;  %v7420_v57 = vld [vmem:[#allocation3 + $0x91] sm:$0xff] }
 0x7fd   : > { %v17067_v1 = vld [vmem:[%s17943_s12 + $0x238] sm:$0xff]  }
 0x800   : > { %11183 = vmatmul.mubr.bf16.vlgmr.msra.gmra.mxu0 %v16984_v61 }
 0x801   : > { %11263 = vmatpush3.bf16.msra.mxu0 %v16905_v0  ;;  %11186 = vmatprep.mubr.bf16.mxu0 %v16989_v29  ;;  %v11582_v0 = vld [vmem:[%s17943_s12 + $0x1a0] sm:$0xff]  }
 0x802   : > { %11163 = vmatmul.mubr.bf16.gmra.mxu1 %v7145_v38  ;;  %11264 = vmatprep.subr.bf16.mxu0 %v11578_v62  ;;  %v7416_v38 = vld [vmem:[#allocation3 + $0x71] sm:$0xff] }
 0x803   : > { %11230 = vmatprep.mubr.bf16.mxu1 %v19289_v59 }
 0x805   : > { %11265 = vmatpush3.bf16.msra.mxu0 %v11578_v62  ;;  %v7415_v62 = vld [vmem:[#allocation3 + $0x69] sm:$0xff] }
 0x806   : > { %11266 = vmatprep.subr.bf16.mxu0 %v11580_v43  ;;  %v17025_v20 = vpack.c.bf16 %v7415_v62, %v7414_v9  ;;  %v11590_v62 = vld [vmem:[%s17943_s12 + $0x180] sm:$0xff]  }
 0x808   : > { %11187 = vmatmul.mubr.bf16.gmra.mxu0 %v17000_v56 }
 0x809   : > { %11190 = vmatprep.mubr.bf16.mxu0 %v17005_v48  ;;  %11267 = vmatpush3.bf16.msra.mxu0 %v11580_v43  ;;  %v7417_v43 = vld [vmem:[#allocation3 + $0x79] sm:$0xff] }
 0x80a   : > { %11231 = vmatmul.mubr.bf16.vlgmr.msra.gmra.mxu1 %v19292_v10  ;;  %11268 = vmatprep.subr.bf16.mxu0 %v11582_v0  ;;  %v17030_v59 = vpack.c.bf16 %v7417_v43, %v7416_v38  ;;  %v7418_v10 = vld [vmem:[#allocation3 + $0x81] sm:$0xff] }
 0x80b   : > { %11311 = vmatpush3.bf16.msra.mxu1 %v16941_v45  ;;  %11234 = vmatprep.mubr.bf16.mxu1 %v19295_v58  ;;  %v11586_v45 = vld [vmem:[%s17943_s12 + $0x190] sm:$0xff]   ;;  %v7421_v58 = vld [vmem:[#allocation3 + $0x99] sm:$0xff]  ;;  %v17049_v9 = vpack.c.bf16 %v7419_v50, %v7418_v10  ;;  %v7424_v10 = vld [vmem:[#allocation3 + $0xb1] sm:$0xff] }
 0x80c   : > { %11312 = vmatprep.subr.bf16.mxu1 %v11579_v2  ;;  %v17054_v38 = vpack.c.bf16 %v7421_v58, %v7420_v57  ;;  %v11587_v43 = vld [vmem:[%s17943_s12 + $0x1d0] sm:$0xff]   ;;  %v7425_v50 = vld [vmem:[#allocation3 + $0xb9] sm:$0xff] }
 0x80d   : > { %11269 = vmatpush3.bf16.msra.mxu0 %v11582_v0  ;;  %v11588_v0 = vld [vmem:[%s17943_s12 + $0x188] sm:$0xff]   ;;  %v17078_v58 = vpack.c.bf16 %v7425_v50, %v7424_v10  ;;  %v19314_v50 = vpack.c.bf16 %v16743_v5, %v16733_v40  ;;  %v19318_v5 = vld [vmem:[#allocation74_spill] sm:$0xff]  ;;  %v19319_v40 = vld [vmem:[#allocation80_spill] sm:$0xff] }
 0x80e   : > { %11270 = vmatprep.subr.bf16.mxu0 %v11584_v63 }
 0x80f   : > { %11313 = vmatpush3.bf16.msra.mxu1 %v11579_v2  ;;  %v19299_v2 = vld [vmem:[#allocation98_spill] sm:$0xff] }
 0x810   : > { %11191 = vmatmul.mubr.bf16.gmra.mxu0 %v17025_v20  ;;  %11314 = vmatprep.subr.bf16.mxu1 %v11581_v13  ;;  %v19301_v36 = vpack.c.bf16 %v19299_v2, %v19300_v54  ;;  %v7422_v54 = vld [vmem:[#allocation3 + $0xa1] sm:$0xff] }
 0x811   : > { %11194 = vmatprep.mubr.bf16.mxu0 %v17030_v59  ;;  %11271 = vmatpush3.bf16.msra.mxu0 %v11584_v63  ;;  %v11585_v63 = vld [vmem:[%s17943_s12 + $0x1d8] sm:$0xff]  }
 0x812   : > { %11235 = vmatmul.mubr.bf16.gmra.mxu1 %v19298_v30  ;;  %11272 = vmatprep.subr.bf16.mxu0 %v11586_v45  ;;  %v19306_v30 = vld [vmem:[#allocation81_spill] sm:$0xff] }
 0x813   : > { %11238 = vmatprep.mubr.bf16.mxu1 %v19301_v36  ;;  %11315 = vmatpush3.bf16.msra.mxu1 %v11581_v13  ;;  %v19302_v13 = vld [vmem:[#allocation15_spill] sm:$0xff]  ;;  %v7423_v36 = vld [vmem:[#allocation3 + $0xa9] sm:$0xff] }
 0x814   : > { %11316 = vmatprep.subr.bf16.mxu1 %v11583_v4  ;;  %v17075_v57 = vpack.c.bf16 %v7423_v36, %v7422_v54  ;;  %v17094_v54 = vld [vmem:[%s17945_s14 + $0x18] sm:$0xff]  }
 0x815   : > { %11273 = vmatpush3.bf16.msra.mxu0 %v11586_v45  ;;  %v19303_v45 = vld [vmem:[#allocation65_spill] sm:$0xff] }
 0x816   : > { %11274 = vmatprep.subr.bf16.mxu0 %v11588_v0  ;;  %v19304_v15 = vpack.c.bf16 %v19302_v13, %v19303_v45  ;;  %v19308_v13 = vld [vmem:[#allocation75_spill] sm:$0xff]  ;;  %v19309_v45 = vld [vmem:[#allocation64_spill] sm:$0xff] }
 0x817   : > { %11317 = vmatpush3.bf16.msra.mxu1 %v11583_v4  ;;  %v19305_v4 = vld [vmem:[#allocation103_spill] sm:$0xff] }
 0x818   : > { %11195 = vmatmul.mubr.bf16.gmra.mxu0 %v17049_v9  ;;  %11318 = vmatprep.subr.bf16.mxu1 %v11585_v63  ;;  %v19307_v2 = vpack.c.bf16 %v19305_v4, %v19306_v30  ;;  %v7426_v4 = vld [vmem:[#allocation3 + $0xc1] sm:$0xff]  ;;  %v7427_v30 = vld [vmem:[#allocation3 + $0xc9] sm:$0xff] }
 0x819   : > { %11198 = vmatprep.mubr.bf16.mxu0 %v17054_v38  ;;  %11275 = vmatpush3.bf16.msra.mxu0 %v11588_v0  ;;  %v11589_v0 = vld [vmem:[%s17943_s12 + $0x1c8] sm:$0xff]   ;;  %v17096_v36 = vpack.c.bf16 %v7427_v30, %v7426_v4  ;;  %v8049_v30 = vld [vmem:[#allocation3 + $0x28] sm:$0xff] }
 0x81a   : > { %11239 = vmatmul.mubr.bf16.gmra.mxu1 %v19304_v15  ;;  %11276 = vmatprep.subr.bf16.mxu0 %v11590_v62  ;;  %v19310_v15 = vpack.c.bf16 %v19308_v13, %v19309_v45  ;;  %v7431_v13 = vld [vmem:[#allocation3 + $0xe9] sm:$0xff]  ;;  %v7432_v45 = vld [vmem:[#allocation3 + $0xf1] sm:$0xff]  ;;  %v8048_v4 = vld [vmem:[#allocation3 + $0x20] sm:$0xff] }
 0x81b   : > { %11242 = vmatprep.mubr.bf16.mxu1 %v19307_v2  ;;  %11319 = vmatpush3.bf16.msra.mxu1 %v11585_v63  ;;  %v11591_v63 = vld [vmem:[%s17943_s12 + $0x1c0] sm:$0xff]  }
 0x81c   : > { %11320 = vmatprep.subr.bf16.mxu1 %v11587_v43  ;;  %v7429_v2 = vld [vmem:[#allocation3 + $0xd9] sm:$0xff] }
 0x81d   : > { %11277 = vmatpush3.bf16.msra.mxu0 %v11590_v62  ;;  %v19311_v62 = vpack.c.bf16 %v16714_v35, %v16699_v31  ;;  %v19312_v35 = vld [vmem:[#allocation134_spill] sm:$0xff] }
 0x81e   : > { %11358 = vmatprep.subr.bf16.mxu0 %v17067_v1  ;;  %v19313_v31 = vpack.c.bf16 %v16729_v25, %v19312_v35  ;;  %v19316_v25 = vld [vmem:[#allocation102_spill] sm:$0xff]  ;;  %v7434_v35 = vld [vmem:[#allocation3 + $0x101] sm:$0xff] }
 0x81f   : > { %11321 = vmatpush3.bf16.msra.mxu1 %v11587_v43  ;;  %v7428_v43 = vld [vmem:[#allocation3 + $0xd1] sm:$0xff] }
 0x820   : > { %11199 = vmatmul.mubr.bf16.gmra.mxu0 %v17075_v57  ;;  %11322 = vmatprep.subr.bf16.mxu1 %v11589_v0  ;;  %v17098_v10 = vpack.c.bf16 %v7429_v2, %v7428_v43  ;;  %v19317_v43 = vpack.c.bf16 %v16762_v24, %v19316_v25  ;;  %v19320_v2 = vpack.c.bf16 %v19318_v5, %v19319_v40  ;;  %v8053_v24 = vld [vmem:[#allocation3 + $0x48] sm:$0xff]  ;;  %v19324_v40 = vld [vmem:[#allocation33_spill] sm:$0xff] }
 0x821   : > { %11202 = vmatprep.mubr.bf16.mxu0 %v17078_v58  ;;  %v7740_v25 = vld [vmem:[#allocation3 + $0x102] sm:$0xff]  ;;  %v19323_v5 = vpack.c.bf16 %v16799_v27, %v16790_v51 }
 0x822   : > { %11243 = vmatmul.mubr.bf16.gmra.mxu1 %v19310_v15  ;;  %v7433_v15 = vld [vmem:[#allocation3 + $0xf9] sm:$0xff]  ;;  %v11594_v51 = vld [vmem:[%s17943_s12 + $0x230] sm:$0xff]  }
 0x823   : > { %11246 = vmatprep.mubr.bf16.mxu1 %v19311_v62  ;;  %11323 = vmatpush3.bf16.msra.mxu1 %v11589_v0  ;;  %v7430_v0 = vld [vmem:[#allocation3 + $0xe1] sm:$0xff] }
 0x824   : > { %11324 = vmatprep.subr.bf16.mxu1 %v11591_v63  ;;  %v17109_v62 = vpack.c.bf16 %v7431_v13, %v7430_v0  ;;  %v19322_v13 = vld [vmem:[#allocation146_spill] sm:$0xff] }
 0x827   : > { %11325 = vmatpush3.bf16.msra.mxu1 %v11591_v63  ;;  %v17111_v63 = vpack.c.bf16 %v7433_v15, %v7432_v45  ;;  %v8081_v45 = vmul.f32 %v8049_v30, %v19322_v13  ;;  %v8083_v30 = vmul.f32 %v8051_v39, %v19324_v40  ;;  %v8055_v39 = vld [vmem:[#allocation3 + $0x58] sm:$0xff] }
 0x828   : > { %11203 = vmatmul.mubr.bf16.gmra.mxu0 %v17096_v36  ;;  %11406 = vmatprep.subr.bf16.mxu1 %v17094_v54 }
 0x829   : > { %11206 = vmatprep.mubr.bf16.mxu0 %v17098_v10  ;;  %19315 = vst [vmem:[#allocation39_spill] sm:$0xff] %v17111_v63 }
 0x82a   : > { %11247 = vmatmul.mubr.bf16.gmra.mxu1 %v19313_v31  ;;  %v7435_v31 = vld [vmem:[#allocation3 + $0x109] sm:$0xff] }
 0x82b   : > { %11250 = vmatprep.mubr.bf16.mxu1 %v19314_v50  ;;  %v19321_v50 = vld [vmem:[#allocation147_spill] sm:$0xff]  ;;  %v17123_v15 = vpack.c.bf16 %v7435_v31, %v7434_v35  ;;  %v8085_v31 = vmul.f32 %v8053_v24, %v15810_v55  ;;  %v19326_v24 = vld [vmem:[#allocation13_spill] sm:$0xff] }
 0x82c   : > { %v8080_v0 = vmul.f32 %v8048_v4, %v19321_v50  ;;  %v8082_v4 = vmul.f32 %v8050_v53, %v15797_v19  ;;  %v8054_v53 = vld [vmem:[#allocation3 + $0x50] sm:$0xff] }
 0x82e   : > { %v8112_v6 = vpack.c.bf16 %v8081_v45, %v8080_v0  ;;  %v8113_v0 = vpack.c.bf16 %v8083_v30, %v8082_v4  ;;  %v11595_v45 = vld [vmem:[%s17943_s12 + $0x228] sm:$0xff]   ;;  %v8058_v30 = vld [vmem:[#allocation3 + $0x70] sm:$0xff] }
 0x830   : > { %11207 = vmatmul.mubr.bf16.gmra.mxu0 %v17109_v62 }
 0x831   : > { %11210 = vmatprep.mubr.bf16.mxu0 %v17111_v63  ;;  %v8052_v63 = vld [vmem:[#allocation3 + $0x40] sm:$0xff] }
 0x832   : > { %11251 = vmatmul.mubr.bf16.gmra.mxu1 %v19317_v43  ;;  %v7741_v43 = vld [vmem:[#allocation3 + $0x10a] sm:$0xff]  ;;  %v8084_v35 = vmul.f32 %v8052_v63, %v15812_v16  ;;  %v8086_v16 = vmul.f32 %v8054_v53, %v19229_v22  ;;  %v8087_v63 = vmul.f32 %v8055_v39, %v19231_v60  ;;  %v11597_v22 = vld [vmem:[%s17943_s12 + $0x220] sm:$0xff]  }
 0x833   : > { %11254 = vmatprep.mubr.bf16.mxu1 %v19320_v2  ;;  %v19325_v2 = vpack.c.bf16 %v16807_v41, %v16803_v26  ;;  %v7773_v50 = vmul.f32 %v7741_v43, %v16964_v7  ;;  %v8056_v26 = vld [vmem:[#allocation3 + $0x60] sm:$0xff]  ;;  %v8057_v41 = vld [vmem:[#allocation3 + $0x68] sm:$0xff]  ;;  %v19327_v43 = vld [vmem:[#allocation18_spill] sm:$0xff] }
 0x834   : > { %v8114_v19 = vpack.c.bf16 %v8085_v31, %v8084_v35  ;;  %v8115_v40 = vpack.c.bf16 %v8087_v63, %v8086_v16  ;;  %v8060_v31 = vld [vmem:[#allocation3 + $0x80] sm:$0xff]  ;;  %v11598_v53 = vld [vmem:[%s17943_s12 + $0x218] sm:$0xff]  }
 0x838   : > { %11211 = vmatmul.mubr.bf16.gmra.mxu0 %v17123_v15 }
 0x839   : > { %11278 = vmatprep.mubr.bf16.mxu0 %v8112_v6  ;;  %v7772_v6 = vmul.f32 %v7740_v25, %v16966_v8  ;;  %v8088_v25 = vmul.f32 %v8056_v26, %v19326_v24 }
 0x83a   : > { %11255 = vmatmul.mubr.bf16.gmra.mxu1 %v19323_v5  ;;  %v8089_v5 = vmul.f32 %v8057_v41, %v19327_v43  ;;  %v8065_v43 = vld [vmem:[#allocation3 + $0xa8] sm:$0xff] }
 0x83b   : > { %11258 = vmatprep.mubr.bf16.mxu1 %v19325_v2  ;;  %v7789_v27 = vpack.c.bf16 %v7773_v50, %v7772_v6  ;;  %v8059_v2 = vld [vmem:[#allocation3 + $0x78] sm:$0xff]  ;;  %v11596_v6 = vld [vmem:[%s17945_s14 + $0x10] sm:$0xff]  }
 0x83c   : > { %v8116_v60 = vpack.c.bf16 %v8089_v5, %v8088_v25  ;;  %v11602_v5 = vld [vmem:[%s17945_s14] sm:$0xff]  }
 0x83f   : > { %v10992_v13 = vpop.f32.mrf.mxu0 }
 0x840   : > { %11279 = vmatmul.mubr.bf16.vlgmr.msra.gmra.mxu0 %v8113_v0 }
 0x841   : > { %11359 = vmatpush3.bf16.msra.mxu0 %v17067_v1  ;;  %11282 = vmatprep.mubr.bf16.mxu0 %v8114_v19  ;;  %v6232_v55 = vpop.f32.mrf.mxu0  ;;  %v8091_v19 = vmul.f32 %v8059_v2, %v19246_v32  ;;  %v11599_v32 = vld [vmem:[%s17945_s14 + $0x8] sm:$0xff]  }
 0x842   : > { %11259 = vmatmul.mubr.bf16.gmra.mxu1 %v7789_v27  ;;  %11360 = vmatprep.subr.bf16.mxu0 %v11594_v51  ;;  %v8092_v27 = vmul.f32 %v8060_v31, %v19248_v34  ;;  %v11600_v34 = vld [vmem:[%s17943_s12 + $0x210] sm:$0xff]   ;;  %v11601_v2 = vld [vmem:[%s17943_s12 + $0x208] sm:$0xff]  }
 0x843   : > { %11326 = vmatprep.mubr.bf16.mxu1 %v16984_v61  ;;  %v10993_v4 = vpop.f32.mrf.mxu0  ;;  %v8061_v61 = vld [vmem:[#allocation3 + $0x88] sm:$0xff] }
 0x845   : > { %11361 = vmatpush3.bf16.msra.mxu0 %v11594_v51  ;;  %v6235_v1 = vpop.f32.mrf.mxu0  ;;  %v8090_v51 = vmul.f32 %v8058_v30, %v19244_v52 }
 0x846   : > { %11362 = vmatprep.subr.bf16.mxu0 %v11595_v45 }
 0x847   : > { %v10996_v35 = vpop.f32.mrf.mxu0  ;;  %v8117_v63 = vpack.c.bf16 %v8091_v19, %v8090_v51  ;;  %v8066_v19 = vld [vmem:[#allocation3 + $0xb0] sm:$0xff] }
 0x848   : > { %11283 = vmatmul.mubr.bf16.gmra.mxu0 %v8115_v40 }
 0x849   : > { %11286 = vmatprep.mubr.bf16.mxu0 %v8116_v60  ;;  %11363 = vmatpush3.bf16.msra.mxu0 %v11595_v45  ;;  %v11040_v50 = vpop.f32.mrf.mxu1  ;;  %v6248_v0 = vpop.f32.mrf.mxu0  ;;  %v8063_v45 = vld [vmem:[#allocation3 + $0x98] sm:$0xff] }
 0x84a   : > { %11327 = vmatmul.mubr.bf16.vlgmr.msra.gmra.mxu1 %v16989_v29  ;;  %11364 = vmatprep.subr.bf16.mxu0 %v11597_v22  ;;  %v17162_v39 = vadd.f32 %v11040_v50, %v10992_v13  ;;  %v8093_v29 = vmul.f32 %v8061_v61, %v19250_v17  ;;  %v8095_v30 = vmul.f32 %v8063_v45, %v19257_v21 }
 0x84b   : > { %11407 = vmatpush3.bf16.msra.mxu1 %v17094_v54  ;;  %11330 = vmatprep.mubr.bf16.mxu1 %v17000_v56  ;;  %v6441_v26 = vpop.f32.mrf.mxu1  ;;  %v10997_v41 = vpop.f32.mrf.mxu0  ;;  %v8062_v54 = vld [vmem:[#allocation3 + $0x90] sm:$0xff]  ;;  %v8097_v61 = vmul.f32 %v8065_v43, %v19261_v18  ;;  %v8067_v18 = vld [vmem:[#allocation3 + $0xb8] sm:$0xff] }
 0x84c   : > { %11408 = vmatprep.subr.bf16.mxu1 %v11596_v6  ;;  %v17171_v52 = vadd.f32 %v6441_v26, %v6232_v55  ;;  %v8118_v17 = vpack.c.bf16 %v8093_v29, %v8092_v27  ;;  %v8064_v55 = vld [vmem:[#allocation3 + $0xa0] sm:$0xff]  ;;  %v8094_v60 = vmul.f32 %v8062_v54, %v19255_v23  ;;  %v8069_v29 = vld [vmem:[#allocation3 + $0xc8] sm:$0xff] }
 0x84d   : > { %11365 = vmatpush3.bf16.msra.mxu0 %v11597_v22  ;;  %v11041_v13 = vpop.f32.mrf.mxu1  ;;  %v6251_v16 = vpop.f32.mrf.mxu0 }
 0x84e   : > { %11366 = vmatprep.subr.bf16.mxu0 %v11598_v53  ;;  %v17176_v56 = vadd.f32 %v11041_v13, %v10993_v4  ;;  %v8119_v51 = vpack.c.bf16 %v8095_v30, %v8094_v60 }
 0x84f   : > { %11409 = vmatpush3.bf16.msra.mxu1 %v11596_v6  ;;  %v6444_v24 = vpop.f32.mrf.mxu1  ;;  %v11000_v25 = vpop.f32.mrf.mxu0 }
 0x850   : > { %11287 = vmatmul.mubr.bf16.gmra.mxu0 %v8117_v63  ;;  %11410 = vmatprep.subr.bf16.mxu1 %v11599_v32  ;;  %v17181_v40 = vadd.f32 %v6444_v24, %v6235_v1  ;;  %v8096_v1 = vmul.f32 %v8064_v55, %v19259_v33  ;;  %v8099_v63 = vmul.f32 %v8067_v18, %v19266_v11  ;;  %v8074_v18 = vld [vmem:[#allocation3 + $0xf0] sm:$0xff] }
 0x851   : > { %11290 = vmatprep.mubr.bf16.mxu0 %v8118_v17  ;;  %11367 = vmatpush3.bf16.msra.mxu0 %v11598_v53  ;;  %v11044_v4 = vpop.f32.mrf.mxu1  ;;  %v6264_v22 = vpop.f32.mrf.mxu0 }
 0x852   : > { %11331 = vmatmul.mubr.bf16.gmra.mxu1 %v17005_v48  ;;  %11368 = vmatprep.subr.bf16.mxu0 %v11600_v34  ;;  %v17189_v31 = vadd.f32 %v11044_v4, %v10996_v35  ;;  %v11603_v35 = vld [vmem:[%s17943_s12 + $0x200] sm:$0xff]   ;;  %v8120_v33 = vpack.c.bf16 %v8097_v61, %v8096_v1 }
 0x853   : > { %11334 = vmatprep.mubr.bf16.mxu1 %v17025_v20  ;;  %11411 = vmatpush3.bf16.msra.mxu1 %v11599_v32  ;;  %v6457_v48 = vpop.f32.mrf.mxu1  ;;  %v11001_v6 = vpop.f32.mrf.mxu0 }
 0x854   : > { %11412 = vmatprep.subr.bf16.mxu1 %v11602_v5  ;;  %v17194_v23 = vadd.f32 %v6457_v48, %v6248_v0  ;;  %v8068_v0 = vld [vmem:[#allocation3 + $0xc0] sm:$0xff] }
 0x855   : > { %11369 = vmatpush3.bf16.msra.mxu0 %v11600_v34  ;;  %v11045_v21 = vpop.f32.mrf.mxu1  ;;  %v6267_v50 = vpop.f32.mrf.mxu0  ;;  %v8100_v17 = vmul.f32 %v8068_v0, %v19268_v46  ;;  %v8073_v46 = vld [vmem:[#allocation3 + $0xe8] sm:$0xff]  ;;  %v8106_v0 = vmul.f32 %v8074_v18, %v19280_v37  ;;  %v8694_v18 = vld [vmem:[#allocation3 + $0x32] sm:$0xff] }
 0x856   : > { %11370 = vmatprep.subr.bf16.mxu0 %v11601_v2  ;;  %v17199_v20 = vadd.f32 %v11045_v21, %v10997_v41  ;;  %v8098_v41 = vmul.f32 %v8066_v19, %v19264_v49  ;;  %v8692_v37 = vld [vmem:[#allocation3 + $0x22] sm:$0xff] }
 0x857   : > { %11413 = vmatpush3.bf16.msra.mxu1 %v11602_v5  ;;  %v6460_v53 = vpop.f32.mrf.mxu1  ;;  %v11004_v27 = vpop.f32.mrf.mxu0  ;;  %v8070_v5 = vld [vmem:[#allocation3 + $0xd0] sm:$0xff] }
 0x858   : > { %11291 = vmatmul.mubr.bf16.gmra.mxu0 %v8119_v51  ;;  %v17201_v26 = vadd.f32 %v6460_v53, %v6251_v16  ;;  %v8101_v16 = vmul.f32 %v8069_v29, %v19270_v3  ;;  %v8121_v43 = vpack.c.bf16 %v8099_v63, %v8098_v41 }
 0x859   : > { %11294 = vmatprep.mubr.bf16.mxu0 %v8120_v33  ;;  %11371 = vmatpush3.bf16.msra.mxu0 %v11601_v2  ;;  %v11048_v32 = vpop.f32.mrf.mxu1  ;;  %v6280_v13 = vpop.f32.mrf.mxu0  ;;  %v8102_v2 = vmul.f32 %v8070_v5, %v19272_v42  ;;  %v19328_v5 = vld [vmem:[#allocation110_spill] sm:$0xff] }
 0x85a   : > { %11335 = vmatmul.mubr.bf16.gmra.mxu1 %v17030_v59  ;;  %11372 = vmatprep.subr.bf16.mxu0 %v11603_v35  ;;  %v17206_v34 = vadd.f32 %v11048_v32, %v11000_v25  ;;  %v8122_v11 = vpack.c.bf16 %v8101_v16, %v8100_v17  ;;  %v8071_v25 = vld [vmem:[#allocation3 + $0xd8] sm:$0xff] }
 0x85b   : > { %11338 = vmatprep.mubr.bf16.mxu1 %v17049_v9  ;;  %v6473_v54 = vpop.f32.mrf.mxu1  ;;  %v11005_v45 = vpop.f32.mrf.mxu0  ;;  %v8072_v9 = vld [vmem:[#allocation3 + $0xe0] sm:$0xff]  ;;  %v8103_v1 = vmul.f32 %v8071_v25, %v19274_v47  ;;  %v8075_v47 = vld [vmem:[#allocation3 + $0xf8] sm:$0xff] }
 0x85c   : > { %v17211_v24 = vadd.f32 %v6473_v54, %v6264_v22  ;;  %v8104_v48 = vmul.f32 %v8072_v9, %v19276_v28  ;;  %v8107_v29 = vmul.f32 %v8075_v47, %v19282_v14  ;;  %v8079_v14 = vld [vmem:[#allocation3 + $0x118] sm:$0xff] }
 0x85d   : > { %11373 = vmatpush3.bf16.msra.mxu0 %v11603_v35  ;;  %v11049_v59 = vpop.f32.mrf.mxu1  ;;  %v6283_v55 = vpop.f32.mrf.mxu0  ;;  %v8695_v47 = vld [vmem:[#allocation3 + $0x3a] sm:$0xff] }
 0x85e   : > { %v17213_v49 = vadd.f32 %v11049_v59, %v11001_v6  ;;  %v8105_v6 = vmul.f32 %v8073_v46, %v19278_v44  ;;  %v8125_v54 = vpack.c.bf16 %v8107_v29, %v8106_v0  ;;  %v8078_v59 = vld [vmem:[#allocation3 + $0x110] sm:$0xff] }
 0x85f   : > { %v6476_v4 = vpop.f32.mrf.mxu1  ;;  %v11008_v60 = vpop.f32.mrf.mxu0  ;;  %v8110_v9 = vmul.f32 %v8078_v59, %v19285_v12  ;;  %v19336_v59 = vld [vmem:[#allocation106_spill] sm:$0xff] }
 0x860   : > { %11295 = vmatmul.mubr.bf16.gmra.mxu0 %v8121_v43  ;;  %v17215_v30 = vadd.f32 %v6476_v4, %v6267_v50  ;;  %v8124_v42 = vpack.c.bf16 %v8105_v6, %v8104_v48  ;;  %v8693_v43 = vld [vmem:[#allocation3 + $0x2a] sm:$0xff]  ;;  %v19333_v48 = vld [vmem:[#allocation95_spill] sm:$0xff] }
 0x861   : > { %11298 = vmatprep.mubr.bf16.mxu0 %v8122_v11  ;;  %v11052_v3 = vpop.f32.mrf.mxu1  ;;  %v6296_v22 = vpop.f32.mrf.mxu0  ;;  %v8111_v6 = vmul.f32 %v8079_v14, %v19333_v48  ;;  %v19338_v14 = vld [vmem:[#allocation26_spill] sm:$0xff] }
 0x862   : > { %11339 = vmatmul.mubr.bf16.gmra.mxu1 %v17054_v38  ;;  %v17220_v61 = vadd.f32 %v11052_v3, %v11004_v27  ;;  %v8123_v38 = vpack.c.bf16 %v8103_v1, %v8102_v2  ;;  %v19331_v3 = vld [vmem:[#allocation72_spill] sm:$0xff]  ;;  %v19332_v2 = vld [vmem:[#allocation73_spill] sm:$0xff] }
 0x863   : > { %11342 = vmatprep.mubr.bf16.mxu1 %v17075_v57  ;;  %v6489_v21 = vpop.f32.mrf.mxu1  ;;  %v11009_v50 = vpop.f32.mrf.mxu0  ;;  %v8725_v1 = vmul.f32 %v8693_v43, %v19332_v2 }
 0x864   : > { %v17225_v51 = vadd.f32 %v6489_v21, %v6280_v13 }
 0x865   : > { %v11053_v35 = vpop.f32.mrf.mxu1  ;;  %v6299_v33 = vpop.f32.mrf.mxu0 }
 0x866   : > { %v17227_v19 = vadd.f32 %v11053_v35, %v11005_v45 }
 0x867   : > { %v6492_v53 = vpop.f32.mrf.mxu1  ;;  %v11012_v27 = vpop.f32.mrf.mxu0 }
 0x868   : > { %11299 = vmatmul.mubr.bf16.gmra.mxu0 %v8123_v38  ;;  %v17229_v57 = vadd.f32 %v6492_v53, %v6283_v55 }
 0x869   : > { %11302 = vmatprep.mubr.bf16.mxu0 %v8124_v42  ;;  %v11056_v28 = vpop.f32.mrf.mxu1  ;;  %v6312_v44 = vpop.f32.mrf.mxu0 }
 0x86a   : > { %11343 = vmatmul.mubr.bf16.gmra.mxu1 %v17078_v58  ;;  %v17234_v32 = vadd.f32 %v11056_v28, %v11008_v60  ;;  %v8697_v28 = vld [vmem:[#allocation3 + $0x4a] sm:$0xff] }
 0x86b   : > { %11346 = vmatprep.mubr.bf16.mxu1 %v17096_v36  ;;  %v6505_v13 = vpop.f32.mrf.mxu1  ;;  %v11013_v41 = vpop.f32.mrf.mxu0  ;;  %v19329_v36 = vld [vmem:[#allocation97_spill] sm:$0xff] }
 0x86c   : > { %v17237_v63 = vadd.f32 %v6505_v13, %v6296_v22  ;;  %v19330_v25 = vpack.c.bf16 %v19328_v5, %v19329_v36  ;;  %v8724_v22 = vmul.f32 %v8692_v37, %v19331_v3  ;;  %v19334_v13 = vld [vmem:[#allocation39_spill] sm:$0xff]  ;;  %v19337_v37 = vld [vmem:[#allocation76_spill] sm:$0xff] }
 0x86d   : > { %v11057_v17 = vpop.f32.mrf.mxu1  ;;  %v6315_v16 = vpop.f32.mrf.mxu0 }
 0x86e   : > { %v17239_v45 = vadd.f32 %v11057_v17, %v11009_v50  ;;  %v8756_v12 = vpack.c.bf16 %v8725_v1, %v8724_v22  ;;  %v19335_v17 = vld [vmem:[#allocation105_spill] sm:$0xff] }
 0x86f   : > { %v6508_v58 = vpop.f32.mrf.mxu1  ;;  %v11016_v55 = vpop.f32.mrf.mxu0 }
 0x870   : > { %11303 = vmatmul.mubr.bf16.gmra.mxu0 %v8125_v54  ;;  %v17241_v11 = vadd.f32 %v6508_v58, %v6299_v33  ;;  %v8726_v54 = vmul.f32 %v8694_v18, %v19335_v17  ;;  %v8700_v18 = vld [vmem:[#allocation3 + $0x62] sm:$0xff] }
 0x871   : > { %11306 = vmatprep.mubr.bf16.mxu0 %v19330_v25  ;;  %v11060_v4 = vpop.f32.mrf.mxu1  ;;  %v6328_v60 = vpop.f32.mrf.mxu0 }
 0x872   : > { %11347 = vmatmul.mubr.bf16.gmra.mxu1 %v17098_v10  ;;  %v17248_v46 = vadd.f32 %v11060_v4, %v11012_v27  ;;  %v8127_v10 = vpack.c.bf16 %v8111_v6, %v8110_v9  ;;  %v8696_v27 = vld [vmem:[#allocation3 + $0x42] sm:$0xff] }
 0x873   : > { %11350 = vmatprep.mubr.bf16.mxu1 %v17109_v62  ;;  %v6521_v21 = vpop.f32.mrf.mxu1  ;;  %v11017_v50 = vpop.f32.mrf.mxu0  ;;  %v8728_v43 = vmul.f32 %v8696_v27, %v19337_v37  ;;  %v11899_v9 = vld [vmem:[#allocation3] sm:$0xff] }
 0x874   : > { %v17254_v35 = vadd.f32 %v6521_v21, %v6312_v44  ;;  %v8433_v3 = vpack.c.bf16 %v11899_v9, %v11899_v9  ;;  %v11901_v6 = vld [vmem:[%s12188_s27 + $0x8] sm:$0xff]  ;;  %v11902_v9 = vld [vmem:[%s12188_s27 + $0x10] sm:$0xff] }
 0x875   : > { %v11061_v33 = vpop.f32.mrf.mxu1  ;;  %v6331_v38 = vpop.f32.mrf.mxu0 }
 0x876   : > { %v17256_v42 = vadd.f32 %v11061_v33, %v11013_v41  ;;  %v8727_v41 = vmul.f32 %v8695_v47, %v19336_v59  ;;  %v8699_v33 = vld [vmem:[#allocation3 + $0x5a] sm:$0xff]  ;;  %v8701_v47 = vld [vmem:[#allocation3 + $0x6a] sm:$0xff] }
 0x877   : > { %v6524_v53 = vpop.f32.mrf.mxu1  ;;  %v11020_v62 = vpop.f32.mrf.mxu0 }
 0x878   : > { %11307 = vmatmul.mubr.bf16.gmra.mxu0 %v8127_v10  ;;  %v17258_v0 = vadd.f32 %v6524_v53, %v6315_v16  ;;  %v8729_v16 = vmul.f32 %v8697_v28, %v19338_v14  ;;  %v8757_v2 = vpack.c.bf16 %v8727_v41, %v8726_v54  ;;  %v19339_v28 = vld [vmem:[#allocation107_spill] sm:$0xff] }
 0x879   : > { %11374 = vmatprep.mubr.bf16.mxu0 %v8756_v12  ;;  %v11064_v29 = vpop.f32.mrf.mxu1  ;;  %v6344_v44 = vpop.f32.mrf.mxu0 }
 0x87a   : > { %11351 = vmatmul.mubr.bf16.gmra.mxu1 %v19334_v13  ;;  %v17263_v58 = vadd.f32 %v11064_v29, %v11016_v55  ;;  %v8758_v48 = vpack.c.bf16 %v8729_v16, %v8728_v43  ;;  %v11900_v55 = vld [vmem:[%s12188_s27] sm:$0xff]  ;;  %v19340_v13 = vld [vmem:[#allocation113_spill] sm:$0xff] }
 0x87b   : > { %11354 = vmatprep.mubr.bf16.mxu1 %v17123_v15  ;;  %v6537_v5 = vpop.f32.mrf.mxu1  ;;  %v11021_v36 = vpop.f32.mrf.mxu0  ;;  %v9069_v21 = vpack.c.bf16 %v11901_v6, %v11900_v55  ;;  %v8698_v15 = vld [vmem:[#allocation3 + $0x52] sm:$0xff]  ;;  %v8731_v17 = vmul.f32 %v8699_v33, %v19340_v13 }
 0x87c   : > { %v17268_v25 = vadd.f32 %v6537_v5, %v6328_v60  ;;  %v8730_v29 = vmul.f32 %v8698_v15, %v19339_v28  ;;  %v11905_v15 = vld [vmem:[%s12188_s27 + $0x28] sm:$0xff]  ;;  %v19343_v28 = vld [vmem:[#allocation121_spill] sm:$0xff]  ;;  %v19344_v13 = vld [vmem:[#allocation122_spill] sm:$0xff] }
 0x87d   : > { %v11065_v4 = vpop.f32.mrf.mxu1  ;;  %v6347_v22 = vpop.f32.mrf.mxu0 }
 0x87e   : > { %v17270_v1 = vadd.f32 %v11065_v4, %v11017_v50 }
 0x87f   : > { %v6540_v10 = vpop.f32.mrf.mxu1 }
 0x880   : > { %v11088_v12 = vpop.f32.mrf.mxu0  ;;  %11375 = vmatmul.mubr.bf16.vlgmr.msra.gmra.mxu0 %v8757_v2  ;;  %v17274_v60 = vadd.f32 %v6540_v10, %v6331_v38  ;;  %v19341_v38 = vld [vmem:[#allocation114_spill] sm:$0xff] }
 0x881   : > { %v7036_v53 = vadd.f32 %v11088_v12, %v17162_v39  ;;  %11378 = vmatprep.mubr.bf16.mxu0 %v8758_v48  ;;  %v8732_v41 = vmul.f32 %v8700_v18, %v19341_v38  ;;  %v19342_v39 = vld [vmem:[#allocation115_spill] sm:$0xff]  ;;  %v8759_v48 = vpack.c.bf16 %v8731_v17, %v8730_v29  ;;  %v8702_v10 = vld [vmem:[#allocation3 + $0x72] sm:$0xff] }
 0x882   : > { %v11068_v27 = vpop.f32.mrf.mxu1  ;;  %11355 = vmatmul.mubr.bf16.gmra.mxu1 %v8433_v3  ;;  %v6907_v50 = vpop.f32.mrf.mxu0  ;;  %v8733_v37 = vmul.f32 %v8701_v47, %v19342_v39  ;;  %v8703_v12 = vld [vmem:[#allocation3 + $0x7a] sm:$0xff]  ;;  %v8705_v47 = vld [vmem:[#allocation3 + $0x8a] sm:$0xff]  ;;  %v8734_v29 = vmul.f32 %v8702_v10, %v19343_v28 }
 0x883   : > { %v17279_v54 = vadd.f32 %v11068_v27, %v11020_v62  ;;  %11414 = vmatprep.mubr.msk.bf16.mxu1 %vm621_vm0, %v9069_v21  ;;  %v7034_v59 = vadd.f32 %v6907_v50, %v17171_v52  ;;  %v11903_v62 = vld [vmem:[%s12188_s27 + $0x18] sm:$0xff]  ;;  %v11904_v21 = vld [vmem:[%s12188_s27 + $0x20] sm:$0xff]  ;;  %v8735_v17 = vmul.f32 %v8703_v12, %v19344_v13  ;;  %v19346_v39 = vld [vmem:[#allocation131_spill] sm:$0xff] }
 0x884   : > { %v6553_v43 = vpop.f32.mrf.mxu1  ;;  %v11089_v14 = vpop.f32.mrf.mxu0  ;;  %v9070_v3 = vpack.c.bf16 %v11903_v62, %v11902_v9  ;;  %v8760_v6 = vpack.c.bf16 %v8733_v37, %v8732_v41  ;;  %v9071_v33 = vpack.c.bf16 %v11905_v15, %v11904_v21  ;;  %v19345_v41 = vld [vmem:[#allocation130_spill] sm:$0xff]  ;;  %v8737_v37 = vmul.f32 %v8705_v47, %v19346_v39  ;;  %v11909_v10 = vld [vmem:[%s12188_s27 + $0x48] sm:$0xff]  ;;  %v8709_v47 = vld [vmem:[#allocation3 + $0xaa] sm:$0xff] }
 0x885   : > { %v17285_v16 = vadd.f32 %v6553_v43, %v6344_v44  ;;  %v7037_v5 = vadd.f32 %v11089_v14, %v17176_v56  ;;  %v8704_v56 = vld [vmem:[#allocation3 + $0x82] sm:$0xff]  ;;  %v19347_v28 = vld [vmem:[#allocation137_spill] sm:$0xff]  ;;  %v19348_v13 = vld [vmem:[#allocation138_spill] sm:$0xff] }
 0x886   : > { %v11069_v4 = vpop.f32.mrf.mxu1  ;;  %v6910_v2 = vpop.f32.mrf.mxu0  ;;  %v19350_v39 = vld [vmem:[#allocation142_spill] sm:$0xff] }
 0x887   : > { %v17290_v55 = vadd.f32 %v11069_v4, %v11021_v36  ;;  %v7035_v52 = vadd.f32 %v6910_v2, %v17181_v40 }
 0x888   : > { %v6556_v44 = vpop.f32.mrf.mxu1  ;;  %v11092_v18 = vpop.f32.mrf.mxu0  ;;  %11379 = vmatmul.mubr.bf16.gmra.mxu0 %v8759_v48 }
 0x889   : > { %v17295_v27 = vadd.f32 %v6556_v44, %v6347_v22  ;;  %v7040_v50 = vadd.f32 %v11092_v18, %v17189_v31  ;;  %11382 = vmatprep.mubr.bf16.mxu0 %v8760_v6  ;;  %v8736_v31 = vmul.f32 %v8704_v56, %v19345_v41  ;;  %v8761_v6 = vpack.c.bf16 %v8735_v17, %v8734_v29  ;;  %v8706_v44 = vld [vmem:[#allocation3 + $0x92] sm:$0xff]  ;;  %v8707_v18 = vld [vmem:[#allocation3 + $0x9a] sm:$0xff] }
 0x88a   : > { %v11136_v36 = vpop.f32.mrf.mxu1  ;;  %11415 = vmatmul.mubr.msk.bf16.vlgmr.msra.gmra.mxu1 %vm621_vm0, %v9070_v3  ;;  %v6923_v40 = vpop.f32.mrf.mxu0  ;;  %v11906_v3 = vld [vmem:[%s12188_s27 + $0x30] sm:$0xff]  ;;  %v8738_v29 = vmul.f32 %v8706_v44, %v19347_v28  ;;  %v8739_v17 = vmul.f32 %v8707_v18, %v19348_v13  ;;  %v11913_v44 = vld [vmem:[%s12188_s27 + $0x68] sm:$0xff]  ;;  %v19351_v28 = vld [vmem:[#allocation22_spill] sm:$0xff] }
 0x88b   : > { %v17301_v38 = vadd.f32 %v11136_v36, %v7036_v53  ;;  %11418 = vmatprep.mubr.msk.bf16.mxu1 %vm621_vm0, %v9071_v33  ;;  %v7038_v22 = vadd.f32 %v6923_v40, %v17194_v23  ;;  %v11907_v53 = vld [vmem:[%s12188_s27 + $0x38] sm:$0xff]  ;;  %v8762_v15 = vpack.c.bf16 %v8737_v37, %v8736_v31  ;;  %v11908_v33 = vld [vmem:[%s12188_s27 + $0x40] sm:$0xff]  ;;  %v8741_v37 = vmul.f32 %v8709_v47, %v19350_v39 }
 0x88c   : > { %v7245_v43 = vpop.f32.mrf.mxu1  ;;  %v11093_v14 = vpop.f32.mrf.mxu0  ;;  %v9072_v2 = vpack.c.bf16 %v11907_v53, %v11906_v3  ;;  %v9073_v12 = vpack.c.bf16 %v11909_v10, %v11908_v33  ;;  %v19349_v31 = vld [vmem:[#allocation141_spill] sm:$0xff]  ;;  %v19354_v39 = vld [vmem:[#allocation38_spill] sm:$0xff] }
 0x88d   : > { %v17307_v4 = vadd.f32 %v7245_v43, %v7034_v59  ;;  %v7041_v9 = vadd.f32 %v11093_v14, %v17199_v20  ;;  %v8708_v20 = vld [vmem:[#allocation3 + $0xa2] sm:$0xff]  ;;  %v8713_v47 = vld [vmem:[#allocation3 + $0xca] sm:$0xff] }
 0x88e   : > { %v11137_v62 = vpop.f32.mrf.mxu1  ;;  %v6926_v48 = vpop.f32.mrf.mxu0  ;;  %v19352_v13 = vld [vmem:[#allocation29_spill] sm:$0xff] }
 0x88f   : > { %v17312_v21 = vadd.f32 %v11137_v62, %v7037_v5  ;;  %v7039_v23 = vadd.f32 %v6926_v48, %v17201_v26 }
 0x890   : > { %v7248_v59 = vpop.f32.mrf.mxu1  ;;  %v11096_v56 = vpop.f32.mrf.mxu0  ;;  %11383 = vmatmul.mubr.bf16.gmra.mxu0 %v8761_v6 }
 0x891   : > { %v17317_v36 = vadd.f32 %v7248_v59, %v7035_v52  ;;  %v7044_v40 = vadd.f32 %v11096_v56, %v17206_v34  ;;  %11386 = vmatprep.mubr.bf16.mxu0 %v8762_v15  ;;  %v8740_v34 = vmul.f32 %v8708_v20, %v19349_v31  ;;  %v8763_v15 = vpack.c.bf16 %v8739_v17, %v8738_v29  ;;  %v8710_v59 = vld [vmem:[#allocation3 + $0xb2] sm:$0xff]  ;;  %v8711_v56 = vld [vmem:[#allocation3 + $0xba] sm:$0xff] }
 0x892   : > { %v11140_v5 = vpop.f32.mrf.mxu1  ;;  %11419 = vmatmul.mubr.msk.bf16.gmra.mxu1 %vm621_vm0, %v9072_v2  ;;  %v6939_v26 = vpop.f32.mrf.mxu0  ;;  %v11910_v2 = vld [vmem:[%s12188_s27 + $0x50] sm:$0xff]  ;;  %v8742_v29 = vmul.f32 %v8710_v59, %v19351_v28  ;;  %v8743_v17 = vmul.f32 %v8711_v56, %v19352_v13  ;;  %v11917_v59 = vld [vmem:[%s12188_s27 + $0x88] sm:$0xff]  ;;  %v19355_v28 = vld [vmem:[#allocation157_spill] sm:$0xff] }
 0x893   : > { %v17323_v41 = vadd.f32 %v11140_v5, %v7040_v50  ;;  %11422 = vmatprep.mubr.msk.bf16.mxu1 %vm621_vm0, %v9073_v12  ;;  %v7042_v52 = vadd.f32 %v6939_v26, %v17211_v24  ;;  %v11911_v50 = vld [vmem:[%s12188_s27 + $0x58] sm:$0xff]  ;;  %v8764_v10 = vpack.c.bf16 %v8741_v37, %v8740_v34  ;;  %v11912_v12 = vld [vmem:[%s12188_s27 + $0x60] sm:$0xff]  ;;  %v19353_v34 = vld [vmem:[#allocation151_spill] sm:$0xff]  ;;  %v8745_v37 = vmul.f32 %v8713_v47, %v19354_v39 }
 0x894   : > { %v7261_v43 = vpop.f32.mrf.mxu1  ;;  %v11097_v14 = vpop.f32.mrf.mxu0  ;;  %v9074_v48 = vpack.c.bf16 %v11911_v50, %v11910_v2  ;;  %v9075_v18 = vpack.c.bf16 %v11913_v44, %v11912_v12  ;;  %v8717_v47 = vld [vmem:[#allocation3 + $0xea] sm:$0xff]  ;;  %v19356_v13 = vld [vmem:[#allocation154_spill] sm:$0xff]  ;;  %v19358_v39 = vld [vmem:[#allocation167_spill] sm:$0xff] }
 0x895   : > { %v17329_v62 = vadd.f32 %v7261_v43, %v7038_v22  ;;  %v7045_v3 = vadd.f32 %v11097_v14, %v17213_v49  ;;  %v8712_v49 = vld [vmem:[#allocation3 + $0xc2] sm:$0xff] }
 0x896   : > { %v11141_v53 = vpop.f32.mrf.mxu1  ;;  %v6942_v6 = vpop.f32.mrf.mxu0 }
 0x897   : > { %v17334_v33 = vadd.f32 %v11141_v53, %v7041_v9  ;;  %v7043_v24 = vadd.f32 %v6942_v6, %v17215_v30 }
 0x898   : > { %v7264_v22 = vpop.f32.mrf.mxu1  ;;  %v11100_v20 = vpop.f32.mrf.mxu0  ;;  %11387 = vmatmul.mubr.bf16.gmra.mxu0 %v8763_v15 }
 0x899   : > { %v17339_v5 = vadd.f32 %v7264_v22, %v7039_v23  ;;  %v7048_v26 = vadd.f32 %v11100_v20, %v17220_v61  ;;  %11390 = vmatprep.mubr.bf16.mxu0 %v8764_v10  ;;  %v8744_v61 = vmul.f32 %v8712_v49, %v19353_v34  ;;  %v8765_v10 = vpack.c.bf16 %v8743_v17, %v8742_v29  ;;  %v8714_v22 = vld [vmem:[#allocation3 + $0xd2] sm:$0xff]  ;;  %v8715_v20 = vld [vmem:[#allocation3 + $0xda] sm:$0xff] }
 0x89a   : > { %v11144_v9 = vpop.f32.mrf.mxu1  ;;  %11423 = vmatmul.mubr.msk.bf16.gmra.mxu1 %vm621_vm0, %v9074_v48  ;;  %v6955_v30 = vpop.f32.mrf.mxu0  ;;  %v11914_v48 = vld [vmem:[%s12188_s27 + $0x70] sm:$0xff]  ;;  %v8746_v29 = vmul.f32 %v8714_v22, %v19355_v28  ;;  %v8747_v17 = vmul.f32 %v8715_v20, %v19356_v13  ;;  %v11921_v22 = vld [vmem:[%s12188_s27 + $0xa8] sm:$0xff]  ;;  %v19359_v28 = vld [vmem:[#allocation70_spill] sm:$0xff] }
 0x89b   : > { %v17345_v31 = vadd.f32 %v11144_v9, %v7044_v40  ;;  %11426 = vmatprep.mubr.msk.bf16.mxu1 %vm621_vm0, %v9075_v18  ;;  %v7046_v23 = vadd.f32 %v6955_v30, %v17225_v51  ;;  %v11915_v40 = vld [vmem:[%s12188_s27 + $0x78] sm:$0xff]  ;;  %v8766_v44 = vpack.c.bf16 %v8745_v37, %v8744_v61  ;;  %v11916_v18 = vld [vmem:[%s12188_s27 + $0x80] sm:$0xff]  ;;  %v8749_v37 = vmul.f32 %v8717_v47, %v19358_v39  ;;  %v19360_v13 = vld [vmem:[#allocation35_spill] sm:$0xff] }
 0x89c   : > { %v7277_v43 = vpop.f32.mrf.mxu1  ;;  %v11101_v14 = vpop.f32.mrf.mxu0  ;;  %v9076_v6 = vpack.c.bf16 %v11915_v40, %v11914_v48  ;;  %v9077_v56 = vpack.c.bf16 %v11917_v59, %v11916_v18  ;;  %v19357_v61 = vld [vmem:[#allocation166_spill] sm:$0xff]  ;;  %v8721_v47 = vld [vmem:[#allocation3 + $0x10a] sm:$0xff] }
 0x89d   : > { %v17351_v53 = vadd.f32 %v7277_v43, %v7042_v52  ;;  %v7049_v2 = vadd.f32 %v11101_v14, %v17227_v19  ;;  %v8716_v19 = vld [vmem:[#allocation3 + $0xe2] sm:$0xff] }
 0x89e   : > { %v11145_v50 = vpop.f32.mrf.mxu1  ;;  %v6958_v15 = vpop.f32.mrf.mxu0 }
 0x89f   : > { %v17356_v12 = vadd.f32 %v11145_v50, %v7045_v3  ;;  %v7047_v51 = vadd.f32 %v6958_v15, %v17229_v57 }
 0x8a0   : > { %v7280_v52 = vpop.f32.mrf.mxu1  ;;  %v11104_v49 = vpop.f32.mrf.mxu0  ;;  %11391 = vmatmul.mubr.bf16.gmra.mxu0 %v8765_v10 }
 0x8a1   : > { %v17361_v9 = vadd.f32 %v7280_v52, %v7043_v24  ;;  %v7052_v30 = vadd.f32 %v11104_v49, %v17234_v32  ;;  %11394 = vmatprep.mubr.bf16.mxu0 %v8766_v44  ;;  %v8748_v32 = vmul.f32 %v8716_v19, %v19357_v61  ;;  %v8767_v44 = vpack.c.bf16 %v8747_v17, %v8746_v29  ;;  %v8718_v52 = vld [vmem:[#allocation3 + $0xf2] sm:$0xff]  ;;  %v8719_v49 = vld [vmem:[#allocation3 + $0xfa] sm:$0xff] }
 0x8a2   : > { %v11148_v3 = vpop.f32.mrf.mxu1  ;;  %11427 = vmatmul.mubr.msk.bf16.gmra.mxu1 %vm621_vm0, %v9076_v6  ;;  %v6971_v57 = vpop.f32.mrf.mxu0  ;;  %v11918_v6 = vld [vmem:[%s12188_s27 + $0x90] sm:$0xff]  ;;  %v8750_v29 = vmul.f32 %v8718_v52, %v19359_v28  ;;  %v8751_v17 = vmul.f32 %v8719_v49, %v19360_v13  ;;  %v11924_v49 = vld [vmem:[%s12188_s27 + $0xc0] sm:$0xff] }
 0x8a3   : > { %v17367_v34 = vadd.f32 %v11148_v3, %v7048_v26  ;;  %11430 = vmatprep.mubr.msk.bf16.mxu1 %vm621_vm0, %v9077_v56  ;;  %v7050_v24 = vadd.f32 %v6971_v57, %v17237_v63  ;;  %v11919_v26 = vld [vmem:[%s12188_s27 + $0x98] sm:$0xff]  ;;  %v8768_v59 = vpack.c.bf16 %v8749_v37, %v8748_v32  ;;  %v11920_v56 = vld [vmem:[%s12188_s27 + $0xa0] sm:$0xff]  ;;  %v19361_v32 = vld [vmem:[#allocation99_spill] sm:$0xff] }
 0x8a4   : > { %v7293_v43 = vpop.f32.mrf.mxu1  ;;  %v11105_v14 = vpop.f32.mrf.mxu0  ;;  %v9078_v15 = vpack.c.bf16 %v11919_v26, %v11918_v6  ;;  %v9079_v20 = vpack.c.bf16 %v11921_v22, %v11920_v56  ;;  %v8723_v56 = vld [vmem:[#allocation3 + $0x11a] sm:$0xff] }
 0x8a5   : > { %v17373_v50 = vadd.f32 %v7293_v43, %v7046_v23  ;;  %v7053_v48 = vadd.f32 %v11105_v14, %v17239_v45  ;;  %v8720_v45 = vld [vmem:[#allocation3 + $0x102] sm:$0xff] }
 0x8a6   : > { %v11149_v40 = vpop.f32.mrf.mxu1  ;;  %v6974_v10 = vpop.f32.mrf.mxu0  ;;  %v8752_v39 = vmul.f32 %v8720_v45, %v19361_v32  ;;  %v11926_v32 = vld [vmem:[%s12188_s27 + $0xd0] sm:$0xff] }
 0x8a7   : > { %v17378_v18 = vadd.f32 %v11149_v40, %v7049_v2  ;;  %v7051_v63 = vadd.f32 %v6974_v10, %v17241_v11 }
 0x8a8   : > { %v7296_v23 = vpop.f32.mrf.mxu1  ;;  %v11108_v19 = vpop.f32.mrf.mxu0  ;;  %11395 = vmatmul.mubr.bf16.gmra.mxu0 %v8767_v44 }
 0x8a9   : > { %v17383_v3 = vadd.f32 %v7296_v23, %v7047_v51  ;;  %v7056_v57 = vadd.f32 %v11108_v19, %v17248_v46  ;;  %11398 = vmatprep.mubr.bf16.mxu0 %v8768_v59  ;;  %v19362_v46 = vld [vmem:[#allocation139_spill] sm:$0xff]  ;;  %v8769_v59 = vpack.c.bf16 %v8751_v17, %v8750_v29 }
 0x8aa   : > { %v11152_v2 = vpop.f32.mrf.mxu1  ;;  %11431 = vmatmul.mubr.msk.bf16.gmra.mxu1 %vm621_vm0, %v9078_v15  ;;  %v6987_v11 = vpop.f32.mrf.mxu0  ;;  %v8753_v37 = vmul.f32 %v8721_v47, %v19362_v46  ;;  %v11922_v15 = vld [vmem:[%s12188_s27 + $0xb0] sm:$0xff]  ;;  %v11925_v23 = vld [vmem:[%s12188_s27 + $0xc8] sm:$0xff] }
 0x8ab   : > { %v17389_v61 = vadd.f32 %v11152_v2, %v7052_v30  ;;  %11434 = vmatprep.mubr.msk.bf16.mxu1 %vm621_vm0, %v9079_v20  ;;  %v7054_v51 = vadd.f32 %v6987_v11, %v17254_v35  ;;  %v11923_v30 = vld [vmem:[%s12188_s27 + $0xb8] sm:$0xff]  ;;  %v9081_v19 = vpack.c.bf16 %v11925_v23, %v11924_v49  ;;  %v8755_v2 = vmul.f32 %v8723_v56, %v16964_v7  ;;  %v11930_v49 = vld [vmem:[%s12188_s27 + $0xf0] sm:$0xff] }
 0x8ac   : > { %v7309_v43 = vpop.f32.mrf.mxu1  ;;  %v11109_v14 = vpop.f32.mrf.mxu0  ;;  %v9080_v10 = vpack.c.bf16 %v11923_v30, %v11922_v15  ;;  %v8722_v35 = vld [vmem:[#allocation3 + $0x112] sm:$0xff]  ;;  %v8770_v52 = vpack.c.bf16 %v8753_v37, %v8752_v39 }
 0x8ad   : > { %v17395_v40 = vadd.f32 %v7309_v43, %v7050_v24  ;;  %v7057_v6 = vadd.f32 %v11109_v14, %v17256_v42  ;;  %v11927_v39 = vld [vmem:[%s12188_s27 + $0xd8] sm:$0xff]  ;;  %v11928_v14 = vld [vmem:[%s12188_s27 + $0xe0] sm:$0xff] }
 0x8ae   : > { %v11153_v26 = vpop.f32.mrf.mxu1  ;;  %v6990_v44 = vpop.f32.mrf.mxu0  ;;  %v9082_v46 = vpack.c.bf16 %v11927_v39, %v11926_v32  ;;  %v11931_v23 = vld [vmem:[%s12188_s27 + $0xf8] sm:$0xff] }
 0x8af   : > { %v17400_v22 = vadd.f32 %v11153_v26, %v7053_v48  ;;  %v7055_v20 = vadd.f32 %v6990_v44, %v17258_v0  ;;  %v8754_v48 = vmul.f32 %v8722_v35, %v16966_v8  ;;  %v11929_v26 = vld [vmem:[%s12188_s27 + $0xe8] sm:$0xff]  ;;  %s577_s27 = sand.u32 1, %s11984_s28  }
 0x8b0   : > { %v7312_v24 = vpop.f32.mrf.mxu1  ;;  %v11112_v45 = vpop.f32.mrf.mxu0  ;;  %11399 = vmatmul.mubr.bf16.gmra.mxu0 %v8769_v59  ;;  %v9083_v15 = vpack.c.bf16 %v11929_v26, %v11928_v14  ;;  %s9486_s29 = sshll.u32 %s577_s27, 8  ;;  %s17891_s0 = scalar_lea.sflag [#allocation5], %s577_s27 }
 0x8b1   : > { %v17405_v42 = vadd.f32 %v7312_v24, %v7051_v63  ;;  %v7060_v47 = vadd.f32 %v11112_v45, %v17263_v58  ;;  %11402 = vmatprep.mubr.bf16.mxu0 %v8770_v52  ;;  %v8771_v17 = vpack.c.bf16 %v8755_v2, %v8754_v48  ;;  %s17710_s3 = scalar_lea.vmem [#allocation4], %s9486_s29 }
 0x8b2   : > { %v11156_v11 = vpop.f32.mrf.mxu1  ;;  %11435 = vmatmul.mubr.msk.bf16.gmra.mxu1 %vm621_vm0, %v9080_v10  ;;  %v7003_v0 = vpop.f32.mrf.mxu0  ;;  %s9411_s1 = sshll.u32 %s17710_s3, 4  ;;  %s17885_s1 = int_to_ptr.vmem [resolvable:$true] %s9411_s1 }
 0x8b3   : > { %v17411_v28 = vadd.f32 %v11156_v11, %v7056_v57  ;;  %11438 = vmatprep.mubr.msk.bf16.mxu1 %vm621_vm0, %v9081_v19  ;;  %v7058_v63 = vadd.f32 %v7003_v0, %v17268_v25  ;;  %s11932_s20 = scalar_lea.vmem %s17885_s1, 4096  ;;  %p11939_p0 = scmp.lt.s32.totalorder %s17885_s1, %s11937_s24 }
 0x8b4   : > { %v7325_v58 = vpop.f32.mrf.mxu1  ;;  %v11113_v29 = vpop.f32.mrf.mxu0  ;;  %p11933_p11 = scmp.ne.s32.totalorder %s17885_s1, %s11932_s20  ;;  %p11940_p1 = scmp.lt.s32.totalorder %s11938_s25, %s11932_s20 }
 0x8b5   : > { %v17415_v13 = vadd.f32 %v7325_v58, %v7054_v51  ;;  %v7061_v7 = vadd.f32 %v11113_v29, %v17270_v1 }
 0x8b6   : > { %v11157_v8 = vpop.f32.mrf.mxu1  ;;  %v7006_v37 = vpop.f32.mrf.mxu0  ;;  %p11934_p12 = pnand %p11933_p11, %p12133_p5  ;;  %p11941_p2 = por %p11940_p1, %p11939_p0 }
 0x8b7   : > { %v17420_v43 = vadd.f32 %v11157_v8, %v7057_v6  ;;  %v7059_v57 = vadd.f32 %v7006_v37, %v17274_v60 }
 0x8b8   : > { %v7328_v25 = vpop.f32.mrf.mxu1  ;;  %v11116_v30 = vpop.f32.mrf.mxu0  ;;  %11403 = vmatmul.mubr.bf16.gmra.mxu0 %v8771_v17  ;;  %p11935_p13 = pneg %p11934_p12 }
 0x8b9   : > { %v17425_v51 = vadd.f32 %v7328_v25, %v7055_v20  ;;  %v7064_v1 = vadd.f32 %v11116_v30, %v17279_v54  ;;  %v9084_v54 = vpack.c.bf16 %v11931_v23, %v11930_v49 }
 0x8ba   : > { %v11160_v10 = vpop.f32.mrf.mxu1  ;;  %11439 = vmatmul.mubr.msk.bf16.gmra.mxu1 %vm621_vm0, %v9082_v46  ;;  %v7019_v44 = vpop.f32.mrf.mxu0  ;;  %p11942_p3 = pnand %p11941_p2, %p11935_p13 }
 0x8bb   : > { %v17429_v6 = vadd.f32 %v11160_v10, %v7060_v47  ;;  %11442 = vmatprep.mubr.msk.bf16.mxu1 %vm621_vm0, %v9083_v15  ;;  %v7062_v60 = vadd.f32 %v7019_v44, %v17285_v16 }
 0x8bc   : > { %v7341_v59 = vpop.f32.mrf.mxu1  ;;  %v11117_v56 = vpop.f32.mrf.mxu0 }
 0x8bd   : > { %v17433_v35 = vadd.f32 %v7341_v59, %v7058_v63  ;;  %v7065_v52 = vadd.f32 %v11117_v56, %v17290_v55 }
 0x8be   : > { %v11161_v20 = vpop.f32.mrf.mxu1  ;;  %v7022_v19 = vpop.f32.mrf.mxu0 }
 0x8bf   : > { %v17438_v24 = vadd.f32 %v11161_v20, %v7061_v7  ;;  %v7063_v45 = vadd.f32 %v7022_v19, %v17295_v27 }
 0x8c0   : > { %v7344_v47 = vpop.f32.mrf.mxu1  ;;  %v11184_v2 = vpop.f32.mrf.mxu0 }
 0x8c1   : > { %v17441_v48 = vadd.f32 %v7344_v47, %v7059_v57  ;;  %v7680_v16 = vadd.f32 %v11184_v2, %v17301_v38 }
 0x8c2   : > { %v11164_v11 = vpop.f32.mrf.mxu1  ;;  %11443 = vmatmul.mubr.msk.bf16.gmra.mxu1 %vm621_vm0, %v9084_v54  ;;  %v7551_v0 = vpop.f32.mrf.mxu0 }
 0x8c3   : > { %v17445_v55 = vadd.f32 %v11164_v11, %v7064_v1  ;;  %v7678_v63 = vadd.f32 %v7551_v0, %v17307_v4 }
 0x8c4   : > { %v7357_v58 = vpop.f32.mrf.mxu1  ;;  %v11185_v29 = vpop.f32.mrf.mxu0 }
 0x8c5   : > { %v17448_v7 = vadd.f32 %v7357_v58, %v7062_v60  ;;  %v7681_v27 = vadd.f32 %v11185_v29, %v17312_v21 }
 0x8c6   : > { %v11165_v17 = vpop.f32.mrf.mxu1  ;;  %v7554_v8 = vpop.f32.mrf.mxu0 }
 0x8c7   : > { %v17451_v32 = vadd.f32 %v11165_v17, %v7065_v52  ;;  %v7679_v38 = vadd.f32 %v7554_v8, %v17317_v36 }
 0x8c8   : > { %v7360_v39 = vpop.f32.mrf.mxu1  ;;  %v11188_v46 = vpop.f32.mrf.mxu0 }
 0x8c9   : > { %v17454_v37 = vadd.f32 %v7360_v39, %v7063_v45  ;;  %v7684_v57 = vadd.f32 %v11188_v46, %v17323_v41 }
 0x8ca   : > { %v11232_v14 = vpop.f32.mrf.mxu1  ;;  %v7567_v4 = vpop.f32.mrf.mxu0 }
 0x8cb   : > { %v17457_v26 = vadd.f32 %v11232_v14, %v7680_v16  ;;  %v7682_v15 = vadd.f32 %v7567_v4, %v17329_v62 }
 0x8cc   : > { %v7889_v25 = vpop.f32.mrf.mxu1  ;;  %v11189_v21 = vpop.f32.mrf.mxu0 }
 0x8cd   : > { %v17460_v30 = vadd.f32 %v7889_v25, %v7678_v63  ;;  %v7685_v1 = vadd.f32 %v11189_v21, %v17334_v33 }
 0x8ce   : > { %v11233_v10 = vpop.f32.mrf.mxu1  ;;  %v7570_v36 = vpop.f32.mrf.mxu0 }
 0x8cf   : > { %v17463_v44 = vadd.f32 %v11233_v10, %v7681_v27  ;;  %v7683_v60 = vadd.f32 %v7570_v36, %v17339_v5 }
 0x8d0   : > { %v7892_v59 = vpop.f32.mrf.mxu1  ;;  %v11192_v41 = vpop.f32.mrf.mxu0 }
 0x8d1   : > { %v17466_v56 = vadd.f32 %v7892_v59, %v7679_v38  ;;  %v7688_v52 = vadd.f32 %v11192_v41, %v17345_v31 }
 0x8d2   : > { %v11236_v20 = vpop.f32.mrf.mxu1  ;;  %v7583_v62 = vpop.f32.mrf.mxu0 }
 0x8d3   : > { %v17469_v49 = vadd.f32 %v11236_v20, %v7684_v57  ;;  %v7686_v23 = vadd.f32 %v7583_v62, %v17351_v53 }
 0x8d4   : > { %v7905_v54 = vpop.f32.mrf.mxu1  ;;  %v11193_v33 = vpop.f32.mrf.mxu0 }
 0x8d5   : > { %v17472_v19 = vadd.f32 %v7905_v54, %v7682_v15  ;;  %v7689_v45 = vadd.f32 %v11193_v33, %v17356_v12 }
 0x8d6   : > { %v11237_v47 = vpop.f32.mrf.mxu1  ;;  %v7586_v5 = vpop.f32.mrf.mxu0 }
 0x8d7   : > { %v17475_v2 = vadd.f32 %v11237_v47, %v7685_v1  ;;  %v7687_v16 = vadd.f32 %v7586_v5, %v17361_v9 }
 0x8d8   : > { %v7908_v11 = vpop.f32.mrf.mxu1  ;;  %v11196_v31 = vpop.f32.mrf.mxu0 }
 0x8d9   : > { %v17478_v0 = vadd.f32 %v7908_v11, %v7683_v60  ;;  %v7692_v63 = vadd.f32 %v11196_v31, %v17367_v34 }
 0x8da   : > { %v11240_v58 = vpop.f32.mrf.mxu1  ;;  %v7599_v53 = vpop.f32.mrf.mxu0 }
 0x8db   : > { %v17481_v29 = vadd.f32 %v11240_v58, %v7688_v52  ;;  %v7690_v27 = vadd.f32 %v7599_v53, %v17373_v50 }
 0x8dc   : > { %v7921_v17 = vpop.f32.mrf.mxu1  ;;  %v11197_v12 = vpop.f32.mrf.mxu0 }
 0x8dd   : > { %v17484_v8 = vadd.f32 %v7921_v17, %v7686_v23  ;;  %v7693_v38 = vadd.f32 %v11197_v12, %v17378_v18 }
 0x8de   : > { %v11241_v39 = vpop.f32.mrf.mxu1  ;;  %v7602_v9 = vpop.f32.mrf.mxu0 }
 0x8df   : > { %v17487_v46 = vadd.f32 %v11241_v39, %v7689_v45  ;;  %v7691_v57 = vadd.f32 %v7602_v9, %v17383_v3 }
 0x8e0   : > { %v7924_v14 = vpop.f32.mrf.mxu1  ;;  %v11200_v34 = vpop.f32.mrf.mxu0 }
 0x8e1   : > { %v17490_v4 = vadd.f32 %v7924_v14, %v7687_v16  ;;  %v7696_v15 = vadd.f32 %v11200_v34, %v17389_v61 }
 0x8e2   : > { %v11244_v25 = vpop.f32.mrf.mxu1  ;;  %v7615_v50 = vpop.f32.mrf.mxu0 }
 0x8e3   : > { %v17493_v21 = vadd.f32 %v11244_v25, %v7692_v63  ;;  %v7694_v1 = vadd.f32 %v7615_v50, %v17395_v40 }
 0x8e4   : > { %v7937_v10 = vpop.f32.mrf.mxu1  ;;  %v11201_v18 = vpop.f32.mrf.mxu0 }
 0x8e5   : > { %v17496_v36 = vadd.f32 %v7937_v10, %v7690_v27  ;;  %v7697_v60 = vadd.f32 %v11201_v18, %v17400_v22 }
 0x8e6   : > { %v11245_v59 = vpop.f32.mrf.mxu1  ;;  %v7618_v3 = vpop.f32.mrf.mxu0 }
 0x8e7   : > { %v17499_v41 = vadd.f32 %v11245_v59, %v7693_v38  ;;  %v7695_v52 = vadd.f32 %v7618_v3, %v17405_v42 }
 0x8e8   : > { %v7940_v20 = vpop.f32.mrf.mxu1  ;;  %v11204_v61 = vpop.f32.mrf.mxu0 }
 0x8e9   : > { %v17502_v62 = vadd.f32 %v7940_v20, %v7691_v57  ;;  %v7700_v23 = vadd.f32 %v11204_v61, %v17411_v28 }
 0x8ea   : > { %v11248_v54 = vpop.f32.mrf.mxu1  ;;  %v7631_v40 = vpop.f32.mrf.mxu0 }
 0x8eb   : > { %v17505_v33 = vadd.f32 %v11248_v54, %v7696_v15  ;;  %v7698_v45 = vadd.f32 %v7631_v40, %v17415_v13 }
 0x8ec   : > { %v7953_v47 = vpop.f32.mrf.mxu1  ;;  %v11205_v22 = vpop.f32.mrf.mxu0 }
 0x8ed   : > { %v17508_v5 = vadd.f32 %v7953_v47, %v7694_v1  ;;  %v7701_v16 = vadd.f32 %v11205_v22, %v17420_v43 }
 0x8ee   : > { %v11249_v11 = vpop.f32.mrf.mxu1  ;;  %v7634_v42 = vpop.f32.mrf.mxu0 }
 0x8ef   : > { %v17511_v31 = vadd.f32 %v11249_v11, %v7697_v60  ;;  %v7699_v63 = vadd.f32 %v7634_v42, %v17425_v51 }
 0x8f0   : > { %v7956_v58 = vpop.f32.mrf.mxu1  ;;  %v11208_v28 = vpop.f32.mrf.mxu0 }
 0x8f1   : > { %19363 = vst [vmem:[#allocation36_spill] sm:$0xff] %v17511_v31  ;;  %v17514_v53 = vadd.f32 %v7956_v58, %v7695_v52  ;;  %v7704_v27 = vadd.f32 %v11208_v28, %v17429_v6 }
 0x8f2   : > { %v11252_v17 = vpop.f32.mrf.mxu1  ;;  %v7647_v13 = vpop.f32.mrf.mxu0 }
 0x8f3   : > { %19364 = vst [vmem:[#allocation69_spill] sm:$0xff] %v17514_v53  ;;  %v17517_v12 = vadd.f32 %v11252_v17, %v7700_v23  ;;  %v7702_v38 = vadd.f32 %v7647_v13, %v17433_v35 }
 0x8f4   : > { %v7969_v39 = vpop.f32.mrf.mxu1  ;;  %v11209_v43 = vpop.f32.mrf.mxu0 }
 0x8f5   : > { %19365 = vst [vmem:[#allocation23_spill] sm:$0xff] %v17517_v12  ;;  %v17520_v9 = vadd.f32 %v7969_v39, %v7698_v45  ;;  %v7705_v57 = vadd.f32 %v11209_v43, %v17438_v24 }
 0x8f6   : > { %v11253_v14 = vpop.f32.mrf.mxu1  ;;  %v7650_v51 = vpop.f32.mrf.mxu0 }
 0x8f7   : > { %19366 = vst [vmem:[#allocation145_spill] sm:$0xff] %v17520_v9  ;;  %v17523_v34 = vadd.f32 %v11253_v14, %v7701_v16  ;;  %v7703_v15 = vadd.f32 %v7650_v51, %v17441_v48 }
 0x8f8   : > { %v7972_v25 = vpop.f32.mrf.mxu1  ;;  %v11212_v6 = vpop.f32.mrf.mxu0 }
 0x8f9   : > { %19367 = vst [vmem:[#allocation109_spill] sm:$0xff] %v17523_v34  ;;  %v17526_v50 = vadd.f32 %v7972_v25, %v7699_v63  ;;  %v7708_v1 = vadd.f32 %v11212_v6, %v17445_v55 }
 0x8fa   : > { %v11256_v10 = vpop.f32.mrf.mxu1  ;;  %v7663_v35 = vpop.f32.mrf.mxu0 }
 0x8fb   : > { %19368 = vst [vmem:[#allocation140_spill] sm:$0xff] %v17526_v50  ;;  %v17529_v18 = vadd.f32 %v11256_v10, %v7704_v27  ;;  %v7706_v60 = vadd.f32 %v7663_v35, %v17448_v7 }
 0x8fc   : > { %v7985_v59 = vpop.f32.mrf.mxu1  ;;  %v11213_v24 = vpop.f32.mrf.mxu0 }
 0x8fd   : > { %19369 = vst [vmem:[#allocation24_spill] sm:$0xff] %v17529_v18  ;;  %v17532_v3 = vadd.f32 %v7985_v59, %v7702_v38  ;;  %v7709_v52 = vadd.f32 %v11213_v24, %v17451_v32 }
 0x8fe   : > { %v11257_v20 = vpop.f32.mrf.mxu1  ;;  %v7666_v48 = vpop.f32.mrf.mxu0 }
 0x8ff   : > { %19370 = vst [vmem:[#allocation112_spill] sm:$0xff] %v17532_v3  ;;  %v17535_v61 = vadd.f32 %v11257_v20, %v7705_v57  ;;  %v7707_v23 = vadd.f32 %v7666_v48, %v17454_v37 }
 0x900   : > { %v7988_v54 = vpop.f32.mrf.mxu1  ;;  %v17538_v55 = vpop.f32.mrf.mxu0 }
 0x901   : > { %19371 = vst [vmem:[#allocation85_spill] sm:$0xff] %v17535_v61  ;;  %v17540_v40 = vadd.f32 %v7988_v54, %v7703_v15 }
 0x902   : > { %v11260_v45 = vpop.f32.mrf.mxu1  ;;  %v17542_v47 = vpop.f32.mrf.mxu0 }
 0x903   : > { %19372 = vst [vmem:[#allocation45_spill] sm:$0xff] %v17540_v40  ;;  %v17544_v7 = vadd.f32 %v11260_v45, %v7708_v1 }
 0x904   : > { %v8001_v22 = vpop.f32.mrf.mxu1  ;;  %v17546_v16 = vpop.f32.mrf.mxu0 }
 0x905   : > { %19373 = vst [vmem:[#allocation56_spill] sm:$0xff] %v17544_v7  ;;  %v17548_v32 = vadd.f32 %v8001_v22, %v7706_v60 }
 0x906   : > { %v11261_v11 = vpop.f32.mrf.mxu1  ;;  %v17550_v42 = vpop.f32.mrf.mxu0 }
 0x907   : > { %19374 = vst [vmem:[#allocation111_spill] sm:$0xff] %v17548_v32  ;;  %v17552_v63 = vadd.f32 %v11261_v11, %v7709_v52 }
 0x908   : > { %v8004_v37 = vpop.f32.mrf.mxu1  ;;  %v17554_v58 = vpop.f32.mrf.mxu0 }
 0x909   : > { %19375 = vst [vmem:[#allocation43_spill] sm:$0xff] %v17552_v63  ;;  %v17556_v28 = vadd.f32 %v8004_v37, %v7707_v23 }
 0x90a   : > { %v11328_v27 = vpop.f32.mrf.mxu1  ;;  %v17558_v17 = vpop.f32.mrf.mxu0 }
 0x90b   : > { %19376 = vst [vmem:[#allocation21_spill] sm:$0xff] %v17556_v28 }
 0x90c   : > { %v17560_v13 = vpop.f32.mrf.mxu1  ;;  %v17562_v38 = vpop.f32.mrf.mxu0 }
 0x90e   : > { %v17564_v39 = vpop.f32.mrf.mxu1  ;;  %v17566_v43 = vpop.f32.mrf.mxu0 }
 0x910   : > { %v17568_v57 = vpop.f32.mrf.mxu1  ;;  %v17570_v14 = vpop.f32.mrf.mxu0 }
 0x912   : > { %v17572_v51 = vpop.f32.mrf.mxu1  ;;  %v17574_v15 = vpop.f32.mrf.mxu0 }
 0x914   : > { %v17576_v25 = vpop.f32.mrf.mxu1  ;;  %v17578_v6 = vpop.f32.mrf.mxu0 }
 0x916   : > { %v17580_v1 = vpop.f32.mrf.mxu1  ;;  %v17582_v10 = vpop.f32.mrf.mxu0 }
 0x918   : > { %v17584_v35 = vpop.f32.mrf.mxu1  ;;  %v17586_v60 = vpop.f32.mrf.mxu0 }
 0x91a   : > { %v17588_v59 = vpop.f32.mrf.mxu1  ;;  %v17590_v24 = vpop.f32.mrf.mxu0 }
 0x91c   : > { %v17592_v52 = vpop.f32.mrf.mxu1  ;;  %v17594_v20 = vpop.f32.mrf.mxu0 }
 0x91e   : > { %v17596_v48 = vpop.f32.mrf.mxu1  ;;  %v17598_v23 = vpop.f32.mrf.mxu0 }
 0x920   : > { %v17600_v54 = vpop.f32.mrf.mxu1  ;;  %v17602_v45 = vpop.f32.mrf.mxu0 }
 0x922   : > { %v17604_v22 = vpop.f32.mrf.mxu1  ;;  %v17606_v11 = vpop.f32.mrf.mxu0 }
 0x923   : > { %19377 = vst [vmem:[#allocation44_spill] sm:$0xff] %v17606_v11 }
 0x924   : > { %v17608_v37 = vpop.f32.mrf.mxu1  ;;  %v17610_v28 = vpop.f32.mrf.mxu0 }
 0x925   : > { %19378 = vst [vmem:[#allocation31_spill] sm:$0xff] %v17610_v28 }
 0x926   : > { %v17612_v63 = vpop.f32.mrf.mxu1  ;;  %v17614_v32 = vpop.f32.mrf.mxu0 }
 0x927   : > { %19379 = vst [vmem:[#allocation41_spill] sm:$0xff] %v17614_v32 }
 0x928   : > { %v17616_v7 = vpop.f32.mrf.mxu1  ;;  %v17618_v40 = vpop.f32.mrf.mxu0 }
 0x929   : > { %19380 = vst [vmem:[#allocation40_spill] sm:$0xff] %v17618_v40 }
 0x92a   : > { %v17620_v61 = vpop.f32.mrf.mxu1  ;;  %v17622_v3 = vpop.f32.mrf.mxu0 }
 0x92b   : > { %19381 = vst [vmem:[#allocation94_spill] sm:$0xff] %v17620_v61  ;;  %19382 = vst [vmem:[#allocation46_spill] sm:$0xff] %v17622_v3 }
 0x92c   : > { %v17624_v18 = vpop.f32.mrf.mxu1  ;;  %v17626_v50 = vpop.f32.mrf.mxu0 }
 0x92d   : > { %19383 = vst [vmem:[#allocation52_spill] sm:$0xff] %v17624_v18  ;;  %19384 = vst [vmem:[#allocation51_spill] sm:$0xff] %v17626_v50 }
 0x92e   : > { %v17628_v34 = vpop.f32.mrf.mxu1  ;;  %v17630_v9 = vpop.f32.mrf.mxu0 }
 0x92f   : > { %19385 = vst [vmem:[#allocation86_spill] sm:$0xff] %v17628_v34  ;;  %19386 = vst [vmem:[#allocation55_spill] sm:$0xff] %v17630_v9 }
 0x930   : > { %v17632_v12 = vpop.f32.mrf.mxu1  ;;  %v17634_v53 = vpop.f32.mrf.mxu0 }
 0x931   : > { %19387 = vst [vmem:[#allocation116_spill] sm:$0xff] %v17632_v12  ;;  %19388 = vst [vmem:[#allocation117_spill] sm:$0xff] %v17634_v53 }
 0x932   : > { %v17636_v32 = vpop.f32.mrf.mxu1  ;;  %v17638_v28 = vpop.f32.mrf.mxu0 }
 0x933   : > { %19389 = vst [vmem:[#allocation118_spill] sm:$0xff] %v17636_v32  ;;  %19390 = vst [vmem:[#allocation87_spill] sm:$0xff] %v17638_v28 }
 0x934   : > { %v17640_v40 = vpop.f32.mrf.mxu1  ;;  %v17642_v31 = vpop.f32.mrf.mxu0 }
 0x935   : > { %19391 = vst [vmem:[#allocation58_spill] sm:$0xff] %v17640_v40  ;;  %19392 = vst [vmem:[#allocation90_spill] sm:$0xff] %v17642_v31 }
 0x936   : > { %v17644_v3 = vpop.f32.mrf.mxu1  ;;  %v17646_v18 = vpop.f32.mrf.mxu0 }
 0x937   : > { %19393 = vst [vmem:[#allocation126_spill] sm:$0xff] %v17644_v3  ;;  %19394 = vst [vmem:[#allocation19_spill] sm:$0xff] %v17646_v18 }
 0x938   : > { %v17648_v50 = vpop.f32.mrf.mxu1  ;;  %v17650_v34 = vpop.f32.mrf.mxu0 }
 0x939   : > { %19395 = vst [vmem:[#allocation68_spill] sm:$0xff] %v17648_v50  ;;  %19396 = vst [vmem:[#allocation163_spill] sm:$0xff] %v17650_v34  ;;  %v8356_v34 = vadd.f32 %v17538_v55, %v17457_v26  ;;  %v17685_v26 = vld [vmem:[%s17944_s13] ss:$0 sm:$0xff]  ;;  %v8355_v55 = vadd.f32 %v17550_v42, %v17466_v56  ;;  %v8358_v56 = vadd.f32 %v17558_v17, %v17472_v19 }
 0x93a   : > { %v17652_v9 = vpop.f32.mrf.mxu1  ;;  %v17654_v53 = vpop.f32.mrf.mxu0 }
 0x93b   : > { %19397 = vst [vmem:[#allocation162_spill] sm:$0xff] %v17652_v9  ;;  %19398 = vst [vmem:[#allocation79_spill] sm:$0xff] %v17654_v53 }
 0x93c   : > { %v17656_v32 = vpop.f32.mrf.mxu1  ;;  %v17658_v28 = vpop.f32.mrf.mxu0 }
 0x93d   : > { %19399 = vst [vmem:[#allocation50_spill] sm:$0xff] %v17656_v32  ;;  %19400 = vst [vmem:[#allocation152_spill] sm:$0xff] %v17658_v28  ;;  %v8354_v28 = vadd.f32 %v17542_v47, %v17460_v30  ;;  %v8662_v32 = vadd.f32 %v11328_v27, %v8356_v34  ;;  %v17690_v30 = vld [vmem:[%s17946_s15] ss:$0 sm:$0xff] }
 0x93e   : > { %v17660_v40 = vpop.f32.mrf.mxu1  ;;  %v17662_v31 = vpop.f32.mrf.mxu0 }
 0x93f   : > { %19401 = vst [vmem:[#allocation49_spill] sm:$0xff] %v17660_v40  ;;  %19402 = vst [vmem:[#allocation17_spill] sm:$0xff] %v17662_v31 }
 0x940   : > { %v17664_v3 = vpop.f32.mrf.mxu1  ;;  %v11376_v18 = vpop.f32.mrf.mxu0 }
 0x941   : > { %19403 = vst [vmem:[#allocation89_spill] sm:$0xff] %v17664_v3  ;;  %v8357_v3 = vadd.f32 %v17546_v16, %v17463_v44  ;;  %v9000_v61 = vadd.f32 %v11376_v18, %v8662_v32  ;;  %v8360_v18 = vadd.f32 %v17554_v58, %v17469_v49 }
 0x942   : > { %v17666_v12 = vpop.f32.mrf.mxu1  ;;  %v8871_v50 = vpop.f32.mrf.mxu0 }
 0x943   : > { %19404 = vst [vmem:[#allocation104_spill] sm:$0xff] %v17666_v12  ;;  %v8660_v12 = vadd.f32 %v17560_v13, %v8354_v28  ;;  %v8663_v44 = vadd.f32 %v17564_v39, %v8357_v3  ;;  %v8661_v28 = vadd.f32 %v17568_v57, %v8355_v55  ;;  %v9039_v27 = vadd.f32 %v17685_v26, %v9000_v61 }
 0x944   : > { %v17670_v9 = vpop.f32.mrf.mxu1  ;;  %v11377_v53 = vpop.f32.mrf.mxu0  ;;  %v8666_v3 = vadd.f32 %v17572_v51, %v8360_v18  ;;  %v8361_v57 = vadd.f32 %v17562_v38, %v17475_v2  ;;  %v8664_v61 = vadd.f32 %v17576_v25, %v8358_v56 }
 0x945   : > { %v8998_v47 = vadd.f32 %v8871_v50, %v8660_v12 }
 0x946   : > { %v17674_v40 = vpop.f32.mrf.mxu1  ;;  %v8874_v31 = vpop.f32.mrf.mxu0  ;;  %v8667_v2 = vadd.f32 %v17580_v1, %v8361_v57 }
 0x947   : > { %v9037_v42 = vadd.f32 %v17685_v26, %v8998_v47  ;;  %v8999_v58 = vadd.f32 %v8874_v31, %v8661_v28  ;;  %v8359_v31 = vadd.f32 %v17566_v43, %v17478_v0  ;;  %v8364_v28 = vadd.f32 %v17570_v14, %v17481_v29 }
 0x948   : > { %v17680_v11 = vpop.f32.mrf.mxu1  ;;  %v11380_v34 = vpop.f32.mrf.mxu0 }
 0x949   : > { %19405 = vst [vmem:[#allocation96_spill] sm:$0xff] %v17680_v11  ;;  %v9001_v11 = vadd.f32 %v11377_v53, %v8663_v44  ;;  %v9004_v44 = vadd.f32 %v11380_v34, %v8666_v3  ;;  %v9038_v47 = vadd.f32 %v17685_v26, %v8999_v58  ;;  %v8665_v34 = vadd.f32 %v17584_v35, %v8359_v31 }
 0x94a   : > { %v11416_v16 = vpop.f32.mrf.mxu1  ;;  %v8887_v32 = vpop.f32.mrf.mxu0  ;;  %v8362_v3 = vadd.f32 %v17574_v15, %v17484_v8 }
 0x94b   : > { %v9215_v13 = vadd.f32 %v11416_v16, %v17690_v30  ;;  %v9040_v19 = vadd.f32 %v17685_v26, %v9001_v11  ;;  %v9002_v11 = vadd.f32 %v8887_v32, %v8664_v61  ;;  %v9043_v0 = vadd.f32 %v17685_v26, %v9004_v44 }
 0x94c   : > { %v9206_v12 = vpop.f32.mrf.mxu1  ;;  %v11381_v50 = vpop.f32.mrf.mxu0  ;;  %v8670_v32 = vadd.f32 %v17588_v59, %v8364_v28  ;;  %v8368_v44 = vadd.f32 %v17586_v60, %v17493_v21 }
 0x94d   : > { %v9335_v39 = vadd.f32 %v9215_v13, %v9039_v27  ;;  %v9207_v49 = vadd.f32 %v17690_v30, %v9206_v12  ;;  %v9005_v56 = vadd.f32 %v11381_v50, %v8667_v2  ;;  %v9041_v29 = vadd.f32 %v17685_v26, %v9002_v11 }
 0x94e   : > { %v11417_v55 = vpop.f32.mrf.mxu1  ;;  %v8890_v53 = vpop.f32.mrf.mxu0  ;;  %v8668_v50 = vadd.f32 %v17592_v52, %v8362_v3 }
 0x94f   : > { %9367 = vst [vmem:[%s17710_s3 + $0x10] sm:$0xff] %v9335_v39  ;;  %v9333_v17 = vadd.f32 %v9207_v49, %v9037_v42  ;;  %v9218_v51 = vadd.f32 %v11417_v55, %v17690_v30  ;;  %v9003_v39 = vadd.f32 %v8890_v53, %v8665_v34  ;;  %v8365_v49 = vadd.f32 %v17578_v6, %v17487_v46 }
 0x950   : > { %v9209_v38 = vpop.f32.mrf.mxu1  ;;  %v11384_v25 = vpop.f32.mrf.mxu0  ;;  %v9044_v8 = vadd.f32 %v17685_v26, %v9005_v56  ;;  %v8363_v55 = vadd.f32 %v17582_v10, %v17490_v4  ;;  %v8369_v34 = vadd.f32 %v17594_v20, %v17499_v41 }
 0x951   : > { %9365 = vst [vmem:[%s17710_s3] sm:$0xff] %v9333_v17  ;;  %v9336_v18 = vadd.f32 %v9218_v51, %v9040_v19  ;;  %v9210_v16 = vadd.f32 %v17690_v30, %v9209_v38  ;;  %v9008_v61 = vadd.f32 %v11384_v25, %v8670_v32  ;;  %v8671_v53 = vadd.f32 %v17596_v48, %v8365_v49  ;;  %v19406_v49 = vld [vmem:[#allocation44_spill] sm:$0xff] }
 0x952   : > { %v11420_v27 = vpop.f32.mrf.mxu1  ;;  %v8903_v13 = vpop.f32.mrf.mxu0  ;;  %v9042_v46 = vadd.f32 %v17685_v26, %v9003_v39  ;;  %v8669_v31 = vadd.f32 %v17600_v54, %v8363_v55  ;;  %v8675_v56 = vadd.f32 %v17612_v63, %v8369_v34  ;;  %v19409_v55 = vld [vmem:[#allocation31_spill] sm:$0xff] }
 0x953   : > { %9368 = vst [vmem:[%s17710_s3 + $0x18] sm:$0xff] %v9336_v18  ;;  %v9334_v43 = vadd.f32 %v9210_v16, %v9038_v47  ;;  %v9231_v1 = vadd.f32 %v11420_v27, %v17690_v30  ;;  %v9006_v51 = vadd.f32 %v8903_v13, %v8668_v50  ;;  %v9047_v4 = vadd.f32 %v17685_v26, %v9008_v61  ;;  %v19408_v61 = vld [vmem:[#allocation36_spill] sm:$0xff] }
 0x954   : > { %v9222_v12 = vpop.f32.mrf.mxu1  ;;  %v11385_v42 = vpop.f32.mrf.mxu0  ;;  %v8366_v47 = vadd.f32 %v17590_v24, %v17496_v36  ;;  %v8674_v18 = vadd.f32 %v17604_v22, %v8368_v44  ;;  %v8370_v50 = vadd.f32 %v19406_v49, %v17508_v5 }
 0x955   : > { %9366 = vst [vmem:[%s17710_s3 + $0x8] sm:$0xff] %v9334_v43  ;;  %v9339_v14 = vadd.f32 %v9231_v1, %v9043_v0  ;;  %v9223_v35 = vadd.f32 %v17690_v30, %v9222_v12  ;;  %v9009_v25 = vadd.f32 %v11385_v42, %v8671_v53  ;;  %v9045_v21 = vadd.f32 %v17685_v26, %v9006_v51 }
 0x956   : > { %v11421_v58 = vpop.f32.mrf.mxu1  ;;  %v8906_v57 = vpop.f32.mrf.mxu0  ;;  %v8672_v27 = vadd.f32 %v17608_v37, %v8366_v47  ;;  %v8367_v1 = vadd.f32 %v17598_v23, %v17502_v62  ;;  %v8372_v42 = vadd.f32 %v17602_v45, %v17505_v33  ;;  %v8373_v53 = vadd.f32 %v19409_v55, %v19408_v61 }
 0x957   : > { %9371 = vst [vmem:[%s17710_s3 + $0x30] sm:$0xff] %v9339_v14  ;;  %v9337_v15 = vadd.f32 %v9223_v35, %v9041_v29  ;;  %v9234_v59 = vadd.f32 %v11421_v58, %v17690_v30  ;;  %v9007_v28 = vadd.f32 %v8906_v57, %v8669_v31  ;;  %v9048_v36 = vadd.f32 %v17685_v26, %v9009_v25  ;;  %v19407_v58 = vld [vmem:[#allocation94_spill] sm:$0xff]  ;;  %v19411_v31 = vld [vmem:[#allocation69_spill] sm:$0xff] }
 0x958   : > { %v9225_v19 = vpop.f32.mrf.mxu1  ;;  %v11388_v17 = vpop.f32.mrf.mxu0  ;;  %v8673_v29 = vadd.f32 %v17616_v7, %v8367_v1  ;;  %v8678_v57 = vadd.f32 %v19407_v58, %v8372_v42  ;;  %v19418_v1 = vld [vmem:[#allocation46_spill] sm:$0xff] }
 0x959   : > { %9369 = vst [vmem:[%s17710_s3 + $0x20] sm:$0xff] %v9337_v15  ;;  %v9340_v6 = vadd.f32 %v9234_v59, %v9044_v8  ;;  %v9226_v52 = vadd.f32 %v17690_v30, %v9225_v19  ;;  %v9012_v43 = vadd.f32 %v11388_v17, %v8674_v18  ;;  %v9046_v41 = vadd.f32 %v17685_v26, %v9007_v28  ;;  %v19410_v19 = vld [vmem:[#allocation52_spill] sm:$0xff] }
 0x95a   : > { %v11424_v2 = vpop.f32.mrf.mxu1  ;;  %v8919_v38 = vpop.f32.mrf.mxu0  ;;  %v8676_v17 = vadd.f32 %v19410_v19, %v8370_v50  ;;  %v19416_v28 = vld [vmem:[#allocation116_spill] sm:$0xff] }
 0x95b   : > { %9372 = vst [vmem:[%s17710_s3 + $0x38] sm:$0xff] %v9340_v6  ;;  %v9338_v10 = vadd.f32 %v9226_v52, %v9042_v46  ;;  %v9247_v48 = vadd.f32 %v11424_v2, %v17690_v30  ;;  %v9010_v12 = vadd.f32 %v8919_v38, %v8672_v27  ;;  %v9051_v62 = vadd.f32 %v17685_v26, %v9012_v43  ;;  %v19412_v2 = vld [vmem:[#allocation41_spill] sm:$0xff] }
 0x95c   : > { %v9238_v16 = vpop.f32.mrf.mxu1  ;;  %v11389_v11 = vpop.f32.mrf.mxu0  ;;  %v8371_v38 = vadd.f32 %v19412_v2, %v19411_v31  ;;  %v19417_v43 = vld [vmem:[#allocation145_spill] sm:$0xff] }
 0x95d   : > { %9370 = vst [vmem:[%s17710_s3 + $0x28] sm:$0xff] %v9338_v10  ;;  %v9343_v60 = vadd.f32 %v9247_v48, %v9047_v4  ;;  %v9239_v54 = vadd.f32 %v17690_v30, %v9238_v16  ;;  %v9013_v39 = vadd.f32 %v11389_v11, %v8675_v56  ;;  %v9049_v33 = vadd.f32 %v17685_v26, %v9010_v12  ;;  %v19413_v4 = vld [vmem:[#allocation86_spill] sm:$0xff] }
 0x95e   : > { %v11425_v13 = vpop.f32.mrf.mxu1  ;;  %v8922_v0 = vpop.f32.mrf.mxu0  ;;  %v8679_v10 = vadd.f32 %v19413_v4, %v8373_v53  ;;  %v8677_v34 = vadd.f32 %v19416_v28, %v8371_v38  ;;  %v8374_v56 = vadd.f32 %v19418_v1, %v19417_v43 }
 0x95f   : > { %9375 = vst [vmem:[%s17710_s3 + $0x50] sm:$0xff] %v9343_v60  ;;  %v9341_v24 = vadd.f32 %v9239_v54, %v9045_v21  ;;  %v9250_v22 = vadd.f32 %v11425_v13, %v17690_v30  ;;  %v9011_v59 = vadd.f32 %v8922_v0, %v8673_v29  ;;  %v9052_v5 = vadd.f32 %v17685_v26, %v9013_v39  ;;  %v19414_v21 = vld [vmem:[#allocation23_spill] sm:$0xff]  ;;  %v19415_v60 = vld [vmem:[#allocation40_spill] sm:$0xff] }
 0x960   : > { %v9241_v3 = vpop.f32.mrf.mxu1  ;;  %v11392_v32 = vpop.f32.mrf.mxu0  ;;  %v8376_v54 = vadd.f32 %v19415_v60, %v19414_v21 }
 0x961   : > { %9373 = vst [vmem:[%s17710_s3 + $0x40] sm:$0xff] %v9341_v24  ;;  %v9344_v20 = vadd.f32 %v9250_v22, %v9048_v36  ;;  %v9242_v37 = vadd.f32 %v17690_v30, %v9241_v3  ;;  %v9016_v44 = vadd.f32 %v11392_v32, %v8678_v57  ;;  %v9050_v47 = vadd.f32 %v17685_v26, %v9011_v59  ;;  %v19419_v3 = vld [vmem:[#allocation118_spill] sm:$0xff] }
 0x962   : > { %v11428_v14 = vpop.f32.mrf.mxu1  ;;  %v8935_v35 = vpop.f32.mrf.mxu0  ;;  %v8682_v32 = vadd.f32 %v19419_v3, %v8376_v54 }
 0x963   : > { %9376 = vst [vmem:[%s17710_s3 + $0x58] sm:$0xff] %v9344_v20  ;;  %v9342_v63 = vadd.f32 %v9242_v37, %v9046_v41  ;;  %v9263_v23 = vadd.f32 %v11428_v14, %v17690_v30  ;;  %v9014_v11 = vadd.f32 %v8935_v35, %v8676_v17  ;;  %v9055_v0 = vadd.f32 %v17685_v26, %v9016_v44  ;;  %v19420_v14 = vld [vmem:[#allocation109_spill] sm:$0xff]  ;;  %v19421_v35 = vld [vmem:[#allocation51_spill] sm:$0xff] }
 0x964   : > { %v9254_v8 = vpop.f32.mrf.mxu1  ;;  %v11393_v15 = vpop.f32.mrf.mxu0 }
 0x965   : > { %9374 = vst [vmem:[%s17710_s3 + $0x48] sm:$0xff] %v9342_v63  ;;  %v9347_v7 = vadd.f32 %v9263_v23, %v9051_v62  ;;  %v9255_v45 = vadd.f32 %v17690_v30, %v9254_v8  ;;  %v9017_v22 = vadd.f32 %v11393_v15, %v8679_v10  ;;  %v9053_v37 = vadd.f32 %v17685_v26, %v9014_v11  ;;  %v19422_v63 = vld [vmem:[#allocation58_spill] sm:$0xff]  ;;  %v19423_v15 = vld [vmem:[#allocation140_spill] sm:$0xff] }
 0x966   : > { %v11429_v46 = vpop.f32.mrf.mxu1  ;;  %v8938_v6 = vpop.f32.mrf.mxu0  ;;  %v8377_v62 = vadd.f32 %v19421_v35, %v19420_v14  ;;  %v8680_v23 = vadd.f32 %v19422_v63, %v8374_v56 }
 0x967   : > { %9379 = vst [vmem:[%s17710_s3 + $0x70] sm:$0xff] %v9347_v7  ;;  %v9345_v52 = vadd.f32 %v9255_v45, %v9049_v33  ;;  %v9266_v51 = vadd.f32 %v11429_v46, %v17690_v30  ;;  %v9015_v29 = vadd.f32 %v8938_v6, %v8677_v34  ;;  %v9056_v50 = vadd.f32 %v17685_v26, %v9017_v22  ;;  %v19424_v33 = vld [vmem:[#allocation55_spill] sm:$0xff]  ;;  %v19425_v45 = vld [vmem:[#allocation126_spill] sm:$0xff]  ;;  %v19426_v6 = vld [vmem:[#allocation24_spill] sm:$0xff] }
 0x968   : > { %v9257_v48 = vpop.f32.mrf.mxu1  ;;  %v11396_v25 = vpop.f32.mrf.mxu0  ;;  %v8375_v7 = vadd.f32 %v19424_v33, %v19423_v15  ;;  %v8683_v59 = vadd.f32 %v19425_v45, %v8377_v62 }
 0x969   : > { %9377 = vst [vmem:[%s17710_s3 + $0x60] sm:$0xff] %v9345_v52  ;;  %v9348_v18 = vadd.f32 %v9266_v51, %v9052_v5  ;;  %v9258_v16 = vadd.f32 %v17690_v30, %v9257_v48  ;;  %v9020_v8 = vadd.f32 %v11396_v25, %v8682_v32  ;;  %v9054_v53 = vadd.f32 %v17685_v26, %v9015_v29  ;;  %v19427_v5 = vld [vmem:[#allocation117_spill] sm:$0xff]  ;;  %v19428_v51 = vld [vmem:[#allocation68_spill] sm:$0xff] }
 0x96a   : > { %v11432_v27 = vpop.f32.mrf.mxu1  ;;  %v8951_v13 = vpop.f32.mrf.mxu0  ;;  %v8380_v52 = vadd.f32 %v19427_v5, %v19426_v6  ;;  %v8681_v44 = vadd.f32 %v19428_v51, %v8375_v7  ;;  %v19429_v25 = vld [vmem:[#allocation112_spill] sm:$0xff] }
 0x96b   : > { %9380 = vst [vmem:[%s17710_s3 + $0x78] sm:$0xff] %v9348_v18  ;;  %v9346_v36 = vadd.f32 %v9258_v16, %v9050_v47  ;;  %v9279_v24 = vadd.f32 %v11432_v27, %v17690_v30  ;;  %v9018_v46 = vadd.f32 %v8951_v13, %v8680_v23  ;;  %v9059_v38 = vadd.f32 %v17685_v26, %v9020_v8  ;;  %v19430_v47 = vld [vmem:[#allocation87_spill] sm:$0xff]  ;;  %v19431_v16 = vld [vmem:[#allocation162_spill] sm:$0xff]  ;;  %v19432_v13 = vld [vmem:[#allocation85_spill] sm:$0xff] }
 0x96c   : > { %v9270_v41 = vpop.f32.mrf.mxu1  ;;  %v11397_v20 = vpop.f32.mrf.mxu0  ;;  %v8378_v18 = vadd.f32 %v19430_v47, %v19429_v25  ;;  %v8686_v11 = vadd.f32 %v19431_v16, %v8380_v52 }
 0x96d   : > { %9378 = vst [vmem:[%s17710_s3 + $0x68] sm:$0xff] %v9346_v36  ;;  %v9351_v12 = vadd.f32 %v9279_v24, %v9055_v0  ;;  %v9271_v42 = vadd.f32 %v17690_v30, %v9270_v41  ;;  %v9021_v48 = vadd.f32 %v11397_v20, %v8683_v59  ;;  %v9057_v54 = vadd.f32 %v17685_v26, %v9018_v46  ;;  %v19433_v0 = vld [vmem:[#allocation90_spill] sm:$0xff]  ;;  %v19435_v20 = vld [vmem:[#allocation45_spill] sm:$0xff] }
 0x96e   : > { %v11433_v39 = vpop.f32.mrf.mxu1  ;;  %v8954_v49 = vpop.f32.mrf.mxu0  ;;  %v8381_v36 = vadd.f32 %v19433_v0, %v19432_v13  ;;  %v19434_v24 = vld [vmem:[#allocation50_spill] sm:$0xff]  ;;  %v19448_v0 = vld [vmem:[#allocation96_spill] sm:$0xff] }
 0x96f   : > { %9383 = vst [vmem:[%s17710_s3 + $0x90] sm:$0xff] %v9351_v12  ;;  %v9349_v58 = vadd.f32 %v9271_v42, %v9053_v37  ;;  %v9282_v57 = vadd.f32 %v11433_v39, %v17690_v30  ;;  %v9019_v27 = vadd.f32 %v8954_v49, %v8681_v44  ;;  %v8684_v22 = vadd.f32 %v19434_v24, %v8378_v18  ;;  %v19436_v37 = vld [vmem:[#allocation19_spill] sm:$0xff]  ;;  %v19437_v42 = vld [vmem:[#allocation49_spill] sm:$0xff]  ;;  %v19438_v49 = vld [vmem:[#allocation56_spill] sm:$0xff] }
 0x970   : > { %v9273_v61 = vpop.f32.mrf.mxu1  ;;  %v11400_v55 = vpop.f32.mrf.mxu0  ;;  %v9060_v56 = vadd.f32 %v17685_v26, %v9021_v48  ;;  %v8379_v12 = vadd.f32 %v19436_v37, %v19435_v20  ;;  %v8687_v29 = vadd.f32 %v19437_v42, %v8381_v36 }
 0x971   : > { %9381 = vst [vmem:[%s17710_s3 + $0x80] sm:$0xff] %v9349_v58  ;;  %v9352_v19 = vadd.f32 %v9282_v57, %v9056_v50  ;;  %v9274_v17 = vadd.f32 %v17690_v30, %v9273_v61  ;;  %v9024_v41 = vadd.f32 %v11400_v55, %v8686_v11  ;;  %v9058_v62 = vadd.f32 %v17685_v26, %v9019_v27  ;;  %v19439_v50 = vld [vmem:[#allocation163_spill] sm:$0xff]  ;;  %v19440_v57 = vld [vmem:[#allocation89_spill] sm:$0xff] }
 0x972   : > { %v11436_v31 = vpop.f32.mrf.mxu1  ;;  %v8967_v2 = vpop.f32.mrf.mxu0  ;;  %v8384_v58 = vadd.f32 %v19439_v50, %v19438_v49  ;;  %v8685_v8 = vadd.f32 %v19440_v57, %v8379_v12  ;;  %v19441_v55 = vld [vmem:[#allocation111_spill] sm:$0xff]  ;;  %v19446_v11 = vld [vmem:[#allocation21_spill] sm:$0xff] }
 0x973   : > { %9384 = vst [vmem:[%s17710_s3 + $0x98] sm:$0xff] %v9352_v19  ;;  %v9350_v4 = vadd.f32 %v9274_v17, %v9054_v53  ;;  %v9295_v10 = vadd.f32 %v11436_v31, %v17690_v30  ;;  %v9022_v39 = vadd.f32 %v8967_v2, %v8684_v22  ;;  %v9063_v7 = vadd.f32 %v17685_v26, %v9024_v41  ;;  %v19442_v53 = vld [vmem:[#allocation79_spill] sm:$0xff]  ;;  %v19443_v17 = vld [vmem:[#allocation104_spill] sm:$0xff] }
 0x974   : > { %v9286_v21 = vpop.f32.mrf.mxu1  ;;  %v11401_v60 = vpop.f32.mrf.mxu0  ;;  %v8382_v19 = vadd.f32 %v19442_v53, %v19441_v55  ;;  %v8690_v46 = vadd.f32 %v19443_v17, %v8384_v58  ;;  %v19444_v31 = vld [vmem:[#allocation43_spill] sm:$0xff]  ;;  %v19445_v2 = vld [vmem:[#allocation152_spill] sm:$0xff] }
 0x975   : > { %9382 = vst [vmem:[%s17710_s3 + $0x88] sm:$0xff] %v9350_v4  ;;  %v9355_v28 = vadd.f32 %v9295_v10, %v9059_v38  ;;  %v9287_v34 = vadd.f32 %v17690_v30, %v9286_v21  ;;  %v9025_v61 = vadd.f32 %v11401_v60, %v8687_v29  ;;  %v9061_v5 = vadd.f32 %v17685_v26, %v9022_v39  ;;  %v19447_v21 = vld [vmem:[#allocation17_spill] sm:$0xff] }
 0x976   : > { %v11437_v43 = vpop.f32.mrf.mxu1  ;;  %v8970_v1 = vpop.f32.mrf.mxu0  ;;  %v8385_v38 = vadd.f32 %v19445_v2, %v19444_v31  ;;  %v8688_v4 = vadd.f32 %v17670_v9, %v8382_v19  ;;  %v8383_v60 = vadd.f32 %v19447_v21, %v19446_v11 }
 0x977   : > { %9387 = vst [vmem:[%s17710_s3 + $0xb0] sm:$0xff] %v9355_v28  ;;  %v9353_v3 = vadd.f32 %v9287_v34, %v9057_v54  ;;  %v9298_v32 = vadd.f32 %v11437_v43, %v17690_v30  ;;  %v9023_v44 = vadd.f32 %v8970_v1, %v8685_v8  ;;  %v9064_v25 = vadd.f32 %v17685_v26, %v9025_v61 }
 0x978   : > { %v9289_v14 = vpop.f32.mrf.mxu1  ;;  %v11404_v35 = vpop.f32.mrf.mxu0  ;;  %v8691_v54 = vadd.f32 %v17674_v40, %v8385_v38  ;;  %v8689_v36 = vadd.f32 %v19448_v0, %v8383_v60 }
 0x979   : > { %9385 = vst [vmem:[%s17710_s3 + $0xa0] sm:$0xff] %v9353_v3  ;;  %v9356_v63 = vadd.f32 %v9298_v32, %v9060_v56  ;;  %v9290_v23 = vadd.f32 %v17690_v30, %v9289_v14  ;;  %v9028_v16 = vadd.f32 %v11404_v35, %v8690_v46  ;;  %v9062_v9 = vadd.f32 %v17685_v26, %v9023_v44 }
 0x97a   : > { %v11440_v15 = vpop.f32.mrf.mxu1  ;;  %v8983_v33 = vpop.f32.mrf.mxu0 }
 0x97b   : > { %9388 = vst [vmem:[%s17710_s3 + $0xb8] sm:$0xff] %v9356_v63  ;;  %v9354_v45 = vadd.f32 %v9290_v23, %v9058_v62  ;;  %v9311_v59 = vadd.f32 %v11440_v15, %v17690_v30  ;;  %v9026_v13 = vadd.f32 %v8983_v33, %v8688_v4  ;;  %v9067_v43 = vadd.f32 %v17685_v26, %v9028_v16 }
 0x97c   : > { %v9302_v6 = vpop.f32.mrf.mxu1  ;;  %v11405_v48 = vpop.f32.mrf.mxu0 }
 0x97d   : > { %9386 = vst [vmem:[%s17710_s3 + $0xa8] sm:$0xff] %v9354_v45  ;;  %v9359_v52 = vadd.f32 %v9311_v59, %v9063_v7  ;;  %v9303_v51 = vadd.f32 %v17690_v30, %v9302_v6  ;;  %v9029_v56 = vadd.f32 %v11405_v48, %v8691_v54  ;;  %v9065_v32 = vadd.f32 %v17685_v26, %v9026_v13 }
 0x97e   : > { %v11441_v10 = vpop.f32.mrf.mxu1  ;;  %v8986_v22 = vpop.f32.mrf.mxu0 }
 0x97f   : > { %9391 = vst [vmem:[%s17710_s3 + $0xd0] sm:$0xff] %v9359_v52  ;;  %v9357_v47 = vadd.f32 %v9303_v51, %v9061_v5  ;;  %v9314_v18 = vadd.f32 %v11441_v10, %v17690_v30  ;;  %v9027_v37 = vadd.f32 %v8986_v22, %v8689_v36  ;;  %v9068_v42 = vadd.f32 %v17685_v26, %v9029_v56 }
 0x980   : > { %v9305_v28 = vpop.f32.mrf.mxu1 }
 0x981   : > { %9389 = vst [vmem:[%s17710_s3 + $0xc0] sm:$0xff] %v9357_v47  ;;  %v9360_v34 = vadd.f32 %v9314_v18, %v9064_v25  ;;  %v9306_v27 = vadd.f32 %v17690_v30, %v9305_v28  ;;  %v9066_v62 = vadd.f32 %v17685_v26, %v9027_v37 }
 0x982   : > { %v11444_v24 = vpop.f32.mrf.mxu1 }
 0x983   : > { %9392 = vst [vmem:[%s17710_s3 + $0xd8] sm:$0xff] %v9360_v34  ;;  %v9358_v40 = vadd.f32 %v9306_v27, %v9062_v9  ;;  %v9327_v1 = vadd.f32 %v11444_v24, %v17690_v30 }
 0x984   : > { %v9318_v3 = vpop.f32.mrf.mxu1 }
 0x985   : > { %9390 = vst [vmem:[%s17710_s3 + $0xc8] sm:$0xff] %v9358_v40  ;;  %v9363_v41 = vadd.f32 %v9327_v1, %v9067_v43  ;;  %v9319_v20 = vadd.f32 %v17690_v30, %v9318_v3 }
 0x986   : > { %v11445_v12 = vpop.f32.mrf.mxu1 }
 0x987   : > { %9395 = vst [vmem:[%s17710_s3 + $0xf0] sm:$0xff] %v9363_v41  ;;  %v9361_v29 = vadd.f32 %v9319_v20, %v9065_v32  ;;  %v9330_v14 = vadd.f32 %v11445_v12, %v17690_v30 }
 0x988   : > { %v9321_v35 = vpop.f32.mrf.mxu1 }
 0x989   : > { %9393 = vst [vmem:[%s17710_s3 + $0xe0] sm:$0xff] %v9361_v29  ;;  %v9364_v63 = vadd.f32 %v9330_v14, %v9068_v42  ;;  %v9322_v23 = vadd.f32 %v17690_v30, %v9321_v35 }
 0x98b   : > { %9396 = vst [vmem:[%s17710_s3 + $0xf8] sm:$0xff] %v9364_v63  ;;  %v9362_v39 = vadd.f32 %v9322_v23, %v9066_v62 }
 0x98d   : > { %9394 = vst [vmem:[%s17710_s3 + $0xe8] sm:$0xff] %v9362_v39 }
 0x98e   : > { %11945 = shalt.err (!%p11942_p3)
}
 0x98f   : > { %s11946_s27 = scalar_lea.hbm %s17883_s19, 4096  ;;  %s11950_s26 = scalar_lea.hbm %s17949_s18, 8192 }
 0x990   : > { %p11947_p4 = scmp.ne.s32.totalorder %s17883_s19, %s11946_s27  ;;  %p11951_p9 = scmp.lt.s32.totalorder %s17883_s19, %s17949_s18 }
 0x991   : > { %p11952_p10 = scmp.lt.s32.totalorder %s11950_s26, %s11946_s27 }
 0x992   : > { %p11948_p7 = pnand %p11947_p4, %p12133_p5 }
 0x993   : > { %p11953_p11 = por %p11952_p10, %p11951_p9 }
 0x994   : > { %p11949_p8 = pneg %p11948_p7 }
 0x996   : > { %p11954_p12 = pnand %p11953_p11, %p11949_p8 }
 0x998   : > { %11957 = shalt.err (!%p11954_p12)
}
 0x999   : > { %s11998_s20 = smov 128   ;;  %s11999_s21 = smov 8  }
 0x99a   : > { %11446 = dma.vmem_to_hbm [thread:$0]  (%p12133_p5), %s17885_s1, 4096, %s17883_s19, %s17891_s0, %s11998_s20, %s11998_s20, %s11999_s21  }
 0x99b PF: > { %s19449_s24 = sld [smem:[#allocation7_spill]]  ;;  %p11452_p13 = scmp.ge.s32.totalorder %s11992_s30, 2 }
 0x99d   : > { %p11449_p0 = pnand %p11452_p13, %p12137_p6 }
 0x99f   : > { %p11450_p1 = pneg %p11449_p0 }
 0x9a1   : > { %s9426_s29 = sand.u32 1, %s19449_s24  }
 0x9a2   : > { %s9427_s27 = scalar_lea.sflag [#allocation5], %s9426_s29 }
 0x9a3   : > { %11975 = dma.done.wait (%p11450_p1), %s9427_s27, 4096  }
 0x9a4   : > { %11977 = vsyncadd (%p11450_p1), %s9427_s27, 4294963200  ;;  %s19451_s30 = sld [smem:[#allocation9_spill]]  ;;  %s19454_s27 = smov %s11984_s28 }
 0x9a5   : > { %s19452_s3 = sld [smem:[#allocation8_spill]] }
 0x9a6   : > { %s19453_s29 = sld [smem:[#allocation10_spill]] }
 0x9aa   : > { %p28_p2 = scmp.ge.s32.totalorder %s19451_s30, 4  }
 0x9ab   : > { %s19455_s28 = smov %s19452_s3 }
 0x9ac   :  { %30 = sbr.rel (!%p28_p2) target bundleno = 8 (0x8), region = 146 }
 0x9b1   :  { %9432 = vsyncpa [#allocation5], 1 }
 0x9b2   :  { %9434 = vsyncpa [#allocation5 + $0x1], 1 }

</bundles_post_ra>
